<compile_context>
chip_gen: v7x
topology: tpu7x:2x2x1
jax: 0.10.0
libtpu: 0.0.40
codegen_flags: <defaults>
</compile_context>

<pallas_src>
import functools
import math

import jax
import jax.numpy as jnp
from jax.experimental import pallas as pl
from jax.experimental.pallas import tpu as pltpu

C_PAD = 64  # uniform channel width inside the kernel (14 -> 64 zero pad)


# ------------------------------ Pallas kernel -------------------------------

def _zero_pad_hw(a):
    """Add a zero halo of width 1 on the two spatial dims of an (H, W, C) value."""
    h, w, c = a.shape
    zr = jnp.zeros((1, w, c), a.dtype)
    a = jnp.concatenate([zr, a, zr], axis=0)          # (H+2, W, C)
    zc = jnp.zeros((h + 2, 1, c), a.dtype)
    return jnp.concatenate([zc, a, zc], axis=1)       # (H+2, W+2, C)


def _fused_vdsr_kernel(x_ref, w_in_ref, w_res_ref, w_out_ref, out_ref,
                       *, H, W, n_res):
    """Whole ResidualLearningNet forward for one batch element, VMEM-resident.

    x_ref    : (1, H, W, C)      f32   channel-padded input (also the residual)
    w_in_ref : (9*C, C)          bf16  im2col weight of the input conv
    w_res_ref: (n_res, 9*C, C)   bf16  im2col weights of the 5 hidden convs
    w_out_ref: (9*C, C)          bf16  im2col weight of the output conv
    out_ref  : (1, H, W, C)      f32
    """
    C = x_ref.shape[-1]
    x_f32 = x_ref[0]                                   # (H, W, C) residual, f32

    def conv_im2col(a_pad, w_2d):
        # Build the (H*W, 9*C) patch matrix from the padded activation and
        # contract it in one MXU matmul (K = 9*C = 576 fills the MXU
        # contraction dim; accumulation in f32).
        cols = [a_pad[ky:ky + H, kx:kx + W, :]
                for ky in range(3) for kx in range(3)]
        patches = jnp.concatenate(cols, axis=-1).reshape(H * W, 9 * C)
        return jnp.dot(patches, w_2d, preferred_element_type=jnp.float32)

    # input conv + ReLU
    a = _zero_pad_hw(x_f32.astype(jnp.bfloat16))
    a = _zero_pad_hw(jnp.maximum(conv_im2col(a, w_in_ref[...]), 0.0)
                     .reshape(H, W, C).astype(jnp.bfloat16))
    # residual branch: n_res conv+ReLU layers (statically unrolled)
    for i in range(n_res):
        a = _zero_pad_hw(jnp.maximum(conv_im2col(a, w_res_ref[i]), 0.0)
                         .reshape(H, W, C).astype(jnp.bfloat16))
    # output conv (no ReLU) + fused residual add in f32
    y = conv_im2col(a, w_out_ref[...]).reshape(H, W, C)
    out_ref[0] = (y + x_f32).astype(out_ref.dtype)


# --------------------------------- wrapper ----------------------------------

def residual_learning_net(x_nchw, params):
    """Forward pass equivalent to ResidualLearningNet.forward (NCHW in/out)."""
    B, Cio, H, W = x_nchw.shape
    C = C_PAD
    assert Cio <= C
    n_res = len(params["res"])

    # NCHW -> NHWC; zero-pad channels to C (padded channels carry exact zeros
    # through every layer and are sliced off at the end).
    x = jnp.transpose(x_nchw, (0, 2, 3, 1)).astype(jnp.float32)
    x = jnp.pad(x, ((0, 0), (0, 0), (0, 0), (0, C - Cio)))

    # HWIO weights -> channel-padded, im2col (9*Cin, Cout) layout, bf16.
    def to_im2col(w_hwio):
        kh, kw, cin, cout = w_hwio.shape
        w = jnp.pad(w_hwio, ((0, 0), (0, 0), (0, C - cin), (0, C - cout)))
        return w.reshape(kh * kw * C, C).astype(jnp.bfloat16)

    w_in = to_im2col(params["input"])
    w_res = jnp.stack([to_im2col(w) for w in params["res"]])
    w_out = to_im2col(params["output"])

    kernel = functools.partial(_fused_vdsr_kernel, H=H, W=W, n_res=n_res)
    out = pl.pallas_call(
        kernel,
        out_shape=jax.ShapeDtypeStruct((B, H, W, C), jnp.float32),
        grid_spec=pltpu.PrefetchScalarGridSpec(
            num_scalar_prefetch=0,
            grid=(B,),
            in_specs=[
                pl.BlockSpec((1, H, W, C), lambda b: (b, 0, 0, 0)),
                pl.BlockSpec((9 * C, C), lambda b: (0, 0)),        # constant ->
                pl.BlockSpec((n_res, 9 * C, C), lambda b: (0, 0, 0)),  # weights
                pl.BlockSpec((9 * C, C), lambda b: (0, 0)),        # not re-DMA'd
            ],
            out_specs=pl.BlockSpec((1, H, W, C), lambda b: (b, 0, 0, 0)),
        ),
        compiler_params=pltpu.CompilerParams(
            dimension_semantics=("parallel",)),   # v7x: 1 image per TensorCore
        # TODO(synk): for larger H*W, tile spatially with a 1-px halo and set
        # vmem_limit_bytes explicitly (v7x has only 64 MiB VMEM per core).
    )(x, w_in, w_res, w_out)

    out = out[..., :Cio]                       # drop channel padding
    return jnp.transpose(out, (0, 3, 1, 2))    # NHWC -> NCHW


# --------------------------- parameter construction -------------------------

def _xavier_uniform_conv(key, cout, cin, kh=3, kw=3, gain=math.sqrt(2.0)):
    """Matches nn.init.xavier_uniform_(w, gain=calculate_gain('relu')) on a
    Conv2d weight of shape (Cout, Cin, Kh, Kw); returned in HWIO layout."""
    fan_in = cin * kh * kw
    fan_out = cout * kh * kw
    bound = gain * math.sqrt(6.0 / (fan_in + fan_out))
    w_oihw = jax.random.uniform(key, (cout, cin, kh, kw),
                                jnp.float32, -bound, bound)
    return jnp.transpose(w_oihw, (2, 3, 1, 0))  # -> (Kh, Kw, Cin, Cout)


def init_params(key, channels=14, hidden=64, n_res=5):
    keys = jax.random.split(key, n_res + 2)
    return {
        "input": _xavier_uniform_conv(keys[0], hidden, channels),
        "res": [_xavier_uniform_conv(keys[1 + i], hidden, hidden)
                for i in range(n_res)],
        "output": _xavier_uniform_conv(keys[-1], channels, hidden),
    }


# ------------------------------- reference ----------------------------------
# Pure-JAX reference with the same bf16-in / f32-accumulate arithmetic so the
# comparison isolates kernel bugs (not bf16 rounding).

def _reference(x_nchw, params):
    x = jnp.transpose(x_nchw, (0, 2, 3, 1)).astype(jnp.float32)

    def conv(inp, w, relu):
        y = jax.lax.conv_general_dilated(
            inp.astype(jnp.bfloat16), w.astype(jnp.bfloat16),
            window_strides=(1, 1), padding="SAME",
            dimension_numbers=("NHWC", "HWIO", "NHWC"),
            preferred_element_type=jnp.float32)
        return jnp.maximum(y, 0.0) if relu else y

    residual = x
    out = conv(x, params["input"], True)
    for w in params["res"]:
        out = conv(out, w, True)
    out = conv(out, params["output"], False) + residual
    return jnp.transpose(out, (0, 3, 1, 2))


if __name__ == "__main__":
    key = jax.random.PRNGKey(0)
    k_param, k_input = jax.random.split(key)

    B, C, H, W = 2, 14, 16, 16  # channels=14 per the module spec
    params = init_params(k_param, channels=C)
    x = jax.random.normal(k_input, (B, C, H, W), jnp.float32)

    out = jax.block_until_ready(residual_learning_net(x, params))
    ref = jax.block_until_ready(_reference(x, params))

    assert out.shape == (B, C, H, W)
    assert jnp.allclose(out, ref, rtol=1e-2, atol=1e-2), \
        f"max abs err {jnp.max(jnp.abs(out - ref))}"

    print("KERNEL_OK")
</pallas_src>

<mosaic_0001>
module attributes {stable_mosaic.version = 11 : i64} {
  func.func @_fused_vdsr_kernel(%arg0: i32, %arg1: memref<1x16x16x64xf32, #tpu.memory_space<vmem>>, %arg2: memref<576x64xbf16, #tpu.memory_space<vmem>>, %arg3: memref<5x576x64xbf16, #tpu.memory_space<vmem>>, %arg4: memref<576x64xbf16, #tpu.memory_space<vmem>>, %arg5: memref<1x16x16x64xf32, #tpu.memory_space<vmem>>) attributes {dimension_semantics = [#tpu.dimension_semantics<parallel>], iteration_bounds = array<i64: 2>, scalar_prefetch = 0 : i64, scratch_operands = 0 : i64, tpu.core_type = #tpu.core_type<tc>, window_params = [{transform_indices = @transform_0, window_bounds = array<i64: 1, 16, 16, 64>}, {pipeline_mode = #tpu.pipeline_mode<synchronous>, transform_indices = @transform_1, window_bounds = array<i64: 576, 64>}, {pipeline_mode = #tpu.pipeline_mode<synchronous>, transform_indices = @transform_2, window_bounds = array<i64: 5, 576, 64>}, {pipeline_mode = #tpu.pipeline_mode<synchronous>, transform_indices = @transform_3, window_bounds = array<i64: 576, 64>}, {transform_indices = @transform_4, window_bounds = array<i64: 1, 16, 16, 64>}]} {
    %c0 = arith.constant 0 : index
    %c0_0 = arith.constant 0 : index
    %c0_1 = arith.constant 0 : index
    %c0_2 = arith.constant 0 : index
    %0 = vector.load %arg1[%c0, %c0_0, %c0_1, %c0_2] : memref<1x16x16x64xf32, #tpu.memory_space<vmem>>, vector<1x16x16x64xf32>
    %1 = vector.shape_cast %0 : vector<1x16x16x64xf32> to vector<16x16x64xf32>
    %2 = arith.truncf %1 : vector<16x16x64xf32> to vector<16x16x64xbf16>
    %cst = arith.constant 0.000000e+00 : bf16
    %3 = vector.broadcast %cst : bf16 to vector<1x16x64xbf16>
    %4 = tpu.concatenate %3, %2, %3 in 0 : vector<1x16x64xbf16>, vector<16x16x64xbf16>, vector<1x16x64xbf16> -> vector<18x16x64xbf16>
    %cst_3 = arith.constant 0.000000e+00 : bf16
    %5 = vector.broadcast %cst_3 : bf16 to vector<18x1x64xbf16>
    %6 = tpu.concatenate %5, %4, %5 in 1 : vector<18x1x64xbf16>, vector<18x16x64xbf16>, vector<18x1x64xbf16> -> vector<18x18x64xbf16>
    %c0_4 = arith.constant 0 : index
    %c0_5 = arith.constant 0 : index
    %7 = vector.load %arg2[%c0_4, %c0_5] : memref<576x64xbf16, #tpu.memory_space<vmem>>, vector<576x64xbf16>
    %8 = vector.extract_strided_slice %6 {offsets = [0, 0, 0], sizes = [16, 16, 64], strides = [1, 1, 1]} : vector<18x18x64xbf16> to vector<16x16x64xbf16>
    %9 = vector.extract_strided_slice %6 {offsets = [0, 1, 0], sizes = [16, 16, 64], strides = [1, 1, 1]} : vector<18x18x64xbf16> to vector<16x16x64xbf16>
    %10 = vector.extract_strided_slice %6 {offsets = [0, 2, 0], sizes = [16, 16, 64], strides = [1, 1, 1]} : vector<18x18x64xbf16> to vector<16x16x64xbf16>
    %11 = vector.extract_strided_slice %6 {offsets = [1, 0, 0], sizes = [16, 16, 64], strides = [1, 1, 1]} : vector<18x18x64xbf16> to vector<16x16x64xbf16>
    %12 = vector.extract_strided_slice %6 {offsets = [1, 1, 0], sizes = [16, 16, 64], strides = [1, 1, 1]} : vector<18x18x64xbf16> to vector<16x16x64xbf16>
    %13 = vector.extract_strided_slice %6 {offsets = [1, 2, 0], sizes = [16, 16, 64], strides = [1, 1, 1]} : vector<18x18x64xbf16> to vector<16x16x64xbf16>
    %14 = vector.extract_strided_slice %6 {offsets = [2, 0, 0], sizes = [16, 16, 64], strides = [1, 1, 1]} : vector<18x18x64xbf16> to vector<16x16x64xbf16>
    %15 = vector.extract_strided_slice %6 {offsets = [2, 1, 0], sizes = [16, 16, 64], strides = [1, 1, 1]} : vector<18x18x64xbf16> to vector<16x16x64xbf16>
    %16 = vector.extract_strided_slice %6 {offsets = [2, 2, 0], sizes = [16, 16, 64], strides = [1, 1, 1]} : vector<18x18x64xbf16> to vector<16x16x64xbf16>
    %17 = tpu.concatenate %8, %9, %10, %11, %12, %13, %14, %15, %16 in 2 : vector<16x16x64xbf16>, vector<16x16x64xbf16>, vector<16x16x64xbf16>, vector<16x16x64xbf16>, vector<16x16x64xbf16>, vector<16x16x64xbf16>, vector<16x16x64xbf16>, vector<16x16x64xbf16>, vector<16x16x64xbf16> -> vector<16x16x576xbf16>
    %18 = vector.shape_cast %17 : vector<16x16x576xbf16> to vector<256x576xbf16>
    %cst_6 = arith.constant dense<0.000000e+00> : vector<256x64xf32>
    %19 = tpu.matmul %18, %7, %cst_6 {dimension_numbers = #tpu.dot_dimension_numbers<[1], [0], [0], [1], [0, 0, 1, 1], [], []>} : vector<256x576xbf16>, vector<576x64xbf16>, vector<256x64xf32> -> vector<256x64xf32>
    %cst_7 = arith.constant 0.000000e+00 : f32
    %20 = vector.broadcast %cst_7 : f32 to vector<256x64xf32>
    %21 = arith.maximumf %19, %20 : vector<256x64xf32>
    %22 = vector.shape_cast %21 : vector<256x64xf32> to vector<16x16x64xf32>
    %23 = arith.truncf %22 : vector<16x16x64xf32> to vector<16x16x64xbf16>
    %cst_8 = arith.constant 0.000000e+00 : bf16
    %24 = vector.broadcast %cst_8 : bf16 to vector<1x16x64xbf16>
    %25 = tpu.concatenate %24, %23, %24 in 0 : vector<1x16x64xbf16>, vector<16x16x64xbf16>, vector<1x16x64xbf16> -> vector<18x16x64xbf16>
    %cst_9 = arith.constant 0.000000e+00 : bf16
    %26 = vector.broadcast %cst_9 : bf16 to vector<18x1x64xbf16>
    %27 = tpu.concatenate %26, %25, %26 in 1 : vector<18x1x64xbf16>, vector<18x16x64xbf16>, vector<18x1x64xbf16> -> vector<18x18x64xbf16>
    %c0_10 = arith.constant 0 : index
    %c0_11 = arith.constant 0 : index
    %c0_12 = arith.constant 0 : index
    %28 = vector.load %arg3[%c0_10, %c0_11, %c0_12] : memref<5x576x64xbf16, #tpu.memory_space<vmem>>, vector<1x576x64xbf16>
    %29 = vector.shape_cast %28 : vector<1x576x64xbf16> to vector<576x64xbf16>
    %30 = vector.extract_strided_slice %27 {offsets = [0, 0, 0], sizes = [16, 16, 64], strides = [1, 1, 1]} : vector<18x18x64xbf16> to vector<16x16x64xbf16>
    %31 = vector.extract_strided_slice %27 {offsets = [0, 1, 0], sizes = [16, 16, 64], strides = [1, 1, 1]} : vector<18x18x64xbf16> to vector<16x16x64xbf16>
    %32 = vector.extract_strided_slice %27 {offsets = [0, 2, 0], sizes = [16, 16, 64], strides = [1, 1, 1]} : vector<18x18x64xbf16> to vector<16x16x64xbf16>
    %33 = vector.extract_strided_slice %27 {offsets = [1, 0, 0], sizes = [16, 16, 64], strides = [1, 1, 1]} : vector<18x18x64xbf16> to vector<16x16x64xbf16>
    %34 = vector.extract_strided_slice %27 {offsets = [1, 1, 0], sizes = [16, 16, 64], strides = [1, 1, 1]} : vector<18x18x64xbf16> to vector<16x16x64xbf16>
    %35 = vector.extract_strided_slice %27 {offsets = [1, 2, 0], sizes = [16, 16, 64], strides = [1, 1, 1]} : vector<18x18x64xbf16> to vector<16x16x64xbf16>
    %36 = vector.extract_strided_slice %27 {offsets = [2, 0, 0], sizes = [16, 16, 64], strides = [1, 1, 1]} : vector<18x18x64xbf16> to vector<16x16x64xbf16>
    %37 = vector.extract_strided_slice %27 {offsets = [2, 1, 0], sizes = [16, 16, 64], strides = [1, 1, 1]} : vector<18x18x64xbf16> to vector<16x16x64xbf16>
    %38 = vector.extract_strided_slice %27 {offsets = [2, 2, 0], sizes = [16, 16, 64], strides = [1, 1, 1]} : vector<18x18x64xbf16> to vector<16x16x64xbf16>
    %39 = tpu.concatenate %30, %31, %32, %33, %34, %35, %36, %37, %38 in 2 : vector<16x16x64xbf16>, vector<16x16x64xbf16>, vector<16x16x64xbf16>, vector<16x16x64xbf16>, vector<16x16x64xbf16>, vector<16x16x64xbf16>, vector<16x16x64xbf16>, vector<16x16x64xbf16>, vector<16x16x64xbf16> -> vector<16x16x576xbf16>
    %40 = vector.shape_cast %39 : vector<16x16x576xbf16> to vector<256x576xbf16>
    %cst_13 = arith.constant dense<0.000000e+00> : vector<256x64xf32>
    %41 = tpu.matmul %40, %29, %cst_13 {dimension_numbers = #tpu.dot_dimension_numbers<[1], [0], [0], [1], [0, 0, 1, 1], [], []>} : vector<256x576xbf16>, vector<576x64xbf16>, vector<256x64xf32> -> vector<256x64xf32>
    %cst_14 = arith.constant 0.000000e+00 : f32
    %42 = vector.broadcast %cst_14 : f32 to vector<256x64xf32>
    %43 = arith.maximumf %41, %42 : vector<256x64xf32>
    %44 = vector.shape_cast %43 : vector<256x64xf32> to vector<16x16x64xf32>
    %45 = arith.truncf %44 : vector<16x16x64xf32> to vector<16x16x64xbf16>
    %cst_15 = arith.constant 0.000000e+00 : bf16
    %46 = vector.broadcast %cst_15 : bf16 to vector<1x16x64xbf16>
    %47 = tpu.concatenate %46, %45, %46 in 0 : vector<1x16x64xbf16>, vector<16x16x64xbf16>, vector<1x16x64xbf16> -> vector<18x16x64xbf16>
    %cst_16 = arith.constant 0.000000e+00 : bf16
    %48 = vector.broadcast %cst_16 : bf16 to vector<18x1x64xbf16>
    %49 = tpu.concatenate %48, %47, %48 in 1 : vector<18x1x64xbf16>, vector<18x16x64xbf16>, vector<18x1x64xbf16> -> vector<18x18x64xbf16>
    %c1 = arith.constant 1 : index
    %c0_17 = arith.constant 0 : index
    %c0_18 = arith.constant 0 : index
    %50 = vector.load %arg3[%c1, %c0_17, %c0_18] : memref<5x576x64xbf16, #tpu.memory_space<vmem>>, vector<1x576x64xbf16>
    %51 = vector.shape_cast %50 : vector<1x576x64xbf16> to vector<576x64xbf16>
    %52 = vector.extract_strided_slice %49 {offsets = [0, 0, 0], sizes = [16, 16, 64], strides = [1, 1, 1]} : vector<18x18x64xbf16> to vector<16x16x64xbf16>
    %53 = vector.extract_strided_slice %49 {offsets = [0, 1, 0], sizes = [16, 16, 64], strides = [1, 1, 1]} : vector<18x18x64xbf16> to vector<16x16x64xbf16>
    %54 = vector.extract_strided_slice %49 {offsets = [0, 2, 0], sizes = [16, 16, 64], strides = [1, 1, 1]} : vector<18x18x64xbf16> to vector<16x16x64xbf16>
    %55 = vector.extract_strided_slice %49 {offsets = [1, 0, 0], sizes = [16, 16, 64], strides = [1, 1, 1]} : vector<18x18x64xbf16> to vector<16x16x64xbf16>
    %56 = vector.extract_strided_slice %49 {offsets = [1, 1, 0], sizes = [16, 16, 64], strides = [1, 1, 1]} : vector<18x18x64xbf16> to vector<16x16x64xbf16>
    %57 = vector.extract_strided_slice %49 {offsets = [1, 2, 0], sizes = [16, 16, 64], strides = [1, 1, 1]} : vector<18x18x64xbf16> to vector<16x16x64xbf16>
    %58 = vector.extract_strided_slice %49 {offsets = [2, 0, 0], sizes = [16, 16, 64], strides = [1, 1, 1]} : vector<18x18x64xbf16> to vector<16x16x64xbf16>
    %59 = vector.extract_strided_slice %49 {offsets = [2, 1, 0], sizes = [16, 16, 64], strides = [1, 1, 1]} : vector<18x18x64xbf16> to vector<16x16x64xbf16>
    %60 = vector.extract_strided_slice %49 {offsets = [2, 2, 0], sizes = [16, 16, 64], strides = [1, 1, 1]} : vector<18x18x64xbf16> to vector<16x16x64xbf16>
    %61 = tpu.concatenate %52, %53, %54, %55, %56, %57, %58, %59, %60 in 2 : vector<16x16x64xbf16>, vector<16x16x64xbf16>, vector<16x16x64xbf16>, vector<16x16x64xbf16>, vector<16x16x64xbf16>, vector<16x16x64xbf16>, vector<16x16x64xbf16>, vector<16x16x64xbf16>, vector<16x16x64xbf16> -> vector<16x16x576xbf16>
    %62 = vector.shape_cast %61 : vector<16x16x576xbf16> to vector<256x576xbf16>
    %cst_19 = arith.constant dense<0.000000e+00> : vector<256x64xf32>
    %63 = tpu.matmul %62, %51, %cst_19 {dimension_numbers = #tpu.dot_dimension_numbers<[1], [0], [0], [1], [0, 0, 1, 1], [], []>} : vector<256x576xbf16>, vector<576x64xbf16>, vector<256x64xf32> -> vector<256x64xf32>
    %cst_20 = arith.constant 0.000000e+00 : f32
    %64 = vector.broadcast %cst_20 : f32 to vector<256x64xf32>
    %65 = arith.maximumf %63, %64 : vector<256x64xf32>
    %66 = vector.shape_cast %65 : vector<256x64xf32> to vector<16x16x64xf32>
    %67 = arith.truncf %66 : vector<16x16x64xf32> to vector<16x16x64xbf16>
    %cst_21 = arith.constant 0.000000e+00 : bf16
    %68 = vector.broadcast %cst_21 : bf16 to vector<1x16x64xbf16>
    %69 = tpu.concatenate %68, %67, %68 in 0 : vector<1x16x64xbf16>, vector<16x16x64xbf16>, vector<1x16x64xbf16> -> vector<18x16x64xbf16>
    %cst_22 = arith.constant 0.000000e+00 : bf16
    %70 = vector.broadcast %cst_22 : bf16 to vector<18x1x64xbf16>
    %71 = tpu.concatenate %70, %69, %70 in 1 : vector<18x1x64xbf16>, vector<18x16x64xbf16>, vector<18x1x64xbf16> -> vector<18x18x64xbf16>
    %c2 = arith.constant 2 : index
    %c0_23 = arith.constant 0 : index
    %c0_24 = arith.constant 0 : index
    %72 = vector.load %arg3[%c2, %c0_23, %c0_24] : memref<5x576x64xbf16, #tpu.memory_space<vmem>>, vector<1x576x64xbf16>
    %73 = vector.shape_cast %72 : vector<1x576x64xbf16> to vector<576x64xbf16>
    %74 = vector.extract_strided_slice %71 {offsets = [0, 0, 0], sizes = [16, 16, 64], strides = [1, 1, 1]} : vector<18x18x64xbf16> to vector<16x16x64xbf16>
    %75 = vector.extract_strided_slice %71 {offsets = [0, 1, 0], sizes = [16, 16, 64], strides = [1, 1, 1]} : vector<18x18x64xbf16> to vector<16x16x64xbf16>
    %76 = vector.extract_strided_slice %71 {offsets = [0, 2, 0], sizes = [16, 16, 64], strides = [1, 1, 1]} : vector<18x18x64xbf16> to vector<16x16x64xbf16>
    %77 = vector.extract_strided_slice %71 {offsets = [1, 0, 0], sizes = [16, 16, 64], strides = [1, 1, 1]} : vector<18x18x64xbf16> to vector<16x16x64xbf16>
    %78 = vector.extract_strided_slice %71 {offsets = [1, 1, 0], sizes = [16, 16, 64], strides = [1, 1, 1]} : vector<18x18x64xbf16> to vector<16x16x64xbf16>
    %79 = vector.extract_strided_slice %71 {offsets = [1, 2, 0], sizes = [16, 16, 64], strides = [1, 1, 1]} : vector<18x18x64xbf16> to vector<16x16x64xbf16>
    %80 = vector.extract_strided_slice %71 {offsets = [2, 0, 0], sizes = [16, 16, 64], strides = [1, 1, 1]} : vector<18x18x64xbf16> to vector<16x16x64xbf16>
    %81 = vector.extract_strided_slice %71 {offsets = [2, 1, 0], sizes = [16, 16, 64], strides = [1, 1, 1]} : vector<18x18x64xbf16> to vector<16x16x64xbf16>
    %82 = vector.extract_strided_slice %71 {offsets = [2, 2, 0], sizes = [16, 16, 64], strides = [1, 1, 1]} : vector<18x18x64xbf16> to vector<16x16x64xbf16>
    %83 = tpu.concatenate %74, %75, %76, %77, %78, %79, %80, %81, %82 in 2 : vector<16x16x64xbf16>, vector<16x16x64xbf16>, vector<16x16x64xbf16>, vector<16x16x64xbf16>, vector<16x16x64xbf16>, vector<16x16x64xbf16>, vector<16x16x64xbf16>, vector<16x16x64xbf16>, vector<16x16x64xbf16> -> vector<16x16x576xbf16>
    %84 = vector.shape_cast %83 : vector<16x16x576xbf16> to vector<256x576xbf16>
    %cst_25 = arith.constant dense<0.000000e+00> : vector<256x64xf32>
    %85 = tpu.matmul %84, %73, %cst_25 {dimension_numbers = #tpu.dot_dimension_numbers<[1], [0], [0], [1], [0, 0, 1, 1], [], []>} : vector<256x576xbf16>, vector<576x64xbf16>, vector<256x64xf32> -> vector<256x64xf32>
    %cst_26 = arith.constant 0.000000e+00 : f32
    %86 = vector.broadcast %cst_26 : f32 to vector<256x64xf32>
    %87 = arith.maximumf %85, %86 : vector<256x64xf32>
    %88 = vector.shape_cast %87 : vector<256x64xf32> to vector<16x16x64xf32>
    %89 = arith.truncf %88 : vector<16x16x64xf32> to vector<16x16x64xbf16>
    %cst_27 = arith.constant 0.000000e+00 : bf16
    %90 = vector.broadcast %cst_27 : bf16 to vector<1x16x64xbf16>
    %91 = tpu.concatenate %90, %89, %90 in 0 : vector<1x16x64xbf16>, vector<16x16x64xbf16>, vector<1x16x64xbf16> -> vector<18x16x64xbf16>
    %cst_28 = arith.constant 0.000000e+00 : bf16
    %92 = vector.broadcast %cst_28 : bf16 to vector<18x1x64xbf16>
    %93 = tpu.concatenate %92, %91, %92 in 1 : vector<18x1x64xbf16>, vector<18x16x64xbf16>, vector<18x1x64xbf16> -> vector<18x18x64xbf16>
    %c3 = arith.constant 3 : index
    %c0_29 = arith.constant 0 : index
    %c0_30 = arith.constant 0 : index
    %94 = vector.load %arg3[%c3, %c0_29, %c0_30] : memref<5x576x64xbf16, #tpu.memory_space<vmem>>, vector<1x576x64xbf16>
    %95 = vector.shape_cast %94 : vector<1x576x64xbf16> to vector<576x64xbf16>
    %96 = vector.extract_strided_slice %93 {offsets = [0, 0, 0], sizes = [16, 16, 64], strides = [1, 1, 1]} : vector<18x18x64xbf16> to vector<16x16x64xbf16>
    %97 = vector.extract_strided_slice %93 {offsets = [0, 1, 0], sizes = [16, 16, 64], strides = [1, 1, 1]} : vector<18x18x64xbf16> to vector<16x16x64xbf16>
    %98 = vector.extract_strided_slice %93 {offsets = [0, 2, 0], sizes = [16, 16, 64], strides = [1, 1, 1]} : vector<18x18x64xbf16> to vector<16x16x64xbf16>
    %99 = vector.extract_strided_slice %93 {offsets = [1, 0, 0], sizes = [16, 16, 64], strides = [1, 1, 1]} : vector<18x18x64xbf16> to vector<16x16x64xbf16>
    %100 = vector.extract_strided_slice %93 {offsets = [1, 1, 0], sizes = [16, 16, 64], strides = [1, 1, 1]} : vector<18x18x64xbf16> to vector<16x16x64xbf16>
    %101 = vector.extract_strided_slice %93 {offsets = [1, 2, 0], sizes = [16, 16, 64], strides = [1, 1, 1]} : vector<18x18x64xbf16> to vector<16x16x64xbf16>
    %102 = vector.extract_strided_slice %93 {offsets = [2, 0, 0], sizes = [16, 16, 64], strides = [1, 1, 1]} : vector<18x18x64xbf16> to vector<16x16x64xbf16>
    %103 = vector.extract_strided_slice %93 {offsets = [2, 1, 0], sizes = [16, 16, 64], strides = [1, 1, 1]} : vector<18x18x64xbf16> to vector<16x16x64xbf16>
    %104 = vector.extract_strided_slice %93 {offsets = [2, 2, 0], sizes = [16, 16, 64], strides = [1, 1, 1]} : vector<18x18x64xbf16> to vector<16x16x64xbf16>
    %105 = tpu.concatenate %96, %97, %98, %99, %100, %101, %102, %103, %104 in 2 : vector<16x16x64xbf16>, vector<16x16x64xbf16>, vector<16x16x64xbf16>, vector<16x16x64xbf16>, vector<16x16x64xbf16>, vector<16x16x64xbf16>, vector<16x16x64xbf16>, vector<16x16x64xbf16>, vector<16x16x64xbf16> -> vector<16x16x576xbf16>
    %106 = vector.shape_cast %105 : vector<16x16x576xbf16> to vector<256x576xbf16>
    %cst_31 = arith.constant dense<0.000000e+00> : vector<256x64xf32>
    %107 = tpu.matmul %106, %95, %cst_31 {dimension_numbers = #tpu.dot_dimension_numbers<[1], [0], [0], [1], [0, 0, 1, 1], [], []>} : vector<256x576xbf16>, vector<576x64xbf16>, vector<256x64xf32> -> vector<256x64xf32>
    %cst_32 = arith.constant 0.000000e+00 : f32
    %108 = vector.broadcast %cst_32 : f32 to vector<256x64xf32>
    %109 = arith.maximumf %107, %108 : vector<256x64xf32>
    %110 = vector.shape_cast %109 : vector<256x64xf32> to vector<16x16x64xf32>
    %111 = arith.truncf %110 : vector<16x16x64xf32> to vector<16x16x64xbf16>
    %cst_33 = arith.constant 0.000000e+00 : bf16
    %112 = vector.broadcast %cst_33 : bf16 to vector<1x16x64xbf16>
    %113 = tpu.concatenate %112, %111, %112 in 0 : vector<1x16x64xbf16>, vector<16x16x64xbf16>, vector<1x16x64xbf16> -> vector<18x16x64xbf16>
    %cst_34 = arith.constant 0.000000e+00 : bf16
    %114 = vector.broadcast %cst_34 : bf16 to vector<18x1x64xbf16>
    %115 = tpu.concatenate %114, %113, %114 in 1 : vector<18x1x64xbf16>, vector<18x16x64xbf16>, vector<18x1x64xbf16> -> vector<18x18x64xbf16>
    %c4 = arith.constant 4 : index
    %c0_35 = arith.constant 0 : index
    %c0_36 = arith.constant 0 : index
    %116 = vector.load %arg3[%c4, %c0_35, %c0_36] : memref<5x576x64xbf16, #tpu.memory_space<vmem>>, vector<1x576x64xbf16>
    %117 = vector.shape_cast %116 : vector<1x576x64xbf16> to vector<576x64xbf16>
    %118 = vector.extract_strided_slice %115 {offsets = [0, 0, 0], sizes = [16, 16, 64], strides = [1, 1, 1]} : vector<18x18x64xbf16> to vector<16x16x64xbf16>
    %119 = vector.extract_strided_slice %115 {offsets = [0, 1, 0], sizes = [16, 16, 64], strides = [1, 1, 1]} : vector<18x18x64xbf16> to vector<16x16x64xbf16>
    %120 = vector.extract_strided_slice %115 {offsets = [0, 2, 0], sizes = [16, 16, 64], strides = [1, 1, 1]} : vector<18x18x64xbf16> to vector<16x16x64xbf16>
    %121 = vector.extract_strided_slice %115 {offsets = [1, 0, 0], sizes = [16, 16, 64], strides = [1, 1, 1]} : vector<18x18x64xbf16> to vector<16x16x64xbf16>
    %122 = vector.extract_strided_slice %115 {offsets = [1, 1, 0], sizes = [16, 16, 64], strides = [1, 1, 1]} : vector<18x18x64xbf16> to vector<16x16x64xbf16>
    %123 = vector.extract_strided_slice %115 {offsets = [1, 2, 0], sizes = [16, 16, 64], strides = [1, 1, 1]} : vector<18x18x64xbf16> to vector<16x16x64xbf16>
    %124 = vector.extract_strided_slice %115 {offsets = [2, 0, 0], sizes = [16, 16, 64], strides = [1, 1, 1]} : vector<18x18x64xbf16> to vector<16x16x64xbf16>
    %125 = vector.extract_strided_slice %115 {offsets = [2, 1, 0], sizes = [16, 16, 64], strides = [1, 1, 1]} : vector<18x18x64xbf16> to vector<16x16x64xbf16>
    %126 = vector.extract_strided_slice %115 {offsets = [2, 2, 0], sizes = [16, 16, 64], strides = [1, 1, 1]} : vector<18x18x64xbf16> to vector<16x16x64xbf16>
    %127 = tpu.concatenate %118, %119, %120, %121, %122, %123, %124, %125, %126 in 2 : vector<16x16x64xbf16>, vector<16x16x64xbf16>, vector<16x16x64xbf16>, vector<16x16x64xbf16>, vector<16x16x64xbf16>, vector<16x16x64xbf16>, vector<16x16x64xbf16>, vector<16x16x64xbf16>, vector<16x16x64xbf16> -> vector<16x16x576xbf16>
    %128 = vector.shape_cast %127 : vector<16x16x576xbf16> to vector<256x576xbf16>
    %cst_37 = arith.constant dense<0.000000e+00> : vector<256x64xf32>
    %129 = tpu.matmul %128, %117, %cst_37 {dimension_numbers = #tpu.dot_dimension_numbers<[1], [0], [0], [1], [0, 0, 1, 1], [], []>} : vector<256x576xbf16>, vector<576x64xbf16>, vector<256x64xf32> -> vector<256x64xf32>
    %cst_38 = arith.constant 0.000000e+00 : f32
    %130 = vector.broadcast %cst_38 : f32 to vector<256x64xf32>
    %131 = arith.maximumf %129, %130 : vector<256x64xf32>
    %132 = vector.shape_cast %131 : vector<256x64xf32> to vector<16x16x64xf32>
    %133 = arith.truncf %132 : vector<16x16x64xf32> to vector<16x16x64xbf16>
    %cst_39 = arith.constant 0.000000e+00 : bf16
    %134 = vector.broadcast %cst_39 : bf16 to vector<1x16x64xbf16>
    %135 = tpu.concatenate %134, %133, %134 in 0 : vector<1x16x64xbf16>, vector<16x16x64xbf16>, vector<1x16x64xbf16> -> vector<18x16x64xbf16>
    %cst_40 = arith.constant 0.000000e+00 : bf16
    %136 = vector.broadcast %cst_40 : bf16 to vector<18x1x64xbf16>
    %137 = tpu.concatenate %136, %135, %136 in 1 : vector<18x1x64xbf16>, vector<18x16x64xbf16>, vector<18x1x64xbf16> -> vector<18x18x64xbf16>
    %c0_41 = arith.constant 0 : index
    %c0_42 = arith.constant 0 : index
    %138 = vector.load %arg4[%c0_41, %c0_42] : memref<576x64xbf16, #tpu.memory_space<vmem>>, vector<576x64xbf16>
    %139 = vector.extract_strided_slice %137 {offsets = [0, 0, 0], sizes = [16, 16, 64], strides = [1, 1, 1]} : vector<18x18x64xbf16> to vector<16x16x64xbf16>
    %140 = vector.extract_strided_slice %137 {offsets = [0, 1, 0], sizes = [16, 16, 64], strides = [1, 1, 1]} : vector<18x18x64xbf16> to vector<16x16x64xbf16>
    %141 = vector.extract_strided_slice %137 {offsets = [0, 2, 0], sizes = [16, 16, 64], strides = [1, 1, 1]} : vector<18x18x64xbf16> to vector<16x16x64xbf16>
    %142 = vector.extract_strided_slice %137 {offsets = [1, 0, 0], sizes = [16, 16, 64], strides = [1, 1, 1]} : vector<18x18x64xbf16> to vector<16x16x64xbf16>
    %143 = vector.extract_strided_slice %137 {offsets = [1, 1, 0], sizes = [16, 16, 64], strides = [1, 1, 1]} : vector<18x18x64xbf16> to vector<16x16x64xbf16>
    %144 = vector.extract_strided_slice %137 {offsets = [1, 2, 0], sizes = [16, 16, 64], strides = [1, 1, 1]} : vector<18x18x64xbf16> to vector<16x16x64xbf16>
    %145 = vector.extract_strided_slice %137 {offsets = [2, 0, 0], sizes = [16, 16, 64], strides = [1, 1, 1]} : vector<18x18x64xbf16> to vector<16x16x64xbf16>
    %146 = vector.extract_strided_slice %137 {offsets = [2, 1, 0], sizes = [16, 16, 64], strides = [1, 1, 1]} : vector<18x18x64xbf16> to vector<16x16x64xbf16>
    %147 = vector.extract_strided_slice %137 {offsets = [2, 2, 0], sizes = [16, 16, 64], strides = [1, 1, 1]} : vector<18x18x64xbf16> to vector<16x16x64xbf16>
    %148 = tpu.concatenate %139, %140, %141, %142, %143, %144, %145, %146, %147 in 2 : vector<16x16x64xbf16>, vector<16x16x64xbf16>, vector<16x16x64xbf16>, vector<16x16x64xbf16>, vector<16x16x64xbf16>, vector<16x16x64xbf16>, vector<16x16x64xbf16>, vector<16x16x64xbf16>, vector<16x16x64xbf16> -> vector<16x16x576xbf16>
    %149 = vector.shape_cast %148 : vector<16x16x576xbf16> to vector<256x576xbf16>
    %cst_43 = arith.constant dense<0.000000e+00> : vector<256x64xf32>
    %150 = tpu.matmul %149, %138, %cst_43 {dimension_numbers = #tpu.dot_dimension_numbers<[1], [0], [0], [1], [0, 0, 1, 1], [], []>} : vector<256x576xbf16>, vector<576x64xbf16>, vector<256x64xf32> -> vector<256x64xf32>
    %151 = vector.shape_cast %150 : vector<256x64xf32> to vector<16x16x64xf32>
    %152 = arith.addf %151, %1 : vector<16x16x64xf32>
    %c0_44 = arith.constant 0 : index
    %c0_45 = arith.constant 0 : index
    %c0_46 = arith.constant 0 : index
    %c0_47 = arith.constant 0 : index
    %153 = vector.load %arg5[%c0_44, %c0_45, %c0_46, %c0_47] : memref<1x16x16x64xf32, #tpu.memory_space<vmem>>, vector<1x16x16x64xf32>
    %154 = vector.shape_cast %153 : vector<1x16x16x64xf32> to vector<16x16x64xf32>
    %155 = vector.shape_cast %152 : vector<16x16x64xf32> to vector<1x16x16x64xf32>
    tpu.vector_store %arg5[%c0_44, %c0_45, %c0_46, %c0_47], %155 {strides = array<i32>} : memref<1x16x16x64xf32, #tpu.memory_space<vmem>>, vector<1x16x16x64xf32>,
    return
  }
  func.func @transform_0(%arg0: i32) -> (i32, i32, i32, i32) {
    %c0_i32 = arith.constant 0 : i32
    %c0_i32_0 = arith.constant 0 : i32
    %c0_i32_1 = arith.constant 0 : i32
    %c0_i32_2 = arith.constant 0 : i32
    return %arg0, %c0_i32, %c0_i32_0, %c0_i32_1 : i32, i32, i32, i32
  }
  func.func @transform_1(%arg0: i32) -> (i32, i32) {
    %c0_i32 = arith.constant 0 : i32
    %c0_i32_0 = arith.constant 0 : i32
    %c0_i32_1 = arith.constant 0 : i32
    return %c0_i32, %c0_i32_0 : i32, i32
  }
  func.func @transform_2(%arg0: i32) -> (i32, i32, i32) {
    %c0_i32 = arith.constant 0 : i32
    %c0_i32_0 = arith.constant 0 : i32
    %c0_i32_1 = arith.constant 0 : i32
    %c0_i32_2 = arith.constant 0 : i32
    return %c0_i32, %c0_i32_0, %c0_i32_1 : i32, i32, i32
  }
  func.func @transform_3(%arg0: i32) -> (i32, i32) {
    %c0_i32 = arith.constant 0 : i32
    %c0_i32_0 = arith.constant 0 : i32
    %c0_i32_1 = arith.constant 0 : i32
    return %c0_i32, %c0_i32_0 : i32, i32
  }
  func.func @transform_4(%arg0: i32) -> (i32, i32, i32, i32) {
    %c0_i32 = arith.constant 0 : i32
    %c0_i32_0 = arith.constant 0 : i32
    %c0_i32_1 = arith.constant 0 : i32
    %c0_i32_2 = arith.constant 0 : i32
    return %arg0, %c0_i32, %c0_i32_0, %c0_i32_1 : i32, i32, i32, i32
  }
}

</mosaic_0001>

<bundles_post_ra>
// kernel: tpu_custom_call.1
= control target key start
LH: loop header
LB: loop body
LE: loop exit
PB: predicated region body
PF: predicated region fallthrough
CT: control target
= control target key end

     0   :  { %9 = vsyncpa [#allocation3], 0  ;;  %s20449_s0 = inlined_call_operand.vmem [shape: f32[2,16,16,64], index: 0, kind: input, shape index: {}]   ;;  %s20450_s1 = inlined_call_operand.vmem [shape: bf16[576,64], index: 1, kind: input, shape index: {}]   ;;  %s20451_s2 = inlined_call_operand.vmem [shape: bf16[5,576,64], index: 2, kind: input, shape index: {}]   ;;  %s20452_s3 = inlined_call_operand.vmem [shape: bf16[576,64], index: 3, kind: input, shape index: {}]   ;;  %s20453_s4 = inlined_call_operand.hbm [shape: f32[2,16,16,64], index: 4, kind: output, shape index: {}]  }
   0x1   :  { %11 = vsyncpa [#allocation3 + $0x1], 0  ;;  %s14463_s15 = smov 0   ;;  %s14465_s16 = smov 0  }
   0x2   :  { %s14467_s17 = smov 0   ;;  %s14469_s18 = smov 0  }
   0x3 LB: > { %s14484_s19 = sadd.s32 4294967295, %s14431_s18   ;;  %s11366_s20 = sadd.s32 4294967294, %s14431_s18   ;;  %s14431_s18 = sphi %s14469_s18, %s20611_s18   ;;  %s14427_s17 = sphi %s14467_s17, %s20610_s17   ;;  %s14423_s16 = sphi %s14465_s16, %s20609_s16   ;;  %s14419_s15 = sphi %s14463_s15, %s20608_s15  }
   0x4   : > { %s14488_s21 = sadd.s32 1, %s14431_s18   ;;  %s113_s22 = sadd.s32 1, %s14427_s17 }
   0x5   : > { %s110_s23 = ssub.s32 %s14431_s18, %s14488_s21  ;;  %p123_p0 = scmp.ne.s32.totalorder %s14427_s17, %s14423_s16 }
   0x6   : > { %p111_p1 = scmp.eq.s32.totalorder %s110_s23, 0  ;;  %p124_p2 = scmp.eq.s32.totalorder %s14484_s19, 1 }
   0x7   : > { %p129_p3 = scmp.ne.s32.totalorder %s14423_s16, %s14419_s15  ;;  %p130_p4 = scmp.eq.s32.totalorder %s11366_s20, 1 }
   0x8   : > { %s14499_s24 = scalar_select %p111_p1, %s14427_s17, %s113_s22  }
   0x9   : > { %p14501_p5 = por %p124_p2, %p123_p0  ;;  %p14505_p6 = por %p130_p4, %p129_p3 }
   0xa   : > { %p11369_p7 = scmp.ge.s32.totalorder %s14431_s18, 1  ;;  %p165_p8 = scmp.lt.s32.totalorder %s14431_s18, 3 }
   0xc   : > { %p166_p9 = pnand %p11369_p7, %p165_p8 }
   0xe   : > { %169 = sbr.rel (%p166_p9) target bundleno = 3382 (0xd36), region = 36 }
  0x15   : > { %p191_p10 = scmp.lt.s32.totalorder %s14484_s19, 1  ;;  %vm398_vm0 = vcmask 1040384   ;;  %vm399_vm1 = vsmask.f32 256  ;;  %v20506_v0 = vmov 0  ;;  %v14433_v1 = vmov 0  }
  0x16   : > { %vm14512_vm2 = vmand %vm398_vm0, %vm399_vm1  ;;  %v248_v2 = vrot.slane %v14433_v1, 7  ;;  %v14079_v3 = vld [vmem:[%s20450_s1 + $0x40] sm:$0xff]   ;;  %v14081_v7 = vld [vmem:[%s20450_s1 + $0x48] sm:$0xff]   ;;  %vm507_vm3 = vsmask.f32 7424  ;;  %s14434_s22 = smov 64  }
  0x17   : > { %v20507_v0 = vsel %vm14512_vm2, 4294967295, %v20506_v0  ;;  %s192_s27 = scalar_select %p191_p10, %s14484_s19, 1  ;;  %v14080_v6 = vld [vmem:[%s20450_s1] sm:$0xff]   ;;  %12032 = vmatprep.subr.bf16.mxu0 %v14079_v3  ;;  %v14082_v11 = vld [vmem:[%s20450_s1 + $0x8] sm:$0xff]   ;;  %14020 = vmatprep.subr.bf16.mxu1 %v14079_v3  ;;  %v14083_v12 = vld [vmem:[%s20450_s1 + $0x50] sm:$0xff]   ;;  %vm764_vm4 = vcmask 1046528  }
  0x18   : > { %20508 = vst [vmem:[#allocation5_spill] sm:$0xff] %v20507_v0  ;;  %v14522_v4 = vsel %vm14512_vm2, 0, %v248_v2  ;;  %v14526_v5 = vsel %vm14512_vm2, %v248_v2, 0  ;;  %12033 = vmatpush3.bf16.msra.mxu0 %v14080_v6  ;;  %14028 = vmatpush3.bf16.msra.mxu1 %v14080_v6  ;;  %vm896_vm5 = vcmask 523264   ;;  %s188_s10 = sand.u32 1, %s14423_s16   ;;  %s12031_s14 = sshll.u32 %s14484_s19, 12 }
  0x19   : > { %s12030_s8 = sshll.u32 %s192_s27, 8  ;;  %v509_v8 = vshrl.u32 %v14522_v4, 16  ;;  %v511_v9 = vshll.u32 %v14522_v4, 16  ;;  %v516_v10 = vshll.u32 %v14526_v5, 16  ;;  %12034 = vmatprep.subr.bf16.mxu0 %v14081_v7  ;;  %14021 = vmatprep.subr.bf16.mxu1 %v14081_v7  ;;  %v14084_v7 = vld [vmem:[%s20450_s1 + $0x10] sm:$0xff]   ;;  %s11370_s11 = sshll.u32 %s188_s10, 8 }
  0x1a   : > { %s14543_s13 = scalar_lea.vmem %s20449_s0, %s12030_s8  ;;  %s20255_s12 = scalar_lea.vmem [#allocation2], %s11370_s11 }
  0x1b   : > { %v197_v13 = vld [vmem:[%s14543_s13] sm:$0xff]  ;;  %v198_v14 = vld [vmem:[%s14543_s13 + $0x8] sm:$0xff]  ;;  %v199_v15 = vld [vmem:[%s14543_s13 + $0x10] sm:$0xff]  ;;  %v513_v16 = vrot.slane %v511_v9, 1  ;;  %v518_v17 = vrot.slane %v516_v10, 1  ;;  %s11304_s20 = sshll.u32 %s20255_s12, 4  ;;  %s20395_s19 = scalar_lea.hbm %s20453_s4, %s12031_s14  ;;  %s20397_s20 = int_to_ptr.vmem [resolvable:$true] %s11304_s20 }
  0x1c   : > { %v229_v18 = vpack.c.bf16 %v198_v14, %v197_v13  ;;  %v200_v19 = vld [vmem:[%s14543_s13 + $0x18] sm:$0xff]  ;;  %v201_v20 = vld [vmem:[%s14543_s13 + $0x20] sm:$0xff]  ;;  %v202_v21 = vld [vmem:[%s14543_s13 + $0x28] sm:$0xff]  ;;  %12035 = vmatpush3.bf16.msra.mxu0 %v14082_v11  ;;  %14029 = vmatpush3.bf16.msra.mxu1 %v14082_v11  ;;  %s20408_s28 = scalar_lea.sflag [#allocation3], %s188_s10  ;;  %s14369_s29 = scalar_lea.vmem %s20397_s20, 4096 }
  0x1d   : > { %v230_v22 = vpack.c.bf16 %v200_v19, %v199_v15  ;;  %v514_v23 = vor.u32 %v513_v16, %v509_v8  ;;  %v231_v24 = vpack.c.bf16 %v202_v21, %v201_v20  ;;  %v203_v25 = vld [vmem:[%s14543_s13 + $0x30] sm:$0xff]  ;;  %v204_v26 = vld [vmem:[%s14543_s13 + $0x38] sm:$0xff]  ;;  %v205_v27 = vld [vmem:[%s14543_s13 + $0x40] sm:$0xff]  ;;  %12036 = vmatprep.subr.bf16.mxu0 %v14083_v12  ;;  %14022 = vmatprep.subr.bf16.mxu1 %v14083_v12  ;;  %p14370_p11 = scmp.ne.s32.totalorder %s20397_s20, %s14369_s29  ;;  %s14435_s30 = smov [#allocation2]  }
  0x1e   : > { %v253_v28 = vshrl.u32 %v229_v18, 16  ;;  %v256_v29 = vshll.u32 %v229_v18, 16  ;;  %v232_v30 = vpack.c.bf16 %v204_v26, %v203_v25  ;;  %v206_v31 = vld [vmem:[%s14543_s13 + $0x48] sm:$0xff]  ;;  %v207_v32 = vld [vmem:[%s14543_s13 + $0x50] sm:$0xff]  ;;  %v208_v33 = vld [vmem:[%s14543_s13 + $0x58] sm:$0xff]  ;;  %s14373_s5 = sshll.u32 %s14435_s30, 4  ;;  %s14374_s5 = int_to_ptr.vmem [resolvable:$false] %s14373_s5 }
  0x1f   : > { %v260_v34 = vshrl.u32 %v230_v22, 16  ;;  %v263_v35 = vshll.u32 %v230_v22, 16  ;;  %v519_v36 = vsel %vm507_vm3, %v514_v23, %v518_v17  ;;  %v267_v37 = vshrl.u32 %v231_v24, 16  ;;  %v209_v38 = vld [vmem:[%s14543_s13 + $0x60] sm:$0xff]  ;;  %v210_v39 = vld [vmem:[%s14543_s13 + $0x68] sm:$0xff]  ;;  %v14085_v20 = vld [vmem:[%s20450_s1 + $0x58] sm:$0xff]   ;;  %p14371_p12 = pnand %p14370_p11, %p14501_p5  ;;  %p14376_p0 = scmp.lt.s32.totalorder %s20397_s20, %s14374_s5 }
  0x20   : > { %v255_v40 = vrot.slane %v253_v28, 7  ;;  %v270_v41 = vshll.u32 %v231_v24, 16  ;;  %v274_v42 = vshrl.u32 %v232_v30, 16  ;;  %v277_v43 = vshll.u32 %v232_v30, 16  ;;  %12037 = vmatpush3.bf16.msra.mxu0 %v14084_v7  ;;  %14030 = vmatpush3.bf16.msra.mxu1 %v14084_v7  ;;  %v14086_v25 = vld [vmem:[%s20450_s1 + $0x18] sm:$0xff]   ;;  %s14375_s6 = scalar_lea.vmem %s14374_s5, 8192 }
  0x21   : > { %v262_v44 = vrot.slane %v260_v34, 7  ;;  %v269_v45 = vrot.slane %v267_v37, 7  ;;  %v233_v46 = vpack.c.bf16 %v206_v31, %v205_v27  ;;  %v14563_v47 = vpack.c.bf16 %v208_v33, %v207_v32  ;;  %12038 = vmatprep.subr.bf16.mxu0 %v14085_v20  ;;  %14023 = vmatprep.subr.bf16.mxu1 %v14085_v20  ;;  %v211_v33 = vld [vmem:[%s14543_s13 + $0x70] sm:$0xff]  ;;  %v212_v37 = vld [vmem:[%s14543_s13 + $0x78] sm:$0xff]  ;;  %p14372_p13 = pneg %p14371_p12  ;;  %p14377_p1 = scmp.lt.s32.totalorder %s14375_s6, %s14369_s29 }
  0x22   : > { %v258_v48 = vor.u32 %v256_v29, %v255_v40  ;;  %v14567_v49 = vsel %vm14512_vm2, %v255_v40, 0  ;;  %v276_v50 = vrot.slane %v274_v42, 7  ;;  %v14569_v51 = vpack.c.bf16 %v210_v39, %v209_v38  ;;  %v14087_v38 = vld [vmem:[%s20450_s1 + $0x60] sm:$0xff]  }
  0x23   : > { %v265_v52 = vor.u32 %v263_v35, %v262_v44  ;;  %v528_v53 = vshll.u32 %v14567_v49, 16  ;;  %v272_v54 = vor.u32 %v270_v41, %v269_v45  ;;  %v14574_v55 = vsel %vm14512_vm2, %v262_v44, 0  ;;  %v14088_v42 = vld [vmem:[%s20450_s1 + $0x20] sm:$0xff]   ;;  %p14378_p2 = por %p14377_p1, %p14376_p0 }
  0x24   : > { %v14578_v56 = vsel %vm14512_vm2, 0, %v258_v48  ;;  %v540_v57 = vshll.u32 %v14574_v55, 16  ;;  %v279_v58 = vor.u32 %v277_v43, %v276_v50  ;;  %v14583_v59 = vsel %vm14512_vm2, %v269_v45, 0  ;;  %12039 = vmatpush3.bf16.msra.mxu0 %v14086_v25  ;;  %14031 = vmatpush3.bf16.msra.mxu1 %v14086_v25  ;;  %v222_v48 = vld [vmem:[%s14543_s13 + $0xc8] sm:$0xff] }
  0x25   : > { %814 = vrot.lane.b32.xlu0 %v14578_v56, %s14434_s22  ;;  %v14589_v60 = vsel %vm14512_vm2, 0, %v265_v52  ;;  %v521_v61 = vshrl.u32 %v14578_v56, 16  ;;  %v523_v62 = vshll.u32 %v14578_v56, 16  ;;  %v530_v63 = vrot.slane %v528_v53, 1  ;;  %12040 = vmatprep.subr.bf16.mxu0 %v14087_v38  ;;  %p14379_p3 = pnand %p14378_p2, %p14372_p13 }
  0x26   : > { %816 = vrot.lane.b32.xlu1 %v14589_v60, %s14434_s22  ;;  %v14597_v1 = vsel %vm14512_vm2, 0, %v272_v54  ;;  %v533_v2 = vshrl.u32 %v14589_v60, 16  ;;  %v535_v3 = vshll.u32 %v14589_v60, 16  ;;  %v542_v6 = vrot.slane %v540_v57, 1  ;;  %14024 = vmatprep.subr.bf16.mxu1 %v14087_v38  ;;  %v14090_v57 = vld [vmem:[%s20450_s1 + $0x28] sm:$0xff]  }
  0x27   : > { %v525_v8 = vrot.slane %v523_v62, 1  ;;  %v14606_v9 = vsel %vm14512_vm2, 0, %v279_v58  ;;  %v545_v10 = vshrl.u32 %v14597_v1, 16  ;;  %v547_v11 = vshll.u32 %v14597_v1, 16 }
  0x28   : > { %v537_v12 = vrot.slane %v535_v3, 1  ;;  %v552_v13 = vshll.u32 %v14583_v59, 16  ;;  %v281_v14 = vshrl.u32 %v233_v46, 16  ;;  %v284_v15 = vshll.u32 %v233_v46, 16  ;;  %12041 = vmatpush3.bf16.msra.mxu0 %v14088_v42  ;;  %14032 = vmatpush3.bf16.msra.mxu1 %v14088_v42 }
  0x29   : > { %700 = vrot.lane.b32.xlu0 %v519_v36, %s14434_s22  ;;  %v526_v16 = vor.u32 %v525_v8, %v521_v61  ;;  %v549_v17 = vrot.slane %v547_v11, 1  ;;  %v14614_v18 = vsel %vm14512_vm2, %v276_v50, 0  ;;  %v557_v19 = vshrl.u32 %v14606_v9, 16  ;;  %v14089_v50 = vld [vmem:[%s20450_s1 + $0x68] sm:$0xff]   ;;  %v219_v8 = vld [vmem:[%s14543_s13 + $0xb0] sm:$0xff]  ;;  %v213_v11 = vld [vmem:[%s14543_s13 + $0x80] sm:$0xff] }
  0x2a   : > { %v538_v21 = vor.u32 %v537_v12, %v533_v2  ;;  %v554_v22 = vrot.slane %v552_v13, 1  ;;  %v283_v23 = vrot.slane %v281_v14, 7  ;;  %v559_v24 = vshll.u32 %v14606_v9, 16  ;;  %12042 = vmatprep.subr.bf16.mxu0 %v14089_v50  ;;  %v14091_v2 = vld [vmem:[%s20450_s1 + $0x70] sm:$0xff]   ;;  %v214_v12 = vld [vmem:[%s14543_s13 + $0x88] sm:$0xff]  ;;  %14025 = vmatprep.subr.bf16.mxu1 %v14089_v50 }
  0x2b   : > { %v14625_v26 = vsel %vm507_vm3, %v526_v16, %v530_v63  ;;  %v564_v27 = vshll.u32 %v14614_v18, 16  ;;  %v288_v28 = vshrl.u32 %v14563_v47, 16  ;;  %v550_v29 = vor.u32 %v549_v17, %v545_v10  ;;  %v220_v10 = vld [vmem:[%s14543_s13 + $0xb8] sm:$0xff]  ;;  %v223_v17 = vld [vmem:[%s14543_s13 + $0xd0] sm:$0xff] }
  0x2c   : > { %702 = vrot.lane.b32.xlu1 %v14625_v26, %s14434_s22  ;;  %v286_v30 = vor.u32 %v284_v15, %v283_v23  ;;  %v561_v31 = vrot.slane %v559_v24, 1  ;;  %v291_v32 = vshll.u32 %v14563_v47, 16  ;;  %v14636_v34 = vsel %vm507_vm3, %v538_v21, %v542_v6  ;;  %v221_v47 = vld [vmem:[%s14543_s13 + $0xc0] sm:$0xff]  ;;  %12043 = vmatpush3.bf16.msra.mxu0 %v14090_v57  ;;  %v14092_v24 = vld [vmem:[%s20450_s1 + $0x30] sm:$0xff]  }
  0x2d   : > { %818 = vrot.lane.b32.xlu0 %v14597_v1, %s14434_s22  ;;  %v290_v35 = vrot.slane %v288_v28, 7  ;;  %v14640_v36 = vsel %vm14512_vm2, %v283_v23, 0  ;;  %v566_v40 = vrot.slane %v564_v27, 1  ;;  %v295_v41 = vshrl.u32 %v14569_v51, 16  ;;  %12044 = vmatprep.subr.bf16.mxu0 %v14091_v2 }
  0x2e   : > { %v14648_v39 = vsel %vm14512_vm2, 0, %v286_v30  ;;  %v562_v43 = vor.u32 %v561_v31, %v557_v19  ;;  %v298_v46 = vshll.u32 %v14569_v51, 16  ;;  %v14664_v52 = vsel %vm507_vm3, %v550_v29, %v554_v22  ;;  %v224_v19 = vld [vmem:[%s14543_s13 + $0xd8] sm:$0xff]  ;;  %14033 = vmatpush3.bf16.msra.mxu1 %v14090_v57 }
  0x2f   : > { %v293_v44 = vor.u32 %v291_v32, %v290_v35  ;;  %v571_v45 = vshll.u32 %v14648_v39, 16  ;;  %v576_v53 = vshll.u32 %v14640_v36, 16  ;;  %v297_v54 = vrot.slane %v295_v41, 7  ;;  %v14093_v30 = vld [vmem:[%s20450_s1 + $0x78] sm:$0xff]   ;;  %14026 = vmatprep.subr.bf16.mxu1 %v14091_v2 }
  0x30   : > { %704 = vrot.lane.b32.xlu1 %v14636_v34, %s14434_s22  ;;  %v14669_v51 = vsel %vm14512_vm2, %v290_v35, 0  ;;  %v569_v61 = vshrl.u32 %v14648_v39, 16  ;;  %v236_v63 = vpack.c.bf16 %v212_v37, %v211_v33  ;;  %v14691_v13 = vsel %vm507_vm3, %v562_v43, %v566_v40  ;;  %v14094_v41 = vld [vmem:[%s20450_s1 + $0x38] sm:$0xff]   ;;  %12045 = vmatpush3.bf16.msra.mxu0 %v14092_v24 }
  0x31   : > { %820 = vrot.lane.b32.xlu0 %v14606_v9, %s14434_s22  ;;  %v14678_v58 = vsel %vm14512_vm2, 0, %v293_v44  ;;  %v573_v62 = vrot.slane %v571_v45, 1  ;;  %v300_v3 = vor.u32 %v298_v46, %v297_v54  ;;  %v588_v7 = vshll.u32 %v14669_v51, 16  ;;  %20509 = vst [vmem:[#allocation6_spill] sm:$0xff] %v14691_v13  ;;  %12046 = vmatprep.subr.bf16.mxu0 %v14093_v30 }
  0x32   : > { %v583_v6 = vshll.u32 %v14678_v58, 16  ;;  %v581_v14 = vshrl.u32 %v14678_v58, 16  ;;  %v302_v15 = vshrl.u32 %v236_v63, 16  ;;  %v14696_v16 = vsel %vm14512_vm2, %v297_v54, 0  ;;  %14034 = vmatpush3.bf16.msra.mxu1 %v14092_v24 }
  0x33   : > { %v14704_v20 = vsel %vm14512_vm2, 0, %v300_v3  ;;  %v305_v22 = vshll.u32 %v236_v63, 16  ;;  %v241_v23 = vpack.c.bf16 %v222_v48, %v221_v47  ;;  %v574_v25 = vor.u32 %v573_v62, %v569_v61  ;;  %14027 = vmatprep.subr.bf16.mxu1 %v14093_v30  ;;  %v14097_v3 = vld [vmem:[%s20450_s1 + $0xc0] sm:$0xff]  }
  0x34   : > { %706 = vrot.lane.b32.xlu1 %v14664_v52, %s14434_s22  ;;  %v585_v21 = vrot.slane %v583_v6, 1  ;;  %v578_v27 = vrot.slane %v576_v53, 1  ;;  %v304_v28 = vrot.slane %v302_v15, 7  ;;  %v595_v29 = vshll.u32 %v14704_v20, 16  ;;  %v14730_v53 = vld [vmem:[%s20450_s1 + $0x100] sm:$0xff]   ;;  %12047 = vmatpush3.bf16.msra.mxu0 %v14094_v41 }
  0x35   : > { %822 = vrot.lane.b32.xlu0 %v14648_v39, %s14434_s22  ;;  %v590_v31 = vrot.slane %v588_v7, 1  ;;  %v337_v32 = vshrl.u32 %v241_v23, 16  ;;  %v340_v33 = vshll.u32 %v241_v23, 16  ;;  %v600_v37 = vshll.u32 %v14696_v16, 16  ;;  %13740 = vmatprep.subr.bf16.mxu0 %v14730_v53 }
  0x36   : > { %v586_v35 = vor.u32 %v585_v21, %v581_v14  ;;  %v240_v38 = vpack.c.bf16 %v220_v10, %v219_v8  ;;  %v237_v40 = vpack.c.bf16 %v214_v12, %v213_v11  ;;  %v307_v42 = vor.u32 %v305_v22, %v304_v28  ;;  %14035 = vmatpush3.bf16.msra.mxu1 %v14094_v41 }
  0x37   : > { %v593_v43 = vshrl.u32 %v14704_v20, 16  ;;  %v339_v44 = vrot.slane %v337_v32, 7  ;;  %v242_v45 = vpack.c.bf16 %v224_v19, %v223_v17  ;;  %v14725_v46 = vsel %vm507_vm3, %v574_v25, %v578_v27  ;;  %v215_v27 = vld [vmem:[%s14543_s13 + $0x90] sm:$0xff]  ;;  %12144 = vmatprep.subr.bf16.mxu1 %v14097_v3  ;;  %v218_v3 = vld [vmem:[%s14543_s13 + $0xa8] sm:$0xff] }
  0x38   : > { %708 = vrot.lane.b32.xlu1 %v14691_v13, %s14434_s22  ;;  %20510 = vst [vmem:[#allocation7_spill] sm:$0xff] %v14725_v46  ;;  %v597_v47 = vrot.slane %v595_v29, 1  ;;  %v330_v48 = vshrl.u32 %v240_v38, 16  ;;  %v333_v50 = vshll.u32 %v240_v38, 16  ;;  %v309_v57 = vshrl.u32 %v237_v40, 16 }
  0x39   : > { %824 = vrot.lane.b32.xlu0 %v14678_v58, %s14434_s22  ;;  %v342_v54 = vor.u32 %v340_v33, %v339_v44  ;;  %v14733_v61 = vsel %vm507_vm3, %v586_v35, %v590_v31  ;;  %v602_v62 = vrot.slane %v600_v37, 1  ;;  %v312_v2 = vshll.u32 %v237_v40, 16 }
  0x3a   : > { %20511 = vst [vmem:[#allocation8_spill] sm:$0xff] %v14733_v61  ;;  %v332_v63 = vrot.slane %v330_v48, 7  ;;  %v14742_v6 = vsel %vm14512_vm2, 0, %v307_v42  ;;  %v311_v7 = vrot.slane %v309_v57, 7  ;;  %v14746_v8 = vsel %vm14512_vm2, %v304_v28, 0  ;;  %v216_v28 = vld [vmem:[%s14543_s13 + $0x98] sm:$0xff] }
  0x3b   : > { %v344_v10 = vshrl.u32 %v242_v45, 16  ;;  %v598_v11 = vor.u32 %v597_v47, %v593_v43  ;;  %v607_v15 = vshll.u32 %v14742_v6, 16  ;;  %v14758_v17 = vsel %vm14512_vm2, 0, %v342_v54  ;;  %v225_v43 = vld [vmem:[%s14543_s13 + $0xe0] sm:$0xff] }
  0x3c   : > { %710 = vrot.lane.b32.xlu1 %v14725_v46, %s14434_s22  ;;  %v335_v12 = vor.u32 %v333_v50, %v332_v63  ;;  %v14752_v14 = vsel %vm14512_vm2, %v332_v63, 0  ;;  %v347_v22 = vshll.u32 %v242_v45, 16  ;;  %v314_v24 = vor.u32 %v312_v2, %v311_v7  ;;  %v226_v45 = vld [vmem:[%s14543_s13 + $0xe8] sm:$0xff]  ;;  %v217_v54 = vld [vmem:[%s14543_s13 + $0xa0] sm:$0xff] }
  0x3d   : > { %826 = vrot.lane.b32.xlu0 %v14704_v20, %s14434_s22  ;;  %v660_v19 = vshll.u32 %v14752_v14, 16  ;;  %v346_v21 = vrot.slane %v344_v10, 7  ;;  %v667_v25 = vshll.u32 %v14758_v17, 16  ;;  %v605_v31 = vshrl.u32 %v14742_v6, 16 }
  0x3e   : > { %v14763_v23 = vsel %vm14512_vm2, 0, %v335_v12  ;;  %v14775_v32 = vsel %vm14512_vm2, %v339_v44, 0  ;;  %v14780_v33 = vsel %vm507_vm3, %v598_v11, %v602_v62  ;;  %v609_v35 = vrot.slane %v607_v15, 1 }
  0x3f   : > { %v653_v29 = vshrl.u32 %v14763_v23, 16  ;;  %v655_v30 = vshll.u32 %v14763_v23, 16  ;;  %20512 = vst [vmem:[#allocation9_spill] sm:$0xff] %v14780_v33  ;;  %v612_v37 = vshll.u32 %v14746_v8, 16  ;;  %v662_v40 = vrot.slane %v660_v19, 1 }
  0x40   : > { %712 = vrot.lane.b32.xlu1 %v14733_v61, %s14434_s22  ;;  %v349_v41 = vor.u32 %v347_v22, %v346_v21  ;;  %v238_v42 = vpack.c.bf16 %v216_v28, %v215_v27  ;;  %v14787_v44 = vsel %vm14512_vm2, 0, %v314_v24  ;;  %v665_v47 = vshrl.u32 %v14758_v17, 16 }
  0x41   : > { %828 = vrot.lane.b32.xlu0 %v14742_v6, %s14434_s22  ;;  %v657_v38 = vrot.slane %v655_v30, 1  ;;  %v669_v48 = vrot.slane %v667_v25, 1  ;;  %v672_v50 = vshll.u32 %v14775_v32, 16  ;;  %v619_v2 = vshll.u32 %v14787_v44, 16 }
  0x42   : > { %v316_v62 = vshrl.u32 %v238_v42, 16  ;;  %v319_v63 = vshll.u32 %v238_v42, 16  ;;  %v610_v10 = vor.u32 %v609_v35, %v605_v31  ;;  %v614_v11 = vrot.slane %v612_v37, 1  ;;  %v227_v42 = vld [vmem:[%s14543_s13 + $0xf0] sm:$0xff] }
  0x43   : > { %v658_v57 = vor.u32 %v657_v38, %v653_v29  ;;  %v14800_v12 = vsel %vm14512_vm2, %v311_v7, 0  ;;  %v243_v15 = vpack.c.bf16 %v226_v45, %v225_v43  ;;  %v14807_v22 = vsel %vm14512_vm2, 0, %v349_v41  ;;  %v228_v43 = vld [vmem:[%s14543_s13 + $0xf8] sm:$0xff] }
  0x44   : > { %714 = vrot.lane.b32.xlu1 %v14780_v33, %s14434_s22  ;;  %v318_v24 = vrot.slane %v316_v62, 7  ;;  %v617_v25 = vshrl.u32 %v14787_v44, 16  ;;  %v670_v27 = vor.u32 %v669_v48, %v665_v47  ;;  %v674_v28 = vrot.slane %v672_v50, 1 }
  0x45   : > { %838 = vrot.lane.b32.xlu0 %v14758_v17, %s14434_s22  ;;  %v14803_v19 = vsel %vm507_vm3, %v658_v57, %v662_v40  ;;  %v351_v29 = vshrl.u32 %v243_v15, 16  ;;  %v354_v30 = vshll.u32 %v243_v15, 16  ;;  %v621_v31 = vrot.slane %v619_v2, 1 }
  0x46   : > { %20513 = vst [vmem:[#allocation10_spill] sm:$0xff] %v14803_v19  ;;  %v321_v7 = vor.u32 %v319_v63, %v318_v24  ;;  %v624_v35 = vshll.u32 %v14800_v12, 16  ;;  %v239_v37 = vpack.c.bf16 %v218_v3, %v217_v54  ;;  %v14816_v38 = vsel %vm507_vm3, %v610_v10, %v614_v11 }
  0x47   : > { %20514 = vst [vmem:[#allocation11_spill] sm:$0xff] %v14816_v38  ;;  %v353_v40 = vrot.slane %v351_v29, 7  ;;  %v679_v41 = vshll.u32 %v14807_v22, 16  ;;  %v14827_v47 = vsel %vm14512_vm2, %v346_v21, 0  ;;  %v14830_v54 = vsel %vm507_vm3, %v670_v27, %v674_v28 }
  0x48   : > { %724 = vrot.lane.b32.xlu1 %v14803_v19, %s14434_s22  ;;  %v14823_v45 = vsel %vm14512_vm2, 0, %v321_v7  ;;  %v323_v48 = vshrl.u32 %v239_v37, 16  ;;  %v326_v50 = vshll.u32 %v239_v37, 16  ;;  %20516 = vst [vmem:[#allocation13_spill] sm:$0xff] %v14830_v54  ;;  %v14834_v62 = vsel %vm14512_vm2, %v318_v24, 0 }
  0x49   : > { %830 = vrot.lane.b32.xlu0 %v14787_v44, %s14434_s22  ;;  %20515 = vst [vmem:[#allocation12_spill] sm:$0xff] %v14823_v45  ;;  %v356_v57 = vor.u32 %v354_v30, %v353_v40  ;;  %v631_v63 = vshll.u32 %v14823_v45, 16  ;;  %v622_v2 = vor.u32 %v621_v31, %v617_v25  ;;  %v626_v3 = vrot.slane %v624_v35, 1 }
  0x4a   : > { %v325_v10 = vrot.slane %v323_v48, 7  ;;  %v244_v21 = vpack.c.bf16 %v228_v43, %v227_v42  ;;  %v677_v11 = vshrl.u32 %v14807_v22, 16  ;;  %v681_v15 = vrot.slane %v679_v41, 1 }
  0x4b   : > { %v684_v27 = vshll.u32 %v14827_v47, 16  ;;  %v14845_v24 = vsel %vm14512_vm2, %v353_v40, 0  ;;  %v14849_v28 = vsel %vm14512_vm2, 0, %v356_v57  ;;  %v636_v29 = vshll.u32 %v14834_v62, 16 }
  0x4c   : > { %716 = vrot.lane.b32.xlu1 %v14816_v38, %s14434_s22  ;;  %v328_v25 = vor.u32 %v326_v50, %v325_v10  ;;  %v358_v30 = vshrl.u32 %v244_v21, 16  ;;  %v629_v7 = vshrl.u32 %v14823_v45, 16  ;;  %v633_v31 = vrot.slane %v631_v63, 1 }
  0x4d   : > { %840 = vrot.lane.b32.xlu0 %v14807_v22, %s14434_s22  ;;  %v361_v35 = vshll.u32 %v244_v21, 16  ;;  %v691_v37 = vshll.u32 %v14849_v28, 16  ;;  %v14857_v40 = vsel %vm507_vm3, %v622_v2, %v626_v3  ;;  %v696_v42 = vshll.u32 %v14845_v24, 16 }
  0x4e   : > { %20517 = vst [vmem:[#allocation14_spill] sm:$0xff] %v14857_v40  ;;  %v360_v41 = vrot.slane %v358_v30, 7  ;;  %v682_v43 = vor.u32 %v681_v15, %v677_v11  ;;  %v686_v48 = vrot.slane %v684_v27, 1  ;;  %v14864_v50 = vsel %vm14512_vm2, 0, %v328_v25 }
  0x4f   : > { %20518 = vst [vmem:[#allocation15_spill] sm:$0xff] %v14864_v50  ;;  %v14868_v57 = vsel %vm14512_vm2, %v325_v10, 0  ;;  %v638_v63 = vrot.slane %v636_v29, 1  ;;  %v643_v2 = vshll.u32 %v14864_v50, 16  ;;  %v634_v3 = vor.u32 %v633_v31, %v629_v7 }
  0x50   : > { %726 = vrot.lane.b32.xlu1 %v14830_v54, %s14434_s22  ;;  %v363_v21 = vor.u32 %v361_v35, %v360_v41  ;;  %v689_v30 = vshrl.u32 %v14849_v28, 16  ;;  %v693_v54 = vrot.slane %v691_v37, 1  ;;  %v698_v15 = vrot.slane %v696_v42, 1 }
  0x51   : > { %832 = vrot.lane.b32.xlu0 %v14823_v45, %s14434_s22  ;;  %v648_v27 = vshll.u32 %v14868_v57, 16  ;;  %v14880_v10 = vsel %vm507_vm3, %v682_v43, %v686_v48  ;;  %v768_v25 = vrot.slane %v14578_v56, 1  ;;  %v769_v29 = vrot.slane %v14567_v49, 1 }
  0x52   : > { %20519 = vst [vmem:[#allocation16_spill] sm:$0xff] %v14880_v10  ;;  %v641_v7 = vshrl.u32 %v14864_v50, 16  ;;  %v645_v31 = vrot.slane %v643_v2, 1  ;;  %v771_v35 = vrot.slane %v14589_v60, 1  ;;  %v772_v37 = vrot.slane %v14574_v55, 1 }
  0x53   : > { %v14888_v42 = vsel %vm507_vm3, %v634_v3, %v638_v63  ;;  %v14892_v19 = vsel %vm14512_vm2, 0, %v363_v21  ;;  %v694_v43 = vor.u32 %v693_v54, %v689_v30  ;;  %v774_v48 = vrot.slane %v14597_v1, 1 }
  0x54   : > { %718 = vrot.lane.b32.xlu1 %v14857_v40, %s14434_s22  ;;  %20520 = vst [vmem:[#allocation17_spill] sm:$0xff] %v14888_v42  ;;  %v650_v49 = vrot.slane %v648_v27, 1  ;;  %v775_v2 = vrot.slane %v14583_v59, 1  ;;  %v777_v11 = vrot.slane %v14606_v9, 1  ;;  %v778_v55 = vrot.slane %v14614_v18, 1 }
  0x55   : > { %842 = vrot.lane.b32.xlu0 %v14849_v28, %s14434_s22  ;;  %v780_v63 = vrot.slane %v14648_v39, 1  ;;  %v781_v3 = vrot.slane %v14640_v36, 1  ;;  %v783_v54 = vrot.slane %v14678_v58, 1  ;;  %v784_v21 = vrot.slane %v14669_v51, 1 }
  0x56   : > { %v786_v30 = vrot.slane %v14704_v20, 1  ;;  %v787_v27 = vrot.slane %v14696_v16, 1  ;;  %v789_v59 = vrot.slane %v14742_v6, 1  ;;  %v792_v18 = vrot.slane %v14787_v44, 1 }
  0x57   : > { %v793_v40 = vrot.slane %v14800_v12, 1  ;;  %v795_v36 = vrot.slane %v14823_v45, 1  ;;  %v796_v38 = vrot.slane %v14834_v62, 1  ;;  %v798_v51 = vrot.slane %v14864_v50, 1 }
  0x58   : > { %728 = vrot.lane.b32.xlu1 %v14880_v10, %s14434_s22  ;;  %v790_v10 = vrot.slane %v14746_v8, 1  ;;  %v799_v33 = vrot.slane %v14868_v57, 1  ;;  %v14921_v16 = vsel %vm507_vm3, %v694_v43, %v698_v15  ;;  %v646_v8 = vor.u32 %v645_v31, %v641_v7 }
  0x59   : > { %834 = vrot.lane.b32.xlu0 %v14864_v50, %s14434_s22  ;;  %20521 = vst [vmem:[#allocation18_spill] sm:$0xff] %v14921_v16  ;;  %v801_v12 = vrot.slane %v14763_v23, 1  ;;  %v802_v61 = vrot.slane %v14752_v14, 1  ;;  %v805_v46 = vrot.slane %v14775_v32, 1  ;;  %v807_v62 = vrot.slane %v14807_v22, 1 }
  0x5a   : > { %v434_v57 = vsel %vm14512_vm2, %v360_v41, 0  ;;  %v808_v50 = vrot.slane %v14827_v47, 1  ;;  %v810_v13 = vrot.slane %v14849_v28, 1  ;;  %v811_v15 = vrot.slane %v14845_v24, 1 }
  0x5b   : > { %v847_v7 = vshrl.u32 %v14892_v19, 16  ;;  %v849_v14 = vshll.u32 %v14892_v19, 16  ;;  %v854_v31 = vshll.u32 %v434_v57, 16  ;;  %v14940_v32 = vsel %vm507_vm3, %v646_v8, %v650_v49 }
  0x5c   : > { %720 = vrot.lane.b32.xlu1 %v14888_v42, %s14434_s22  ;;  %v804_v42 = vrot.slane %v14758_v17, 1  ;;  %v859_v47 = vrot.slane %v14892_v19, 1  ;;  %v860_v41 = vrot.slane %v434_v57, 1  ;;  %v770_v43 = vsel %vm764_vm4, %v768_v25, %v769_v29 }
  0x5d   : > { %844 = vrot.lane.b32.xlu0 %v14892_v19, %s14434_s22  ;;  %v851_v24 = vrot.slane %v849_v14, 1  ;;  %v856_v0 = vrot.slane %v854_v31, 1  ;;  %v14951_v45 = vsel %vm764_vm4, %v774_v48, %v775_v2  ;;  %v14958_v25 = vsel %vm764_vm4, %v777_v11, %v778_v55 }
  0x5e   : > { %v14961_v29 = vsel %vm764_vm4, %v780_v63, %v781_v3  ;;  %v14978_v11 = vsel %vm764_vm4, %v789_v59, %v790_v10  ;;  %v14981_v48 = vsel %vm764_vm4, %v792_v18, %v793_v40  ;;  %v14988_v49 = vsel %vm764_vm4, %v795_v36, %v796_v38  ;;  %v14114_v36 = vld [vmem:[%s20450_s1 + $0x118] sm:$0xff]  }
  0x5f   : > { %v14991_v2 = vsel %vm764_vm4, %v798_v51, %v799_v33  ;;  %v852_v40 = vor.u32 %v851_v24, %v847_v7  ;;  %v14998_v10 = vsel %vm764_vm4, %v801_v12, %v802_v61  ;;  %v15003_v55 = vsel %vm764_vm4, %v804_v42, %v805_v46 }
  0x60   : > { %730 = vrot.lane.b32.xlu1 %v14921_v16, %s14434_s22  ;;  %v14948_v16 = vsel %vm764_vm4, %v771_v35, %v772_v37  ;;  %v14968_v35 = vsel %vm764_vm4, %v783_v54, %v784_v21  ;;  %v14971_v37 = vsel %vm764_vm4, %v786_v30, %v787_v27  ;;  %v15011_v38 = vsel %vm764_vm4, %v807_v62, %v808_v50  ;;  %v14096_v54 = vld [vmem:[%s20450_s1 + $0x108] sm:$0xff]   ;;  %v14106_v27 = vld [vmem:[%s20450_s1 + $0x110] sm:$0xff]  }
  0x61   : > { %836 = vrot.lane.b32.xlu0 %v14763_v23, %s14434_s22  ;;  %v15008_v33 = vsel %vm507_vm3, %v852_v40, %v856_v0  ;;  %v15018_v61 = vsel %vm764_vm4, %v859_v47, %v860_v41  ;;  %v15021_v46 = vsel %vm764_vm4, %v810_v13, %v811_v15  ;;  %v20522_v0 = vrot.slane %v14526_v5, 1 }
  0x62   : > { %v20523_v50 = vrot.slane %v14522_v4, 1 }
  0x64   : > { %722 = vrot.lane.b32.xlu1 %v14940_v32, %s14434_s22  ;;  %v15032_v42 = vsel %vm764_vm4, %v20523_v50, %v20522_v0  ;;  %v14098_v0 = vld [vmem:[%s20450_s1 + $0x80] sm:$0xff]  }
  0x65   : > { %862 = vrot.lane.b32.xlu0 %v770_v43, %s14434_s22 }
  0x68   : > { %864 = vrot.lane.b32.xlu1 %v14948_v16, %s14434_s22 }
  0x69   : > { %866 = vrot.lane.b32.xlu0 %v14951_v45, %s14434_s22 }
  0x6c   : > { %868 = vrot.lane.b32.xlu1 %v14958_v25, %s14434_s22 }
  0x6d   : > { %870 = vrot.lane.b32.xlu0 %v14961_v29, %s14434_s22 }
  0x70   : > { %872 = vrot.lane.b32.xlu1 %v14968_v35, %s14434_s22 }
  0x71   : > { %874 = vrot.lane.b32.xlu0 %v14971_v37, %s14434_s22 }
  0x74   : > { %876 = vrot.lane.b32.xlu1 %v14978_v11, %s14434_s22 }
  0x75   : > { %878 = vrot.lane.b32.xlu0 %v14981_v48, %s14434_s22 }
  0x78   : > { %880 = vrot.lane.b32.xlu1 %v14988_v49, %s14434_s22 }
  0x79   : > { %882 = vrot.lane.b32.xlu0 %v14991_v2, %s14434_s22 }
  0x7c   : > { %884 = vrot.lane.b32.xlu1 %v14998_v10, %s14434_s22 }
  0x7d   : > { %886 = vrot.lane.b32.xlu0 %v15003_v55, %s14434_s22 }
  0x80   : > { %888 = vrot.lane.b32.xlu1 %v15011_v38, %s14434_s22 }
  0x81   : > { %894 = vrot.lane.b32.xlu0 %v15008_v33, %s14434_s22 }
  0x84   : > { %890 = vrot.lane.b32.xlu1 %v15021_v46, %s14434_s22 }
  0x85   : > { %892 = vrot.lane.b32.xlu0 %v15018_v61, %s14434_s22 }
  0x97   : > { %v815_v63 = vpop.permute.xlu0 %814 }
  0x98   : > { %v947_v3 = vsel %vm896_vm5, %v15032_v42, %v815_v63  ;;  %v817_v13 = vpop.permute.xlu1 %816 }
  0x99   : > { %1357 = vmatprep.mubr.bf16.mxu0 %v947_v3  ;;  %v951_v30 = vsel %vm896_vm5, %v770_v43, %v817_v13 }
  0x9b   : > { %v701_v21 = vpop.permute.xlu0 %700 }
  0x9c   : > { %v15042_v5 = vsel %vm896_vm5, %v14522_v4, %v701_v21  ;;  %v14100_v21 = vld [vmem:[%s20450_s1 + $0x88] sm:$0xff]  }
  0x9d   : > { %1358 = vmatmul.mubr.bf16.vlgmr.msra.gmra.mrb[0].mxu0 %v15042_v5 }
  0x9e   : > { %13741 = vmatpush3.bf16.msra.mxu0 %v14730_v53  ;;  %v703_v59 = vpop.permute.xlu1 %702  ;;  %1365 = vmatprep.mubr.bf16.mxu0 %v951_v30 }
  0x9f   : > { %v819_v18 = vpop.permute.xlu0 %818  ;;  %13742 = vmatprep.subr.bf16.mxu0 %v14096_v54  ;;  %v901_v4 = vsel %vm896_vm5, %v14578_v56, %v703_v59  ;;  %v14102_v59 = vld [vmem:[%s20450_s1 + $0x90] sm:$0xff]  }
  0xa0   : > { %v955_v12 = vsel %vm896_vm5, %v14948_v16, %v819_v18 }
  0xa2   : > { %v705_v51 = vpop.permute.xlu1 %704  ;;  %13743 = vmatpush3.bf16.msra.mxu0 %v14096_v54 }
  0xa3   : > { %v821_v8 = vpop.permute.xlu0 %820  ;;  %13744 = vmatprep.subr.bf16.mxu0 %v14106_v27  ;;  %v15058_v15 = vsel %vm896_vm5, %v14589_v60, %v705_v51 }
  0xa4   : > { %v959_v56 = vsel %vm896_vm5, %v14951_v45, %v821_v8 }
  0xa5   : > { %1366 = vmatmul.mubr.bf16.gmra.mrb[4].mxu0 %v901_v4 }
  0xa6   : > { %v707_v53 = vpop.permute.xlu1 %706  ;;  %1373 = vmatprep.mubr.bf16.mxu0 %v955_v12  ;;  %13745 = vmatpush3.bf16.msra.mxu0 %v14106_v27 }
  0xa7   : > { %v823_v62 = vpop.permute.xlu0 %822  ;;  %13746 = vmatprep.subr.bf16.mxu0 %v14114_v36  ;;  %v15065_v41 = vsel %vm896_vm5, %v14597_v1, %v707_v53  ;;  %v14099_v1 = vld [vmem:[%s20450_s1 + $0xc8] sm:$0xff]   ;;  %v14104_v53 = vld [vmem:[%s20450_s1 + $0x98] sm:$0xff]  }
  0xa8   : > { %v963_v60 = vsel %vm896_vm5, %v14958_v25, %v823_v62 }
  0xaa   : > { %v709_v57 = vpop.permute.xlu1 %708  ;;  %13747 = vmatpush3.bf16.msra.mxu0 %v14114_v36  ;;  %v14103_v36 = vld [vmem:[%s20450_s1 + $0xd8] sm:$0xff]  }
  0xab   : > { %v825_v7 = vpop.permute.xlu0 %824  ;;  %v15082_v3 = vsel %vm896_vm5, %v14606_v9, %v709_v57  ;;  %v14101_v9 = vld [vmem:[%s20450_s1 + $0xd0] sm:$0xff]   ;;  %v14105_v57 = vld [vmem:[%s20450_s1 + $0xe0] sm:$0xff]  }
  0xac   : > { %v967_v30 = vsel %vm896_vm5, %v14961_v29, %v825_v7  ;;  %v14107_v7 = vld [vmem:[%s20450_s1 + $0xa0] sm:$0xff]  }
  0xad   : > { %1374 = vmatmul.mubr.bf16.gmra.mrb[8].mxu0 %v15058_v15 }
  0xae   : > { %v711_v14 = vpop.permute.xlu1 %710  ;;  %1381 = vmatprep.mubr.bf16.mxu0 %v959_v56 }
  0xaf   : > { %v827_v31 = vpop.permute.xlu0 %826  ;;  %v15112_v4 = vsel %vm896_vm5, %v14648_v39, %v711_v14  ;;  %v14108_v14 = vld [vmem:[%s20450_s1 + $0xe8] sm:$0xff]  }
  0xb0   : > { %v971_v62 = vsel %vm896_vm5, %v14968_v35, %v827_v31 }
  0xb2   : > { %v713_v47 = vpop.permute.xlu1 %712 }
  0xb3   : > { %v829_v43 = vpop.permute.xlu0 %828 }
  0xb5   : > { %1382 = vmatmul.mubr.bf16.gmra.mrb[12].mxu0 %v15065_v41 }
  0xb6   : > { %v15070_v24 = vpop.permute.xlu1 %714  ;;  %1389 = vmatprep.mubr.bf16.mxu0 %v963_v60  ;;  %v916_v60 = vsel %vm896_vm5, %v14678_v58, %v713_v47  ;;  %v14111_v47 = vld [vmem:[%s20450_s1 + $0xb0] sm:$0xff]  }
  0xb7   : > { %v839_v40 = vpop.permute.xlu0 %838 }
  0xb8   : > { %v995_v50 = vsel %vm896_vm5, %v14998_v10, %v839_v40 }
  0xb9   : > { %1453 = vmatprep.mubr.bf16.mxu1 %v995_v50  ;;  %v14109_v50 = vld [vmem:[%s20450_s1 + $0xa8] sm:$0xff]  }
  0xba   : > { %v725_v63 = vpop.permute.xlu1 %724 }
  0xbb   : > { %v15086_v13 = vsel %vm896_vm5, %v14763_v23, %v725_v63  ;;  %v15088_v54 = vpop.permute.xlu0 %830  ;;  %v14110_v63 = vld [vmem:[%s20450_s1 + $0xf0] sm:$0xff]  }
  0xbc   : > { %1454 = vmatmul.mubr.bf16.vlgmr.msra.gmra.mrb[0].mxu1 %v15086_v13 }
  0xbd   : > { %1390 = vmatmul.mubr.bf16.gmra.mrb[16].mxu0 %v15082_v3  ;;  %12145 = vmatpush3.bf16.msra.mxu1 %v14098_v0 }
  0xbe   : > { %v15100_v23 = vpop.permute.xlu1 %716  ;;  %12146 = vmatprep.subr.bf16.mxu1 %v14099_v1  ;;  %1397 = vmatprep.mubr.bf16.mxu0 %v967_v30  ;;  %v975_v1 = vsel %vm896_vm5, %v14971_v37, %v829_v43  ;;  %v14112_v43 = vld [vmem:[%s20450_s1 + $0xf8] sm:$0xff]  }
  0xbf   : > { %v841_v27 = vpop.permute.xlu0 %840 }
  0xc0   : > { %v999_v18 = vsel %vm896_vm5, %v15003_v55, %v841_v27 }
  0xc1   : > { %12147 = vmatpush3.bf16.msra.mxu1 %v14100_v21  ;;  %1461 = vmatprep.mubr.bf16.mxu1 %v999_v18  ;;  %v14113_v18 = vld [vmem:[%s20450_s1 + $0xb8] sm:$0xff]  }
  0xc2   : > { %v727_v51 = vpop.permute.xlu1 %726  ;;  %12148 = vmatprep.subr.bf16.mxu1 %v14101_v9  ;;  %v919_v9 = vsel %vm896_vm5, %v14704_v20, %v15070_v24 }
  0xc3   : > { %v15116_v8 = vsel %vm896_vm5, %v14758_v17, %v727_v51  ;;  %v833_v12 = vpop.permute.xlu0 %832  ;;  %v922_v51 = vsel %vm896_vm5, %v14742_v6, %v15100_v23  ;;  %v20524_v23 = vld [vmem:[#allocation12_spill] sm:$0xff] }
  0xc4   : > { %1462 = vmatmul.mubr.bf16.gmra.mrb[4].mxu1 %v15116_v8 }
  0xc5   : > { %1398 = vmatmul.mubr.bf16.gmra.mrb[20].mxu0 %v15112_v4  ;;  %12149 = vmatpush3.bf16.msra.mxu1 %v14102_v59 }
  0xc6   : > { %v719_v39 = vpop.permute.xlu1 %718  ;;  %12150 = vmatprep.subr.bf16.mxu1 %v14103_v36  ;;  %1405 = vmatprep.mubr.bf16.mxu0 %v971_v62  ;;  %v979_v36 = vsel %vm896_vm5, %v14978_v11, %v15088_v54 }
  0xc7   : > { %v843_v17 = vpop.permute.xlu0 %842  ;;  %v925_v62 = vsel %vm896_vm5, %v14787_v44, %v719_v39  ;;  %v20526_v39 = vld [vmem:[#allocation15_spill] sm:$0xff] }
  0xc8   : > { %v1003_v56 = vsel %vm896_vm5, %v15011_v38, %v843_v17 }
  0xc9   : > { %12151 = vmatpush3.bf16.msra.mxu1 %v14104_v53  ;;  %1469 = vmatprep.mubr.bf16.mxu1 %v1003_v56  ;;  %v983_v53 = vsel %vm896_vm5, %v14981_v48, %v833_v12 }
  0xca   : > { %v729_v31 = vpop.permute.xlu1 %728  ;;  %12152 = vmatprep.subr.bf16.mxu1 %v14105_v57  ;;  %v20525_v57 = vld [vmem:[#allocation6_spill] sm:$0xff] }
  0xcb   : > { %v15140_v40 = vsel %vm896_vm5, %v14807_v22, %v729_v31  ;;  %v835_v0 = vpop.permute.xlu0 %834 }
  0xcc   : > { %1470 = vmatmul.mubr.bf16.gmra.mrb[8].mxu1 %v15140_v40 }
  0xcd   : > { %1406 = vmatmul.mubr.bf16.gmra.mrb[24].mxu0 %v916_v60  ;;  %12153 = vmatpush3.bf16.msra.mxu1 %v14107_v7  ;;  %v20527_v7 = vld [vmem:[#allocation7_spill] sm:$0xff] }
  0xce   : > { %v721_v58 = vpop.permute.xlu1 %720  ;;  %12154 = vmatprep.subr.bf16.mxu1 %v14108_v14  ;;  %1413 = vmatprep.mubr.bf16.mxu0 %v975_v1  ;;  %v20528_v14 = vld [vmem:[#allocation8_spill] sm:$0xff] }
  0xcf   : > { %v845_v22 = vpop.permute.xlu0 %844  ;;  %v928_v12 = vsel %vm896_vm5, %v20524_v23, %v721_v58  ;;  %v20535_v58 = vld [vmem:[#allocation16_spill] sm:$0xff] }
  0xd0   : > { %v1007_v21 = vsel %vm896_vm5, %v15021_v46, %v845_v22 }
  0xd1   : > { %12155 = vmatpush3.bf16.msra.mxu1 %v14109_v50  ;;  %1477 = vmatprep.mubr.bf16.mxu1 %v1007_v21 }
  0xd2   : > { %v731_v30 = vpop.permute.xlu1 %730  ;;  %12156 = vmatprep.subr.bf16.mxu1 %v14110_v63 }
  0xd3   : > { %v15164_v27 = vsel %vm896_vm5, %v14849_v28, %v731_v30  ;;  %v837_v59 = vpop.permute.xlu0 %836 }
  0xd4   : > { %1478 = vmatmul.mubr.bf16.gmra.mrb[12].mxu1 %v15164_v27 }
  0xd5   : > { %1414 = vmatmul.mubr.bf16.gmra.mrb[28].mxu0 %v919_v9  ;;  %12157 = vmatpush3.bf16.msra.mxu1 %v14111_v47  ;;  %v20536_v47 = vld [vmem:[#allocation18_spill] sm:$0xff] }
  0xd6   : > { %1518 = vmatprep.mubr.bf16.mxu1 %v15058_v15  ;;  %12158 = vmatprep.subr.bf16.mxu1 %v14112_v43  ;;  %v723_v28 = vpop.permute.xlu1 %722 }
  0xd7   : > { %v863_v20 = vpop.permute.xlu0 %862  ;;  %1421 = vmatprep.mubr.bf16.mxu0 %v979_v36  ;;  %v931_v17 = vsel %vm896_vm5, %v20526_v39, %v723_v28 }
  0xd8   : > { %v1011_v24 = vsel %vm896_vm5, %v14625_v26, %v863_v20  ;;  %v987_v26 = vsel %vm896_vm5, %v14988_v49, %v835_v0 }
  0xd9   : > { %12159 = vmatpush3.bf16.msra.mxu1 %v14113_v18 }
  0xda   : > { %v865_v15 = vpop.permute.xlu1 %864 }
  0xdb   : > { %v1015_v54 = vsel %vm896_vm5, %v14636_v34, %v865_v15  ;;  %v867_v6 = vpop.permute.xlu0 %866  ;;  %v991_v34 = vsel %vm896_vm5, %v14991_v2, %v837_v59  ;;  %v14118_v59 = vld [vmem:[%s20451_s2 + $0x8] sm:$0xff]  }
  0xdc   : > { %1519 = vmatmul.mubr.bf16.vlgmr.msra.gmra.mrb[16].mxu1 %v1011_v24 }
  0xdd   : > { %1422 = vmatmul.mubr.bf16.gmra.mrb[32].mxu0 %v922_v51  ;;  %1526 = vmatprep.mubr.bf16.mxu1 %v15065_v41  ;;  %v1019_v41 = vsel %vm896_vm5, %v14664_v52, %v867_v6 }
  0xde   : > { %1429 = vmatprep.mubr.bf16.mxu0 %v983_v53  ;;  %v869_v44 = vpop.permute.xlu1 %868  ;;  %v14119_v53 = vld [vmem:[%s20451_s2 + $0x50] sm:$0xff]  }
  0xdf   : > { %v871_v52 = vpop.permute.xlu0 %870 }
  0xe0   : > { %v1027_v56 = vsel %vm896_vm5, %v20527_v7, %v871_v52  ;;  %v14121_v52 = vld [vmem:[%s20451_s2 + $0x58] sm:$0xff]  }
  0xe4   : > { %1527 = vmatmul.mubr.bf16.gmra.mrb[20].mxu1 %v1015_v54 }
  0xe5   : > { %1430 = vmatmul.mubr.bf16.gmra.mrb[36].mxu0 %v925_v62  ;;  %1534 = vmatprep.mubr.bf16.mxu1 %v15082_v3  ;;  %v1023_v3 = vsel %vm896_vm5, %v20525_v57, %v869_v44 }
  0xe6   : > { %1437 = vmatprep.mubr.bf16.mxu0 %v987_v26 }
  0xec   : > { %1535 = vmatmul.mubr.bf16.gmra.mrb[24].mxu1 %v1019_v41  ;;  %v14120_v41 = vld [vmem:[%s20451_s2 + $0x10] sm:$0xff]  }
  0xed   : > { %1438 = vmatmul.mubr.bf16.gmra.mrb[40].mxu0 %v928_v12  ;;  %1542 = vmatprep.mubr.bf16.mxu1 %v15112_v4  ;;  %v873_v4 = vpop.permute.xlu1 %872 }
  0xee   : > { %1445 = vmatprep.mubr.bf16.mxu0 %v991_v34  ;;  %v1031_v31 = vsel %vm896_vm5, %v20528_v14, %v873_v4 }
  0xf4   : > { %1543 = vmatmul.mubr.bf16.gmra.mrb[28].mxu1 %v1023_v3 }
  0xf5   : > { %1446 = vmatmul.mubr.bf16.gmra.mrb[44].mxu0 %v931_v17  ;;  %1550 = vmatprep.mubr.bf16.mxu1 %v916_v60  ;;  %v20529_v60 = vld [vmem:[#allocation9_spill] sm:$0xff] }
  0xf6   : > { %13748 = vmatprep.mubr.msk.bf16.mxu0 %vm896_vm5, %v14948_v16  ;;  %v875_v16 = vpop.permute.xlu0 %874 }
  0xf7   : > { %v1035_v0 = vsel %vm896_vm5, %v20529_v60, %v875_v16  ;;  %v14122_v16 = vld [vmem:[%s20451_s2 + $0x18] sm:$0xff]  }
  0xfc   : > { %1551 = vmatmul.mubr.bf16.gmra.mrb[32].mxu1 %v1027_v56 }
  0xfd   : > { %1558 = vmatprep.mubr.bf16.mxu1 %v919_v9  ;;  %13749 = vmatmul.mubr.msk.bf16.vlgmr.msra.gmra.mrb[48].mxu0 %vm896_vm5, %v14951_v45  ;;  %v877_v45 = vpop.permute.xlu1 %876  ;;  %v14115_v9 = vld [vmem:[%s20451_s2 + $0x40] sm:$0xff]  }
  0xfe   : > { %13752 = vmatprep.mubr.msk.bf16.mxu0 %vm896_vm5, %v14958_v25  ;;  %v20530_v25 = vld [vmem:[#allocation11_spill] sm:$0xff]  ;;  %12276 = vmatprep.subr.bf16.mxu1 %v14115_v9 }
  0xff   : > { %v1039_v50 = vsel %vm896_vm5, %v20530_v25, %v877_v45 }
 0x104   : > { %1559 = vmatmul.mubr.bf16.gmra.mrb[36].mxu1 %v1031_v31 }
 0x105   : > { %1566 = vmatprep.mubr.bf16.mxu1 %v922_v51  ;;  %13753 = vmatmul.mubr.msk.bf16.gmra.mrb[52].mxu0 %vm896_vm5, %v14961_v29  ;;  %v879_v29 = vpop.permute.xlu0 %878 }
 0x106   : > { %13756 = vmatprep.mubr.msk.bf16.mxu0 %vm896_vm5, %v14968_v35  ;;  %v20531_v35 = vld [vmem:[#allocation14_spill] sm:$0xff] }
 0x107   : > { %v1043_v1 = vsel %vm896_vm5, %v20531_v35, %v879_v29 }
 0x10c   : > { %1567 = vmatmul.mubr.bf16.gmra.mrb[40].mxu1 %v1035_v0 }
 0x10d   : > { %1574 = vmatprep.mubr.bf16.mxu1 %v925_v62  ;;  %13757 = vmatmul.mubr.msk.bf16.gmra.mrb[56].mxu0 %vm896_vm5, %v14971_v37  ;;  %v881_v37 = vpop.permute.xlu1 %880 }
 0x10e   : > { %13760 = vmatprep.mubr.msk.bf16.mxu0 %vm896_vm5, %v14978_v11  ;;  %v20532_v11 = vld [vmem:[#allocation17_spill] sm:$0xff] }
 0x10f   : > { %v1047_v63 = vsel %vm896_vm5, %v20532_v11, %v881_v37 }
 0x114   : > { %1575 = vmatmul.mubr.bf16.gmra.mrb[44].mxu1 %v1039_v50 }
 0x115   : > { %1582 = vmatprep.mubr.bf16.mxu1 %v928_v12  ;;  %13761 = vmatmul.mubr.msk.bf16.gmra.mrb[60].mxu0 %vm896_vm5, %v14981_v48  ;;  %v883_v48 = vpop.permute.xlu0 %882 }
 0x116   : > { %13764 = vmatprep.mubr.msk.bf16.mxu0 %vm896_vm5, %v14988_v49  ;;  %v1051_v49 = vsel %vm896_vm5, %v14940_v32, %v883_v48 }
 0x119   : > { %v887_v32 = vpop.permute.xlu0 %886 }
 0x11c   : > { %1583 = vmatmul.mubr.bf16.gmra.mrb[48].mxu1 %v1043_v1 }
 0x11d   : > { %1590 = vmatprep.mubr.bf16.mxu1 %v931_v17  ;;  %13765 = vmatmul.mubr.msk.bf16.gmra.mrb[64].mxu0 %vm896_vm5, %v14991_v2  ;;  %v885_v2 = vpop.permute.xlu1 %884 }
 0x11e   : > { %13768 = vmatprep.mubr.msk.bf16.mxu0 %vm896_vm5, %v14998_v10  ;;  %v20533_v10 = vld [vmem:[#allocation10_spill] sm:$0xff] }
 0x124   : > { %1591 = vmatmul.mubr.bf16.gmra.mrb[52].mxu1 %v1047_v63 }
 0x125   : > { %1598 = vmatprep.mubr.bf16.mxu1 %v15086_v13  ;;  %13769 = vmatmul.mubr.msk.bf16.gmra.mrb[68].mxu0 %vm896_vm5, %v15003_v55  ;;  %v1055_v55 = vsel %vm896_vm5, %v20533_v10, %v885_v2 }
 0x126   : > { %13772 = vmatprep.mubr.msk.bf16.mxu0 %vm896_vm5, %v15011_v38  ;;  %v20534_v38 = vld [vmem:[#allocation13_spill] sm:$0xff] }
 0x127   : > { %v1059_v13 = vsel %vm896_vm5, %v20534_v38, %v887_v32 }
 0x12c   : > { %1599 = vmatmul.mubr.bf16.gmra.mrb[56].mxu1 %v1051_v49  ;;  %v14123_v49 = vld [vmem:[%s20451_s2 + $0x60] sm:$0xff]  }
 0x12d   : > { %1606 = vmatprep.mubr.bf16.mxu1 %v15116_v8  ;;  %13773 = vmatmul.mubr.msk.bf16.gmra.mrb[72].mxu0 %vm896_vm5, %v15021_v46  ;;  %v889_v46 = vpop.permute.xlu1 %888  ;;  %v895_v8 = vpop.permute.xlu0 %894 }
 0x12e   : > { %13776 = vmatprep.mubr.msk.bf16.mxu0 %vm896_vm5, %v15018_v61  ;;  %v1063_v61 = vsel %vm896_vm5, %v20535_v58, %v889_v46  ;;  %v1074_v22 = vsel %vm896_vm5, %v14892_v19, %v895_v8  ;;  %v14116_v19 = vld [vmem:[%s20451_s2] sm:$0xff]  }
 0x12f   : > { %12277 = vmatpush3.bf16.msra.mxu1 %v14116_v19 }
 0x131   : > { %v893_v43 = vpop.permute.xlu0 %892 }
 0x132   : > { %v1071_v30 = vsel %vm896_vm5, %v15008_v33, %v893_v43 }
 0x134   : > { %1607 = vmatmul.mubr.bf16.gmra.mrb[60].mxu1 %v1055_v55 }
 0x135   : > { %1614 = vmatprep.mubr.bf16.mxu1 %v15140_v40  ;;  %13777 = vmatmul.mubr.msk.bf16.gmra.mrb[76].mxu0 %vm896_vm5, %v15032_v42  ;;  %v891_v40 = vpop.permute.xlu1 %890 }
 0x136   : > { %v1067_v21 = vsel %vm896_vm5, %v20536_v47, %v891_v40  ;;  %v14124_v47 = vld [vmem:[%s20451_s2 + $0x20] sm:$0xff]  }
 0x13c   : > { %1615 = vmatmul.mubr.bf16.gmra.mrb[64].mxu1 %v1059_v13 }
 0x13d   : > { %1622 = vmatprep.mubr.bf16.mxu1 %v15164_v27  ;;  %v14117_v27 = vld [vmem:[%s20451_s2 + $0x48] sm:$0xff]  }
 0x13e   : > { %12278 = vmatprep.subr.bf16.mxu1 %v14117_v27 }
 0x13f   : > { %12279 = vmatpush3.bf16.msra.mxu1 %v14118_v59 }
 0x140   : > { %12280 = vmatprep.subr.bf16.mxu1 %v14119_v53  ;;  %v14125_v53 = vld [vmem:[%s20451_s2 + $0x68] sm:$0xff]  }
 0x143   : > { %12281 = vmatpush3.bf16.msra.mxu1 %v14120_v41 }
 0x144   : > { %1623 = vmatmul.mubr.bf16.gmra.mrb[68].mxu1 %v1063_v61  ;;  %12282 = vmatprep.subr.bf16.mxu1 %v14121_v52 }
 0x145   : > { %1630 = vmatprep.mubr.bf16.mxu1 %v1074_v22 }
 0x147   : > { %12283 = vmatpush3.bf16.msra.mxu1 %v14122_v16 }
 0x148   : > { %12284 = vmatprep.subr.bf16.mxu1 %v14123_v49 }
 0x14b   : > { %12285 = vmatpush3.bf16.msra.mxu1 %v14124_v47 }
 0x14c   : > { %1631 = vmatmul.mubr.bf16.gmra.mrb[72].mxu1 %v1067_v21  ;;  %12286 = vmatprep.subr.bf16.mxu1 %v14125_v53 }
 0x14d   : > { %1638 = vmatprep.mubr.bf16.mxu1 %v15042_v5 }
 0x154   : > { %1639 = vmatmul.mubr.bf16.gmra.mrb[76].mxu1 %v1071_v30 }
 0x170   : > { %v12048_v33 = vpop.f32.mrb[0].mxu0 }
 0x171   : > { %v12049_v18 = vpop.f32.mrb[1].mxu0 }
 0x172   : > { %v15275_v36 = vadd.f32 %v12049_v18, %v12048_v33  ;;  %v12051_v20 = vpop.f32.mrb[2].mxu0 }
 0x173   : > { %v12052_v28 = vpop.f32.mrb[3].mxu0 }
 0x174   : > { %v15277_v24 = vadd.f32 %v12052_v28, %v12051_v20 }
 0x178   : > { %v12054_v51 = vpop.f32.mrb[4].mxu0 }
 0x179   : > { %v12055_v15 = vpop.f32.mrb[5].mxu0 }
 0x17a   : > { %v15282_v54 = vadd.f32 %v12055_v15, %v12054_v51  ;;  %v12057_v62 = vpop.f32.mrb[6].mxu0 }
 0x17b   : > { %v12058_v26 = vpop.f32.mrb[7].mxu0 }
 0x17c   : > { %v15284_v6 = vadd.f32 %v12058_v26, %v12057_v62 }
 0x180   : > { %v12060_v23 = vpop.f32.mrb[8].mxu0 }
 0x181   : > { %v12061_v12 = vpop.f32.mrb[9].mxu0 }
 0x182   : > { %v15289_v34 = vadd.f32 %v12061_v12, %v12060_v23  ;;  %v12063_v44 = vpop.f32.mrb[10].mxu0 }
 0x183   : > { %v12064_v57 = vpop.f32.mrb[11].mxu0 }
 0x184   : > { %v15291_v3 = vadd.f32 %v12064_v57, %v12063_v44 }
 0x188   : > { %v12066_v39 = vpop.f32.mrb[12].mxu0 }
 0x189   : > { %v12067_v17 = vpop.f32.mrb[13].mxu0 }
 0x18a   : > { %v15296_v7 = vadd.f32 %v12067_v17, %v12066_v39  ;;  %v12069_v56 = vpop.f32.mrb[14].mxu0 }
 0x18b   : > { %v12070_v4 = vpop.f32.mrb[15].mxu0 }
 0x18c   : > { %v15298_v14 = vadd.f32 %v12070_v4, %v12069_v56  ;;  %v14126_v4 = vld [vmem:[%s20451_s2 + $0x28] sm:$0xff]  }
 0x18d   : > { %12287 = vmatpush3.bf16.msra.mxu1 %v14126_v4 }
 0x18f   : > { %v12120_v31 = vpop.f32.mrb[0].mxu1 }
 0x190   : > { %v12072_v60 = vpop.f32.mrb[16].mxu0  ;;  %v12121_v0 = vpop.f32.mrb[1].mxu1 }
 0x191   : > { %v12073_v45 = vpop.f32.mrb[17].mxu0  ;;  %v15303_v25 = vadd.f32 %v12121_v0, %v12120_v31  ;;  %v12123_v50 = vpop.f32.mrb[2].mxu1 }
 0x192   : > { %v15305_v29 = vadd.f32 %v12073_v45, %v12072_v60  ;;  %v12075_v35 = vpop.f32.mrb[18].mxu0  ;;  %v12124_v1 = vpop.f32.mrb[3].mxu1 }
 0x193   : > { %v12076_v37 = vpop.f32.mrb[19].mxu0  ;;  %v15307_v11 = vadd.f32 %v12124_v1, %v12123_v50 }
 0x194   : > { %v15309_v63 = vadd.f32 %v12076_v37, %v12075_v35 }
 0x197   : > { %v12126_v48 = vpop.f32.mrb[4].mxu1 }
 0x198   : > { %v12078_v2 = vpop.f32.mrb[20].mxu0  ;;  %v12127_v10 = vpop.f32.mrb[5].mxu1 }
 0x199   : > { %v12079_v55 = vpop.f32.mrb[21].mxu0  ;;  %v15314_v32 = vadd.f32 %v12127_v10, %v12126_v48  ;;  %v12129_v38 = vpop.f32.mrb[6].mxu1  ;;  %v14127_v10 = vld [vmem:[%s20451_s2 + $0x70] sm:$0xff]  }
 0x19a   : > { %v15316_v13 = vadd.f32 %v12079_v55, %v12078_v2  ;;  %v12081_v46 = vpop.f32.mrb[22].mxu0  ;;  %v12130_v8 = vpop.f32.mrb[7].mxu1  ;;  %v14128_v55 = vld [vmem:[%s20451_s2 + $0x30] sm:$0xff]   ;;  %12288 = vmatprep.subr.bf16.mxu1 %v14127_v10 }
 0x19b   : > { %v12082_v58 = vpop.f32.mrb[23].mxu0  ;;  %v15318_v61 = vadd.f32 %v12130_v8, %v12129_v38  ;;  %12289 = vmatpush3.bf16.msra.mxu1 %v14128_v55 }
 0x19c   : > { %v15320_v22 = vadd.f32 %v12082_v58, %v12081_v46 }
 0x19f   : > { %v12132_v40 = vpop.f32.mrb[8].mxu1 }
 0x1a0   : > { %v12084_v21 = vpop.f32.mrb[24].mxu0  ;;  %v12133_v43 = vpop.f32.mrb[9].mxu1 }
 0x1a1   : > { %v12085_v30 = vpop.f32.mrb[25].mxu0  ;;  %v15325_v9 = vadd.f32 %v12133_v43, %v12132_v40  ;;  %v12135_v19 = vpop.f32.mrb[10].mxu1 }
 0x1a2   : > { %v15327_v27 = vadd.f32 %v12085_v30, %v12084_v21  ;;  %v12087_v59 = vpop.f32.mrb[26].mxu0  ;;  %v12136_v33 = vpop.f32.mrb[11].mxu1 }
 0x1a3   : > { %v12088_v18 = vpop.f32.mrb[27].mxu0  ;;  %v15329_v20 = vadd.f32 %v12136_v33, %v12135_v19 }
 0x1a4   : > { %v15331_v28 = vadd.f32 %v12088_v18, %v12087_v59 }
 0x1a7   : > { %v12138_v51 = vpop.f32.mrb[12].mxu1 }
 0x1a8   : > { %v12090_v15 = vpop.f32.mrb[28].mxu0  ;;  %v12139_v62 = vpop.f32.mrb[13].mxu1 }
 0x1a9   : > { %v12091_v26 = vpop.f32.mrb[29].mxu0  ;;  %v15336_v41 = vadd.f32 %v12139_v62, %v12138_v51  ;;  %v12141_v23 = vpop.f32.mrb[14].mxu1 }
 0x1aa   : > { %v15338_v12 = vadd.f32 %v12091_v26, %v12090_v15  ;;  %v12093_v44 = vpop.f32.mrb[30].mxu0  ;;  %v12142_v57 = vpop.f32.mrb[15].mxu1 }
 0x1ab   : > { %v12094_v39 = vpop.f32.mrb[31].mxu0  ;;  %v15340_v17 = vadd.f32 %v12142_v57, %v12141_v23 }
 0x1ac   : > { %v15342_v52 = vadd.f32 %v12094_v39, %v12093_v44 }
 0x1af   : > { %v12160_v56 = vpop.f32.mrb[16].mxu1 }
 0x1b0   : > { %v12096_v31 = vpop.f32.mrb[32].mxu0  ;;  %v12161_v16 = vpop.f32.mrb[17].mxu1 }
 0x1b1   : > { %v12162_v60 = vadd.f32 %v12161_v16, %v12160_v56  ;;  %v12097_v0 = vpop.f32.mrb[33].mxu0  ;;  %v12163_v45 = vpop.f32.mrb[18].mxu1 }
 0x1b2   : > { %v15347_v50 = vadd.f32 %v12097_v0, %v12096_v31  ;;  %v12099_v35 = vpop.f32.mrb[34].mxu0  ;;  %v12164_v1 = vpop.f32.mrb[19].mxu1 }
 0x1b3   : > { %v12165_v37 = vadd.f32 %v12164_v1, %v12163_v45  ;;  %v12100_v48 = vpop.f32.mrb[35].mxu0  ;;  %v1521_v49 = vadd.f32 %v12162_v60, %v15275_v36 }
 0x1b4   : > { %v15350_v2 = vadd.f32 %v12100_v48, %v12099_v35 }
 0x1b5   : > { %v15359_v38 = vadd.f32 %v12165_v37, %v15277_v24 }
 0x1b7   : > { %v12166_v46 = vpop.f32.mrb[20].mxu1 }
 0x1b8   : > { %v12102_v8 = vpop.f32.mrb[36].mxu0  ;;  %v12167_v58 = vpop.f32.mrb[21].mxu1 }
 0x1b9   : > { %v12168_v40 = vadd.f32 %v12167_v58, %v12166_v46  ;;  %v12103_v36 = vpop.f32.mrb[37].mxu0  ;;  %v12169_v47 = vpop.f32.mrb[22].mxu1 }
 0x1ba   : > { %v15361_v21 = vadd.f32 %v12103_v36, %v12102_v8  ;;  %v12105_v43 = vpop.f32.mrb[38].mxu0  ;;  %v12170_v30 = vpop.f32.mrb[23].mxu1 }
 0x1bb   : > { %v12171_v19 = vadd.f32 %v12170_v30, %v12169_v47  ;;  %v12106_v59 = vpop.f32.mrb[39].mxu0  ;;  %v1529_v33 = vadd.f32 %v12168_v40, %v15282_v54  ;;  %v14129_v54 = vld [vmem:[%s20451_s2 + $0x78] sm:$0xff]  }
 0x1bc   : > { %v15364_v18 = vadd.f32 %v12106_v59, %v12105_v43  ;;  %12290 = vmatprep.subr.bf16.mxu1 %v14129_v54 }
 0x1bd   : > { %v1532_v24 = vadd.f32 %v12171_v19, %v15284_v6  ;;  %v14130_v6 = vld [vmem:[%s20451_s2 + $0x38] sm:$0xff]  }
 0x1be   : > { %12291 = vmatpush3.bf16.msra.mxu1 %v14130_v6 }
 0x1bf   : > { %v12172_v51 = vpop.f32.mrb[24].mxu1 }
 0x1c0   : > { %v12108_v53 = vpop.f32.mrb[40].mxu0  ;;  %v12173_v15 = vpop.f32.mrb[25].mxu1 }
 0x1c1   : > { %v12174_v62 = vadd.f32 %v12173_v15, %v12172_v51  ;;  %v12109_v26 = vpop.f32.mrb[41].mxu0  ;;  %v12175_v23 = vpop.f32.mrb[26].mxu1 }
 0x1c2   : > { %v15367_v44 = vadd.f32 %v12109_v26, %v12108_v53  ;;  %v12111_v57 = vpop.f32.mrb[42].mxu0  ;;  %v12176_v39 = vpop.f32.mrb[27].mxu1 }
 0x1c3   : > { %v12177_v56 = vadd.f32 %v12176_v39, %v12175_v23  ;;  %v12112_v4 = vpop.f32.mrb[43].mxu0  ;;  %v1537_v31 = vadd.f32 %v12174_v62, %v15289_v34 }
 0x1c4   : > { %v15370_v16 = vadd.f32 %v12112_v4, %v12111_v57 }
 0x1c5   : > { %v1540_v60 = vadd.f32 %v12177_v56, %v15291_v3 }
 0x1c7   : > { %v12178_v0 = vpop.f32.mrb[28].mxu1 }
 0x1c8   : > { %v12114_v45 = vpop.f32.mrb[44].mxu0  ;;  %v12179_v35 = vpop.f32.mrb[29].mxu1 }
 0x1c9   : > { %v12180_v1 = vadd.f32 %v12179_v35, %v12178_v0  ;;  %v12115_v37 = vpop.f32.mrb[45].mxu0  ;;  %v12181_v34 = vpop.f32.mrb[30].mxu1 }
 0x1ca   : > { %v15379_v48 = vadd.f32 %v12115_v37, %v12114_v45  ;;  %v12117_v10 = vpop.f32.mrb[46].mxu0  ;;  %v12182_v55 = vpop.f32.mrb[31].mxu1 }
 0x1cb   : > { %v12183_v46 = vadd.f32 %v12182_v55, %v12181_v34  ;;  %v12118_v8 = vpop.f32.mrb[47].mxu0  ;;  %v1545_v58 = vadd.f32 %v12180_v1, %v15296_v7 }
 0x1cc   : > { %v15382_v40 = vadd.f32 %v12118_v8, %v12117_v10 }
 0x1cd   : > { %v1548_v3 = vadd.f32 %v12183_v46, %v15298_v14 }
 0x1cf   : > { %v12184_v36 = vpop.f32.mrb[32].mxu1 }
 0x1d0   : > { %v12185_v47 = vpop.f32.mrb[33].mxu1  ;;  %v13750_v43 = vpop.f32.mrb[48].mxu0 }
 0x1d1   : > { %v12186_v30 = vadd.f32 %v12185_v47, %v12184_v36  ;;  %v1690_v19 = vadd.f32 %v13750_v43, %v1529_v33  ;;  %v12187_v59 = vpop.f32.mrb[34].mxu1  ;;  %v1681_v51 = vpop.f32.mrb[49].mxu0  ;;  %v14131_v33 = vld [vmem:[%s20451_s2 + $0x100] sm:$0xff]  }
 0x1d2   : > { %v1682_v53 = vadd.f32 %v1681_v51, %v1521_v49  ;;  %v12188_v15 = vpop.f32.mrb[35].mxu1  ;;  %v13751_v62 = vpop.f32.mrb[50].mxu0  ;;  %13780 = vmatprep.subr.bf16.mxu1 %v14131_v33 }
 0x1d3   : > { %v12189_v26 = vadd.f32 %v12188_v15, %v12187_v59  ;;  %v1693_v23 = vadd.f32 %v13751_v62, %v1532_v24  ;;  %v1684_v57 = vpop.f32.mrb[51].mxu0  ;;  %v1553_v39 = vadd.f32 %v12186_v30, %v15305_v29  ;;  %v1810_v56 = vmax.f32 %v1690_v19, 0.0 }
 0x1d4   : > { %v1685_v7 = vadd.f32 %v1684_v57, %v15359_v38  ;;  %v1808_v54 = vmax.f32 %v1682_v53, 0.0 }
 0x1d5   : > { %v1811_v4 = vmax.f32 %v1693_v23, 0.0  ;;  %v15388_v14 = vadd.f32 %v12189_v26, %v15309_v63 }
 0x1d6   : > { %v1809_v49 = vmax.f32 %v1685_v7, 0.0 }
 0x1d7   : > { %v1841_v6 = vpack.c.bf16 %v1811_v4, %v1810_v56  ;;  %v12190_v0 = vpop.f32.mrb[36].mxu1 }
 0x1d8   : > { %v1840_v24 = vpack.c.bf16 %v1809_v49, %v1808_v54  ;;  %v12191_v45 = vpop.f32.mrb[37].mxu1  ;;  %v13754_v35 = vpop.f32.mrb[52].mxu0 }
 0x1d9   : > { %v1864_v29 = vshrl.u32 %v1841_v6, 16  ;;  %v12192_v1 = vadd.f32 %v12191_v45, %v12190_v0  ;;  %v1706_v38 = vadd.f32 %v13754_v35, %v1545_v58  ;;  %v12193_v37 = vpop.f32.mrb[38].mxu1  ;;  %v1697_v34 = vpop.f32.mrb[53].mxu0  ;;  %v1867_v10 = vshll.u32 %v1841_v6, 16 }
 0x1da   : > { %v1857_v63 = vshrl.u32 %v1840_v24, 16  ;;  %v1698_v55 = vadd.f32 %v1697_v34, %v1537_v31  ;;  %v12194_v46 = vpop.f32.mrb[39].mxu1  ;;  %v13755_v8 = vpop.f32.mrb[54].mxu0  ;;  %v1860_v47 = vshll.u32 %v1840_v24, 16 }
 0x1db   : > { %v1866_v36 = vrot.slane %v1864_v29, 7  ;;  %v12195_v43 = vadd.f32 %v12194_v46, %v12193_v37  ;;  %v1709_v30 = vadd.f32 %v13755_v8, %v1548_v3  ;;  %v1700_v19 = vpop.f32.mrb[55].mxu0  ;;  %v1814_v51 = vmax.f32 %v1706_v38, 0.0 }
 0x1dc   : > { %v1859_v59 = vrot.slane %v1857_v63, 7  ;;  %v1701_v53 = vadd.f32 %v1700_v19, %v1540_v60  ;;  %v1561_v15 = vadd.f32 %v12192_v1, %v15316_v13  ;;  %v1812_v31 = vmax.f32 %v1698_v55, 0.0 }
 0x1dd   : > { %v1815_v62 = vmax.f32 %v1709_v30, 0.0  ;;  %v1869_v26 = vor.u32 %v1867_v10, %v1866_v36  ;;  %v1564_v58 = vadd.f32 %v12195_v43, %v15320_v22  ;;  %v15397_v57 = vsel %vm14512_vm2, %v1866_v36, 0 }
 0x1de   : > { %v1813_v7 = vmax.f32 %v1701_v53, 0.0  ;;  %v1862_v56 = vor.u32 %v1860_v47, %v1859_v59  ;;  %v15401_v3 = vsel %vm14512_vm2, %v1859_v59, 0  ;;  %v2124_v60 = vshll.u32 %v15397_v57, 16 }
 0x1df   : > { %v1843_v4 = vpack.c.bf16 %v1815_v62, %v1814_v51  ;;  %v12196_v33 = vpop.f32.mrb[40].mxu1  ;;  %v15405_v13 = vsel %vm14512_vm2, 0, %v1869_v26  ;;  %v2112_v0 = vshll.u32 %v15401_v3, 16 }
 0x1e0   : > { %v1842_v22 = vpack.c.bf16 %v1813_v7, %v1812_v31  ;;  %v12197_v54 = vpop.f32.mrb[41].mxu1  ;;  %v13758_v49 = vpop.f32.mrb[56].mxu0  ;;  %2392 = vrot.lane.b32.xlu0 %v15405_v13, %s14434_s22  ;;  %v15412_v6 = vsel %vm14512_vm2, 0, %v1862_v56  ;;  %v2117_v24 = vshrl.u32 %v15405_v13, 16  ;;  %v2119_v37 = vshll.u32 %v15405_v13, 16 }
 0x1e1   : > { %v1878_v45 = vshrl.u32 %v1843_v4, 16  ;;  %v12198_v35 = vadd.f32 %v12197_v54, %v12196_v33  ;;  %v1722_v29 = vadd.f32 %v13758_v49, %v1561_v15  ;;  %v12199_v1 = vpop.f32.mrb[42].mxu1  ;;  %v1713_v38 = vpop.f32.mrb[57].mxu0  ;;  %2390 = vrot.lane.b32.xlu1 %v15412_v6, %s14434_s22  ;;  %v1881_v34 = vshll.u32 %v1843_v4, 16 }
 0x1e2   : > { %v1871_v10 = vshrl.u32 %v1842_v22, 16  ;;  %v1874_v63 = vshll.u32 %v1842_v22, 16  ;;  %v1714_v55 = vadd.f32 %v1713_v38, %v1553_v39  ;;  %v12200_v46 = vpop.f32.mrb[43].mxu1  ;;  %v13759_v8 = vpop.f32.mrb[58].mxu0  ;;  %v2105_v19 = vshrl.u32 %v15412_v6, 16 }
 0x1e3   : > { %v1880_v36 = vrot.slane %v1878_v45, 7  ;;  %v12201_v47 = vadd.f32 %v12200_v46, %v12199_v1  ;;  %v1725_v43 = vadd.f32 %v13759_v8, %v1564_v58  ;;  %v1716_v30 = vpop.f32.mrb[59].mxu0  ;;  %v1818_v51 = vmax.f32 %v1722_v29, 0.0 }
 0x1e4   : > { %v1873_v59 = vrot.slane %v1871_v10, 7  ;;  %v1717_v53 = vadd.f32 %v1716_v30, %v15388_v14  ;;  %v2107_v15 = vshll.u32 %v15412_v6, 16  ;;  %v1816_v62 = vmax.f32 %v1714_v55, 0.0 }
 0x1e5   : > { %v1819_v26 = vmax.f32 %v1725_v43, 0.0  ;;  %v1569_v31 = vadd.f32 %v12198_v35, %v15327_v27  ;;  %v1572_v39 = vadd.f32 %v12201_v47, %v15331_v28  ;;  %v2121_v33 = vrot.slane %v2119_v37, 1 }
 0x1e6   : > { %v1817_v7 = vmax.f32 %v1717_v53, 0.0  ;;  %v2109_v56 = vrot.slane %v2107_v15, 1  ;;  %v1876_v4 = vor.u32 %v1874_v63, %v1873_v59  ;;  %v2114_v54 = vrot.slane %v2112_v0, 1 }
 0x1e7   : > { %v1845_v58 = vpack.c.bf16 %v1819_v26, %v1818_v51  ;;  %v12202_v22 = vpop.f32.mrb[44].mxu1  ;;  %v2126_v49 = vrot.slane %v2124_v60, 1  ;;  %v1883_v45 = vor.u32 %v1881_v34, %v1880_v36  ;;  %v2122_v27 = vor.u32 %v2121_v33, %v2117_v24 }
 0x1e8   : > { %v1844_v29 = vpack.c.bf16 %v1817_v7, %v1816_v62  ;;  %v12203_v1 = vpop.f32.mrb[45].mxu1  ;;  %v13762_v14 = vpop.f32.mrb[60].mxu0  ;;  %v2110_v38 = vor.u32 %v2109_v56, %v2105_v19  ;;  %v15426_v10 = vsel %vm14512_vm2, 0, %v1876_v4  ;;  %v15432_v60 = vsel %vm14512_vm2, %v1873_v59, 0 }
 0x1e9   : > { %v1892_v35 = vshrl.u32 %v1845_v58, 16  ;;  %v1895_v28 = vshll.u32 %v1845_v58, 16  ;;  %v12204_v55 = vadd.f32 %v12203_v1, %v12202_v22  ;;  %v12205_v46 = vpop.f32.mrb[46].mxu1  ;;  %v1729_v63 = vpop.f32.mrb[61].mxu0  ;;  %2394 = vrot.lane.b32.xlu0 %v15426_v10, %s14434_s22  ;;  %v15439_v24 = vsel %vm14512_vm2, 0, %v1883_v45 }
 0x1ea   : > { %v1885_v0 = vshrl.u32 %v1844_v29, 16  ;;  %v15435_v37 = vsel %vm507_vm3, %v2110_v38, %v2114_v54  ;;  %v1730_v34 = vadd.f32 %v1729_v63, %v1569_v31  ;;  %v12206_v8 = vpop.f32.mrb[47].mxu1  ;;  %v13763_v47 = vpop.f32.mrb[62].mxu0  ;;  %v1888_v30 = vshll.u32 %v1844_v29, 16 }
 0x1eb   : > { %v15441_v43 = vrot.slane %v1892_v35, 7  ;;  %v1577_v19 = vadd.f32 %v12204_v55, %v15338_v12  ;;  %2284 = vrot.lane.b32.xlu1 %v15435_v37, %s14434_s22  ;;  %v12207_v59 = vadd.f32 %v12206_v8, %v12205_v46  ;;  %v1732_v51 = vpop.f32.mrb[63].mxu0  ;;  %v15447_v26 = vsel %vm507_vm3, %v2122_v27, %v2126_v49 }
 0x1ec   : > { %v1887_v53 = vrot.slane %v1885_v0, 7  ;;  %v1820_v15 = vmax.f32 %v1730_v34, 0.0  ;;  %v1733_v62 = vadd.f32 %v1732_v51, %v1572_v39  ;;  %v2131_v56 = vshll.u32 %v15426_v10, 16 }
 0x1ed   : > { %v1738_v31 = vadd.f32 %v13762_v14, %v1577_v19  ;;  %v1580_v7 = vadd.f32 %v12207_v59, %v15342_v52  ;;  %2396 = vrot.lane.b32.xlu0 %v15439_v24, %s14434_s22  ;;  %v2136_v12 = vshll.u32 %v15432_v60, 16  ;;  %v2129_v33 = vshrl.u32 %v15426_v10, 16 }
 0x1ee   : > { %v1821_v4 = vmax.f32 %v1733_v62, 0.0  ;;  %v1890_v58 = vor.u32 %v1888_v30, %v1887_v53  ;;  %v15457_v39 = vsel %vm14512_vm2, %v1880_v36, 0  ;;  %v2133_v49 = vrot.slane %v2131_v56, 1 }
 0x1ef   : > { %v1822_v22 = vmax.f32 %v1738_v31, 0.0  ;;  %v1741_v54 = vadd.f32 %v13763_v47, %v1580_v7  ;;  %2286 = vrot.lane.b32.xlu1 %v15447_v26, %s14434_s22  ;;  %v12208_v52 = vpop.f32.mrb[48].mxu1  ;;  %v2138_v45 = vrot.slane %v2136_v12, 1  ;;  %v2143_v27 = vshll.u32 %v15439_v24, 16 }
 0x1f0   : > { %v1846_v29 = vpack.c.bf16 %v1821_v4, %v1820_v15  ;;  %v12209_v1 = vpop.f32.mrb[49].mxu1  ;;  %v15463_v14 = vsel %vm14512_vm2, 0, %v1890_v58  ;;  %v15465_v38 = vpop.f32.mrb[64].mxu0  ;;  %v2148_v36 = vshll.u32 %v15457_v39, 16  ;;  %v2134_v46 = vor.u32 %v2133_v49, %v2129_v33 }
 0x1f1   : > { %v1823_v35 = vmax.f32 %v1741_v54, 0.0  ;;  %v12210_v55 = vadd.f32 %v12209_v1, %v12208_v52  ;;  %v12211_v63 = vpop.f32.mrb[50].mxu1  ;;  %2398 = vrot.lane.b32.xlu0 %v15463_v14, %s14434_s22  ;;  %v1745_v0 = vpop.f32.mrb[65].mxu0  ;;  %v1897_v34 = vor.u32 %v1895_v28, %v15441_v43  ;;  %v2141_v30 = vshrl.u32 %v15439_v24, 16 }
 0x1f2   : > { %v1899_v8 = vshrl.u32 %v1846_v29, 16  ;;  %v12212_v47 = vpop.f32.mrb[51].mxu1  ;;  %v2145_v19 = vrot.slane %v2143_v27, 1  ;;  %v2150_v59 = vrot.slane %v2148_v36, 1  ;;  %v15473_v51 = vpop.f32.mrb[66].mxu0  ;;  %v15476_v62 = vsel %vm507_vm3, %v2134_v46, %v2138_v45 }
 0x1f3   : > { %v1847_v15 = vpack.c.bf16 %v1823_v35, %v1822_v22  ;;  %v12213_v31 = vadd.f32 %v12212_v47, %v12211_v63  ;;  %v1585_v7 = vadd.f32 %v12210_v55, %v15347_v50  ;;  %v1748_v56 = vpop.f32.mrb[67].mxu0  ;;  %2288 = vrot.lane.b32.xlu1 %v15476_v62, %s14434_s22  ;;  %v15483_v4 = vsel %vm14512_vm2, 0, %v1897_v34 }
 0x1f4   : > { %v1901_v12 = vrot.slane %v1899_v8, 7  ;;  %v2146_v28 = vor.u32 %v2145_v19, %v2141_v30  ;;  %v15487_v33 = vsel %vm14512_vm2, %v1887_v53, 0  ;;  %v1902_v22 = vshll.u32 %v1846_v29, 16 }
 0x1f5   : > { %v1906_v58 = vshrl.u32 %v1847_v15, 16  ;;  %v1746_v54 = vadd.f32 %v1745_v0, %v1585_v7  ;;  %2400 = vrot.lane.b32.xlu0 %v15483_v4, %s14434_s22  ;;  %v1588_v50 = vadd.f32 %v12213_v31, %v15350_v2  ;;  %v1909_v52 = vshll.u32 %v1847_v15, 16 }
 0x1f6   : > { %v15493_v49 = vsel %vm507_vm3, %v2146_v28, %v2150_v59  ;;  %v2155_v45 = vshll.u32 %v15463_v14, 16  ;;  %v2160_v1 = vshll.u32 %v15487_v33, 16  ;;  %v2153_v35 = vshrl.u32 %v15463_v14, 16 }
 0x1f7   : > { %20538 = vst [vmem:[#allocation12_spill] sm:$0xff] %v15493_v49  ;;  %v1908_v27 = vrot.slane %v1906_v58, 7  ;;  %v1749_v36 = vadd.f32 %v1748_v56, %v1588_v50  ;;  %v12214_v53 = vpop.f32.mrb[52].mxu1  ;;  %v1904_v29 = vor.u32 %v1902_v22, %v1901_v12  ;;  %v1824_v55 = vmax.f32 %v1746_v54, 0.0  ;;  %2290 = vrot.lane.b32.xlu1 %v15493_v49, %s14434_s22 }
 0x1f8   : > { %v12215_v46 = vpop.f32.mrb[53].mxu1  ;;  %v2157_v2 = vrot.slane %v2155_v45, 1  ;;  %v2162_v63 = vrot.slane %v2160_v1, 1  ;;  %v15503_v0 = vsel %vm14512_vm2, %v15441_v43, 0  ;;  %v15505_v34 = vpop.f32.mrb[68].mxu0  ;;  %v2167_v59 = vshll.u32 %v15483_v4, 16 }
 0x1f9   : > { %v1825_v8 = vmax.f32 %v1749_v36, 0.0  ;;  %v12216_v47 = vadd.f32 %v12215_v46, %v12214_v53  ;;  %v12217_v30 = vpop.f32.mrb[54].mxu1  ;;  %v15509_v19 = vsel %vm14512_vm2, 0, %v1904_v29  ;;  %v1761_v15 = vpop.f32.mrb[69].mxu0  ;;  %v2172_v43 = vshll.u32 %v15503_v0, 16 }
 0x1fa   : > { %v2158_v31 = vor.u32 %v2157_v2, %v2153_v35  ;;  %2402 = vrot.lane.b32.xlu0 %v15509_v19, %s14434_s22  ;;  %v12218_v7 = vpop.f32.mrb[55].mxu1  ;;  %v1911_v56 = vor.u32 %v1909_v52, %v1908_v27  ;;  %v15517_v28 = vsel %vm14512_vm2, %v1901_v12, 0  ;;  %v15519_v58 = vpop.f32.mrb[70].mxu0  ;;  %v2169_v45 = vrot.slane %v2167_v59, 1 }
 0x1fb   : > { %v1848_v22 = vpack.c.bf16 %v1825_v8, %v1824_v55  ;;  %v1593_v54 = vadd.f32 %v12216_v47, %v15361_v21  ;;  %v12219_v50 = vadd.f32 %v12218_v7, %v12217_v30  ;;  %v1764_v1 = vpop.f32.mrb[71].mxu0  ;;  %v2165_v53 = vshrl.u32 %v15483_v4, 16 }
 0x1fc   : > { %v15523_v36 = vsel %vm507_vm3, %v2158_v31, %v2162_v63  ;;  %v2174_v35 = vrot.slane %v2172_v43, 1  ;;  %v15528_v52 = vsel %vm14512_vm2, 0, %v1911_v56  ;;  %v2177_v55 = vshrl.u32 %v15509_v19, 16 }
 0x1fd   : > { %20539 = vst [vmem:[#allocation6_spill] sm:$0xff] %v15523_v36  ;;  %v1913_v12 = vshrl.u32 %v1848_v22, 16  ;;  %v1754_v29 = vadd.f32 %v15465_v38, %v1593_v54  ;;  %2292 = vrot.lane.b32.xlu1 %v15523_v36, %s14434_s22  ;;  %v1596_v21 = vadd.f32 %v12219_v50, %v15364_v18  ;;  %v2170_v46 = vor.u32 %v2169_v45, %v2165_v53 }
 0x1fe   : > { %2404 = vrot.lane.b32.xlu0 %v15528_v52, %s14434_s22  ;;  %v2179_v2 = vshll.u32 %v15509_v19, 16  ;;  %v2184_v63 = vshll.u32 %v15517_v28, 16  ;;  %v15541_v8 = vsel %vm14512_vm2, %v1908_v27, 0  ;;  %v1916_v47 = vshll.u32 %v1848_v22, 16 }
 0x1ff   : > { %v1915_v38 = vrot.slane %v1913_v12, 7  ;;  %v1826_v30 = vmax.f32 %v1754_v29, 0.0  ;;  %v1757_v59 = vadd.f32 %v15473_v51, %v1596_v21  ;;  %v12220_v18 = vpop.f32.mrb[56].mxu1  ;;  %v15545_v31 = vsel %vm507_vm3, %v2170_v46, %v2174_v35 }
 0x200   : > { %20540 = vst [vmem:[#allocation15_spill] sm:$0xff] %v15545_v31  ;;  %v12221_v7 = vpop.f32.mrb[57].mxu1  ;;  %v2181_v43 = vrot.slane %v2179_v2, 1  ;;  %v2189_v56 = vshrl.u32 %v15528_v52, 16  ;;  %v2191_v54 = vshll.u32 %v15528_v52, 16  ;;  %v15549_v50 = vpop.f32.mrb[72].mxu0 }
 0x201   : > { %v1827_v45 = vmax.f32 %v1757_v59, 0.0  ;;  %2294 = vrot.lane.b32.xlu1 %v15545_v31, %s14434_s22  ;;  %v12222_v27 = vadd.f32 %v12221_v7, %v12220_v18  ;;  %v12223_v22 = vpop.f32.mrb[58].mxu1  ;;  %v1918_v53 = vor.u32 %v1916_v47, %v1915_v38  ;;  %v2196_v51 = vshll.u32 %v15541_v8, 16  ;;  %v15554_v12 = vpop.f32.mrb[73].mxu0 }
 0x202   : > { %v2182_v35 = vor.u32 %v2181_v43, %v2177_v55  ;;  %v2186_v29 = vrot.slane %v2184_v63, 1  ;;  %v12224_v21 = vpop.f32.mrb[59].mxu1  ;;  %v2193_v46 = vrot.slane %v2191_v54, 1  ;;  %v15558_v2 = vsel %vm14512_vm2, %v1915_v38, 0  ;;  %v15560_v36 = vpop.f32.mrb[74].mxu0 }
 0x203   : > { %v1849_v59 = vpack.c.bf16 %v1827_v45, %v1826_v30  ;;  %v12225_v49 = vadd.f32 %v12224_v21, %v12223_v22  ;;  %v1601_v18 = vadd.f32 %v12222_v27, %v15367_v44  ;;  %v15565_v47 = vsel %vm14512_vm2, 0, %v1918_v53  ;;  %v15567_v7 = vpop.f32.mrb[75].mxu0 }
 0x204   : > { %v15570_v55 = vsel %vm507_vm3, %v2182_v35, %v2186_v29  ;;  %2406 = vrot.lane.b32.xlu0 %v15565_v47, %s14434_s22  ;;  %v2194_v63 = vor.u32 %v2193_v46, %v2189_v56  ;;  %v2198_v38 = vrot.slane %v2196_v51, 1  ;;  %v2203_v43 = vshll.u32 %v15565_v47, 16 }
 0x205   : > { %20541 = vst [vmem:[#allocation7_spill] sm:$0xff] %v15570_v55  ;;  %2296 = vrot.lane.b32.xlu1 %v15570_v55, %s14434_s22  ;;  %v1762_v30 = vadd.f32 %v1761_v15, %v1601_v18  ;;  %v1604_v44 = vadd.f32 %v12225_v49, %v15370_v16  ;;  %v2208_v54 = vshll.u32 %v15558_v2, 16  ;;  %v1920_v27 = vshrl.u32 %v1849_v59, 16 }
 0x206   : > { %v15580_v45 = vsel %vm507_vm3, %v2194_v63, %v2198_v38  ;;  %v2201_v35 = vshrl.u32 %v15565_v47, 16  ;;  %v2205_v56 = vrot.slane %v2203_v43, 1  ;;  %v1923_v46 = vshll.u32 %v1849_v59, 16 }
 0x207   : > { %20542 = vst [vmem:[#allocation8_spill] sm:$0xff] %v15580_v45  ;;  %v1765_v22 = vadd.f32 %v1764_v1, %v1604_v44  ;;  %v12226_v53 = vpop.f32.mrb[60].mxu1  ;;  %v1828_v51 = vmax.f32 %v1762_v30, 0.0  ;;  %v1922_v21 = vrot.slane %v1920_v27, 7  ;;  %v2210_v38 = vrot.slane %v2208_v54, 1 }
 0x208   : > { %v12227_v29 = vpop.f32.mrb[61].mxu1  ;;  %v15583_v15 = vpop.f32.mrb[76].mxu0  ;;  %v2206_v63 = vor.u32 %v2205_v56, %v2201_v35 }
 0x209   : > { %2298 = vrot.lane.b32.xlu1 %v15580_v45, %s14434_s22  ;;  %v1829_v16 = vmax.f32 %v1765_v22, 0.0  ;;  %v12228_v49 = vadd.f32 %v12227_v29, %v12226_v53  ;;  %v12229_v18 = vpop.f32.mrb[62].mxu1  ;;  %v15587_v55 = vpop.f32.mrb[77].mxu0  ;;  %v1925_v44 = vor.u32 %v1923_v46, %v1922_v21  ;;  %v15591_v30 = vsel %vm14512_vm2, %v1922_v21, 0 }
 0x20a   : > { %v12230_v1 = vpop.f32.mrb[63].mxu1  ;;  %v15593_v43 = vpop.f32.mrb[78].mxu0  ;;  %v15597_v22 = vsel %vm507_vm3, %v2206_v63, %v2210_v38 }
 0x20b   : > { %v1850_v59 = vpack.c.bf16 %v1829_v16, %v1828_v51  ;;  %v1609_v27 = vadd.f32 %v12228_v49, %v15379_v48  ;;  %v12231_v31 = vadd.f32 %v12230_v1, %v12229_v18  ;;  %20543 = vst [vmem:[#allocation9_spill] sm:$0xff] %v15597_v22  ;;  %v15599_v53 = vpop.f32.mrb[79].mxu0  ;;  %v15603_v54 = vsel %vm14512_vm2, 0, %v1925_v44 }
 0x20c   : > { %2408 = vrot.lane.b32.xlu0 %v15603_v54, %s14434_s22  ;;  %v2215_v48 = vshll.u32 %v15603_v54, 16  ;;  %v2220_v51 = vshll.u32 %v15591_v30, 16 }
 0x20d   : > { %v1927_v35 = vshrl.u32 %v1850_v59, 16  ;;  %v1770_v56 = vadd.f32 %v15505_v34, %v1609_v27  ;;  %v1612_v29 = vadd.f32 %v12231_v31, %v15382_v40  ;;  %2300 = vrot.lane.b32.xlu1 %v15597_v22, %s14434_s22  ;;  %v1930_v46 = vshll.u32 %v1850_v59, 16  ;;  %v14133_v31 = vld [vmem:[%s20451_s2 + $0xc0] sm:$0xff]  }
 0x20e   : > { %v2213_v34 = vshrl.u32 %v15603_v54, 16  ;;  %v2217_v40 = vrot.slane %v2215_v48, 1  ;;  %12388 = vmatprep.subr.bf16.mxu0 %v14133_v31 }
 0x20f   : > { %v1929_v21 = vrot.slane %v1927_v35, 7  ;;  %v1773_v16 = vadd.f32 %v15519_v58, %v1612_v29  ;;  %v12232_v49 = vpop.f32.mrb[64].mxu1  ;;  %v1830_v18 = vmax.f32 %v1770_v56, 0.0  ;;  %v14134_v58 = vld [vmem:[%s20451_s2 + $0x80] sm:$0xff]   ;;  %v2222_v29 = vrot.slane %v2220_v51, 1 }
 0x210   : > { %v12233_v63 = vpop.f32.mrb[65].mxu1  ;;  %v2218_v56 = vor.u32 %v2217_v40, %v2213_v34  ;;  %12389 = vmatpush3.bf16.msra.mxu0 %v14134_v58 }
 0x211   : > { %v1831_v38 = vmax.f32 %v1773_v16, 0.0  ;;  %v12234_v1 = vadd.f32 %v12233_v63, %v12232_v49  ;;  %v12235_v44 = vpop.f32.mrb[66].mxu1  ;;  %v1932_v27 = vor.u32 %v1930_v46, %v1929_v21  ;;  %v15620_v35 = vsel %vm14512_vm2, %v1929_v21, 0 }
 0x212   : > { %v12236_v59 = vpop.f32.mrb[67].mxu1  ;;  %v15631_v21 = vsel %vm507_vm3, %v2218_v56, %v2222_v29  ;;  %v2232_v51 = vshll.u32 %v15620_v35, 16  ;;  %v14136_v56 = vld [vmem:[%s20451_s2 + $0xc8] sm:$0xff]  }
 0x213   : > { %v1851_v48 = vpack.c.bf16 %v1831_v38, %v1830_v18  ;;  %v12237_v22 = vadd.f32 %v12236_v59, %v12235_v44  ;;  %v1617_v45 = vadd.f32 %v12234_v1, %v15303_v25  ;;  %v15628_v16 = vsel %vm14512_vm2, 0, %v1932_v27  ;;  %2302 = vrot.lane.b32.xlu1 %v15631_v21, %s14434_s22  ;;  %12390 = vmatprep.subr.bf16.mxu0 %v14136_v56 }
 0x214   : > { %2410 = vrot.lane.b32.xlu0 %v15628_v16, %s14434_s22  ;;  %v2227_v46 = vshll.u32 %v15628_v16, 16  ;;  %v2225_v63 = vshrl.u32 %v15628_v16, 16  ;;  %v2234_v59 = vrot.slane %v2232_v51, 1 }
 0x215   : > { %v1778_v25 = vadd.f32 %v15554_v12, %v1617_v45  ;;  %v1620_v49 = vadd.f32 %v12237_v22, %v15307_v11  ;;  %v1934_v18 = vshrl.u32 %v1851_v48, 16  ;;  %v1937_v1 = vshll.u32 %v1851_v48, 16  ;;  %v14137_v11 = vld [vmem:[%s20451_s2 + $0x88] sm:$0xff]   ;;  %v14138_v12 = vld [vmem:[%s20451_s2 + $0xd0] sm:$0xff]  }
 0x216   : > { %v2229_v34 = vrot.slane %v2227_v46, 1  ;;  %12391 = vmatpush3.bf16.msra.mxu0 %v14137_v11 }
 0x217   : > { %v1781_v40 = vadd.f32 %v15567_v7, %v1620_v49  ;;  %v12238_v31 = vpop.f32.mrb[68].mxu1  ;;  %v1936_v38 = vrot.slane %v1934_v18, 7  ;;  %v1832_v44 = vmax.f32 %v1778_v25, 0.0  ;;  %12392 = vmatprep.subr.bf16.mxu0 %v14138_v12  ;;  %v14140_v12 = vld [vmem:[%s20451_s2 + $0xd8] sm:$0xff]  }
 0x218   : > { %v12239_v27 = vpop.f32.mrb[69].mxu1  ;;  %v2230_v58 = vor.u32 %v2229_v34, %v2225_v63  ;;  %v14139_v34 = vld [vmem:[%s20451_s2 + $0x90] sm:$0xff]  }
 0x219   : > { %v1833_v7 = vmax.f32 %v1781_v40, 0.0  ;;  %v12240_v45 = vadd.f32 %v12239_v27, %v12238_v31  ;;  %v12241_v22 = vpop.f32.mrb[70].mxu1  ;;  %v1939_v29 = vor.u32 %v1937_v1, %v1936_v38  ;;  %v15654_v48 = vsel %vm14512_vm2, %v1936_v38, 0 }
 0x21a   : > { %v12242_v46 = vpop.f32.mrb[71].mxu1  ;;  %v15657_v51 = vsel %vm507_vm3, %v2230_v58, %v2234_v59  ;;  %12393 = vmatpush3.bf16.msra.mxu0 %v14139_v34 }
 0x21b   : > { %v1852_v25 = vpack.c.bf16 %v1833_v7, %v1832_v44  ;;  %v1625_v49 = vadd.f32 %v12240_v45, %v15314_v32  ;;  %v12243_v18 = vadd.f32 %v12242_v46, %v12241_v22  ;;  %2304 = vrot.lane.b32.xlu1 %v15657_v51, %s14434_s22  ;;  %v15664_v63 = vsel %vm14512_vm2, 0, %v1939_v29  ;;  %12394 = vmatprep.subr.bf16.mxu0 %v14140_v12 }
 0x21c   : > { %2412 = vrot.lane.b32.xlu0 %v15664_v63, %s14434_s22  ;;  %v2239_v40 = vshll.u32 %v15664_v63, 16  ;;  %v2244_v32 = vshll.u32 %v15654_v48, 16  ;;  %v2237_v44 = vshrl.u32 %v15664_v63, 16 }
 0x21d   : > { %v1941_v31 = vshrl.u32 %v1852_v25, 16  ;;  %v1786_v38 = vadd.f32 %v15549_v50, %v1625_v49  ;;  %v1628_v1 = vadd.f32 %v12243_v18, %v15318_v61  ;;  %v1944_v59 = vshll.u32 %v1852_v25, 16  ;;  %v14141_v61 = vld [vmem:[%s20451_s2 + $0x98] sm:$0xff]   ;;  %v14142_v50 = vld [vmem:[%s20451_s2 + $0xe0] sm:$0xff]  }
 0x21e   : > { %v2241_v27 = vrot.slane %v2239_v40, 1  ;;  %v2246_v29 = vrot.slane %v2244_v32, 1  ;;  %12395 = vmatpush3.bf16.msra.mxu0 %v14141_v61 }
 0x21f   : > { %v1943_v58 = vrot.slane %v1941_v31, 7  ;;  %v1789_v56 = vadd.f32 %v15560_v36, %v1628_v1  ;;  %v12244_v11 = vpop.f32.mrb[72].mxu1  ;;  %v1834_v7 = vmax.f32 %v1786_v38, 0.0  ;;  %12396 = vmatprep.subr.bf16.mxu0 %v14142_v50 }
 0x220   : > { %v12245_v45 = vpop.f32.mrb[73].mxu1  ;;  %v2242_v22 = vor.u32 %v2241_v27, %v2237_v44  ;;  %v14143_v44 = vld [vmem:[%s20451_s2 + $0xa0] sm:$0xff]  }
 0x221   : > { %v1835_v46 = vmax.f32 %v1789_v56, 0.0  ;;  %v12246_v36 = vadd.f32 %v12245_v45, %v12244_v11  ;;  %v12247_v25 = vpop.f32.mrb[74].mxu1  ;;  %v1946_v49 = vor.u32 %v1944_v59, %v1943_v58  ;;  %v15688_v18 = vsel %vm14512_vm2, %v1943_v58, 0 }
 0x222   : > { %v12248_v34 = vpop.f32.mrb[75].mxu1  ;;  %v15691_v40 = vsel %vm507_vm3, %v2242_v22, %v2246_v29  ;;  %v2256_v58 = vshll.u32 %v15688_v18, 16  ;;  %12397 = vmatpush3.bf16.msra.mxu0 %v14143_v44 }
 0x223   : > { %v1853_v32 = vpack.c.bf16 %v1835_v46, %v1834_v7  ;;  %v12249_v31 = vadd.f32 %v12248_v34, %v12247_v25  ;;  %2306 = vrot.lane.b32.xlu1 %v15691_v40, %s14434_s22  ;;  %v1633_v38 = vadd.f32 %v12246_v36, %v15325_v9  ;;  %v15698_v1 = vsel %vm14512_vm2, 0, %v1946_v49 }
 0x224   : > { %2414 = vrot.lane.b32.xlu0 %v15698_v1, %s14434_s22  ;;  %v2251_v27 = vshll.u32 %v15698_v1, 16  ;;  %v2249_v11 = vshrl.u32 %v15698_v1, 16  ;;  %v2258_v25 = vrot.slane %v2256_v58, 1 }
 0x225   : > { %v1794_v59 = vadd.f32 %v15587_v55, %v1633_v38  ;;  %v1636_v9 = vadd.f32 %v12249_v31, %v15329_v20  ;;  %v1948_v56 = vshrl.u32 %v1853_v32, 16  ;;  %v1951_v12 = vshll.u32 %v1853_v32, 16  ;;  %v14144_v55 = vld [vmem:[%s20451_s2 + $0xe8] sm:$0xff]  }
 0x226   : > { %v2253_v7 = vrot.slane %v2251_v27, 1  ;;  %v14145_v20 = vld [vmem:[%s20451_s2 + $0xa8] sm:$0xff]   ;;  %12398 = vmatprep.subr.bf16.mxu0 %v14144_v55 }
 0x227   : > { %v1797_v45 = vadd.f32 %v15599_v53, %v1636_v9  ;;  %v12250_v22 = vpop.f32.mrb[76].mxu1  ;;  %v1950_v29 = vrot.slane %v1948_v56, 7  ;;  %v1836_v61 = vmax.f32 %v1794_v59, 0.0  ;;  %v14146_v53 = vld [vmem:[%s20451_s2 + $0xf0] sm:$0xff]   ;;  %12399 = vmatpush3.bf16.msra.mxu0 %v14145_v20  ;;  %v14148_v20 = vld [vmem:[%s20451_s2 + $0xf8] sm:$0xff]  }
 0x228   : > { %v12251_v46 = vpop.f32.mrb[77].mxu1  ;;  %v2254_v36 = vor.u32 %v2253_v7, %v2249_v11  ;;  %v14147_v56 = vld [vmem:[%s20451_s2 + $0xb0] sm:$0xff]   ;;  %12400 = vmatprep.subr.bf16.mxu0 %v14146_v53 }
 0x229   : > { %v1837_v50 = vmax.f32 %v1797_v45, 0.0  ;;  %v12252_v49 = vadd.f32 %v12251_v46, %v12250_v22  ;;  %v12253_v34 = vpop.f32.mrb[78].mxu1  ;;  %v1953_v32 = vor.u32 %v1951_v12, %v1950_v29  ;;  %v15722_v31 = vsel %vm14512_vm2, %v1950_v29, 0 }
 0x22a   : > { %v12254_v38 = vpop.f32.mrb[79].mxu1  ;;  %v15725_v44 = vsel %vm507_vm3, %v2254_v36, %v2258_v25 }
 0x22b   : > { %v1854_v27 = vpack.c.bf16 %v1837_v50, %v1836_v61  ;;  %v1641_v58 = vadd.f32 %v12252_v49, %v15336_v41  ;;  %v12255_v59 = vadd.f32 %v12254_v38, %v12253_v34  ;;  %2308 = vrot.lane.b32.xlu1 %v15725_v44, %s14434_s22  ;;  %v15732_v9 = vsel %vm14512_vm2, 0, %v1953_v32  ;;  %12401 = vmatpush3.bf16.msra.mxu0 %v14147_v56 }
 0x22c   : > { %2416 = vrot.lane.b32.xlu0 %v15732_v9, %s14434_s22  ;;  %v2263_v11 = vshll.u32 %v15732_v9, 16  ;;  %v2268_v41 = vshll.u32 %v15722_v31, 16  ;;  %v2261_v29 = vshrl.u32 %v15732_v9, 16  ;;  %12402 = vmatprep.subr.bf16.mxu0 %v14148_v20  ;;  %v2353_v20 = vrot.slane %v15439_v24, 1 }
 0x22d   : > { %v1955_v7 = vshrl.u32 %v1854_v27, 16  ;;  %v1802_v45 = vadd.f32 %v15583_v15, %v1641_v58  ;;  %v1644_v22 = vadd.f32 %v12255_v59, %v15340_v17  ;;  %v1958_v46 = vshll.u32 %v1854_v27, 16  ;;  %v14149_v15 = vld [vmem:[%s20451_s2 + $0xb8] sm:$0xff]  }
 0x22e   : > { %v2265_v12 = vrot.slane %v2263_v11, 1  ;;  %v2270_v55 = vrot.slane %v2268_v41, 1 }
 0x22f   : > { %v1957_v61 = vrot.slane %v1955_v7, 7  ;;  %v1805_v36 = vadd.f32 %v15593_v43, %v1644_v22  ;;  %v1838_v53 = vmax.f32 %v1802_v45, 0.0  ;;  %12403 = vmatpush3.bf16.msra.mxu0 %v14149_v15 }
 0x230   : > { %v2266_v25 = vor.u32 %v2265_v12, %v2261_v29  ;;  %v2347_v12 = vrot.slane %v15405_v13, 1 }
 0x231   : > { %v1839_v17 = vmax.f32 %v1805_v36, 0.0  ;;  %v1960_v50 = vor.u32 %v1958_v46, %v1957_v61  ;;  %v15753_v49 = vsel %vm14512_vm2, %v1957_v61, 0  ;;  %v2344_v46 = vrot.slane %v15412_v6, 1 }
 0x232   : > { %v15756_v43 = vsel %vm507_vm3, %v2266_v25, %v2270_v55  ;;  %v2280_v27 = vshll.u32 %v15753_v49, 16  ;;  %v2348_v36 = vrot.slane %v15397_v57, 1  ;;  %v2345_v25 = vrot.slane %v15401_v3, 1 }
 0x233   : > { %v1855_v34 = vpack.c.bf16 %v1839_v17, %v1838_v53  ;;  %2310 = vrot.lane.b32.xlu1 %v15756_v43, %s14434_s22  ;;  %v15762_v32 = vsel %vm14512_vm2, 0, %v1960_v50  ;;  %v2350_v53 = vrot.slane %v15426_v10, 1  ;;  %v2354_v17 = vrot.slane %v15457_v39, 1 }
 0x234   : > { %2418 = vrot.lane.b32.xlu0 %v15762_v32, %s14434_s22  ;;  %v2275_v38 = vshll.u32 %v15762_v32, 16  ;;  %v2273_v59 = vshrl.u32 %v15762_v32, 16  ;;  %v2282_v45 = vrot.slane %v2280_v27, 1  ;;  %v15785_v55 = vsel %vm764_vm4, %v2347_v12, %v2348_v36 }
 0x235   : > { %v1962_v58 = vshrl.u32 %v1855_v34, 16  ;;  %v1965_v41 = vshll.u32 %v1855_v34, 16  ;;  %v2346_v15 = vsel %vm764_vm4, %v2344_v46, %v2345_v25  ;;  %v2351_v57 = vrot.slane %v15432_v60, 1 }
 0x236   : > { %v2277_v56 = vrot.slane %v2275_v38, 1  ;;  %v15796_v3 = vsel %vm764_vm4, %v2353_v20, %v2354_v17  ;;  %v2359_v50 = vrot.slane %v15483_v4, 1  ;;  %v2356_v38 = vrot.slane %v15463_v14, 1 }
 0x237   : > { %v1964_v11 = vrot.slane %v1962_v58, 7  ;;  %v15802_v34 = vsel %vm764_vm4, %v2350_v53, %v2351_v57  ;;  %v2360_v39 = vrot.slane %v15503_v0, 1  ;;  %v2357_v60 = vrot.slane %v15487_v33, 1 }
 0x238   : > { %v2278_v7 = vor.u32 %v2277_v56, %v2273_v59  ;;  %v2365_v58 = vrot.slane %v15528_v52, 1  ;;  %v2362_v56 = vrot.slane %v15509_v19, 1  ;;  %v2366_v0 = vrot.slane %v15541_v8, 1 }
 0x239   : > { %v1967_v22 = vor.u32 %v1965_v41, %v1964_v11  ;;  %v15810_v27 = vsel %vm764_vm4, %v2359_v50, %v2360_v39  ;;  %v15816_v59 = vsel %vm764_vm4, %v2356_v38, %v2357_v60  ;;  %v2363_v33 = vrot.slane %v15517_v28, 1 }
 0x23a   : > { %v15770_v29 = vsel %vm507_vm3, %v2278_v7, %v2282_v45  ;;  %v15824_v41 = vsel %vm764_vm4, %v2365_v58, %v2366_v0  ;;  %v2371_v7 = vrot.slane %v15603_v54, 1  ;;  %v2372_v8 = vrot.slane %v15591_v30, 1 }
 0x23b   : > { %2312 = vrot.lane.b32.xlu1 %v15770_v29, %s14434_s22  ;;  %v15777_v61 = vsel %vm14512_vm2, 0, %v1967_v22  ;;  %v15830_v45 = vsel %vm764_vm4, %v2362_v56, %v2363_v33  ;;  %v2368_v22 = vrot.slane %v15565_v47, 1  ;;  %v2369_v28 = vrot.slane %v15558_v2, 1  ;;  %v14132_v33 = vld [vmem:[%s20451_s2 + $0x108] sm:$0xff]  }
 0x23c   : > { %2420 = vrot.lane.b32.xlu0 %v15777_v61, %s14434_s22  ;;  %v15838_v12 = vsel %vm764_vm4, %v2371_v7, %v2372_v8  ;;  %v2377_v46 = vrot.slane %v15664_v63, 1  ;;  %v2374_v25 = vrot.slane %v15628_v16, 1  ;;  %v2425_v20 = vshll.u32 %v15777_v61, 16 }
 0x23d   : > { %v15844_v36 = vsel %vm764_vm4, %v2368_v22, %v2369_v28  ;;  %v2378_v2 = vrot.slane %v15654_v48, 1  ;;  %v2375_v30 = vrot.slane %v15620_v35, 1  ;;  %v2031_v17 = vsel %vm14512_vm2, %v1964_v11, 0  ;;  %v14331_v22 = vld [vmem:[%s20451_s2 + $0x100] sm:$0xff]  }
 0x23e   : > { %v2383_v39 = vrot.slane %v15732_v9, 1  ;;  %v2380_v48 = vrot.slane %v15698_v1, 1  ;;  %v2427_v60 = vrot.slane %v2425_v20, 1  ;;  %v2384_v11 = vrot.slane %v15722_v31, 1 }
 0x23f   : > { %2440 = vrot.lane.b32.xlu1 %v15785_v55, %s14434_s22  ;;  %v15853_v53 = vsel %vm764_vm4, %v2377_v46, %v2378_v2  ;;  %v15860_v38 = vsel %vm764_vm4, %v2374_v25, %v2375_v30  ;;  %v2381_v58 = vrot.slane %v15688_v18, 1  ;;  %v2423_v56 = vshrl.u32 %v15777_v61, 16  ;;  %v14135_v25 = vld [vmem:[%s20451_s2 + $0x110] sm:$0xff]  }
 0x240   : > { %2438 = vrot.lane.b32.xlu0 %v2346_v15, %s14434_s22  ;;  %v2430_v0 = vshll.u32 %v2031_v17, 16  ;;  %v15880_v31 = vsel %vm764_vm4, %v2383_v39, %v2384_v11  ;;  %v2386_v8 = vrot.slane %v15762_v32, 1  ;;  %v2435_v30 = vrot.slane %v15777_v61, 1 }
 0x241   : > { %v15883_v18 = vsel %vm764_vm4, %v2380_v48, %v2381_v58  ;;  %v2428_v28 = vor.u32 %v2427_v60, %v2423_v56  ;;  %v14150_v48 = vld [vmem:[%s20451_s2 + $0x118] sm:$0xff]  }
 0x242   : > { %v2432_v46 = vrot.slane %v2430_v0, 1 }
 0x243   : > { %2444 = vrot.lane.b32.xlu1 %v15796_v3, %s14434_s22 }
 0x244   : > { %2442 = vrot.lane.b32.xlu0 %v15802_v34, %s14434_s22  ;;  %v15898_v2 = vsel %vm507_vm3, %v2428_v28, %v2432_v46 }
 0x247   : > { %2448 = vrot.lane.b32.xlu1 %v15810_v27, %s14434_s22 }
 0x248   : > { %2446 = vrot.lane.b32.xlu0 %v15816_v59, %s14434_s22 }
 0x24b   : > { %2452 = vrot.lane.b32.xlu1 %v15824_v41, %s14434_s22 }
 0x24c   : > { %2450 = vrot.lane.b32.xlu0 %v15830_v45, %s14434_s22 }
 0x24f   : > { %2456 = vrot.lane.b32.xlu1 %v15838_v12, %s14434_s22 }
 0x250   : > { %2454 = vrot.lane.b32.xlu0 %v15844_v36, %s14434_s22 }
 0x252   : > { %v2393_v57 = vpop.permute.xlu0 %2392 }
 0x253   : > { %v2391_v50 = vpop.permute.xlu1 %2390  ;;  %2460 = vrot.lane.b32.xlu1 %v15853_v53, %s14434_s22  ;;  %v2522_v7 = vsel %vm896_vm5, %v2346_v15, %v2393_v57  ;;  %v2387_v15 = vrot.slane %v15753_v49, 1 }
 0x254   : > { %2458 = vrot.lane.b32.xlu0 %v15860_v38, %s14434_s22  ;;  %v2518_v35 = vsel %vm896_vm5, %v15032_v42, %v2391_v50  ;;  %v2436_v50 = vrot.slane %v2031_v17, 1 }
 0x255   : > { %2926 = vmatprep.mubr.bf16.mxu1 %v2518_v35  ;;  %v15895_v20 = vsel %vm764_vm4, %v2386_v8, %v2387_v15 }
 0x256   : > { %2927 = vmatmul.mubr.bf16.vlgmr.msra.gmra.mrb[80].mxu1 %v15042_v5  ;;  %v15913_v35 = vsel %vm764_vm4, %v2435_v30, %v2436_v50 }
 0x257   : > { %13781 = vmatpush3.bf16.msra.mxu1 %v14331_v22  ;;  %2934 = vmatprep.mubr.bf16.mxu1 %v2522_v7 }
 0x258   : > { %2464 = vrot.lane.b32.xlu1 %v15880_v31, %s14434_s22  ;;  %2462 = vrot.lane.b32.xlu0 %v15883_v18, %s14434_s22 }
 0x259   : > { %13782 = vmatprep.subr.bf16.mxu1 %v14132_v33 }
 0x25b   : > { %13783 = vmatpush3.bf16.msra.mxu1 %v14132_v33  ;;  %v2395_v57 = vpop.permute.xlu0 %2394 }
 0x25c   : > { %2466 = vrot.lane.b32.xlu1 %v15895_v20, %s14434_s22  ;;  %2470 = vrot.lane.b32.xlu0 %v15898_v2, %s14434_s22  ;;  %v2526_v60 = vsel %vm896_vm5, %v15785_v55, %v2395_v57 }
 0x25d   : > { %v2285_v49 = vpop.permute.xlu1 %2284  ;;  %13784 = vmatprep.subr.bf16.mxu1 %v14135_v25 }
 0x25e   : > { %v2473_v39 = vsel %vm896_vm5, %v15412_v6, %v2285_v49 }
 0x25f   : > { %2935 = vmatmul.mubr.bf16.gmra.mrb[84].mxu1 %v2473_v39  ;;  %v2397_v11 = vpop.permute.xlu0 %2396 }
 0x260   : > { %2942 = vmatprep.mubr.bf16.mxu1 %v2526_v60  ;;  %2468 = vrot.lane.b32.xlu0 %v15913_v35, %s14434_s22  ;;  %v2530_v58 = vsel %vm896_vm5, %v15802_v34, %v2397_v11 }
 0x261   : > { %v2287_v17 = vpop.permute.xlu1 %2286  ;;  %13785 = vmatpush3.bf16.msra.mxu1 %v14135_v25 }
 0x262   : > { %v2476_v6 = vsel %vm896_vm5, %v15405_v13, %v2287_v17  ;;  %13786 = vmatprep.subr.bf16.mxu1 %v14150_v48 }
 0x263   : > { %3087 = vmatprep.mubr.bf16.mxu0 %v2476_v6  ;;  %v2399_v0 = vpop.permute.xlu0 %2398 }
 0x264   : > { %v2534_v7 = vsel %vm896_vm5, %v15796_v3, %v2399_v0 }
 0x265   : > { %13787 = vmatpush3.bf16.msra.mxu1 %v14150_v48  ;;  %v2289_v56 = vpop.permute.xlu1 %2288 }
 0x266   : > { %v2479_v33 = vsel %vm896_vm5, %v15426_v10, %v2289_v56 }
 0x267   : > { %2943 = vmatmul.mubr.bf16.gmra.mrb[88].mxu1 %v2476_v6  ;;  %v2401_v22 = vpop.permute.xlu0 %2400 }
 0x268   : > { %2950 = vmatprep.mubr.bf16.mxu1 %v2530_v58  ;;  %v2538_v28 = vsel %vm896_vm5, %v15816_v59, %v2401_v22 }
 0x269   : > { %v2291_v13 = vpop.permute.xlu1 %2290 }
 0x26a   : > { %v15927_v8 = vsel %vm896_vm5, %v15439_v24, %v2291_v13 }
 0x26c   : > { %v2403_v46 = vpop.permute.xlu0 %2402 }
 0x26d   : > { %v2542_v25 = vsel %vm896_vm5, %v15810_v27, %v2403_v46 }
 0x26f   : > { %2951 = vmatmul.mubr.bf16.gmra.mrb[92].mxu1 %v2479_v33  ;;  %v2293_v15 = vpop.permute.xlu1 %2292 }
 0x270   : > { %2958 = vmatprep.mubr.bf16.mxu1 %v2534_v7  ;;  %v15934_v10 = vsel %vm896_vm5, %v15463_v14, %v2293_v15  ;;  %v2405_v30 = vpop.permute.xlu0 %2404 }
 0x271   : > { %v2546_v49 = vsel %vm896_vm5, %v15830_v45, %v2405_v30 }
 0x273   : > { %v2295_v24 = vpop.permute.xlu1 %2294 }
 0x274   : > { %v15941_v57 = vsel %vm896_vm5, %v15483_v4, %v2295_v24 }
 0x276   : > { %v2407_v50 = vpop.permute.xlu0 %2406 }
 0x277   : > { %2959 = vmatmul.mubr.bf16.gmra.mrb[96].mxu1 %v15927_v8  ;;  %v2297_v14 = vpop.permute.xlu1 %2296  ;;  %v2550_v48 = vsel %vm896_vm5, %v15824_v41, %v2407_v50 }
 0x278   : > { %2966 = vmatprep.mubr.bf16.mxu1 %v2538_v28  ;;  %v15948_v39 = vsel %vm896_vm5, %v15509_v19, %v2297_v14 }
 0x27b   : > { %v2299_v4 = vpop.permute.xlu1 %2298 }
 0x27c   : > { %v15955_v17 = vsel %vm896_vm5, %v15528_v52, %v2299_v4 }
 0x27e   : > { %v2409_v60 = vpop.permute.xlu0 %2408 }
 0x27f   : > { %2967 = vmatmul.mubr.bf16.gmra.mrb[100].mxu1 %v15934_v10  ;;  %v2554_v6 = vsel %vm896_vm5, %v15844_v36, %v2409_v60  ;;  %v2301_v19 = vpop.permute.xlu1 %2300 }
 0x280   : > { %2974 = vmatprep.mubr.bf16.mxu1 %v2542_v25  ;;  %v15962_v0 = vsel %vm896_vm5, %v15565_v47, %v2301_v19 }
 0x285   : > { %v2303_v58 = vpop.permute.xlu1 %2302 }
 0x286   : > { %v2411_v11 = vpop.permute.xlu0 %2410  ;;  %v15969_v15 = vsel %vm896_vm5, %v15603_v54, %v2303_v58 }
 0x287   : > { %2975 = vmatmul.mubr.bf16.gmra.mrb[104].mxu1 %v15941_v57  ;;  %v2558_v52 = vsel %vm896_vm5, %v15838_v12, %v2411_v11  ;;  %v20544_v11 = vld [vmem:[#allocation12_spill] sm:$0xff] }
 0x288   : > { %2982 = vmatprep.mubr.bf16.mxu1 %v2546_v49 }
 0x28d   : > { %v2305_v7 = vpop.permute.xlu1 %2304 }
 0x28e   : > { %v2413_v56 = vpop.permute.xlu0 %2412  ;;  %v15976_v49 = vsel %vm896_vm5, %v15628_v16, %v2305_v7 }
 0x28f   : > { %2983 = vmatmul.mubr.bf16.gmra.mrb[108].mxu1 %v15948_v39  ;;  %v2562_v47 = vsel %vm896_vm5, %v15860_v38, %v2413_v56 }
 0x290   : > { %2990 = vmatprep.mubr.bf16.mxu1 %v2550_v48 }
 0x295   : > { %v2307_v22 = vpop.permute.xlu1 %2306 }
 0x296   : > { %v2415_v13 = vpop.permute.xlu0 %2414  ;;  %v2506_v4 = vsel %vm896_vm5, %v15664_v63, %v2307_v22 }
 0x297   : > { %2991 = vmatmul.mubr.bf16.gmra.mrb[112].mxu1 %v15955_v17  ;;  %v2566_v54 = vsel %vm896_vm5, %v15853_v53, %v2415_v13 }
 0x298   : > { %2998 = vmatprep.mubr.bf16.mxu1 %v2554_v6 }
 0x29d   : > { %v2309_v46 = vpop.permute.xlu1 %2308 }
 0x29e   : > { %v2417_v28 = vpop.permute.xlu0 %2416 }
 0x29f   : > { %2999 = vmatmul.mubr.bf16.gmra.mrb[116].mxu1 %v15962_v0  ;;  %v2570_v16 = vsel %vm896_vm5, %v15883_v18, %v2417_v28 }
 0x2a0   : > { %3006 = vmatprep.mubr.bf16.mxu1 %v2558_v52 }
 0x2a5   : > { %v2311_v24 = vpop.permute.xlu1 %2310 }
 0x2a6   : > { %v2419_v25 = vpop.permute.xlu0 %2418 }
 0x2a7   : > { %3007 = vmatmul.mubr.bf16.gmra.mrb[120].mxu1 %v15969_v15 }
 0x2a8   : > { %3014 = vmatprep.mubr.bf16.mxu1 %v2562_v47 }
 0x2ad   : > { %v2313_v14 = vpop.permute.xlu1 %2312 }
 0x2ae   : > { %v2421_v30 = vpop.permute.xlu0 %2420 }
 0x2af   : > { %3015 = vmatmul.mubr.bf16.gmra.mrb[124].mxu1 %v15976_v49 }
 0x2b0   : > { %3022 = vmatprep.mubr.bf16.mxu1 %v2566_v54 }
 0x2b1   : > { %v2441_v60 = vpop.permute.xlu1 %2440 }
 0x2b2   : > { %v2439_v50 = vpop.permute.xlu0 %2438  ;;  %v2586_v6 = vsel %vm896_vm5, %v15447_v26, %v2441_v60  ;;  %v2512_v26 = vsel %vm896_vm5, %v15732_v9, %v2311_v24  ;;  %v20545_v9 = vld [vmem:[#allocation6_spill] sm:$0xff] }
 0x2b3   : > { %v2582_v48 = vsel %vm896_vm5, %v15435_v37, %v2439_v50  ;;  %v2509_v37 = vsel %vm896_vm5, %v15698_v1, %v2309_v46 }
 0x2b4   : > { %3088 = vmatmul.mubr.bf16.vlgmr.msra.gmra.mrb[80].mxu0 %v2582_v48 }
 0x2b5   : > { %3095 = vmatprep.mubr.bf16.mxu0 %v2479_v33  ;;  %v2574_v33 = vsel %vm896_vm5, %v15880_v31, %v2419_v25  ;;  %v2445_v1 = vpop.permute.xlu1 %2444 }
 0x2b6   : > { %v2443_v63 = vpop.permute.xlu0 %2442  ;;  %v2594_v58 = vsel %vm896_vm5, %v20544_v11, %v2445_v1  ;;  %v14153_v1 = vld [vmem:[%s20451_s2 + $0x168] sm:$0xff]  }
 0x2b7   : > { %3023 = vmatmul.mubr.bf16.gmra.mrb[128].mxu1 %v2506_v4  ;;  %v2590_v19 = vsel %vm896_vm5, %v15476_v62, %v2443_v63  ;;  %v2515_v62 = vsel %vm896_vm5, %v15762_v32, %v2313_v14  ;;  %v14151_v14 = vld [vmem:[%s20451_s2 + $0x160] sm:$0xff]   ;;  %v14154_v11 = vld [vmem:[%s20451_s2 + $0x128] sm:$0xff]  }
 0x2b8   : > { %3030 = vmatprep.mubr.bf16.mxu1 %v2570_v16  ;;  %12520 = vmatprep.subr.bf16.mxu0 %v14151_v14 }
 0x2b9   : > { %v2449_v52 = vpop.permute.xlu1 %2448 }
 0x2bc   : > { %3096 = vmatmul.mubr.bf16.gmra.mrb[84].mxu0 %v2586_v6 }
 0x2bd   : > { %3103 = vmatprep.mubr.bf16.mxu0 %v15927_v8  ;;  %v2578_v8 = vsel %vm896_vm5, %v15895_v20, %v2421_v30 }
 0x2bf   : > { %3031 = vmatmul.mubr.bf16.gmra.mrb[132].mxu1 %v2509_v37 }
 0x2c0   : > { %3038 = vmatprep.mubr.bf16.mxu1 %v2574_v33 }
 0x2c4   : > { %3104 = vmatmul.mubr.bf16.gmra.mrb[88].mxu0 %v2590_v19 }
 0x2c5   : > { %3111 = vmatprep.mubr.bf16.mxu0 %v15934_v10  ;;  %v2447_v10 = vpop.permute.xlu0 %2446 }
 0x2c6   : > { %v2598_v56 = vsel %vm896_vm5, %v20545_v9, %v2447_v10 }
 0x2c7   : > { %3039 = vmatmul.mubr.bf16.gmra.mrb[136].mxu1 %v2512_v26 }
 0x2c8   : > { %3046 = vmatprep.mubr.bf16.mxu1 %v2578_v8 }
 0x2cc   : > { %3112 = vmatmul.mubr.bf16.gmra.mrb[92].mxu0 %v2594_v58 }
 0x2cd   : > { %3119 = vmatprep.mubr.bf16.mxu0 %v15941_v57  ;;  %v20546_v57 = vld [vmem:[#allocation15_spill] sm:$0xff] }
 0x2ce   : > { %v2602_v32 = vsel %vm896_vm5, %v20546_v57, %v2449_v52 }
 0x2cf   : > { %3047 = vmatmul.mubr.bf16.gmra.mrb[140].mxu1 %v2515_v62 }
 0x2d0   : > { %13788 = vmatprep.mubr.msk.bf16.mxu1 %vm896_vm5, %v15785_v55  ;;  %v2451_v55 = vpop.permute.xlu0 %2450 }
 0x2d4   : > { %3120 = vmatmul.mubr.bf16.gmra.mrb[96].mxu0 %v2598_v56 }
 0x2d5   : > { %3127 = vmatprep.mubr.bf16.mxu0 %v15948_v39  ;;  %v20547_v39 = vld [vmem:[#allocation7_spill] sm:$0xff] }
 0x2d7   : > { %13789 = vmatmul.mubr.msk.bf16.vlgmr.msra.gmra.mrb[144].mxu1 %vm896_vm5, %v15802_v34  ;;  %v2606_v34 = vsel %vm896_vm5, %v20547_v39, %v2451_v55 }
 0x2d8   : > { %13792 = vmatprep.mubr.msk.bf16.mxu1 %vm896_vm5, %v15796_v3  ;;  %v2453_v3 = vpop.permute.xlu1 %2452 }
 0x2dc   : > { %3128 = vmatmul.mubr.bf16.gmra.mrb[100].mxu0 %v2602_v32 }
 0x2dd   : > { %3135 = vmatprep.mubr.bf16.mxu0 %v15955_v17  ;;  %v20548_v17 = vld [vmem:[#allocation8_spill] sm:$0xff] }
 0x2df   : > { %13793 = vmatmul.mubr.msk.bf16.gmra.mrb[148].mxu1 %vm896_vm5, %v15816_v59  ;;  %v2610_v59 = vsel %vm896_vm5, %v20548_v17, %v2453_v3  ;;  %v14155_v17 = vld [vmem:[%s20451_s2 + $0x170] sm:$0xff]  }
 0x2e0   : > { %13796 = vmatprep.mubr.msk.bf16.mxu1 %vm896_vm5, %v15810_v27  ;;  %v2455_v27 = vpop.permute.xlu0 %2454 }
 0x2e4   : > { %3136 = vmatmul.mubr.bf16.gmra.mrb[104].mxu0 %v2606_v34 }
 0x2e5   : > { %3143 = vmatprep.mubr.bf16.mxu0 %v15962_v0  ;;  %v20549_v0 = vld [vmem:[#allocation9_spill] sm:$0xff] }
 0x2e7   : > { %13797 = vmatmul.mubr.msk.bf16.gmra.mrb[152].mxu1 %vm896_vm5, %v15830_v45  ;;  %v2614_v45 = vsel %vm896_vm5, %v20549_v0, %v2455_v27 }
 0x2e8   : > { %13800 = vmatprep.mubr.msk.bf16.mxu1 %vm896_vm5, %v15824_v41  ;;  %v2457_v41 = vpop.permute.xlu1 %2456 }
 0x2ec   : > { %3144 = vmatmul.mubr.bf16.gmra.mrb[108].mxu0 %v2610_v59  ;;  %v14156_v59 = vld [vmem:[%s20451_s2 + $0x130] sm:$0xff]  }
 0x2ed   : > { %3151 = vmatprep.mubr.bf16.mxu0 %v15969_v15 }
 0x2ef   : > { %13801 = vmatmul.mubr.msk.bf16.gmra.mrb[156].mxu1 %vm896_vm5, %v15844_v36  ;;  %v2618_v36 = vsel %vm896_vm5, %v15631_v21, %v2457_v41 }
 0x2f0   : > { %13804 = vmatprep.mubr.msk.bf16.mxu1 %vm896_vm5, %v15838_v12  ;;  %v2459_v12 = vpop.permute.xlu0 %2458 }
 0x2f1   : > { %v2622_v7 = vsel %vm896_vm5, %v15657_v51, %v2459_v12 }
 0x2f4   : > { %3152 = vmatmul.mubr.bf16.gmra.mrb[112].mxu0 %v2614_v45 }
 0x2f5   : > { %3159 = vmatprep.mubr.bf16.mxu0 %v15976_v49 }
 0x2f7   : > { %13805 = vmatmul.mubr.msk.bf16.gmra.mrb[160].mxu1 %vm896_vm5, %v15860_v38  ;;  %v2463_v38 = vpop.permute.xlu0 %2462 }
 0x2f8   : > { %13808 = vmatprep.mubr.msk.bf16.mxu1 %vm896_vm5, %v15853_v53  ;;  %v2461_v53 = vpop.permute.xlu1 %2460  ;;  %v2630_v51 = vsel %vm896_vm5, %v15725_v44, %v2463_v38  ;;  %v14158_v38 = vld [vmem:[%s20451_s2 + $0x138] sm:$0xff]  }
 0x2f9   : > { %v2626_v21 = vsel %vm896_vm5, %v15691_v40, %v2461_v53 }
 0x2fc   : > { %3160 = vmatmul.mubr.bf16.gmra.mrb[116].mxu0 %v2618_v36 }
 0x2fd   : > { %3167 = vmatprep.mubr.bf16.mxu0 %v2506_v4 }
 0x2ff   : > { %13809 = vmatmul.mubr.msk.bf16.gmra.mrb[164].mxu1 %vm896_vm5, %v15883_v18  ;;  %v2471_v18 = vpop.permute.xlu0 %2470 }
 0x300   : > { %13812 = vmatprep.mubr.msk.bf16.mxu1 %vm896_vm5, %v15880_v31  ;;  %v2465_v31 = vpop.permute.xlu1 %2464  ;;  %v2645_v40 = vsel %vm896_vm5, %v15777_v61, %v2471_v18 }
 0x303   : > { %v2469_v44 = vpop.permute.xlu0 %2468 }
 0x304   : > { %3168 = vmatmul.mubr.bf16.gmra.mrb[120].mxu0 %v2622_v7 }
 0x305   : > { %3175 = vmatprep.mubr.bf16.mxu0 %v2509_v37 }
 0x307   : > { %13813 = vmatmul.mubr.msk.bf16.gmra.mrb[168].mxu1 %vm896_vm5, %v15895_v20  ;;  %v2634_v20 = vsel %vm896_vm5, %v15756_v43, %v2465_v31  ;;  %v2642_v43 = vsel %vm896_vm5, %v15898_v2, %v2469_v44  ;;  %v14152_v2 = vld [vmem:[%s20451_s2 + $0x120] sm:$0xff]  }
 0x308   : > { %13816 = vmatprep.mubr.msk.bf16.mxu1 %vm896_vm5, %v15913_v35  ;;  %v2467_v35 = vpop.permute.xlu1 %2466  ;;  %12521 = vmatpush3.bf16.msra.mxu0 %v14152_v2 }
 0x309   : > { %v2638_v13 = vsel %vm896_vm5, %v15770_v29, %v2467_v35  ;;  %12522 = vmatprep.subr.bf16.mxu0 %v14153_v1 }
 0x30c   : > { %3176 = vmatmul.mubr.bf16.gmra.mrb[124].mxu0 %v2626_v21  ;;  %v14157_v21 = vld [vmem:[%s20451_s2 + $0x178] sm:$0xff]  }
 0x30d   : > { %3183 = vmatprep.mubr.bf16.mxu0 %v2512_v26  ;;  %12523 = vmatpush3.bf16.msra.mxu0 %v14154_v11 }
 0x30e   : > { %12524 = vmatprep.subr.bf16.mxu0 %v14155_v17 }
 0x30f   : > { %13817 = vmatmul.mubr.msk.bf16.gmra.mrb[172].mxu1 %vm896_vm5, %v15032_v42 }
 0x311   : > { %12525 = vmatpush3.bf16.msra.mxu0 %v14156_v59 }
 0x312   : > { %12526 = vmatprep.subr.bf16.mxu0 %v14157_v21  ;;  %v14163_v21 = vld [vmem:[%s20451_s2 + $0x190] sm:$0xff]  }
 0x314   : > { %3184 = vmatmul.mubr.bf16.gmra.mrb[128].mxu0 %v2630_v51 }
 0x315   : > { %3191 = vmatprep.mubr.bf16.mxu0 %v2515_v62  ;;  %12527 = vmatpush3.bf16.msra.mxu0 %v14158_v38  ;;  %v14164_v38 = vld [vmem:[%s20451_s2 + $0x150] sm:$0xff]  }
 0x31c   : > { %3192 = vmatmul.mubr.bf16.gmra.mrb[132].mxu0 %v2634_v20 }
 0x31d   : > { %3199 = vmatprep.mubr.bf16.mxu0 %v2645_v40 }
 0x324   : > { %3200 = vmatmul.mubr.bf16.gmra.mrb[136].mxu0 %v2638_v13 }
 0x325   : > { %3207 = vmatprep.mubr.bf16.mxu0 %v15042_v5 }
 0x329   : > { %v12292_v22 = vpop.f32.mrb[80].mxu1 }
 0x32a   : > { %v12293_v28 = vpop.f32.mrb[81].mxu1 }
 0x32b   : > { %v16068_v15 = vadd.f32 %v12293_v28, %v12292_v22  ;;  %v12295_v47 = vpop.f32.mrb[82].mxu1 }
 0x32c   : > { %v12296_v46 = vpop.f32.mrb[83].mxu1  ;;  %3208 = vmatmul.mubr.bf16.gmra.mrb[140].mxu0 %v2642_v43 }
 0x32d   : > { %v16072_v61 = vadd.f32 %v12296_v46, %v12295_v47  ;;  %v14159_v46 = vld [vmem:[%s20451_s2 + $0x180] sm:$0xff]  }
 0x32e   : > { %12528 = vmatprep.subr.bf16.mxu0 %v14159_v46 }
 0x332   : > { %v12298_v25 = vpop.f32.mrb[84].mxu1 }
 0x333   : > { %v12299_v24 = vpop.f32.mrb[85].mxu1 }
 0x334   : > { %v16074_v30 = vadd.f32 %v12299_v24, %v12298_v25  ;;  %v12301_v29 = vpop.f32.mrb[86].mxu1  ;;  %v14160_v25 = vld [vmem:[%s20451_s2 + $0x140] sm:$0xff]  }
 0x335   : > { %v12302_v49 = vpop.f32.mrb[87].mxu1  ;;  %12529 = vmatpush3.bf16.msra.mxu0 %v14160_v25 }
 0x336   : > { %v16076_v54 = vadd.f32 %v12302_v49, %v12301_v29 }
 0x33a   : > { %v12304_v50 = vpop.f32.mrb[88].mxu1 }
 0x33b   : > { %v12305_v48 = vpop.f32.mrb[89].mxu1 }
 0x33c   : > { %v16084_v4 = vadd.f32 %v12305_v48, %v12304_v50  ;;  %v12307_v16 = vpop.f32.mrb[90].mxu1 }
 0x33d   : > { %v12308_v60 = vpop.f32.mrb[91].mxu1 }
 0x33e   : > { %v16086_v6 = vadd.f32 %v12308_v60, %v12307_v16 }
 0x342   : > { %v12310_v37 = vpop.f32.mrb[92].mxu1 }
 0x343   : > { %v12311_v33 = vpop.f32.mrb[93].mxu1 }
 0x344   : > { %v16088_v63 = vadd.f32 %v12311_v33, %v12310_v37  ;;  %v12313_v19 = vpop.f32.mrb[94].mxu1 }
 0x345   : > { %v12314_v26 = vpop.f32.mrb[95].mxu1 }
 0x346   : > { %v16090_v8 = vadd.f32 %v12314_v26, %v12313_v19 }
 0x34a   : > { %v12316_v58 = vpop.f32.mrb[96].mxu1 }
 0x34b   : > { %v12317_v62 = vpop.f32.mrb[97].mxu1 }
 0x34c   : > { %v16098_v10 = vadd.f32 %v12317_v62, %v12316_v58  ;;  %v12319_v9 = vpop.f32.mrb[98].mxu1 }
 0x34d   : > { %v12320_v56 = vpop.f32.mrb[99].mxu1 }
 0x34e   : > { %v16100_v52 = vadd.f32 %v12320_v56, %v12319_v9  ;;  %v14161_v9 = vld [vmem:[%s20451_s2 + $0x188] sm:$0xff]  }
 0x34f   : > { %v14162_v56 = vld [vmem:[%s20451_s2 + $0x148] sm:$0xff]   ;;  %12530 = vmatprep.subr.bf16.mxu0 %v14161_v9 }
 0x350   : > { %12531 = vmatpush3.bf16.msra.mxu0 %v14162_v56 }
 0x351   : > { %12532 = vmatprep.subr.bf16.mxu0 %v14163_v21 }
 0x352   : > { %v12322_v57 = vpop.f32.mrb[100].mxu1 }
 0x353   : > { %v12323_v32 = vpop.f32.mrb[101].mxu1 }
 0x354   : > { %v16102_v55 = vadd.f32 %v12323_v32, %v12322_v57  ;;  %v12325_v39 = vpop.f32.mrb[102].mxu1  ;;  %12533 = vmatpush3.bf16.msra.mxu0 %v14164_v38 }
 0x355   : > { %v12326_v34 = vpop.f32.mrb[103].mxu1 }
 0x356   : > { %v16104_v3 = vadd.f32 %v12326_v34, %v12325_v39 }
 0x35a   : > { %v12328_v27 = vpop.f32.mrb[104].mxu1 }
 0x35b   : > { %v12329_v0 = vpop.f32.mrb[105].mxu1 }
 0x35c   : > { %v16112_v45 = vadd.f32 %v12329_v0, %v12328_v27  ;;  %v12331_v41 = vpop.f32.mrb[106].mxu1 }
 0x35d   : > { %v12332_v36 = vpop.f32.mrb[107].mxu1 }
 0x35e   : > { %v16114_v12 = vadd.f32 %v12332_v36, %v12331_v41 }
 0x362   : > { %v12334_v7 = vpop.f32.mrb[108].mxu1 }
 0x363   : > { %v12335_v53 = vpop.f32.mrb[109].mxu1 }
 0x364   : > { %v16122_v51 = vadd.f32 %v12335_v53, %v12334_v7  ;;  %v12337_v31 = vpop.f32.mrb[110].mxu1 }
 0x365   : > { %v12338_v18 = vpop.f32.mrb[111].mxu1 }
 0x366   : > { %v16124_v20 = vadd.f32 %v12338_v18, %v12337_v31 }
 0x36a   : > { %v12340_v40 = vpop.f32.mrb[112].mxu1 }
 0x36b   : > { %v12341_v35 = vpop.f32.mrb[113].mxu1 }
 0x36c   : > { %v16126_v13 = vadd.f32 %v12341_v35, %v12340_v40  ;;  %v12343_v44 = vpop.f32.mrb[114].mxu1 }
 0x36d   : > { %v12344_v22 = vpop.f32.mrb[115].mxu1 }
 0x36e   : > { %v16128_v28 = vadd.f32 %v12344_v22, %v12343_v44 }
 0x372   : > { %v12346_v47 = vpop.f32.mrb[116].mxu1 }
 0x373   : > { %v12347_v43 = vpop.f32.mrb[117].mxu1 }
 0x374   : > { %v16136_v24 = vadd.f32 %v12347_v43, %v12346_v47  ;;  %v12349_v29 = vpop.f32.mrb[118].mxu1 }
 0x375   : > { %v12350_v49 = vpop.f32.mrb[119].mxu1 }
 0x376   : > { %v16138_v14 = vadd.f32 %v12350_v49, %v12349_v29 }
 0x37a   : > { %v12352_v2 = vpop.f32.mrb[120].mxu1 }
 0x37b   : > { %v12353_v50 = vpop.f32.mrb[121].mxu1 }
 0x37c   : > { %v16140_v48 = vadd.f32 %v12353_v50, %v12352_v2  ;;  %v12355_v16 = vpop.f32.mrb[122].mxu1 }
 0x37d   : > { %v12356_v60 = vpop.f32.mrb[123].mxu1 }
 0x37e   : > { %v16142_v37 = vadd.f32 %v12356_v60, %v12355_v16 }
 0x382   : > { %v12358_v33 = vpop.f32.mrb[124].mxu1 }
 0x383   : > { %v12359_v19 = vpop.f32.mrb[125].mxu1 }
 0x384   : > { %v16144_v26 = vadd.f32 %v12359_v19, %v12358_v33  ;;  %v12361_v1 = vpop.f32.mrb[126].mxu1 }
 0x385   : > { %v12362_v11 = vpop.f32.mrb[127].mxu1 }
 0x386   : > { %v16146_v58 = vadd.f32 %v12362_v11, %v12361_v1 }
 0x387   : > { %v12404_v62 = vpop.f32.mrb[80].mxu0 }
 0x388   : > { %v12405_v57 = vpop.f32.mrb[81].mxu0 }
 0x389   : > { %v12406_v32 = vadd.f32 %v12405_v57, %v12404_v62  ;;  %v12407_v39 = vpop.f32.mrb[82].mxu0  ;;  %v14165_v57 = vld [vmem:[%s20451_s2 + $0x198] sm:$0xff]  }
 0x38a   : > { %v12364_v34 = vpop.f32.mrb[128].mxu1  ;;  %v12408_v17 = vpop.f32.mrb[83].mxu0  ;;  %12534 = vmatprep.subr.bf16.mxu0 %v14165_v57 }
 0x38b   : > { %v12365_v59 = vpop.f32.mrb[129].mxu1  ;;  %v12409_v27 = vadd.f32 %v12408_v17, %v12407_v39  ;;  %v16155_v0 = vadd.f32 %v12406_v32, %v16068_v15 }
 0x38c   : > { %v16157_v41 = vadd.f32 %v12365_v59, %v12364_v34  ;;  %v12367_v36 = vpop.f32.mrb[130].mxu1 }
 0x38d   : > { %v12368_v7 = vpop.f32.mrb[131].mxu1  ;;  %v16160_v53 = vadd.f32 %v12409_v27, %v16072_v61 }
 0x38e   : > { %v16168_v31 = vadd.f32 %v12368_v7, %v12367_v36 }
 0x38f   : > { %v12410_v18 = vpop.f32.mrb[84].mxu0 }
 0x390   : > { %v12411_v15 = vpop.f32.mrb[85].mxu0 }
 0x391   : > { %v12412_v40 = vadd.f32 %v12411_v15, %v12410_v18  ;;  %v12413_v35 = vpop.f32.mrb[86].mxu0 }
 0x392   : > { %v12370_v44 = vpop.f32.mrb[132].mxu1  ;;  %v12414_v22 = vpop.f32.mrb[87].mxu0 }
 0x393   : > { %v12371_v61 = vpop.f32.mrb[133].mxu1  ;;  %v12415_v47 = vadd.f32 %v12414_v22, %v12413_v35  ;;  %v3098_v43 = vadd.f32 %v12412_v40, %v16074_v30 }
 0x394   : > { %v16171_v46 = vadd.f32 %v12371_v61, %v12370_v44  ;;  %v12373_v25 = vpop.f32.mrb[134].mxu1 }
 0x395   : > { %v12374_v29 = vpop.f32.mrb[135].mxu1  ;;  %v3101_v49 = vadd.f32 %v12415_v47, %v16076_v54  ;;  %v14166_v54 = vld [vmem:[%s20451_s2 + $0x158] sm:$0xff]  }
 0x396   : > { %v16174_v2 = vadd.f32 %v12374_v29, %v12373_v25  ;;  %12535 = vmatpush3.bf16.msra.mxu0 %v14166_v54 }
 0x397   : > { %v12416_v50 = vpop.f32.mrb[88].mxu0 }
 0x398   : > { %v12417_v16 = vpop.f32.mrb[89].mxu0 }
 0x399   : > { %v12418_v60 = vadd.f32 %v12417_v16, %v12416_v50  ;;  %v12419_v33 = vpop.f32.mrb[90].mxu0 }
 0x39a   : > { %v12376_v19 = vpop.f32.mrb[136].mxu1  ;;  %v12420_v1 = vpop.f32.mrb[91].mxu0 }
 0x39b   : > { %v12377_v11 = vpop.f32.mrb[137].mxu1  ;;  %v12421_v62 = vadd.f32 %v12420_v1, %v12419_v33  ;;  %v3106_v9 = vadd.f32 %v12418_v60, %v16084_v4 }
 0x39c   : > { %v16177_v56 = vadd.f32 %v12377_v11, %v12376_v19  ;;  %v12379_v30 = vpop.f32.mrb[138].mxu1 }
 0x39d   : > { %v12380_v32 = vpop.f32.mrb[139].mxu1  ;;  %v16186_v39 = vadd.f32 %v12421_v62, %v16086_v6 }
 0x39e   : > { %v16188_v34 = vadd.f32 %v12380_v32, %v12379_v30 }
 0x39f   : > { %v12422_v17 = vpop.f32.mrb[92].mxu0 }
 0x3a0   : > { %v12423_v4 = vpop.f32.mrb[93].mxu0 }
 0x3a1   : > { %v12424_v59 = vadd.f32 %v12423_v4, %v12422_v17  ;;  %v12425_v27 = vpop.f32.mrb[94].mxu0 }
 0x3a2   : > { %v12382_v36 = vpop.f32.mrb[140].mxu1  ;;  %v12426_v7 = vpop.f32.mrb[95].mxu0 }
 0x3a3   : > { %v12383_v21 = vpop.f32.mrb[141].mxu1  ;;  %v12427_v38 = vadd.f32 %v12426_v7, %v12425_v27  ;;  %v3114_v18 = vadd.f32 %v12424_v59, %v16088_v63 }
 0x3a4   : > { %v16191_v15 = vadd.f32 %v12383_v21, %v12382_v36  ;;  %v12385_v40 = vpop.f32.mrb[142].mxu1 }
 0x3a5   : > { %v12386_v35 = vpop.f32.mrb[143].mxu1  ;;  %v3117_v6 = vadd.f32 %v12427_v38, %v16090_v8 }
 0x3a6   : > { %v16194_v44 = vadd.f32 %v12386_v35, %v12385_v40 }
 0x3a7   : > { %v12428_v22 = vpop.f32.mrb[96].mxu0 }
 0x3a8   : > { %v12429_v61 = vpop.f32.mrb[97].mxu0 }
 0x3a9   : > { %v12430_v47 = vadd.f32 %v12429_v61, %v12428_v22  ;;  %v12431_v25 = vpop.f32.mrb[98].mxu0 }
 0x3aa   : > { %v13790_v29 = vpop.f32.mrb[144].mxu1  ;;  %v12432_v50 = vpop.f32.mrb[99].mxu0 }
 0x3ab   : > { %v3259_v16 = vadd.f32 %v13790_v29, %v3098_v43  ;;  %v12433_v60 = vadd.f32 %v12432_v50, %v12431_v25  ;;  %v3250_v33 = vpop.f32.mrb[145].mxu1  ;;  %v16197_v19 = vadd.f32 %v12430_v47, %v16098_v10  ;;  %v14167_v43 = vld [vmem:[%s20451_s2 + $0x220] sm:$0xff]  }
 0x3ac   : > { %v3251_v63 = vadd.f32 %v3250_v33, %v16155_v0  ;;  %v13791_v1 = vpop.f32.mrb[146].mxu1  ;;  %13820 = vmatprep.subr.bf16.mxu0 %v14167_v43 }
 0x3ad   : > { %v3262_v11 = vadd.f32 %v13791_v1, %v3101_v49  ;;  %v3253_v62 = vpop.f32.mrb[147].mxu1  ;;  %v16201_v8 = vadd.f32 %v12433_v60, %v16100_v52  ;;  %v3379_v57 = vmax.f32 %v3259_v16, 0.0 }
 0x3ae   : > { %v3254_v30 = vadd.f32 %v3253_v62, %v16160_v53  ;;  %v3377_v17 = vmax.f32 %v3251_v63, 0.0 }
 0x3af   : > { %v3380_v54 = vmax.f32 %v3262_v11, 0.0  ;;  %v12434_v32 = vpop.f32.mrb[100].mxu0 }
 0x3b0   : > { %v3378_v10 = vmax.f32 %v3254_v30, 0.0  ;;  %v12435_v4 = vpop.f32.mrb[101].mxu0 }
 0x3b1   : > { %v3410_v59 = vpack.c.bf16 %v3380_v54, %v3379_v57  ;;  %v12436_v0 = vadd.f32 %v12435_v4, %v12434_v32  ;;  %v12437_v27 = vpop.f32.mrb[102].mxu0 }
 0x3b2   : > { %v3409_v49 = vpack.c.bf16 %v3378_v10, %v3377_v17  ;;  %v13794_v36 = vpop.f32.mrb[148].mxu1  ;;  %v12438_v52 = vpop.f32.mrb[103].mxu0 }
 0x3b3   : > { %v3433_v7 = vshrl.u32 %v3410_v59, 16  ;;  %v3275_v21 = vadd.f32 %v13794_v36, %v3114_v18  ;;  %v12439_v53 = vadd.f32 %v12438_v52, %v12437_v27  ;;  %v3266_v38 = vpop.f32.mrb[149].mxu1  ;;  %v3130_v61 = vadd.f32 %v12436_v0, %v16102_v55 }
 0x3b4   : > { %v3426_v40 = vshrl.u32 %v3409_v49, 16  ;;  %v3267_v35 = vadd.f32 %v3266_v38, %v3106_v9  ;;  %v13795_v22 = vpop.f32.mrb[150].mxu1  ;;  %v3436_v25 = vshll.u32 %v3410_v59, 16  ;;  %v3429_v33 = vshll.u32 %v3409_v49, 16 }
 0x3b5   : > { %v3435_v47 = vrot.slane %v3433_v7, 7  ;;  %v3278_v29 = vadd.f32 %v13795_v22, %v3117_v6  ;;  %v3269_v50 = vpop.f32.mrb[151].mxu1  ;;  %v3133_v16 = vadd.f32 %v12439_v53, %v16104_v3  ;;  %v3383_v1 = vmax.f32 %v3275_v21, 0.0 }
 0x3b6   : > { %v3428_v60 = vrot.slane %v3426_v40, 7  ;;  %v3270_v63 = vadd.f32 %v3269_v50, %v16186_v39  ;;  %v3381_v30 = vmax.f32 %v3267_v35, 0.0 }
 0x3b7   : > { %v3384_v11 = vmax.f32 %v3278_v29, 0.0  ;;  %v12440_v18 = vpop.f32.mrb[104].mxu0  ;;  %v3438_v62 = vor.u32 %v3436_v25, %v3435_v47  ;;  %v16212_v9 = vsel %vm14512_vm2, %v3435_v47, 0 }
 0x3b8   : > { %v3382_v55 = vmax.f32 %v3270_v63, 0.0  ;;  %v12441_v57 = vpop.f32.mrb[105].mxu0  ;;  %v3431_v54 = vor.u32 %v3429_v33, %v3428_v60  ;;  %v16216_v6 = vsel %vm14512_vm2, %v3428_v60, 0  ;;  %v3694_v17 = vshll.u32 %v16212_v9, 16 }
 0x3b9   : > { %v3412_v3 = vpack.c.bf16 %v3384_v11, %v3383_v1  ;;  %v12442_v32 = vadd.f32 %v12441_v57, %v12440_v18  ;;  %v12443_v43 = vpop.f32.mrb[106].mxu0  ;;  %v16220_v39 = vsel %vm14512_vm2, 0, %v3438_v62  ;;  %v3682_v27 = vshll.u32 %v16216_v6, 16 }
 0x3ba   : > { %v3411_v10 = vpack.c.bf16 %v3382_v55, %v3381_v30  ;;  %v13798_v4 = vpop.f32.mrb[152].mxu1  ;;  %3962 = vrot.lane.b32.xlu0 %v16220_v39, %s14434_s22  ;;  %v12444_v59 = vpop.f32.mrb[107].mxu0  ;;  %v16227_v0 = vsel %vm14512_vm2, 0, %v3431_v54  ;;  %v3687_v49 = vshrl.u32 %v16220_v39, 16  ;;  %v3689_v53 = vshll.u32 %v16220_v39, 16 }
 0x3bb   : > { %v3447_v36 = vshrl.u32 %v3412_v3, 16  ;;  %v3291_v52 = vadd.f32 %v13798_v4, %v3130_v61  ;;  %v12445_v7 = vadd.f32 %v12444_v59, %v12443_v43  ;;  %v3282_v21 = vpop.f32.mrb[153].mxu1  ;;  %3960 = vrot.lane.b32.xlu1 %v16227_v0, %s14434_s22  ;;  %v3450_v38 = vshll.u32 %v3412_v3, 16 }
 0x3bc   : > { %v3440_v40 = vshrl.u32 %v3411_v10, 16  ;;  %v3443_v35 = vshll.u32 %v3411_v10, 16  ;;  %v3283_v22 = vadd.f32 %v3282_v21, %v16197_v19  ;;  %v13799_v47 = vpop.f32.mrb[154].mxu1  ;;  %v3675_v60 = vshrl.u32 %v16227_v0, 16 }
 0x3bd   : > { %v3449_v25 = vrot.slane %v3447_v36, 7  ;;  %v3294_v29 = vadd.f32 %v13799_v47, %v3133_v16  ;;  %v3285_v50 = vpop.f32.mrb[155].mxu1  ;;  %v3677_v61 = vshll.u32 %v16227_v0, 16  ;;  %v3387_v63 = vmax.f32 %v3291_v52, 0.0 }
 0x3be   : > { %v3442_v33 = vrot.slane %v3440_v40, 7  ;;  %v3385_v1 = vmax.f32 %v3283_v22, 0.0  ;;  %v3286_v11 = vadd.f32 %v3285_v50, %v16201_v8  ;;  %v3138_v55 = vadd.f32 %v12442_v32, %v16112_v45 }
 0x3bf   : > { %v3388_v18 = vmax.f32 %v3294_v29, 0.0  ;;  %v12446_v62 = vpop.f32.mrb[108].mxu0  ;;  %v3679_v30 = vrot.slane %v3677_v61, 1  ;;  %v3141_v19 = vadd.f32 %v12445_v7, %v16114_v12  ;;  %v3684_v16 = vrot.slane %v3682_v27, 1 }
 0x3c0   : > { %v3386_v57 = vmax.f32 %v3286_v11, 0.0  ;;  %v12447_v54 = vpop.f32.mrb[109].mxu0  ;;  %v3445_v3 = vor.u32 %v3443_v35, %v3442_v33  ;;  %v3691_v43 = vrot.slane %v3689_v53, 1  ;;  %v3696_v52 = vrot.slane %v3694_v17, 1 }
 0x3c1   : > { %v16240_v10 = vpack.c.bf16 %v3388_v18, %v3387_v63  ;;  %v12448_v4 = vadd.f32 %v12447_v54, %v12446_v62  ;;  %v12449_v59 = vpop.f32.mrb[110].mxu0  ;;  %v3680_v36 = vor.u32 %v3679_v30, %v3675_v60  ;;  %v3452_v12 = vor.u32 %v3450_v38, %v3449_v25 }
 0x3c2   : > { %v3413_v21 = vpack.c.bf16 %v3386_v57, %v3385_v1  ;;  %v13802_v8 = vpop.f32.mrb[156].mxu1  ;;  %v12450_v40 = vpop.f32.mrb[111].mxu0  ;;  %v16244_v22 = vsel %vm14512_vm2, 0, %v3445_v3  ;;  %v3692_v45 = vor.u32 %v3691_v43, %v3687_v49  ;;  %v16255_v17 = vsel %vm14512_vm2, %v3442_v33, 0 }
 0x3c3   : > { %v3461_v32 = vshrl.u32 %v16240_v10, 16  ;;  %v3146_v27 = vadd.f32 %v12448_v4, %v16122_v51  ;;  %v16249_v7 = vsel %vm507_vm3, %v3680_v36, %v3684_v16  ;;  %v3298_v53 = vpop.f32.mrb[157].mxu1  ;;  %3964 = vrot.lane.b32.xlu0 %v16244_v22, %s14434_s22  ;;  %v3464_v35 = vshll.u32 %v16240_v10, 16 }
 0x3c4   : > { %20550 = vst [vmem:[#allocation11_spill] sm:$0xff] %v16249_v7  ;;  %v3454_v47 = vshrl.u32 %v3413_v21, 16  ;;  %3854 = vrot.lane.b32.xlu1 %v16249_v7, %s14434_s22  ;;  %v12451_v49 = vadd.f32 %v12450_v40, %v12449_v59  ;;  %v3299_v38 = vadd.f32 %v3298_v53, %v3138_v55  ;;  %v13803_v51 = vpop.f32.mrb[158].mxu1  ;;  %v3457_v50 = vshll.u32 %v3413_v21, 16 }
 0x3c5   : > { %v16260_v29 = vrot.slane %v3461_v32, 7  ;;  %v3307_v60 = vadd.f32 %v13802_v8, %v3146_v27  ;;  %v3301_v61 = vpop.f32.mrb[159].mxu1  ;;  %v16263_v63 = vsel %vm507_vm3, %v3692_v45, %v3696_v52  ;;  %v16268_v18 = vsel %vm14512_vm2, 0, %v3452_v12 }
 0x3c6   : > { %20551 = vst [vmem:[#allocation14_spill] sm:$0xff] %v16263_v63  ;;  %v3456_v1 = vrot.slane %v3454_v47, 7  ;;  %v3149_v33 = vadd.f32 %v12451_v49, %v16124_v20  ;;  %v3302_v11 = vadd.f32 %v3301_v61, %v3141_v19  ;;  %v3389_v30 = vmax.f32 %v3299_v38, 0.0 }
 0x3c7   : > { %v3391_v62 = vmax.f32 %v3307_v60, 0.0  ;;  %3966 = vrot.lane.b32.xlu0 %v16268_v18, %s14434_s22  ;;  %v12452_v55 = vpop.f32.mrb[112].mxu0  ;;  %v3701_v57 = vshll.u32 %v16244_v22, 16  ;;  %v3706_v54 = vshll.u32 %v16255_v17, 16  ;;  %v16278_v43 = vsel %vm14512_vm2, %v3449_v25, 0 }
 0x3c8   : > { %v3310_v16 = vadd.f32 %v13803_v51, %v3149_v33  ;;  %v3390_v3 = vmax.f32 %v3302_v11, 0.0  ;;  %3856 = vrot.lane.b32.xlu1 %v16263_v63, %s14434_s22  ;;  %v12453_v20 = vpop.f32.mrb[113].mxu0  ;;  %v3459_v19 = vor.u32 %v3457_v50, %v3456_v1  ;;  %v3699_v59 = vshrl.u32 %v16244_v22, 16 }
 0x3c9   : > { %v12454_v10 = vadd.f32 %v12453_v20, %v12452_v55  ;;  %v12455_v4 = vpop.f32.mrb[114].mxu0  ;;  %v3703_v36 = vrot.slane %v3701_v57, 1  ;;  %v3708_v52 = vrot.slane %v3706_v54, 1  ;;  %v3713_v32 = vshll.u32 %v16268_v18, 16 }
 0x3ca   : > { %v3392_v21 = vmax.f32 %v3310_v16, 0.0  ;;  %v3415_v8 = vpack.c.bf16 %v3390_v3, %v3389_v30  ;;  %v13806_v40 = vpop.f32.mrb[160].mxu1  ;;  %v12456_v45 = vpop.f32.mrb[115].mxu0  ;;  %v16283_v12 = vsel %vm14512_vm2, 0, %v3459_v19  ;;  %v3718_v49 = vshll.u32 %v16278_v43, 16 }
 0x3cb   : > { %v3704_v27 = vor.u32 %v3703_v36, %v3699_v59  ;;  %v12457_v53 = vadd.f32 %v12456_v45, %v12455_v4  ;;  %v3154_v25 = vadd.f32 %v12454_v10, %v16126_v13  ;;  %v3314_v47 = vpop.f32.mrb[161].mxu1  ;;  %3968 = vrot.lane.b32.xlu0 %v16283_v12, %s14434_s22  ;;  %v3711_v60 = vshrl.u32 %v16268_v18, 16 }
 0x3cc   : > { %v3416_v38 = vpack.c.bf16 %v3392_v21, %v3391_v62  ;;  %v3468_v51 = vshrl.u32 %v3415_v8, 16  ;;  %v13807_v50 = vpop.f32.mrb[162].mxu1  ;;  %v3715_v61 = vrot.slane %v3713_v32, 1  ;;  %v3471_v33 = vshll.u32 %v3415_v8, 16 }
 0x3cd   : > { %v16292_v11 = vsel %vm507_vm3, %v3704_v27, %v3708_v52  ;;  %v3315_v30 = vadd.f32 %v3314_v47, %v3154_v25  ;;  %v3157_v55 = vadd.f32 %v12457_v53, %v16128_v28  ;;  %v3317_v13 = vpop.f32.mrb[163].mxu1  ;;  %v3720_v62 = vrot.slane %v3718_v49, 1 }
 0x3ce   : > { %20552 = vst [vmem:[#allocation17_spill] sm:$0xff] %v16292_v11  ;;  %v3475_v57 = vshrl.u32 %v3416_v38, 16  ;;  %v3470_v54 = vrot.slane %v3468_v51, 7  ;;  %3858 = vrot.lane.b32.xlu1 %v16292_v11, %s14434_s22  ;;  %v3716_v16 = vor.u32 %v3715_v61, %v3711_v60  ;;  %v3478_v3 = vshll.u32 %v3416_v38, 16 }
 0x3cf   : > { %v3318_v20 = vadd.f32 %v3317_v13, %v3157_v55  ;;  %v3466_v19 = vor.u32 %v3464_v35, %v16260_v29  ;;  %v12458_v10 = vpop.f32.mrb[116].mxu0  ;;  %v16300_v4 = vsel %vm14512_vm2, %v3456_v1, 0  ;;  %v3393_v36 = vmax.f32 %v3315_v30, 0.0 }
 0x3d0   : > { %v3477_v59 = vrot.slane %v3475_v57, 7  ;;  %v16303_v28 = vsel %vm507_vm3, %v3716_v16, %v3720_v62  ;;  %v12459_v52 = vpop.f32.mrb[117].mxu0  ;;  %v3725_v21 = vshll.u32 %v16283_v12, 16  ;;  %v3730_v27 = vshll.u32 %v16300_v4, 16 }
 0x3d1   : > { %20553 = vst [vmem:[#allocation10_spill] sm:$0xff] %v16303_v28  ;;  %v3394_v8 = vmax.f32 %v3318_v20, 0.0  ;;  %v16308_v45 = vsel %vm14512_vm2, 0, %v3466_v19  ;;  %v12460_v32 = vadd.f32 %v12459_v52, %v12458_v10  ;;  %v12461_v35 = vpop.f32.mrb[118].mxu0  ;;  %v3723_v53 = vshrl.u32 %v16283_v12, 16 }
 0x3d2   : > { %3860 = vrot.lane.b32.xlu1 %v16303_v28, %s14434_s22  ;;  %3970 = vrot.lane.b32.xlu0 %v16308_v45, %s14434_s22  ;;  %v16315_v1 = vpop.f32.mrb[164].mxu1  ;;  %v3727_v25 = vrot.slane %v3725_v21, 1  ;;  %v12462_v47 = vpop.f32.mrb[119].mxu0  ;;  %v3473_v49 = vor.u32 %v3471_v33, %v3470_v54  ;;  %v16321_v38 = vsel %vm14512_vm2, %v16260_v29, 0  ;;  %v3732_v61 = vrot.slane %v3730_v27, 1 }
 0x3d3   : > { %v3417_v51 = vpack.c.bf16 %v3394_v8, %v3393_v36  ;;  %v3162_v60 = vadd.f32 %v12460_v32, %v16136_v24  ;;  %v12463_v30 = vadd.f32 %v12462_v47, %v12461_v35  ;;  %v3330_v55 = vpop.f32.mrb[165].mxu1  ;;  %v3737_v33 = vshll.u32 %v16308_v45, 16 }
 0x3d4   : > { %v3728_v13 = vor.u32 %v3727_v25, %v3723_v53  ;;  %v16326_v57 = vsel %vm14512_vm2, 0, %v3473_v49  ;;  %v16328_v16 = vpop.f32.mrb[166].mxu1  ;;  %v3742_v62 = vshll.u32 %v16321_v38, 16  ;;  %v3735_v24 = vshrl.u32 %v16308_v45, 16 }
 0x3d5   : > { %v3482_v20 = vshrl.u32 %v3417_v51, 16  ;;  %v3323_v29 = vadd.f32 %v13806_v40, %v3162_v60  ;;  %v3165_v19 = vadd.f32 %v12463_v30, %v16138_v14  ;;  %v3333_v10 = vpop.f32.mrb[167].mxu1  ;;  %v3485_v36 = vshll.u32 %v3417_v51, 16 }
 0x3d6   : > { %v16335_v52 = vsel %vm507_vm3, %v3728_v13, %v3732_v61  ;;  %3972 = vrot.lane.b32.xlu0 %v16326_v57, %s14434_s22  ;;  %v3739_v21 = vrot.slane %v3737_v33, 1  ;;  %v3480_v8 = vor.u32 %v3478_v3, %v3477_v59  ;;  %v3744_v40 = vrot.slane %v3742_v62, 1 }
 0x3d7   : > { %20554 = vst [vmem:[#allocation13_spill] sm:$0xff] %v16335_v52  ;;  %v3484_v32 = vrot.slane %v3482_v20, 7  ;;  %3862 = vrot.lane.b32.xlu1 %v16335_v52, %s14434_s22  ;;  %v3326_v35 = vadd.f32 %v13807_v50, %v3165_v19  ;;  %v12464_v27 = vpop.f32.mrb[120].mxu0  ;;  %v16343_v14 = vsel %vm14512_vm2, %v3470_v54, 0  ;;  %v3395_v53 = vmax.f32 %v3323_v29, 0.0 }
 0x3d8   : > { %v3740_v25 = vor.u32 %v3739_v21, %v3735_v24  ;;  %v16347_v47 = vsel %vm14512_vm2, 0, %v3480_v8  ;;  %v12465_v49 = vpop.f32.mrb[121].mxu0  ;;  %v3749_v3 = vshll.u32 %v16326_v57, 16  ;;  %v3754_v50 = vshll.u32 %v16343_v14, 16 }
 0x3d9   : > { %v3396_v51 = vmax.f32 %v3326_v35, 0.0  ;;  %v12466_v60 = vadd.f32 %v12465_v49, %v12464_v27  ;;  %v12467_v61 = vpop.f32.mrb[122].mxu0  ;;  %v3487_v30 = vor.u32 %v3485_v36, %v3484_v32  ;;  %v3747_v33 = vshrl.u32 %v16326_v57, 16 }
 0x3da   : > { %v16352_v13 = vsel %vm507_vm3, %v3740_v25, %v3744_v40  ;;  %3974 = vrot.lane.b32.xlu0 %v16347_v47, %s14434_s22  ;;  %v16356_v54 = vpop.f32.mrb[168].mxu1  ;;  %v3751_v62 = vrot.slane %v3749_v3, 1  ;;  %v12468_v20 = vpop.f32.mrb[123].mxu0  ;;  %v16361_v29 = vsel %vm14512_vm2, %v3477_v59, 0  ;;  %v3756_v36 = vrot.slane %v3754_v50, 1 }
 0x3db   : > { %20555 = vst [vmem:[#allocation16_spill] sm:$0xff] %v16352_v13  ;;  %v3418_v19 = vpack.c.bf16 %v3396_v51, %v3395_v53  ;;  %3864 = vrot.lane.b32.xlu1 %v16352_v13, %s14434_s22  ;;  %v3170_v24 = vadd.f32 %v12466_v60, %v16140_v48  ;;  %v12469_v21 = vadd.f32 %v12468_v20, %v12467_v61  ;;  %v16366_v8 = vpop.f32.mrb[169].mxu1  ;;  %v16372_v27 = vsel %vm14512_vm2, 0, %v3487_v30 }
 0x3dc   : > { %v3752_v35 = vor.u32 %v3751_v62, %v3747_v33  ;;  %v16368_v40 = vpop.f32.mrb[170].mxu1  ;;  %v3761_v59 = vshll.u32 %v16347_v47, 16  ;;  %v3766_v53 = vshll.u32 %v16361_v29, 16  ;;  %v16381_v48 = vsel %vm14512_vm2, %v3484_v32, 0 }
 0x3dd   : > { %v3331_v25 = vadd.f32 %v3330_v55, %v3170_v24  ;;  %v3173_v49 = vadd.f32 %v12469_v21, %v16142_v37  ;;  %v16377_v3 = vpop.f32.mrb[171].mxu1  ;;  %v3759_v60 = vshrl.u32 %v16347_v47, 16  ;;  %v3773_v50 = vshll.u32 %v16372_v27, 16 }
 0x3de   : > { %v16384_v51 = vsel %vm507_vm3, %v3752_v35, %v3756_v36  ;;  %3976 = vrot.lane.b32.xlu0 %v16372_v27, %s14434_s22  ;;  %v3763_v61 = vrot.slane %v3761_v59, 1  ;;  %v3771_v30 = vshrl.u32 %v16372_v27, 16  ;;  %v3778_v32 = vshll.u32 %v16381_v48, 16 }
 0x3df   : > { %20556 = vst [vmem:[#allocation18_spill] sm:$0xff] %v16384_v51  ;;  %3866 = vrot.lane.b32.xlu1 %v16384_v51, %s14434_s22  ;;  %v3334_v37 = vadd.f32 %v3333_v10, %v3173_v49  ;;  %v12470_v55 = vpop.f32.mrb[124].mxu0  ;;  %v3489_v33 = vshrl.u32 %v3418_v19, 16  ;;  %v3397_v62 = vmax.f32 %v3331_v25, 0.0  ;;  %v3768_v24 = vrot.slane %v3766_v53, 1 }
 0x3e0   : > { %v3764_v20 = vor.u32 %v3763_v61, %v3759_v60  ;;  %v12471_v36 = vpop.f32.mrb[125].mxu0  ;;  %v3775_v21 = vrot.slane %v3773_v50, 1  ;;  %v3492_v28 = vshll.u32 %v3418_v19, 16  ;;  %v3780_v51 = vrot.slane %v3778_v32, 1 }
 0x3e1   : > { %v3398_v35 = vmax.f32 %v3334_v37, 0.0  ;;  %v12472_v13 = vadd.f32 %v12471_v36, %v12470_v55  ;;  %v12473_v59 = vpop.f32.mrb[126].mxu0  ;;  %v3491_v52 = vrot.slane %v3489_v33, 7 }
 0x3e2   : > { %v16395_v11 = vsel %vm507_vm3, %v3764_v20, %v3768_v24  ;;  %v12474_v10 = vpop.f32.mrb[127].mxu0  ;;  %v3776_v49 = vor.u32 %v3775_v21, %v3771_v30  ;;  %v16397_v63 = vpop.f32.mrb[172].mxu1 }
 0x3e3   : > { %v3419_v7 = vpack.c.bf16 %v3398_v35, %v3397_v62  ;;  %3868 = vrot.lane.b32.xlu1 %v16395_v11, %s14434_s22  ;;  %v3178_v53 = vadd.f32 %v12472_v13, %v16144_v26  ;;  %v12475_v25 = vadd.f32 %v12474_v10, %v12473_v59  ;;  %v3494_v60 = vor.u32 %v3492_v28, %v3491_v52  ;;  %v16402_v61 = vpop.f32.mrb[173].mxu1  ;;  %v14169_v10 = vld [vmem:[%s20451_s2 + $0x1e0] sm:$0xff]  }
 0x3e4   : > { %v16405_v19 = vsel %vm507_vm3, %v3776_v49, %v3780_v51  ;;  %v16409_v50 = vsel %vm14512_vm2, %v3491_v52, 0  ;;  %v16411_v37 = vpop.f32.mrb[174].mxu1  ;;  %12632 = vmatprep.subr.bf16.mxu1 %v14169_v10 }
 0x3e5   : > { %v3339_v55 = vadd.f32 %v16315_v1, %v3178_v53  ;;  %v3181_v30 = vadd.f32 %v12475_v25, %v16146_v58  ;;  %v16417_v26 = vsel %vm14512_vm2, 0, %v3494_v60  ;;  %v16419_v28 = vpop.f32.mrb[175].mxu1  ;;  %v3790_v52 = vshll.u32 %v16409_v50, 16 }
 0x3e6   : > { %3978 = vrot.lane.b32.xlu0 %v16417_v26, %s14434_s22  ;;  %v3785_v13 = vshll.u32 %v16417_v26, 16  ;;  %v3496_v51 = vshrl.u32 %v3419_v7, 16  ;;  %v3783_v33 = vshrl.u32 %v16417_v26, 16  ;;  %v3499_v24 = vshll.u32 %v3419_v7, 16 }
 0x3e7   : > { %v3342_v32 = vadd.f32 %v16328_v16, %v3181_v30  ;;  %3870 = vrot.lane.b32.xlu1 %v16405_v19, %s14434_s22  ;;  %v12476_v58 = vpop.f32.mrb[128].mxu0  ;;  %v3399_v36 = vmax.f32 %v3339_v55, 0.0  ;;  %v14170_v16 = vld [vmem:[%s20451_s2 + $0x1a0] sm:$0xff]   ;;  %v3792_v25 = vrot.slane %v3790_v52, 1 }
 0x3e8   : > { %v12477_v1 = vpop.f32.mrb[129].mxu0  ;;  %v3787_v62 = vrot.slane %v3785_v13, 1  ;;  %v3498_v20 = vrot.slane %v3496_v51, 7  ;;  %12633 = vmatpush3.bf16.msra.mxu1 %v14170_v16 }
 0x3e9   : > { %v3400_v21 = vmax.f32 %v3342_v32, 0.0  ;;  %v12478_v35 = vadd.f32 %v12477_v1, %v12476_v58  ;;  %v12479_v59 = vpop.f32.mrb[130].mxu0 }
 0x3ea   : > { %v12480_v49 = vpop.f32.mrb[131].mxu0  ;;  %v3788_v53 = vor.u32 %v3787_v62, %v3783_v33  ;;  %v3501_v60 = vor.u32 %v3499_v24, %v3498_v20  ;;  %v16437_v30 = vsel %vm14512_vm2, %v3498_v20, 0 }
 0x3eb   : > { %v3420_v7 = vpack.c.bf16 %v3400_v21, %v3399_v36  ;;  %v3186_v55 = vadd.f32 %v12478_v35, %v16157_v41  ;;  %v12481_v13 = vadd.f32 %v12480_v49, %v12479_v59  ;;  %v3802_v58 = vshll.u32 %v16437_v30, 16 }
 0x3ec   : > { %v16441_v51 = vsel %vm507_vm3, %v3788_v53, %v3792_v25  ;;  %v16445_v32 = vsel %vm14512_vm2, 0, %v3501_v60  ;;  %v14172_v25 = vld [vmem:[%s20451_s2 + $0x1e8] sm:$0xff]   ;;  %v14174_v60 = vld [vmem:[%s20451_s2 + $0x1f0] sm:$0xff]  }
 0x3ed   : > { %v3347_v52 = vadd.f32 %v16366_v8, %v3186_v55  ;;  %v3189_v1 = vadd.f32 %v12481_v13, %v16168_v31  ;;  %3872 = vrot.lane.b32.xlu1 %v16441_v51, %s14434_s22  ;;  %3980 = vrot.lane.b32.xlu0 %v16445_v32, %s14434_s22  ;;  %v3797_v41 = vshll.u32 %v16445_v32, 16  ;;  %v3503_v33 = vshrl.u32 %v3420_v7, 16 }
 0x3ee   : > { %v3795_v24 = vshrl.u32 %v16445_v32, 16  ;;  %v3804_v35 = vrot.slane %v3802_v58, 1  ;;  %v3506_v59 = vshll.u32 %v3420_v7, 16  ;;  %12634 = vmatprep.subr.bf16.mxu1 %v14172_v25 }
 0x3ef   : > { %v3350_v62 = vadd.f32 %v16377_v3, %v3189_v1  ;;  %v12482_v20 = vpop.f32.mrb[132].mxu0  ;;  %v3799_v36 = vrot.slane %v3797_v41, 1  ;;  %v3505_v8 = vrot.slane %v3503_v33, 7  ;;  %v3401_v31 = vmax.f32 %v3347_v52, 0.0  ;;  %v14173_v3 = vld [vmem:[%s20451_s2 + $0x1a8] sm:$0xff]  }
 0x3f0   : > { %v12483_v21 = vpop.f32.mrb[133].mxu0  ;;  %12635 = vmatpush3.bf16.msra.mxu1 %v14173_v3 }
 0x3f1   : > { %v3402_v10 = vmax.f32 %v3350_v62, 0.0  ;;  %v12484_v16 = vadd.f32 %v12483_v21, %v12482_v20  ;;  %v12485_v49 = vpop.f32.mrb[134].mxu0  ;;  %v3800_v53 = vor.u32 %v3799_v36, %v3795_v24  ;;  %v3508_v13 = vor.u32 %v3506_v59, %v3505_v8  ;;  %v14175_v20 = vld [vmem:[%s20451_s2 + $0x1b0] sm:$0xff]   ;;  %12636 = vmatprep.subr.bf16.mxu1 %v14174_v60  ;;  %v14176_v60 = vld [vmem:[%s20451_s2 + $0x1f8] sm:$0xff]  }
 0x3f2   : > { %v12486_v55 = vpop.f32.mrb[135].mxu0  ;;  %v16468_v7 = vsel %vm14512_vm2, %v3505_v8, 0 }
 0x3f3   : > { %v3421_v58 = vpack.c.bf16 %v3402_v10, %v3401_v31  ;;  %v3194_v52 = vadd.f32 %v12484_v16, %v16171_v46  ;;  %v12487_v1 = vadd.f32 %v12486_v55, %v12485_v49  ;;  %v16472_v41 = vsel %vm507_vm3, %v3800_v53, %v3804_v35 }
 0x3f4   : > { %3874 = vrot.lane.b32.xlu1 %v16472_v41, %s14434_s22  ;;  %v16478_v33 = vsel %vm14512_vm2, 0, %v3508_v13  ;;  %v3814_v62 = vshll.u32 %v16468_v7, 16  ;;  %12637 = vmatpush3.bf16.msra.mxu1 %v14175_v20  ;;  %v14178_v13 = vld [vmem:[%s20451_s2 + $0x200] sm:$0xff]  }
 0x3f5   : > { %v3355_v46 = vadd.f32 %v16356_v54, %v3194_v52  ;;  %v3197_v24 = vadd.f32 %v12487_v1, %v16174_v2  ;;  %3982 = vrot.lane.b32.xlu0 %v16478_v33, %s14434_s22  ;;  %v3809_v36 = vshll.u32 %v16478_v33, 16  ;;  %v3510_v21 = vshrl.u32 %v3421_v58, 16  ;;  %12638 = vmatprep.subr.bf16.mxu1 %v14176_v60 }
 0x3f6   : > { %v3807_v59 = vshrl.u32 %v16478_v33, 16  ;;  %v3816_v16 = vrot.slane %v3814_v62, 1  ;;  %v3513_v53 = vshll.u32 %v3421_v58, 16 }
 0x3f7   : > { %v3358_v35 = vadd.f32 %v16368_v40, %v3197_v24  ;;  %v12488_v8 = vpop.f32.mrb[136].mxu0  ;;  %v3811_v31 = vrot.slane %v3809_v36, 1  ;;  %v3512_v49 = vrot.slane %v3510_v21, 7  ;;  %v3403_v54 = vmax.f32 %v3355_v46, 0.0  ;;  %v14177_v40 = vld [vmem:[%s20451_s2 + $0x1b8] sm:$0xff]  }
 0x3f8   : > { %v12489_v10 = vpop.f32.mrb[137].mxu0  ;;  %12639 = vmatpush3.bf16.msra.mxu1 %v14177_v40 }
 0x3f9   : > { %v3404_v2 = vmax.f32 %v3358_v35, 0.0  ;;  %v12490_v25 = vadd.f32 %v12489_v10, %v12488_v8  ;;  %v12491_v3 = vpop.f32.mrb[138].mxu0  ;;  %v3812_v55 = vor.u32 %v3811_v31, %v3807_v59  ;;  %v3515_v58 = vor.u32 %v3513_v53, %v3512_v49  ;;  %v14179_v35 = vld [vmem:[%s20451_s2 + $0x1c0] sm:$0xff]   ;;  %12640 = vmatprep.subr.bf16.mxu1 %v14178_v13  ;;  %v14180_v13 = vld [vmem:[%s20451_s2 + $0x208] sm:$0xff]  }
 0x3fa   : > { %v12492_v52 = vpop.f32.mrb[139].mxu0  ;;  %v16502_v1 = vsel %vm14512_vm2, %v3512_v49, 0 }
 0x3fb   : > { %v3422_v62 = vpack.c.bf16 %v3404_v2, %v3403_v54  ;;  %v12493_v20 = vadd.f32 %v12492_v52, %v12491_v3  ;;  %v16505_v46 = vsel %vm507_vm3, %v3812_v55, %v3816_v16  ;;  %v3202_v24 = vadd.f32 %v12490_v25, %v16177_v56  ;;  %v14182_v52 = vld [vmem:[%s20451_s2 + $0x210] sm:$0xff]  }
 0x3fc   : > { %3876 = vrot.lane.b32.xlu1 %v16505_v46, %s14434_s22  ;;  %v16512_v36 = vsel %vm14512_vm2, 0, %v3515_v58  ;;  %v3826_v21 = vshll.u32 %v16502_v1, 16  ;;  %12641 = vmatpush3.bf16.msra.mxu1 %v14179_v35 }
 0x3fd   : > { %v3363_v8 = vadd.f32 %v16402_v61, %v3202_v24  ;;  %3984 = vrot.lane.b32.xlu0 %v16512_v36, %s14434_s22  ;;  %v3205_v56 = vadd.f32 %v12493_v20, %v16188_v34  ;;  %v3821_v59 = vshll.u32 %v16512_v36, 16  ;;  %v3517_v31 = vshrl.u32 %v3422_v62, 16  ;;  %12642 = vmatprep.subr.bf16.mxu1 %v14180_v13 }
 0x3fe   : > { %v3819_v49 = vshrl.u32 %v16512_v36, 16  ;;  %v3828_v2 = vrot.slane %v3826_v21, 1  ;;  %v3520_v3 = vshll.u32 %v3422_v62, 16 }
 0x3ff   : > { %v3366_v10 = vadd.f32 %v16419_v28, %v3205_v56  ;;  %v12494_v16 = vpop.f32.mrb[140].mxu0  ;;  %v3823_v53 = vrot.slane %v3821_v59, 1  ;;  %v3519_v25 = vrot.slane %v3517_v31, 7  ;;  %v3405_v61 = vmax.f32 %v3363_v8, 0.0  ;;  %v14181_v28 = vld [vmem:[%s20451_s2 + $0x1c8] sm:$0xff]   ;;  %v14183_v59 = vld [vmem:[%s20451_s2 + $0x1d0] sm:$0xff]  }
 0x400   : > { %v12495_v54 = vpop.f32.mrb[141].mxu0  ;;  %12643 = vmatpush3.bf16.msra.mxu1 %v14181_v28 }
 0x401   : > { %v3406_v55 = vmax.f32 %v3366_v10, 0.0  ;;  %v12496_v60 = vadd.f32 %v12495_v54, %v12494_v16  ;;  %v12497_v40 = vpop.f32.mrb[142].mxu0  ;;  %v3824_v34 = vor.u32 %v3823_v53, %v3819_v49  ;;  %v3522_v62 = vor.u32 %v3520_v3, %v3519_v25  ;;  %12644 = vmatprep.subr.bf16.mxu1 %v14182_v52 }
 0x402   : > { %v12498_v58 = vpop.f32.mrb[143].mxu0  ;;  %v16536_v20 = vsel %vm14512_vm2, %v3519_v25, 0 }
 0x403   : > { %v3423_v24 = vpack.c.bf16 %v3406_v55, %v3405_v61  ;;  %v3210_v21 = vadd.f32 %v12496_v60, %v16191_v15  ;;  %v12499_v35 = vadd.f32 %v12498_v58, %v12497_v40  ;;  %v16540_v8 = vsel %vm507_vm3, %v3824_v34, %v3828_v2  ;;  %v14184_v60 = vld [vmem:[%s20451_s2 + $0x218] sm:$0xff]  }
 0x404   : > { %3878 = vrot.lane.b32.xlu1 %v16540_v8, %s14434_s22  ;;  %v16546_v56 = vsel %vm14512_vm2, 0, %v3522_v62  ;;  %v3838_v49 = vshll.u32 %v16536_v20, 16  ;;  %12645 = vmatpush3.bf16.msra.mxu1 %v14183_v59  ;;  %v14185_v40 = vld [vmem:[%s20451_s2 + $0x1d8] sm:$0xff]  }
 0x405   : > { %v3524_v31 = vshrl.u32 %v3423_v24, 16  ;;  %v3371_v15 = vadd.f32 %v16397_v63, %v3210_v21  ;;  %v3213_v10 = vadd.f32 %v12499_v35, %v16194_v44  ;;  %3986 = vrot.lane.b32.xlu0 %v16546_v56, %s14434_s22  ;;  %v3833_v16 = vshll.u32 %v16546_v56, 16  ;;  %12646 = vmatprep.subr.bf16.mxu1 %v14184_v60 }
 0x406   : > { %v3527_v54 = vshll.u32 %v3423_v24, 16  ;;  %v3831_v25 = vshrl.u32 %v16546_v56, 16  ;;  %v3840_v34 = vrot.slane %v3838_v49, 1  ;;  %v3920_v60 = vrot.slane %v16244_v22, 1 }
 0x407   : > { %v3526_v53 = vrot.slane %v3524_v31, 7  ;;  %v3374_v2 = vadd.f32 %v16411_v37, %v3213_v10  ;;  %v3835_v3 = vrot.slane %v3833_v16, 1  ;;  %v3407_v61 = vmax.f32 %v3371_v15, 0.0 }
 0x408   : > { %12647 = vmatpush3.bf16.msra.mxu1 %v14185_v40 }
 0x409   : > { %v3408_v63 = vmax.f32 %v3374_v2, 0.0  ;;  %v3529_v55 = vor.u32 %v3527_v54, %v3526_v53  ;;  %v16561_v44 = vsel %vm14512_vm2, %v3526_v53, 0  ;;  %v3836_v37 = vor.u32 %v3835_v3, %v3831_v25 }
 0x40a   : > { %v3850_v62 = vshll.u32 %v16561_v44, 16  ;;  %v3917_v53 = vrot.slane %v16220_v39, 1  ;;  %v3914_v2 = vrot.slane %v16227_v0, 1  ;;  %v3918_v25 = vrot.slane %v16212_v9, 1 }
 0x40b   : > { %v3424_v13 = vpack.c.bf16 %v3408_v63, %v3407_v61  ;;  %v16571_v28 = vsel %vm14512_vm2, 0, %v3529_v55  ;;  %v16574_v52 = vsel %vm507_vm3, %v3836_v37, %v3840_v34  ;;  %v3915_v3 = vrot.slane %v16216_v6, 1 }
 0x40c   : > { %3988 = vrot.lane.b32.xlu0 %v16571_v28, %s14434_s22  ;;  %v3845_v58 = vshll.u32 %v16571_v28, 16  ;;  %3880 = vrot.lane.b32.xlu1 %v16574_v52, %s14434_s22  ;;  %v3843_v21 = vshrl.u32 %v16571_v28, 16  ;;  %v3852_v10 = vrot.slane %v3850_v62, 1  ;;  %v16599_v61 = vsel %vm764_vm4, %v3917_v53, %v3918_v25 }
 0x40d   : > { %v3531_v24 = vshrl.u32 %v3424_v13, 16  ;;  %v3534_v31 = vshll.u32 %v3424_v13, 16  ;;  %v3923_v63 = vrot.slane %v16268_v18, 1  ;;  %v16605_v55 = vsel %vm764_vm4, %v3914_v2, %v3915_v3 }
 0x40e   : > { %v3847_v35 = vrot.slane %v3845_v58, 1  ;;  %v3924_v9 = vrot.slane %v16278_v43, 1  ;;  %v3921_v6 = vrot.slane %v16255_v17, 1  ;;  %v3929_v37 = vrot.slane %v16308_v45, 1 }
 0x40f   : > { %v3533_v59 = vrot.slane %v3531_v24, 7  ;;  %v3926_v13 = vrot.slane %v16283_v12, 1  ;;  %v3930_v43 = vrot.slane %v16321_v38, 1  ;;  %v3927_v17 = vrot.slane %v16300_v4, 1 }
 0x410   : > { %v3848_v15 = vor.u32 %v3847_v35, %v3843_v21  ;;  %v16613_v40 = vsel %vm764_vm4, %v3923_v63, %v3924_v9  ;;  %v16619_v34 = vsel %vm764_vm4, %v3920_v60, %v3921_v6  ;;  %v3935_v62 = vrot.slane %v16347_v47, 1 }
 0x411   : > { %v3536_v16 = vor.u32 %v3534_v31, %v3533_v59  ;;  %v16627_v58 = vsel %vm764_vm4, %v3929_v37, %v3930_v43  ;;  %v16633_v24 = vsel %vm764_vm4, %v3926_v13, %v3927_v17  ;;  %v3932_v21 = vrot.slane %v16326_v57, 1 }
 0x412   : > { %v16584_v49 = vsel %vm507_vm3, %v3848_v15, %v3852_v10  ;;  %v3936_v38 = vrot.slane %v16361_v29, 1  ;;  %v3933_v4 = vrot.slane %v16343_v14, 1  ;;  %v3941_v31 = vrot.slane %v16417_v26, 1 }
 0x413   : > { %3882 = vrot.lane.b32.xlu1 %v16584_v49, %s14434_s22  ;;  %v16591_v54 = vsel %vm14512_vm2, 0, %v3536_v16  ;;  %v3938_v10 = vrot.slane %v16372_v27, 1  ;;  %v3942_v29 = vrot.slane %v16409_v50, 1  ;;  %v3939_v14 = vrot.slane %v16381_v48, 1 }
 0x414   : > { %3990 = vrot.lane.b32.xlu0 %v16591_v54, %s14434_s22  ;;  %v16641_v35 = vsel %vm764_vm4, %v3935_v62, %v3936_v38  ;;  %v16647_v15 = vsel %vm764_vm4, %v3932_v21, %v3933_v4  ;;  %v3947_v53 = vrot.slane %v16478_v33, 1  ;;  %v3944_v25 = vrot.slane %v16445_v32, 1 }
 0x415   : > { %v16655_v16 = vsel %vm764_vm4, %v3941_v31, %v3942_v29  ;;  %v16661_v2 = vsel %vm764_vm4, %v3938_v10, %v3939_v14  ;;  %v3995_v3 = vshll.u32 %v16591_v54, 16  ;;  %v3948_v48 = vrot.slane %v16468_v7, 1  ;;  %v14168_v31 = vld [vmem:[%s20451_s2 + $0x228] sm:$0xff]   ;;  %v14332_v14 = vld [vmem:[%s20451_s2 + $0x220] sm:$0xff]  }
 0x416   : > { %v3945_v50 = vrot.slane %v16437_v30, 1  ;;  %v3953_v60 = vrot.slane %v16546_v56, 1  ;;  %v3600_v9 = vsel %vm14512_vm2, %v3533_v59, 0  ;;  %v3950_v37 = vrot.slane %v16512_v36, 1 }
 0x417   : > { %4010 = vrot.lane.b32.xlu1 %v16599_v61, %s14434_s22  ;;  %v16670_v63 = vsel %vm764_vm4, %v3947_v53, %v3948_v48  ;;  %v3997_v13 = vrot.slane %v3995_v3, 1  ;;  %v3954_v30 = vrot.slane %v16536_v20, 1  ;;  %v3951_v17 = vrot.slane %v16502_v1, 1  ;;  %v14171_v3 = vld [vmem:[%s20451_s2 + $0x230] sm:$0xff]  }
 0x418   : > { %4008 = vrot.lane.b32.xlu0 %v16605_v55, %s14434_s22  ;;  %v16678_v6 = vsel %vm764_vm4, %v3944_v25, %v3945_v50  ;;  %v3993_v59 = vshrl.u32 %v16591_v54, 16  ;;  %v4000_v62 = vshll.u32 %v3600_v9, 16  ;;  %v3956_v4 = vrot.slane %v16571_v28, 1 }
 0x419   : > { %v16689_v38 = vsel %vm764_vm4, %v3953_v60, %v3954_v30  ;;  %v16698_v1 = vsel %vm764_vm4, %v3950_v37, %v3951_v17  ;;  %v3957_v29 = vrot.slane %v16561_v44, 1  ;;  %v4006_v50 = vrot.slane %v3600_v9, 1  ;;  %v14186_v37 = vld [vmem:[%s20451_s2 + $0x238] sm:$0xff]  }
 0x41a   : > { %v3998_v20 = vor.u32 %v3997_v13, %v3993_v59  ;;  %v4002_v53 = vrot.slane %v4000_v62, 1 }
 0x41b   : > { %4014 = vrot.lane.b32.xlu1 %v16613_v40, %s14434_s22  ;;  %v16710_v25 = vsel %vm764_vm4, %v3956_v4, %v3957_v29 }
 0x41c   : > { %4012 = vrot.lane.b32.xlu0 %v16619_v34, %s14434_s22  ;;  %v16718_v44 = vsel %vm507_vm3, %v3998_v20, %v4002_v53 }
 0x41f   : > { %4018 = vrot.lane.b32.xlu1 %v16627_v58, %s14434_s22 }
 0x420   : > { %4016 = vrot.lane.b32.xlu0 %v16633_v24, %s14434_s22 }
 0x423   : > { %4022 = vrot.lane.b32.xlu1 %v16641_v35, %s14434_s22 }
 0x424   : > { %4020 = vrot.lane.b32.xlu0 %v16647_v15, %s14434_s22 }
 0x427   : > { %4026 = vrot.lane.b32.xlu1 %v16655_v16, %s14434_s22 }
 0x428   : > { %4024 = vrot.lane.b32.xlu0 %v16661_v2, %s14434_s22 }
 0x42b   : > { %4030 = vrot.lane.b32.xlu1 %v16670_v63, %s14434_s22 }
 0x42c   : > { %4028 = vrot.lane.b32.xlu0 %v16678_v6, %s14434_s22  ;;  %v3963_v7 = vpop.permute.xlu0 %3962 }
 0x42d   : > { %v3961_v43 = vpop.permute.xlu1 %3960  ;;  %v4092_v10 = vsel %vm896_vm5, %v16605_v55, %v3963_v7  ;;  %v4005_v55 = vrot.slane %v16591_v54, 1 }
 0x42e   : > { %v4088_v21 = vsel %vm896_vm5, %v15032_v42, %v3961_v43 }
 0x42f   : > { %4496 = vmatprep.mubr.bf16.mxu0 %v4088_v21  ;;  %4034 = vrot.lane.b32.xlu1 %v16689_v38, %s14434_s22  ;;  %v16729_v30 = vsel %vm764_vm4, %v4005_v55, %v4006_v50 }
 0x430   : > { %4497 = vmatmul.mubr.bf16.vlgmr.msra.gmra.mrb[144].mxu0 %v15042_v5  ;;  %4032 = vrot.lane.b32.xlu0 %v16698_v1, %s14434_s22 }
 0x431   : > { %13821 = vmatpush3.bf16.msra.mxu0 %v14332_v14  ;;  %4504 = vmatprep.mubr.bf16.mxu0 %v4092_v10 }
 0x432   : > { %13822 = vmatprep.subr.bf16.mxu0 %v14168_v31 }
 0x433   : > { %4036 = vrot.lane.b32.xlu1 %v16710_v25, %s14434_s22 }
 0x434   : > { %4040 = vrot.lane.b32.xlu0 %v16718_v44, %s14434_s22 }
 0x435   : > { %v3965_v48 = vpop.permute.xlu0 %3964  ;;  %13823 = vmatpush3.bf16.msra.mxu0 %v14168_v31 }
 0x436   : > { %v3855_v60 = vpop.permute.xlu1 %3854  ;;  %13824 = vmatprep.subr.bf16.mxu0 %v14171_v3  ;;  %v4096_v9 = vsel %vm896_vm5, %v16599_v61, %v3965_v48 }
 0x437   : > { %v4043_v13 = vsel %vm896_vm5, %v16227_v0, %v3855_v60 }
 0x438   : > { %4505 = vmatmul.mubr.bf16.gmra.mrb[148].mxu0 %v4043_v13  ;;  %4038 = vrot.lane.b32.xlu0 %v16729_v30, %s14434_s22 }
 0x439   : > { %4512 = vmatprep.mubr.bf16.mxu0 %v4096_v9  ;;  %13825 = vmatpush3.bf16.msra.mxu0 %v14171_v3  ;;  %v3967_v17 = vpop.permute.xlu0 %3966 }
 0x43a   : > { %v3857_v7 = vpop.permute.xlu1 %3856  ;;  %13826 = vmatprep.subr.bf16.mxu0 %v14186_v37  ;;  %v4100_v0 = vsel %vm896_vm5, %v16619_v34, %v3967_v17 }
 0x43b   : > { %v4046_v43 = vsel %vm896_vm5, %v16220_v39, %v3857_v7 }
 0x43c   : > { %4657 = vmatprep.mubr.bf16.mxu1 %v4046_v43 }
 0x43d   : > { %13827 = vmatpush3.bf16.msra.mxu0 %v14186_v37  ;;  %v3969_v62 = vpop.permute.xlu0 %3968 }
 0x43e   : > { %v4104_v4 = vsel %vm896_vm5, %v16613_v40, %v3969_v62 }
 0x440   : > { %4513 = vmatmul.mubr.bf16.gmra.mrb[152].mxu0 %v4046_v43  ;;  %v3859_v59 = vpop.permute.xlu1 %3858 }
 0x441   : > { %4520 = vmatprep.mubr.bf16.mxu0 %v4100_v0  ;;  %v4049_v21 = vsel %vm896_vm5, %v16244_v22, %v3859_v59 }
 0x444   : > { %v3861_v31 = vpop.permute.xlu1 %3860  ;;  %v3971_v39 = vpop.permute.xlu0 %3970 }
 0x445   : > { %v16745_v20 = vsel %vm896_vm5, %v16268_v18, %v3861_v31  ;;  %v4108_v10 = vsel %vm896_vm5, %v16633_v24, %v3971_v39 }
 0x448   : > { %4521 = vmatmul.mubr.bf16.gmra.mrb[156].mxu0 %v4049_v21  ;;  %v3973_v14 = vpop.permute.xlu0 %3972 }
 0x449   : > { %4528 = vmatprep.mubr.bf16.mxu0 %v4104_v4  ;;  %v3863_v29 = vpop.permute.xlu1 %3862  ;;  %v4112_v53 = vsel %vm896_vm5, %v16627_v58, %v3973_v14 }
 0x44a   : > { %v16752_v22 = vsel %vm896_vm5, %v16283_v12, %v3863_v29 }
 0x44c   : > { %v3975_v3 = vpop.permute.xlu0 %3974 }
 0x44d   : > { %v3865_v18 = vpop.permute.xlu1 %3864  ;;  %v4116_v48 = vsel %vm896_vm5, %v16647_v15, %v3975_v3 }
 0x44e   : > { %v16759_v55 = vsel %vm896_vm5, %v16308_v45, %v3865_v18 }
 0x450   : > { %4529 = vmatmul.mubr.bf16.gmra.mrb[160].mxu0 %v16745_v20  ;;  %v3977_v50 = vpop.permute.xlu0 %3976 }
 0x451   : > { %4536 = vmatprep.mubr.bf16.mxu0 %v4108_v10  ;;  %v3867_v12 = vpop.permute.xlu1 %3866  ;;  %v4120_v37 = vsel %vm896_vm5, %v16641_v35, %v3977_v50  ;;  %v20557_v50 = vld [vmem:[#allocation11_spill] sm:$0xff] }
 0x452   : > { %v16766_v60 = vsel %vm896_vm5, %v16326_v57, %v3867_v12 }
 0x455   : > { %v3869_v45 = vpop.permute.xlu1 %3868 }
 0x456   : > { %v16773_v9 = vsel %vm896_vm5, %v16347_v47, %v3869_v45 }
 0x458   : > { %4537 = vmatmul.mubr.bf16.gmra.mrb[164].mxu0 %v16752_v22  ;;  %v3979_v13 = vpop.permute.xlu0 %3978 }
 0x459   : > { %4544 = vmatprep.mubr.bf16.mxu0 %v4112_v53  ;;  %v4124_v7 = vsel %vm896_vm5, %v16661_v2, %v3979_v13  ;;  %v3871_v57 = vpop.permute.xlu1 %3870 }
 0x45a   : > { %v16780_v59 = vsel %vm896_vm5, %v16372_v27, %v3871_v57 }
 0x45f   : > { %v3981_v43 = vpop.permute.xlu0 %3980  ;;  %v3873_v17 = vpop.permute.xlu1 %3872 }
 0x460   : > { %4545 = vmatmul.mubr.bf16.gmra.mrb[168].mxu0 %v16759_v55  ;;  %v4128_v47 = vsel %vm896_vm5, %v16655_v16, %v3981_v43  ;;  %v16787_v10 = vsel %vm896_vm5, %v16417_v26, %v3873_v17 }
 0x461   : > { %4552 = vmatprep.mubr.bf16.mxu0 %v4116_v48 }
 0x466   : > { %v3875_v62 = vpop.permute.xlu1 %3874 }
 0x467   : > { %v3983_v0 = vpop.permute.xlu0 %3982  ;;  %v16794_v3 = vsel %vm896_vm5, %v16445_v32, %v3875_v62 }
 0x468   : > { %4553 = vmatmul.mubr.bf16.gmra.mrb[172].mxu0 %v16766_v60  ;;  %v4132_v27 = vsel %vm896_vm5, %v16678_v6, %v3983_v0 }
 0x469   : > { %4560 = vmatprep.mubr.bf16.mxu0 %v4120_v37 }
 0x46e   : > { %v3877_v31 = vpop.permute.xlu1 %3876 }
 0x46f   : > { %v3985_v4 = vpop.permute.xlu0 %3984  ;;  %v4076_v45 = vsel %vm896_vm5, %v16478_v33, %v3877_v31 }
 0x470   : > { %4561 = vmatmul.mubr.bf16.gmra.mrb[176].mxu0 %v16773_v9  ;;  %v4136_v26 = vsel %vm896_vm5, %v16670_v63, %v3985_v4 }
 0x471   : > { %4568 = vmatprep.mubr.bf16.mxu0 %v4124_v7  ;;  %v20558_v7 = vld [vmem:[#allocation14_spill] sm:$0xff] }
 0x476   : > { %v3879_v29 = vpop.permute.xlu1 %3878 }
 0x477   : > { %v3987_v39 = vpop.permute.xlu0 %3986  ;;  %v4079_v43 = vsel %vm896_vm5, %v16512_v36, %v3879_v29 }
 0x478   : > { %4569 = vmatmul.mubr.bf16.gmra.mrb[180].mxu0 %v16780_v59  ;;  %v4140_v32 = vsel %vm896_vm5, %v16698_v1, %v3987_v39 }
 0x479   : > { %4576 = vmatprep.mubr.bf16.mxu0 %v4128_v47 }
 0x47e   : > { %v3989_v14 = vpop.permute.xlu0 %3988  ;;  %v3881_v53 = vpop.permute.xlu1 %3880 }
 0x47f   : > { %v4144_v33 = vsel %vm896_vm5, %v16689_v38, %v3989_v14  ;;  %v4082_v47 = vsel %vm896_vm5, %v16546_v56, %v3881_v53  ;;  %v20561_v56 = vld [vmem:[#allocation13_spill] sm:$0xff] }
 0x480   : > { %4577 = vmatmul.mubr.bf16.gmra.mrb[184].mxu0 %v16787_v10 }
 0x481   : > { %4584 = vmatprep.mubr.bf16.mxu0 %v4132_v27 }
 0x485   : > { %v3883_v48 = vpop.permute.xlu1 %3882 }
 0x486   : > { %v3991_v18 = vpop.permute.xlu0 %3990  ;;  %v4085_v31 = vsel %vm896_vm5, %v16571_v28, %v3883_v48 }
 0x487   : > { %v4148_v36 = vsel %vm896_vm5, %v16710_v25, %v3991_v18 }
 0x488   : > { %4585 = vmatmul.mubr.bf16.gmra.mrb[188].mxu0 %v16794_v3 }
 0x489   : > { %4592 = vmatprep.mubr.bf16.mxu0 %v4136_v26  ;;  %v4011_v13 = vpop.permute.xlu1 %4010 }
 0x48a   : > { %v4009_v12 = vpop.permute.xlu0 %4008  ;;  %v4156_v57 = vsel %vm896_vm5, %v20558_v7, %v4011_v13 }
 0x48b   : > { %v4152_v37 = vsel %vm896_vm5, %v20557_v50, %v4009_v12  ;;  %v14188_v12 = vld [vmem:[%s20451_s2 + $0x240] sm:$0xff]  }
 0x48c   : > { %4658 = vmatmul.mubr.bf16.vlgmr.msra.gmra.mrb[176].mxu1 %v4152_v37 }
 0x48d   : > { %4665 = vmatprep.mubr.bf16.mxu1 %v4049_v21  ;;  %v20559_v21 = vld [vmem:[#allocation17_spill] sm:$0xff]  ;;  %v4015_v62 = vpop.permute.xlu1 %4014 }
 0x48e   : > { %v4013_v17 = vpop.permute.xlu0 %4012 }
 0x48f   : > { %v4160_v0 = vsel %vm896_vm5, %v20559_v21, %v4013_v17 }
 0x490   : > { %4593 = vmatmul.mubr.bf16.gmra.mrb[192].mxu0 %v4076_v45 }
 0x491   : > { %4600 = vmatprep.mubr.bf16.mxu0 %v4140_v32  ;;  %v4019_v27 = vpop.permute.xlu1 %4018 }
 0x492   : > { %v4017_v39 = vpop.permute.xlu0 %4016 }
 0x494   : > { %4666 = vmatmul.mubr.bf16.gmra.mrb[180].mxu1 %v4156_v57 }
 0x495   : > { %4673 = vmatprep.mubr.bf16.mxu1 %v16745_v20  ;;  %v20560_v20 = vld [vmem:[#allocation10_spill] sm:$0xff] }
 0x496   : > { %v4164_v4 = vsel %vm896_vm5, %v20560_v20, %v4015_v62  ;;  %v14190_v62 = vld [vmem:[%s20451_s2 + $0x248] sm:$0xff]  }
 0x498   : > { %4601 = vmatmul.mubr.bf16.gmra.mrb[196].mxu0 %v4079_v43 }
 0x499   : > { %4608 = vmatprep.mubr.bf16.mxu0 %v4144_v33 }
 0x49c   : > { %4674 = vmatmul.mubr.bf16.gmra.mrb[184].mxu1 %v4160_v0 }
 0x49d   : > { %4681 = vmatprep.mubr.bf16.mxu1 %v16752_v22  ;;  %v4168_v22 = vsel %vm896_vm5, %v20561_v56, %v4017_v39 }
 0x4a0   : > { %4609 = vmatmul.mubr.bf16.gmra.mrb[200].mxu0 %v4082_v47 }
 0x4a1   : > { %4616 = vmatprep.mubr.bf16.mxu0 %v4148_v36 }
 0x4a4   : > { %4682 = vmatmul.mubr.bf16.gmra.mrb[188].mxu1 %v4164_v4 }
 0x4a5   : > { %4689 = vmatprep.mubr.bf16.mxu1 %v16759_v55  ;;  %v20562_v55 = vld [vmem:[#allocation16_spill] sm:$0xff] }
 0x4a6   : > { %v4172_v28 = vsel %vm896_vm5, %v20562_v55, %v4019_v27 }
 0x4a8   : > { %4617 = vmatmul.mubr.bf16.gmra.mrb[204].mxu0 %v4085_v31 }
 0x4a9   : > { %13828 = vmatprep.mubr.msk.bf16.mxu0 %vm896_vm5, %v16599_v61  ;;  %v4021_v61 = vpop.permute.xlu0 %4020 }
 0x4ac   : > { %4690 = vmatmul.mubr.bf16.gmra.mrb[192].mxu1 %v4168_v22 }
 0x4ad   : > { %4697 = vmatprep.mubr.bf16.mxu1 %v16766_v60  ;;  %v20563_v60 = vld [vmem:[#allocation18_spill] sm:$0xff] }
 0x4ae   : > { %v4176_v29 = vsel %vm896_vm5, %v20563_v60, %v4021_v61 }
 0x4b0   : > { %13829 = vmatmul.mubr.msk.bf16.vlgmr.msra.gmra.mrb[208].mxu0 %vm896_vm5, %v16619_v34 }
 0x4b1   : > { %13832 = vmatprep.mubr.msk.bf16.mxu0 %vm896_vm5, %v16613_v40  ;;  %v4023_v40 = vpop.permute.xlu1 %4022 }
 0x4b2   : > { %v4180_v34 = vsel %vm896_vm5, %v16395_v11, %v4023_v40  ;;  %v14192_v40 = vld [vmem:[%s20451_s2 + $0x250] sm:$0xff]  }
 0x4b4   : > { %4698 = vmatmul.mubr.bf16.gmra.mrb[196].mxu1 %v4172_v28 }
 0x4b5   : > { %4705 = vmatprep.mubr.bf16.mxu1 %v16773_v9 }
 0x4b8   : > { %13833 = vmatmul.mubr.msk.bf16.gmra.mrb[212].mxu0 %vm896_vm5, %v16633_v24 }
 0x4b9   : > { %13836 = vmatprep.mubr.msk.bf16.mxu0 %vm896_vm5, %v16627_v58  ;;  %v4025_v58 = vpop.permute.xlu0 %4024 }
 0x4ba   : > { %v4184_v24 = vsel %vm896_vm5, %v16405_v19, %v4025_v58 }
 0x4bc   : > { %4706 = vmatmul.mubr.bf16.gmra.mrb[200].mxu1 %v4176_v29  ;;  %v14191_v29 = vld [vmem:[%s20451_s2 + $0x290] sm:$0xff]  }
 0x4bd   : > { %4713 = vmatprep.mubr.bf16.mxu1 %v16780_v59 }
 0x4c0   : > { %13837 = vmatmul.mubr.msk.bf16.gmra.mrb[216].mxu0 %vm896_vm5, %v16647_v15  ;;  %v4029_v15 = vpop.permute.xlu0 %4028 }
 0x4c1   : > { %13840 = vmatprep.mubr.msk.bf16.mxu0 %vm896_vm5, %v16641_v35  ;;  %v4027_v35 = vpop.permute.xlu1 %4026  ;;  %v4192_v19 = vsel %vm896_vm5, %v16472_v41, %v4029_v15 }
 0x4c2   : > { %v4188_v11 = vsel %vm896_vm5, %v16441_v51, %v4027_v35 }
 0x4c4   : > { %4714 = vmatmul.mubr.bf16.gmra.mrb[204].mxu1 %v4180_v34 }
 0x4c5   : > { %4721 = vmatprep.mubr.bf16.mxu1 %v16787_v10 }
 0x4c8   : > { %13841 = vmatmul.mubr.msk.bf16.gmra.mrb[220].mxu0 %vm896_vm5, %v16661_v2  ;;  %v4033_v2 = vpop.permute.xlu0 %4032 }
 0x4c9   : > { %13844 = vmatprep.mubr.msk.bf16.mxu0 %vm896_vm5, %v16655_v16  ;;  %v4031_v16 = vpop.permute.xlu1 %4030  ;;  %v4200_v41 = vsel %vm896_vm5, %v16540_v8, %v4033_v2 }
 0x4ca   : > { %v4196_v51 = vsel %vm896_vm5, %v16505_v46, %v4031_v16 }
 0x4cc   : > { %4722 = vmatmul.mubr.bf16.gmra.mrb[208].mxu1 %v4184_v24 }
 0x4cd   : > { %4729 = vmatprep.mubr.bf16.mxu1 %v16794_v3 }
 0x4d0   : > { %13845 = vmatmul.mubr.msk.bf16.gmra.mrb[224].mxu0 %vm896_vm5, %v16678_v6  ;;  %v4041_v6 = vpop.permute.xlu0 %4040 }
 0x4d1   : > { %13848 = vmatprep.mubr.msk.bf16.mxu0 %vm896_vm5, %v16670_v63  ;;  %v4035_v63 = vpop.permute.xlu1 %4034  ;;  %v4215_v46 = vsel %vm896_vm5, %v16591_v54, %v4041_v6 }
 0x4d4   : > { %4730 = vmatmul.mubr.bf16.gmra.mrb[212].mxu1 %v4188_v11  ;;  %v4039_v8 = vpop.permute.xlu0 %4038 }
 0x4d5   : > { %4737 = vmatprep.mubr.bf16.mxu1 %v4076_v45  ;;  %v4212_v9 = vsel %vm896_vm5, %v16718_v44, %v4039_v8  ;;  %v14187_v44 = vld [vmem:[%s20451_s2 + $0x280] sm:$0xff]  }
 0x4d6   : > { %12764 = vmatprep.subr.bf16.mxu1 %v14187_v44  ;;  %v14196_v44 = vld [vmem:[%s20451_s2 + $0x260] sm:$0xff]  }
 0x4d7   : > { %12765 = vmatpush3.bf16.msra.mxu1 %v14188_v12 }
 0x4d8   : > { %13849 = vmatmul.mubr.msk.bf16.gmra.mrb[228].mxu0 %vm896_vm5, %v16698_v1  ;;  %v4037_v1 = vpop.permute.xlu1 %4036 }
 0x4d9   : > { %13852 = vmatprep.mubr.msk.bf16.mxu0 %vm896_vm5, %v16689_v38  ;;  %v4204_v38 = vsel %vm896_vm5, %v16574_v52, %v4035_v63 }
 0x4dc   : > { %4738 = vmatmul.mubr.bf16.gmra.mrb[216].mxu1 %v4192_v19 }
 0x4dd   : > { %4745 = vmatprep.mubr.bf16.mxu1 %v4079_v43 }
 0x4e0   : > { %13853 = vmatmul.mubr.msk.bf16.gmra.mrb[232].mxu0 %vm896_vm5, %v16710_v25  ;;  %v4208_v25 = vsel %vm896_vm5, %v16584_v49, %v4037_v1 }
 0x4e1   : > { %13856 = vmatprep.mubr.msk.bf16.mxu0 %vm896_vm5, %v16729_v30 }
 0x4e4   : > { %4746 = vmatmul.mubr.bf16.gmra.mrb[220].mxu1 %v4196_v51 }
 0x4e5   : > { %4753 = vmatprep.mubr.bf16.mxu1 %v4082_v47  ;;  %v14189_v47 = vld [vmem:[%s20451_s2 + $0x288] sm:$0xff]  }
 0x4e6   : > { %12766 = vmatprep.subr.bf16.mxu1 %v14189_v47 }
 0x4e7   : > { %12767 = vmatpush3.bf16.msra.mxu1 %v14190_v62 }
 0x4e8   : > { %13857 = vmatmul.mubr.msk.bf16.gmra.mrb[236].mxu0 %vm896_vm5, %v15032_v42  ;;  %12768 = vmatprep.subr.bf16.mxu1 %v14191_v29 }
 0x4eb   : > { %12769 = vmatpush3.bf16.msra.mxu1 %v14192_v40 }
 0x4ec   : > { %4754 = vmatmul.mubr.bf16.gmra.mrb[224].mxu1 %v4200_v41  ;;  %v14193_v41 = vld [vmem:[%s20451_s2 + $0x298] sm:$0xff]  }
 0x4ed   : > { %4761 = vmatprep.mubr.bf16.mxu1 %v4085_v31  ;;  %12770 = vmatprep.subr.bf16.mxu1 %v14193_v41 }
 0x4f4   : > { %4762 = vmatmul.mubr.bf16.gmra.mrb[228].mxu1 %v4204_v38  ;;  %v14194_v38 = vld [vmem:[%s20451_s2 + $0x258] sm:$0xff]  }
 0x4f5   : > { %4769 = vmatprep.mubr.bf16.mxu1 %v4215_v46  ;;  %12771 = vmatpush3.bf16.msra.mxu1 %v14194_v38 }
 0x4fc   : > { %4770 = vmatmul.mubr.bf16.gmra.mrb[232].mxu1 %v4208_v25 }
 0x4fd   : > { %4777 = vmatprep.mubr.bf16.mxu1 %v15042_v5 }
 0x503   : > { %v12536_v30 = vpop.f32.mrb[144].mxu0 }
 0x504   : > { %v12537_v59 = vpop.f32.mrb[145].mxu0  ;;  %4778 = vmatmul.mubr.bf16.gmra.mrb[236].mxu1 %v4212_v9 }
 0x505   : > { %v16888_v52 = vadd.f32 %v12537_v59, %v12536_v30  ;;  %v12539_v10 = vpop.f32.mrb[146].mxu0 }
 0x506   : > { %v12540_v14 = vpop.f32.mrb[147].mxu0 }
 0x507   : > { %v16890_v54 = vadd.f32 %v12540_v14, %v12539_v10  ;;  %v14195_v10 = vld [vmem:[%s20451_s2 + $0x2a0] sm:$0xff]  }
 0x508   : > { %12772 = vmatprep.subr.bf16.mxu1 %v14195_v10 }
 0x509   : > { %12773 = vmatpush3.bf16.msra.mxu1 %v14196_v44 }
 0x50b   : > { %v12542_v53 = vpop.f32.mrb[148].mxu0 }
 0x50c   : > { %v12543_v18 = vpop.f32.mrb[149].mxu0 }
 0x50d   : > { %v16892_v3 = vadd.f32 %v12543_v18, %v12542_v53  ;;  %v12545_v49 = vpop.f32.mrb[150].mxu0 }
 0x50e   : > { %v12546_v26 = vpop.f32.mrb[151].mxu0 }
 0x50f   : > { %v16894_v48 = vadd.f32 %v12546_v26, %v12545_v49 }
 0x513   : > { %v12548_v50 = vpop.f32.mrb[152].mxu0 }
 0x514   : > { %v12549_v37 = vpop.f32.mrb[153].mxu0 }
 0x515   : > { %v16902_v45 = vadd.f32 %v12549_v37, %v12548_v50  ;;  %v12551_v13 = vpop.f32.mrb[154].mxu0 }
 0x516   : > { %v12552_v32 = vpop.f32.mrb[155].mxu0 }
 0x517   : > { %v16904_v7 = vadd.f32 %v12552_v32, %v12551_v13 }
 0x51b   : > { %v12554_v57 = vpop.f32.mrb[156].mxu0 }
 0x51c   : > { %v12555_v43 = vpop.f32.mrb[157].mxu0 }
 0x51d   : > { %v16906_v17 = vadd.f32 %v12555_v43, %v12554_v57  ;;  %v12557_v33 = vpop.f32.mrb[158].mxu0 }
 0x51e   : > { %v12558_v21 = vpop.f32.mrb[159].mxu0 }
 0x51f   : > { %v16908_v0 = vadd.f32 %v12558_v21, %v12557_v33 }
 0x523   : > { %v12560_v36 = vpop.f32.mrb[160].mxu0 }
 0x524   : > { %v12561_v20 = vpop.f32.mrb[161].mxu0 }
 0x525   : > { %v16916_v4 = vadd.f32 %v12561_v20, %v12560_v36  ;;  %v12563_v31 = vpop.f32.mrb[162].mxu0 }
 0x526   : > { %v12564_v39 = vpop.f32.mrb[163].mxu0 }
 0x527   : > { %v16918_v56 = vadd.f32 %v12564_v39, %v12563_v31  ;;  %v14197_v31 = vld [vmem:[%s20451_s2 + $0x2a8] sm:$0xff]  }
 0x528   : > { %v14198_v39 = vld [vmem:[%s20451_s2 + $0x268] sm:$0xff]   ;;  %12774 = vmatprep.subr.bf16.mxu1 %v14197_v31 }
 0x529   : > { %12775 = vmatpush3.bf16.msra.mxu1 %v14198_v39 }
 0x52b   : > { %v12566_v22 = vpop.f32.mrb[164].mxu0 }
 0x52c   : > { %v12567_v27 = vpop.f32.mrb[165].mxu0 }
 0x52d   : > { %v16920_v55 = vadd.f32 %v12567_v27, %v12566_v22  ;;  %v12569_v28 = vpop.f32.mrb[166].mxu0 }
 0x52e   : > { %v12570_v61 = vpop.f32.mrb[167].mxu0 }
 0x52f   : > { %v16922_v60 = vadd.f32 %v12570_v61, %v12569_v28 }
 0x533   : > { %v12572_v34 = vpop.f32.mrb[168].mxu0 }
 0x534   : > { %v12573_v58 = vpop.f32.mrb[169].mxu0 }
 0x535   : > { %v16930_v24 = vadd.f32 %v12573_v58, %v12572_v34  ;;  %v12575_v35 = vpop.f32.mrb[170].mxu0 }
 0x536   : > { %v12576_v11 = vpop.f32.mrb[171].mxu0 }
 0x537   : > { %v16932_v15 = vadd.f32 %v12576_v11, %v12575_v35 }
 0x53b   : > { %v12578_v19 = vpop.f32.mrb[172].mxu0 }
 0x53c   : > { %v12579_v16 = vpop.f32.mrb[173].mxu0 }
 0x53d   : > { %v16934_v51 = vadd.f32 %v12579_v16, %v12578_v19  ;;  %v12581_v2 = vpop.f32.mrb[174].mxu0  ;;  %v14199_v16 = vld [vmem:[%s20451_s2 + $0x2b0] sm:$0xff]  }
 0x53e   : > { %v12582_v63 = vpop.f32.mrb[175].mxu0  ;;  %12776 = vmatprep.subr.bf16.mxu1 %v14199_v16 }
 0x53f   : > { %v16939_v6 = vadd.f32 %v12582_v63, %v12581_v2  ;;  %v14200_v2 = vld [vmem:[%s20451_s2 + $0x270] sm:$0xff]  }
 0x540   : > { %12777 = vmatpush3.bf16.msra.mxu1 %v14200_v2 }
 0x543   : > { %v12584_v46 = vpop.f32.mrb[176].mxu0 }
 0x544   : > { %v12585_v1 = vpop.f32.mrb[177].mxu0 }
 0x545   : > { %v16944_v25 = vadd.f32 %v12585_v1, %v12584_v46  ;;  %v12587_v8 = vpop.f32.mrb[178].mxu0 }
 0x546   : > { %v12588_v30 = vpop.f32.mrb[179].mxu0 }
 0x547   : > { %v16946_v9 = vadd.f32 %v12588_v30, %v12587_v8 }
 0x54b   : > { %v12590_v59 = vpop.f32.mrb[180].mxu0 }
 0x54c   : > { %v12591_v14 = vpop.f32.mrb[181].mxu0 }
 0x54d   : > { %v16951_v53 = vadd.f32 %v12591_v14, %v12590_v59  ;;  %v12593_v18 = vpop.f32.mrb[182].mxu0 }
 0x54e   : > { %v12594_v49 = vpop.f32.mrb[183].mxu0 }
 0x54f   : > { %v16953_v26 = vadd.f32 %v12594_v49, %v12593_v18 }
 0x553   : > { %v12596_v12 = vpop.f32.mrb[184].mxu0 }
 0x554   : > { %v12597_v50 = vpop.f32.mrb[185].mxu0 }
 0x555   : > { %v16958_v37 = vadd.f32 %v12597_v50, %v12596_v12  ;;  %v12599_v13 = vpop.f32.mrb[186].mxu0 }
 0x556   : > { %v12600_v32 = vpop.f32.mrb[187].mxu0 }
 0x557   : > { %v16960_v57 = vadd.f32 %v12600_v32, %v12599_v13 }
 0x55b   : > { %v12602_v43 = vpop.f32.mrb[188].mxu0 }
 0x55c   : > { %v12603_v33 = vpop.f32.mrb[189].mxu0 }
 0x55d   : > { %v16962_v21 = vadd.f32 %v12603_v33, %v12602_v43  ;;  %v12605_v47 = vpop.f32.mrb[190].mxu0 }
 0x55e   : > { %v12606_v62 = vpop.f32.mrb[191].mxu0 }
 0x55f   : > { %v16964_v36 = vadd.f32 %v12606_v62, %v12605_v47  ;;  %v12648_v20 = vpop.f32.mrb[176].mxu1 }
 0x560   : > { %v12649_v22 = vpop.f32.mrb[177].mxu1 }
 0x561   : > { %v12650_v27 = vadd.f32 %v12649_v22, %v12648_v20  ;;  %v12651_v28 = vpop.f32.mrb[178].mxu1 }
 0x562   : > { %v12652_v61 = vpop.f32.mrb[179].mxu1 }
 0x563   : > { %v12608_v29 = vpop.f32.mrb[192].mxu0  ;;  %v12653_v40 = vadd.f32 %v12652_v61, %v12651_v28  ;;  %v16973_v34 = vadd.f32 %v12650_v27, %v16888_v52 }
 0x564   : > { %v12609_v58 = vpop.f32.mrb[193].mxu0 }
 0x565   : > { %v16975_v35 = vadd.f32 %v12609_v58, %v12608_v29  ;;  %v12611_v11 = vpop.f32.mrb[194].mxu0  ;;  %v16978_v19 = vadd.f32 %v12653_v40, %v16890_v54 }
 0x566   : > { %v12612_v41 = vpop.f32.mrb[195].mxu0 }
 0x567   : > { %v16986_v63 = vadd.f32 %v12612_v41, %v12611_v11  ;;  %v12654_v52 = vpop.f32.mrb[180].mxu1 }
 0x568   : > { %v12655_v38 = vpop.f32.mrb[181].mxu1 }
 0x569   : > { %v12656_v46 = vadd.f32 %v12655_v38, %v12654_v52  ;;  %v12657_v1 = vpop.f32.mrb[182].mxu1 }
 0x56a   : > { %v12658_v8 = vpop.f32.mrb[183].mxu1 }
 0x56b   : > { %v12614_v54 = vpop.f32.mrb[196].mxu0  ;;  %v12659_v30 = vadd.f32 %v12658_v8, %v12657_v1  ;;  %v4668_v59 = vadd.f32 %v12656_v46, %v16892_v3  ;;  %v14201_v3 = vld [vmem:[%s20451_s2 + $0x2b8] sm:$0xff]  }
 0x56c   : > { %v12615_v10 = vpop.f32.mrb[197].mxu0  ;;  %12778 = vmatprep.subr.bf16.mxu1 %v14201_v3 }
 0x56d   : > { %v16989_v14 = vadd.f32 %v12615_v10, %v12614_v54  ;;  %v12617_v18 = vpop.f32.mrb[198].mxu0  ;;  %v4671_v49 = vadd.f32 %v12659_v30, %v16894_v48 }
 0x56e   : > { %v12618_v44 = vpop.f32.mrb[199].mxu0 }
 0x56f   : > { %v16992_v12 = vadd.f32 %v12618_v44, %v12617_v18  ;;  %v12660_v50 = vpop.f32.mrb[184].mxu1 }
 0x570   : > { %v12661_v13 = vpop.f32.mrb[185].mxu1 }
 0x571   : > { %v12662_v32 = vadd.f32 %v12661_v13, %v12660_v50  ;;  %v12663_v43 = vpop.f32.mrb[186].mxu1 }
 0x572   : > { %v12664_v33 = vpop.f32.mrb[187].mxu1 }
 0x573   : > { %v12620_v47 = vpop.f32.mrb[200].mxu0  ;;  %v12665_v62 = vadd.f32 %v12664_v33, %v12663_v43  ;;  %v4676_v20 = vadd.f32 %v12662_v32, %v16902_v45  ;;  %v14202_v45 = vld [vmem:[%s20451_s2 + $0x278] sm:$0xff]  }
 0x574   : > { %v12621_v31 = vpop.f32.mrb[201].mxu0  ;;  %12779 = vmatpush3.bf16.msra.mxu1 %v14202_v45 }
 0x575   : > { %v16998_v39 = vadd.f32 %v12621_v31, %v12620_v47  ;;  %v12623_v48 = vpop.f32.mrb[202].mxu0  ;;  %v17001_v22 = vadd.f32 %v12665_v62, %v16904_v7 }
 0x576   : > { %v12624_v27 = vpop.f32.mrb[203].mxu0 }
 0x577   : > { %v17003_v28 = vadd.f32 %v12624_v27, %v12623_v48  ;;  %v12666_v61 = vpop.f32.mrb[188].mxu1 }
 0x578   : > { %v12667_v29 = vpop.f32.mrb[189].mxu1 }
 0x579   : > { %v12668_v40 = vadd.f32 %v12667_v29, %v12666_v61  ;;  %v12669_v58 = vpop.f32.mrb[190].mxu1 }
 0x57a   : > { %v12670_v11 = vpop.f32.mrb[191].mxu1 }
 0x57b   : > { %v12626_v16 = vpop.f32.mrb[204].mxu0  ;;  %v12671_v2 = vadd.f32 %v12670_v11, %v12669_v58  ;;  %v4684_v41 = vadd.f32 %v12668_v40, %v16906_v17 }
 0x57c   : > { %v12627_v7 = vpop.f32.mrb[205].mxu0 }
 0x57d   : > { %v17009_v52 = vadd.f32 %v12627_v7, %v12626_v16  ;;  %v12629_v38 = vpop.f32.mrb[206].mxu0  ;;  %v4687_v46 = vadd.f32 %v12671_v2, %v16908_v0 }
 0x57e   : > { %v12630_v1 = vpop.f32.mrb[207].mxu0 }
 0x57f   : > { %v17012_v8 = vadd.f32 %v12630_v1, %v12629_v38  ;;  %v12672_v54 = vpop.f32.mrb[192].mxu1 }
 0x580   : > { %v12673_v30 = vpop.f32.mrb[193].mxu1 }
 0x581   : > { %v12674_v10 = vadd.f32 %v12673_v30, %v12672_v54  ;;  %v12675_v18 = vpop.f32.mrb[194].mxu1 }
 0x582   : > { %v12676_v44 = vpop.f32.mrb[195].mxu1 }
 0x583   : > { %v12677_v50 = vadd.f32 %v12676_v44, %v12675_v18  ;;  %v13830_v13 = vpop.f32.mrb[208].mxu0  ;;  %v17015_v32 = vadd.f32 %v12674_v10, %v16916_v4  ;;  %v14203_v4 = vld [vmem:[%s20451_s2 + $0x340] sm:$0xff]  }
 0x584   : > { %v4829_v17 = vadd.f32 %v13830_v13, %v4668_v59  ;;  %v4820_v43 = vpop.f32.mrb[209].mxu0  ;;  %13860 = vmatprep.subr.bf16.mxu1 %v14203_v4 }
 0x585   : > { %v4821_v33 = vadd.f32 %v4820_v43, %v16973_v34  ;;  %v13831_v47 = vpop.f32.mrb[210].mxu0  ;;  %v17019_v0 = vadd.f32 %v12677_v50, %v16918_v56 }
 0x586   : > { %v4832_v62 = vadd.f32 %v13831_v47, %v4671_v49  ;;  %v4823_v31 = vpop.f32.mrb[211].mxu0  ;;  %v4949_v27 = vmax.f32 %v4829_v17, 0.0 }
 0x587   : > { %v4824_v3 = vadd.f32 %v4823_v31, %v16978_v19  ;;  %v12678_v48 = vpop.f32.mrb[196].mxu1  ;;  %v4947_v59 = vmax.f32 %v4821_v33, 0.0 }
 0x588   : > { %v4950_v61 = vmax.f32 %v4832_v62, 0.0  ;;  %v12679_v45 = vpop.f32.mrb[197].mxu1 }
 0x589   : > { %v4948_v29 = vmax.f32 %v4824_v3, 0.0  ;;  %v12680_v40 = vadd.f32 %v12679_v45, %v12678_v48  ;;  %v12681_v34 = vpop.f32.mrb[198].mxu1 }
 0x58a   : > { %v4980_v58 = vpack.c.bf16 %v4950_v61, %v4949_v27  ;;  %v12682_v11 = vpop.f32.mrb[199].mxu1 }
 0x58b   : > { %v4979_v56 = vpack.c.bf16 %v4948_v29, %v4947_v59  ;;  %v12683_v49 = vadd.f32 %v12682_v11, %v12681_v34  ;;  %v13834_v16 = vpop.f32.mrb[212].mxu0  ;;  %v4700_v19 = vadd.f32 %v12680_v40, %v16920_v55 }
 0x58c   : > { %v5003_v2 = vshrl.u32 %v4980_v58, 16  ;;  %v4845_v7 = vadd.f32 %v13834_v16, %v4684_v41  ;;  %v4836_v38 = vpop.f32.mrb[213].mxu0  ;;  %v5006_v44 = vshll.u32 %v4980_v58, 16 }
 0x58d   : > { %v4996_v1 = vshrl.u32 %v4979_v56, 16  ;;  %v4837_v54 = vadd.f32 %v4836_v38, %v4676_v20  ;;  %v13835_v30 = vpop.f32.mrb[214].mxu0  ;;  %v4703_v10 = vadd.f32 %v12683_v49, %v16922_v60  ;;  %v4999_v43 = vshll.u32 %v4979_v56, 16 }
 0x58e   : > { %v5005_v18 = vrot.slane %v5003_v2, 7  ;;  %v4848_v50 = vadd.f32 %v13835_v30, %v4687_v46  ;;  %v4839_v13 = vpop.f32.mrb[215].mxu0  ;;  %v4953_v33 = vmax.f32 %v4845_v7, 0.0 }
 0x58f   : > { %v4998_v17 = vrot.slane %v4996_v1, 7  ;;  %v4840_v47 = vadd.f32 %v4839_v13, %v17001_v22  ;;  %v12684_v62 = vpop.f32.mrb[200].mxu1  ;;  %v4951_v31 = vmax.f32 %v4837_v54, 0.0 }
 0x590   : > { %v4954_v55 = vmax.f32 %v4848_v50, 0.0  ;;  %v12685_v3 = vpop.f32.mrb[201].mxu1  ;;  %v5008_v41 = vor.u32 %v5006_v44, %v5005_v18  ;;  %v17030_v20 = vsel %vm14512_vm2, %v5005_v18, 0 }
 0x591   : > { %v4952_v48 = vmax.f32 %v4840_v47, 0.0  ;;  %v12686_v60 = vadd.f32 %v12685_v3, %v12684_v62  ;;  %v12687_v27 = vpop.f32.mrb[202].mxu1  ;;  %v5001_v61 = vor.u32 %v4999_v43, %v4998_v17  ;;  %v17034_v46 = vsel %vm14512_vm2, %v4998_v17, 0 }
 0x592   : > { %v4982_v45 = vpack.c.bf16 %v4954_v55, %v4953_v33  ;;  %v12688_v4 = vpop.f32.mrb[203].mxu1  ;;  %v17038_v22 = vsel %vm14512_vm2, 0, %v5008_v41  ;;  %v5252_v59 = vshll.u32 %v17034_v46, 16  ;;  %v5264_v7 = vshll.u32 %v17030_v20, 16 }
 0x593   : > { %v4981_v29 = vpack.c.bf16 %v4952_v48, %v4951_v31  ;;  %v12689_v40 = vadd.f32 %v12688_v4, %v12687_v27  ;;  %v13838_v34 = vpop.f32.mrb[216].mxu0  ;;  %5532 = vrot.lane.b32.xlu0 %v17038_v22, %s14434_s22  ;;  %v17045_v58 = vsel %vm14512_vm2, 0, %v5001_v61  ;;  %v4708_v11 = vadd.f32 %v12686_v60, %v16930_v24 }
 0x594   : > { %v5017_v56 = vshrl.u32 %v4982_v45, 16  ;;  %v5020_v49 = vshll.u32 %v4982_v45, 16  ;;  %v4861_v16 = vadd.f32 %v13838_v34, %v4700_v19  ;;  %v4852_v2 = vpop.f32.mrb[217].mxu0  ;;  %5530 = vrot.lane.b32.xlu1 %v17045_v58, %s14434_s22  ;;  %v5245_v30 = vshrl.u32 %v17045_v58, 16 }
 0x595   : > { %v5010_v38 = vshrl.u32 %v4981_v29, 16  ;;  %v4853_v1 = vadd.f32 %v4852_v2, %v17015_v32  ;;  %v13839_v54 = vpop.f32.mrb[218].mxu0  ;;  %v5247_v18 = vshll.u32 %v17045_v58, 16  ;;  %v5013_v24 = vshll.u32 %v4981_v29, 16 }
 0x596   : > { %v17054_v44 = vrot.slane %v5017_v56, 7  ;;  %v4957_v50 = vmax.f32 %v4861_v16, 0.0  ;;  %v4864_v13 = vadd.f32 %v13839_v54, %v4703_v10  ;;  %v4855_v19 = vpop.f32.mrb[219].mxu0  ;;  %v5254_v62 = vrot.slane %v5252_v59, 1 }
 0x597   : > { %v5012_v17 = vrot.slane %v5010_v38, 7  ;;  %v4856_v43 = vadd.f32 %v4855_v19, %v17019_v0  ;;  %v12690_v33 = vpop.f32.mrb[204].mxu1  ;;  %v5249_v47 = vrot.slane %v5247_v18, 1  ;;  %v4955_v31 = vmax.f32 %v4853_v1, 0.0 }
 0x598   : > { %v4958_v55 = vmax.f32 %v4864_v13, 0.0  ;;  %v12691_v32 = vpop.f32.mrb[205].mxu1  ;;  %v4711_v3 = vadd.f32 %v12689_v40, %v16932_v15  ;;  %v5259_v41 = vshll.u32 %v17038_v22, 16  ;;  %v5257_v0 = vshrl.u32 %v17038_v22, 16 }
 0x599   : > { %v4956_v48 = vmax.f32 %v4856_v43, 0.0  ;;  %v12692_v60 = vadd.f32 %v12691_v32, %v12690_v33  ;;  %v12693_v27 = vpop.f32.mrb[206].mxu1  ;;  %v5250_v61 = vor.u32 %v5249_v47, %v5245_v30  ;;  %v5015_v45 = vor.u32 %v5013_v24, %v5012_v17 }
 0x59a   : > { %v17059_v10 = vpack.c.bf16 %v4958_v55, %v4957_v50  ;;  %v12694_v4 = vpop.f32.mrb[207].mxu1  ;;  %v5261_v29 = vrot.slane %v5259_v41, 1  ;;  %v5022_v59 = vor.u32 %v5020_v49, %v17054_v44  ;;  %v5266_v49 = vrot.slane %v5264_v7, 1 }
 0x59b   : > { %v4983_v34 = vpack.c.bf16 %v4956_v48, %v4955_v31  ;;  %v12695_v56 = vadd.f32 %v12694_v4, %v12693_v27  ;;  %v4716_v16 = vadd.f32 %v12692_v60, %v16934_v51  ;;  %v13842_v15 = vpop.f32.mrb[220].mxu0  ;;  %v17065_v40 = vsel %vm507_vm3, %v5250_v61, %v5254_v62 }
 0x59c   : > { %20564 = vst [vmem:[#allocation5_spill] sm:$0xff] %v17065_v40  ;;  %v5031_v2 = vshrl.u32 %v17059_v10, 16  ;;  %5424 = vrot.lane.b32.xlu1 %v17065_v40, %s14434_s22  ;;  %v4868_v38 = vpop.f32.mrb[221].mxu0  ;;  %v17072_v1 = vsel %vm14512_vm2, 0, %v5015_v45  ;;  %v5262_v54 = vor.u32 %v5261_v29, %v5257_v0  ;;  %v5034_v30 = vshll.u32 %v17059_v10, 16 }
 0x59d   : > { %v5024_v18 = vshrl.u32 %v4983_v34, 16  ;;  %v4877_v51 = vadd.f32 %v13842_v15, %v4716_v16  ;;  %v4869_v24 = vadd.f32 %v4868_v38, %v4708_v11  ;;  %5534 = vrot.lane.b32.xlu0 %v17072_v1, %s14434_s22  ;;  %v13843_v50 = vpop.f32.mrb[222].mxu0  ;;  %v5027_v19 = vshll.u32 %v4983_v34, 16 }
 0x59e   : > { %v17077_v13 = vrot.slane %v5031_v2, 7  ;;  %v4719_v43 = vadd.f32 %v12695_v56, %v16939_v6  ;;  %v4871_v33 = vpop.f32.mrb[223].mxu0  ;;  %v17081_v47 = vsel %vm507_vm3, %v5262_v54, %v5266_v49  ;;  %v17085_v11 = vsel %vm14512_vm2, 0, %v5022_v59 }
 0x59f   : > { %20565 = vst [vmem:[#allocation12_spill] sm:$0xff] %v17081_v47  ;;  %v5026_v62 = vrot.slane %v5024_v18, 7  ;;  %v4961_v7 = vmax.f32 %v4877_v51, 0.0  ;;  %v4872_v31 = vadd.f32 %v4871_v33, %v4711_v3  ;;  %v12696_v55 = vpop.f32.mrb[208].mxu1  ;;  %v4959_v32 = vmax.f32 %v4869_v24, 0.0 }
 0x5a0   : > { %v4880_v41 = vadd.f32 %v13843_v50, %v4719_v43  ;;  %5426 = vrot.lane.b32.xlu1 %v17081_v47, %s14434_s22  ;;  %v12697_v48 = vpop.f32.mrb[209].mxu1  ;;  %v17091_v6 = vsel %vm14512_vm2, %v5012_v17, 0  ;;  %v5271_v60 = vshll.u32 %v17072_v1, 16  ;;  %v5269_v29 = vshrl.u32 %v17072_v1, 16 }
 0x5a1   : > { %v4960_v27 = vmax.f32 %v4872_v31, 0.0  ;;  %5536 = vrot.lane.b32.xlu0 %v17085_v11, %s14434_s22  ;;  %v12698_v3 = vadd.f32 %v12697_v48, %v12696_v55  ;;  %v12699_v61 = vpop.f32.mrb[210].mxu1  ;;  %v5276_v45 = vshll.u32 %v17091_v6, 16  ;;  %v5029_v10 = vor.u32 %v5027_v19, %v5026_v62 }
 0x5a2   : > { %v4962_v4 = vmax.f32 %v4880_v41, 0.0  ;;  %v12700_v0 = vpop.f32.mrb[211].mxu1  ;;  %v5273_v59 = vrot.slane %v5271_v60, 1  ;;  %v17101_v17 = vsel %vm14512_vm2, %v17054_v44, 0  ;;  %v5283_v51 = vshll.u32 %v17085_v11, 16 }
 0x5a3   : > { %v4985_v34 = vpack.c.bf16 %v4960_v27, %v4959_v32  ;;  %v12701_v56 = vadd.f32 %v12700_v0, %v12699_v61  ;;  %v13846_v16 = vpop.f32.mrb[224].mxu0  ;;  %v5278_v15 = vrot.slane %v5276_v45, 1  ;;  %v4724_v2 = vadd.f32 %v12698_v3, %v16944_v25 }
 0x5a4   : > { %v17104_v38 = vpack.c.bf16 %v4962_v4, %v4961_v7  ;;  %v5274_v54 = vor.u32 %v5273_v59, %v5269_v29  ;;  %v4884_v49 = vpop.f32.mrb[225].mxu0  ;;  %v17108_v18 = vsel %vm14512_vm2, 0, %v5029_v10  ;;  %v5281_v25 = vshrl.u32 %v17085_v11, 16 }
 0x5a5   : > { %v5038_v24 = vshrl.u32 %v4985_v34, 16  ;;  %v4885_v50 = vadd.f32 %v4884_v49, %v4724_v2  ;;  %5538 = vrot.lane.b32.xlu0 %v17108_v18, %s14434_s22  ;;  %v13847_v44 = vpop.f32.mrb[226].mxu0  ;;  %v4727_v19 = vadd.f32 %v12701_v56, %v16946_v9  ;;  %v5041_v33 = vshll.u32 %v4985_v34, 16 }
 0x5a6   : > { %v5045_v43 = vshrl.u32 %v17104_v38, 16  ;;  %v17117_v7 = vsel %vm507_vm3, %v5274_v54, %v5278_v15  ;;  %v4887_v31 = vpop.f32.mrb[227].mxu0  ;;  %v5285_v55 = vrot.slane %v5283_v51, 1  ;;  %v5048_v32 = vshll.u32 %v17104_v38, 16 }
 0x5a7   : > { %20566 = vst [vmem:[#allocation6_spill] sm:$0xff] %v17117_v7  ;;  %v5040_v41 = vrot.slane %v5038_v24, 7  ;;  %5428 = vrot.lane.b32.xlu1 %v17117_v7, %s14434_s22  ;;  %v4888_v48 = vadd.f32 %v4887_v31, %v4727_v19  ;;  %v5288_v60 = vshll.u32 %v17101_v17, 16  ;;  %v12702_v9 = vpop.f32.mrb[212].mxu1  ;;  %v4963_v27 = vmax.f32 %v4885_v50, 0.0 }
 0x5a8   : > { %v5286_v3 = vor.u32 %v5285_v55, %v5281_v25  ;;  %v5036_v61 = vor.u32 %v5034_v30, %v17077_v13  ;;  %v12703_v45 = vpop.f32.mrb[213].mxu1  ;;  %v17126_v10 = vsel %vm14512_vm2, %v5026_v62, 0  ;;  %v5047_v4 = vrot.slane %v5045_v43, 7 }
 0x5a9   : > { %v4964_v0 = vmax.f32 %v4888_v48, 0.0  ;;  %v5290_v29 = vrot.slane %v5288_v60, 1  ;;  %v12704_v59 = vadd.f32 %v12703_v45, %v12702_v9  ;;  %v12705_v34 = vpop.f32.mrb[214].mxu1  ;;  %v5295_v2 = vshll.u32 %v17108_v18, 16 }
 0x5aa   : > { %v17130_v56 = vsel %vm14512_vm2, 0, %v5036_v61  ;;  %v12706_v15 = vpop.f32.mrb[215].mxu1  ;;  %v5300_v38 = vshll.u32 %v17126_v10, 16  ;;  %v5043_v30 = vor.u32 %v5041_v33, %v5040_v41  ;;  %v5293_v50 = vshrl.u32 %v17108_v18, 16 }
 0x5ab   : > { %v4987_v54 = vpack.c.bf16 %v4964_v0, %v4963_v27  ;;  %v17135_v49 = vsel %vm507_vm3, %v5286_v3, %v5290_v29  ;;  %5540 = vrot.lane.b32.xlu0 %v17130_v56, %s14434_s22  ;;  %v4732_v62 = vadd.f32 %v12704_v59, %v16951_v53  ;;  %v12707_v51 = vadd.f32 %v12706_v15, %v12705_v34  ;;  %v17140_v24 = vpop.f32.mrb[228].mxu0 }
 0x5ac   : > { %20567 = vst [vmem:[#allocation15_spill] sm:$0xff] %v17135_v49  ;;  %5430 = vrot.lane.b32.xlu1 %v17135_v49, %s14434_s22  ;;  %v5297_v19 = vrot.slane %v5295_v2, 1  ;;  %v4900_v25 = vpop.f32.mrb[229].mxu0  ;;  %v17147_v43 = vsel %vm14512_vm2, 0, %v5043_v30  ;;  %v17152_v33 = vsel %vm14512_vm2, %v17077_v13, 0  ;;  %v5302_v48 = vrot.slane %v5300_v38, 1 }
 0x5ad   : > { %v5052_v53 = vshrl.u32 %v4987_v54, 16  ;;  %v4893_v31 = vadd.f32 %v13846_v16, %v4732_v62  ;;  %v4735_v55 = vadd.f32 %v12707_v51, %v16953_v26  ;;  %v17155_v60 = vpop.f32.mrb[230].mxu0  ;;  %v5055_v9 = vshll.u32 %v4987_v54, 16 }
 0x5ae   : > { %v5298_v27 = vor.u32 %v5297_v19, %v5293_v50  ;;  %v4903_v3 = vpop.f32.mrb[231].mxu0  ;;  %v5307_v61 = vshll.u32 %v17130_v56, 16  ;;  %v5312_v45 = vshll.u32 %v17152_v33, 16  ;;  %v5305_v13 = vshrl.u32 %v17130_v56, 16 }
 0x5af   : > { %v5054_v0 = vrot.slane %v5052_v53, 7  ;;  %v4896_v29 = vadd.f32 %v13847_v44, %v4735_v55  ;;  %5542 = vrot.lane.b32.xlu0 %v17147_v43, %s14434_s22  ;;  %v12708_v16 = vpop.f32.mrb[216].mxu1  ;;  %v5050_v59 = vor.u32 %v5048_v32, %v5047_v4  ;;  %v4965_v26 = vmax.f32 %v4893_v31, 0.0 }
 0x5b0   : > { %v17163_v34 = vsel %vm507_vm3, %v5298_v27, %v5302_v48  ;;  %v5309_v15 = vrot.slane %v5307_v61, 1  ;;  %v12709_v2 = vpop.f32.mrb[217].mxu1  ;;  %v17167_v38 = vsel %vm14512_vm2, %v5040_v41, 0  ;;  %v5314_v44 = vrot.slane %v5312_v45, 1 }
 0x5b1   : > { %20568 = vst [vmem:[#allocation7_spill] sm:$0xff] %v17163_v34  ;;  %v4966_v30 = vmax.f32 %v4896_v29, 0.0  ;;  %5432 = vrot.lane.b32.xlu1 %v17163_v34, %s14434_s22  ;;  %v17173_v54 = vsel %vm14512_vm2, 0, %v5050_v59  ;;  %v12710_v32 = vadd.f32 %v12709_v2, %v12708_v16  ;;  %v12711_v62 = vpop.f32.mrb[218].mxu1  ;;  %v5319_v19 = vshll.u32 %v17147_v43, 16 }
 0x5b2   : > { %v5310_v51 = vor.u32 %v5309_v15, %v5305_v13  ;;  %v12712_v50 = vpop.f32.mrb[219].mxu1  ;;  %v5324_v53 = vshll.u32 %v17167_v38, 16  ;;  %v5057_v31 = vor.u32 %v5055_v9, %v5054_v0  ;;  %v17184_v61 = vsel %vm14512_vm2, %v5047_v4, 0 }
 0x5b3   : > { %v4988_v41 = vpack.c.bf16 %v4966_v30, %v4965_v26  ;;  %5544 = vrot.lane.b32.xlu0 %v17173_v54, %s14434_s22  ;;  %v4740_v55 = vadd.f32 %v12710_v32, %v16958_v37  ;;  %v12713_v48 = vadd.f32 %v12712_v50, %v12711_v62  ;;  %v17180_v27 = vpop.f32.mrb[232].mxu0  ;;  %v5317_v29 = vshrl.u32 %v17147_v43, 16 }
 0x5b4   : > { %v17187_v45 = vsel %vm507_vm3, %v5310_v51, %v5314_v44  ;;  %v5321_v13 = vrot.slane %v5319_v19, 1  ;;  %v17190_v9 = vpop.f32.mrb[233].mxu0  ;;  %v17194_v16 = vsel %vm14512_vm2, 0, %v5057_v31  ;;  %v5331_v26 = vshll.u32 %v17173_v54, 16 }
 0x5b5   : > { %20569 = vst [vmem:[#allocation8_spill] sm:$0xff] %v17187_v45  ;;  %5434 = vrot.lane.b32.xlu1 %v17187_v45, %s14434_s22  ;;  %v4901_v37 = vadd.f32 %v4900_v25, %v4740_v55  ;;  %v4743_v59 = vadd.f32 %v12713_v48, %v16960_v57  ;;  %v17199_v4 = vpop.f32.mrb[234].mxu0  ;;  %v5326_v2 = vrot.slane %v5324_v53, 1  ;;  %v5336_v44 = vshll.u32 %v17184_v61, 16 }
 0x5b6   : > { %v5322_v15 = vor.u32 %v5321_v13, %v5317_v29  ;;  %v17202_v30 = vpop.f32.mrb[235].mxu0  ;;  %v17207_v32 = vsel %vm14512_vm2, %v5054_v0, 0  ;;  %v5329_v57 = vshrl.u32 %v17173_v54, 16  ;;  %v5333_v25 = vrot.slane %v5331_v26, 1 }
 0x5b7   : > { %v4904_v62 = vadd.f32 %v4903_v3, %v4743_v59  ;;  %5546 = vrot.lane.b32.xlu0 %v17194_v16, %s14434_s22  ;;  %v12714_v51 = vpop.f32.mrb[220].mxu1  ;;  %v5343_v50 = vshll.u32 %v17194_v16, 16  ;;  %v4967_v19 = vmax.f32 %v4901_v37, 0.0  ;;  %v5348_v55 = vshll.u32 %v17207_v32, 16 }
 0x5b8   : > { %v17214_v53 = vsel %vm507_vm3, %v5322_v15, %v5326_v2  ;;  %v12715_v31 = vpop.f32.mrb[221].mxu1  ;;  %v5059_v48 = vshrl.u32 %v4988_v41, 16  ;;  %v5334_v3 = vor.u32 %v5333_v25, %v5329_v57  ;;  %v5338_v26 = vrot.slane %v5336_v44, 1 }
 0x5b9   : > { %v4968_v0 = vmax.f32 %v4904_v62, 0.0  ;;  %5436 = vrot.lane.b32.xlu1 %v17214_v53, %s14434_s22  ;;  %v12716_v29 = vadd.f32 %v12715_v31, %v12714_v51  ;;  %v12717_v13 = vpop.f32.mrb[222].mxu1  ;;  %v5345_v59 = vrot.slane %v5343_v50, 1  ;;  %v5341_v34 = vshrl.u32 %v17194_v16, 16 }
 0x5ba   : > { %v12718_v45 = vpop.f32.mrb[223].mxu1  ;;  %v5061_v37 = vrot.slane %v5059_v48, 7  ;;  %v5062_v49 = vshll.u32 %v4988_v41, 16  ;;  %v5350_v47 = vrot.slane %v5348_v55, 1  ;;  %v17224_v62 = vsel %vm507_vm3, %v5334_v3, %v5338_v26 }
 0x5bb   : > { %v4989_v15 = vpack.c.bf16 %v4968_v0, %v4967_v19  ;;  %v4748_v2 = vadd.f32 %v12716_v29, %v16962_v21  ;;  %v12719_v7 = vadd.f32 %v12718_v45, %v12717_v13  ;;  %v17221_v40 = vpop.f32.mrb[236].mxu0  ;;  %v5346_v57 = vor.u32 %v5345_v59, %v5341_v34 }
 0x5bc   : > { %v5064_v25 = vor.u32 %v5062_v49, %v5061_v37  ;;  %v17228_v44 = vsel %vm14512_vm2, %v5061_v37, 0  ;;  %v17230_v51 = vpop.f32.mrb[237].mxu0 }
 0x5bd   : > { %5438 = vrot.lane.b32.xlu1 %v17224_v62, %s14434_s22  ;;  %v4909_v21 = vadd.f32 %v17140_v24, %v4748_v2  ;;  %v4751_v41 = vadd.f32 %v12719_v7, %v16964_v36  ;;  %v5066_v45 = vshrl.u32 %v4989_v15, 16  ;;  %v17236_v50 = vpop.f32.mrb[238].mxu0  ;;  %v17239_v19 = vsel %vm507_vm3, %v5346_v57, %v5350_v47 }
 0x5be   : > { %v17243_v49 = vsel %vm14512_vm2, 0, %v5064_v25  ;;  %v5360_v34 = vshll.u32 %v17228_v44, 16  ;;  %v17246_v31 = vpop.f32.mrb[239].mxu0  ;;  %v5069_v0 = vshll.u32 %v4989_v15, 16  ;;  %v14205_v15 = vld [vmem:[%s20451_s2 + $0x300] sm:$0xff]  }
 0x5bf   : > { %v4912_v55 = vadd.f32 %v17155_v60, %v4751_v41  ;;  %5548 = vrot.lane.b32.xlu0 %v17243_v49, %s14434_s22  ;;  %v12720_v36 = vpop.f32.mrb[224].mxu1  ;;  %v5355_v7 = vshll.u32 %v17243_v49, 16  ;;  %v4969_v24 = vmax.f32 %v4909_v21, 0.0  ;;  %v5068_v47 = vrot.slane %v5066_v45, 7  ;;  %v14206_v25 = vld [vmem:[%s20451_s2 + $0x2c0] sm:$0xff]   ;;  %12876 = vmatprep.subr.bf16.mxu0 %v14205_v15  ;;  %v14208_v15 = vld [vmem:[%s20451_s2 + $0x308] sm:$0xff]  }
 0x5c0   : > { %v12721_v48 = vpop.f32.mrb[225].mxu1  ;;  %v5353_v59 = vshrl.u32 %v17243_v49, 16  ;;  %v5362_v37 = vrot.slane %v5360_v34, 1  ;;  %12877 = vmatpush3.bf16.msra.mxu0 %v14206_v25 }
 0x5c1   : > { %v4970_v3 = vmax.f32 %v4912_v55, 0.0  ;;  %5440 = vrot.lane.b32.xlu1 %v17239_v19, %s14434_s22  ;;  %v12722_v29 = vadd.f32 %v12721_v48, %v12720_v36  ;;  %v12723_v13 = vpop.f32.mrb[226].mxu1  ;;  %v5357_v26 = vrot.slane %v5355_v7, 1  ;;  %v5071_v2 = vor.u32 %v5069_v0, %v5068_v47  ;;  %12878 = vmatprep.subr.bf16.mxu0 %v14208_v15 }
 0x5c2   : > { %v12724_v60 = vpop.f32.mrb[227].mxu1  ;;  %v17257_v57 = vsel %vm14512_vm2, %v5068_v47, 0 }
 0x5c3   : > { %v4990_v21 = vpack.c.bf16 %v4970_v3, %v4969_v24  ;;  %v4756_v41 = vadd.f32 %v12722_v29, %v16975_v35  ;;  %v12725_v45 = vadd.f32 %v12724_v60, %v12723_v13  ;;  %v5358_v55 = vor.u32 %v5357_v26, %v5353_v59 }
 0x5c4   : > { %v17268_v34 = vsel %vm14512_vm2, 0, %v5071_v2  ;;  %v5372_v24 = vshll.u32 %v17257_v57, 16 }
 0x5c5   : > { %v4917_v36 = vadd.f32 %v17190_v9, %v4756_v41  ;;  %v4759_v7 = vadd.f32 %v12725_v45, %v16986_v63  ;;  %v17273_v48 = vsel %vm507_vm3, %v5358_v55, %v5362_v37  ;;  %5550 = vrot.lane.b32.xlu0 %v17268_v34, %s14434_s22  ;;  %v5367_v35 = vshll.u32 %v17268_v34, 16 }
 0x5c6   : > { %5442 = vrot.lane.b32.xlu1 %v17273_v48, %s14434_s22  ;;  %v5073_v47 = vshrl.u32 %v4990_v21, 16  ;;  %v5365_v63 = vshrl.u32 %v17268_v34, 16  ;;  %v5076_v59 = vshll.u32 %v4990_v21, 16  ;;  %v5374_v45 = vrot.slane %v5372_v24, 1  ;;  %v14209_v21 = vld [vmem:[%s20451_s2 + $0x2c8] sm:$0xff]  }
 0x5c7   : > { %v4920_v0 = vadd.f32 %v17202_v30, %v4759_v7  ;;  %v12726_v9 = vpop.f32.mrb[228].mxu1  ;;  %v5369_v29 = vrot.slane %v5367_v35, 1  ;;  %v4971_v26 = vmax.f32 %v4917_v36, 0.0  ;;  %v14210_v36 = vld [vmem:[%s20451_s2 + $0x310] sm:$0xff]   ;;  %12879 = vmatpush3.bf16.msra.mxu0 %v14209_v21 }
 0x5c8   : > { %v12727_v3 = vpop.f32.mrb[229].mxu1  ;;  %v5075_v13 = vrot.slane %v5073_v47, 7  ;;  %12880 = vmatprep.subr.bf16.mxu0 %v14210_v36  ;;  %v14212_v36 = vld [vmem:[%s20451_s2 + $0x318] sm:$0xff]  }
 0x5c9   : > { %v4972_v60 = vmax.f32 %v4920_v0, 0.0  ;;  %v12728_v37 = vadd.f32 %v12727_v3, %v12726_v9  ;;  %v12729_v2 = vpop.f32.mrb[230].mxu1  ;;  %v5370_v41 = vor.u32 %v5369_v29, %v5365_v63  ;;  %v14211_v3 = vld [vmem:[%s20451_s2 + $0x2d0] sm:$0xff]  }
 0x5ca   : > { %v12730_v25 = vpop.f32.mrb[231].mxu1  ;;  %v5078_v55 = vor.u32 %v5076_v59, %v5075_v13  ;;  %v17288_v30 = vsel %vm14512_vm2, %v5075_v13, 0 }
 0x5cb   : > { %v4991_v7 = vpack.c.bf16 %v4972_v60, %v4971_v26  ;;  %v4764_v35 = vadd.f32 %v12728_v37, %v16989_v14  ;;  %v12731_v47 = vadd.f32 %v12730_v25, %v12729_v2  ;;  %v17298_v24 = vsel %vm507_vm3, %v5370_v41, %v5374_v45  ;;  %12881 = vmatpush3.bf16.msra.mxu0 %v14211_v3 }
 0x5cc   : > { %v17302_v0 = vsel %vm14512_vm2, 0, %v5078_v55  ;;  %v5384_v9 = vshll.u32 %v17288_v30, 16  ;;  %5444 = vrot.lane.b32.xlu1 %v17298_v24, %s14434_s22  ;;  %12882 = vmatprep.subr.bf16.mxu0 %v14212_v36 }
 0x5cd   : > { %v4925_v63 = vadd.f32 %v17180_v27, %v4764_v35  ;;  %v4767_v14 = vadd.f32 %v12731_v47, %v16992_v12  ;;  %5552 = vrot.lane.b32.xlu0 %v17302_v0, %s14434_s22  ;;  %v5379_v29 = vshll.u32 %v17302_v0, 16  ;;  %v5080_v13 = vshrl.u32 %v4991_v7, 16 }
 0x5ce   : > { %v5377_v60 = vshrl.u32 %v17302_v0, 16  ;;  %v5386_v27 = vrot.slane %v5384_v9, 1  ;;  %v5083_v12 = vshll.u32 %v4991_v7, 16  ;;  %v14213_v7 = vld [vmem:[%s20451_s2 + $0x2d8] sm:$0xff]   ;;  %v14214_v9 = vld [vmem:[%s20451_s2 + $0x320] sm:$0xff]  }
 0x5cf   : > { %v4928_v59 = vadd.f32 %v17199_v4, %v4767_v14  ;;  %v12732_v26 = vpop.f32.mrb[232].mxu1  ;;  %v5381_v37 = vrot.slane %v5379_v29, 1  ;;  %v5082_v15 = vrot.slane %v5080_v13, 7  ;;  %v4973_v25 = vmax.f32 %v4925_v63, 0.0  ;;  %12883 = vmatpush3.bf16.msra.mxu0 %v14213_v7  ;;  %v14216_v7 = vld [vmem:[%s20451_s2 + $0x328] sm:$0xff]  }
 0x5d0   : > { %v12733_v2 = vpop.f32.mrb[233].mxu1  ;;  %12884 = vmatprep.subr.bf16.mxu0 %v14214_v9 }
 0x5d1   : > { %v4974_v41 = vmax.f32 %v4928_v59, 0.0  ;;  %v12734_v45 = vadd.f32 %v12733_v2, %v12732_v26  ;;  %v12735_v55 = vpop.f32.mrb[234].mxu1  ;;  %v5382_v21 = vor.u32 %v5381_v37, %v5377_v60  ;;  %v5085_v4 = vor.u32 %v5083_v12, %v5082_v15  ;;  %v14215_v26 = vld [vmem:[%s20451_s2 + $0x2e0] sm:$0xff]  }
 0x5d2   : > { %v12736_v35 = vpop.f32.mrb[235].mxu1  ;;  %v17322_v47 = vsel %vm14512_vm2, %v5082_v15, 0 }
 0x5d3   : > { %v4992_v3 = vpack.c.bf16 %v4974_v41, %v4973_v25  ;;  %v12737_v63 = vadd.f32 %v12736_v35, %v12735_v55  ;;  %v17331_v14 = vsel %vm507_vm3, %v5382_v21, %v5386_v27  ;;  %v4772_v29 = vadd.f32 %v12734_v45, %v16998_v39  ;;  %12885 = vmatpush3.bf16.msra.mxu0 %v14215_v26 }
 0x5d4   : > { %5446 = vrot.lane.b32.xlu1 %v17331_v14, %s14434_s22  ;;  %v17338_v13 = vsel %vm14512_vm2, 0, %v5085_v4  ;;  %v5396_v59 = vshll.u32 %v17322_v47, 16  ;;  %12886 = vmatprep.subr.bf16.mxu0 %v14216_v7 }
 0x5d5   : > { %v4933_v60 = vadd.f32 %v17230_v51, %v4772_v29  ;;  %5554 = vrot.lane.b32.xlu0 %v17338_v13, %s14434_s22  ;;  %v4775_v39 = vadd.f32 %v12737_v63, %v17003_v28  ;;  %v5391_v37 = vshll.u32 %v17338_v13, 16  ;;  %v5087_v2 = vshrl.u32 %v4992_v3, 16  ;;  %v14218_v29 = vld [vmem:[%s20451_s2 + $0x330] sm:$0xff]  }
 0x5d6   : > { %v5389_v12 = vshrl.u32 %v17338_v13, 16  ;;  %v5398_v45 = vrot.slane %v5396_v59, 1  ;;  %v5090_v21 = vshll.u32 %v4992_v3, 16  ;;  %v14217_v3 = vld [vmem:[%s20451_s2 + $0x2e8] sm:$0xff]  }
 0x5d7   : > { %v4936_v27 = vadd.f32 %v17246_v31, %v4775_v39  ;;  %v12738_v15 = vpop.f32.mrb[236].mxu1  ;;  %v5393_v25 = vrot.slane %v5391_v37, 1  ;;  %v5089_v55 = vrot.slane %v5087_v2, 7  ;;  %v4975_v51 = vmax.f32 %v4933_v60, 0.0  ;;  %12887 = vmatpush3.bf16.msra.mxu0 %v14217_v3  ;;  %v14219_v2 = vld [vmem:[%s20451_s2 + $0x2f0] sm:$0xff]  }
 0x5d8   : > { %v12739_v41 = vpop.f32.mrb[237].mxu1  ;;  %12888 = vmatprep.subr.bf16.mxu0 %v14218_v29 }
 0x5d9   : > { %v4976_v36 = vmax.f32 %v4936_v27, 0.0  ;;  %v12740_v35 = vadd.f32 %v12739_v41, %v12738_v15  ;;  %v12741_v4 = vpop.f32.mrb[238].mxu1  ;;  %v5394_v28 = vor.u32 %v5393_v25, %v5389_v12  ;;  %v5092_v31 = vor.u32 %v5090_v21, %v5089_v55 }
 0x5da   : > { %v12742_v9 = vpop.f32.mrb[239].mxu1  ;;  %v17356_v63 = vsel %vm14512_vm2, %v5089_v55, 0 }
 0x5db   : > { %v4993_v59 = vpack.c.bf16 %v4976_v36, %v4975_v51  ;;  %v4780_v26 = vadd.f32 %v12740_v35, %v17009_v52  ;;  %v12743_v60 = vadd.f32 %v12742_v9, %v12741_v4  ;;  %v17366_v39 = vsel %vm507_vm3, %v5394_v28, %v5398_v45  ;;  %12889 = vmatpush3.bf16.msra.mxu0 %v14219_v2  ;;  %v14220_v4 = vld [vmem:[%s20451_s2 + $0x338] sm:$0xff]  }
 0x5dc   : > { %5448 = vrot.lane.b32.xlu1 %v17366_v39, %s14434_s22  ;;  %v17372_v37 = vsel %vm14512_vm2, 0, %v5092_v31  ;;  %v5408_v25 = vshll.u32 %v17356_v63, 16  ;;  %12890 = vmatprep.subr.bf16.mxu0 %v14220_v4 }
 0x5dd   : > { %v5094_v27 = vshrl.u32 %v4993_v59, 16  ;;  %v4941_v52 = vadd.f32 %v17221_v40, %v4780_v26  ;;  %v4783_v15 = vadd.f32 %v12743_v60, %v17012_v8  ;;  %5556 = vrot.lane.b32.xlu0 %v17372_v37, %s14434_s22  ;;  %v5403_v12 = vshll.u32 %v17372_v37, 16 }
 0x5de   : > { %v5097_v45 = vshll.u32 %v4993_v59, 16  ;;  %v5401_v21 = vshrl.u32 %v17372_v37, 16  ;;  %v5410_v7 = vrot.slane %v5408_v25, 1 }
 0x5df   : > { %v5096_v41 = vrot.slane %v5094_v27, 7  ;;  %v4944_v55 = vadd.f32 %v17236_v50, %v4783_v15  ;;  %v5405_v51 = vrot.slane %v5403_v12, 1  ;;  %v4977_v36 = vmax.f32 %v4941_v52, 0.0  ;;  %v14221_v50 = vld [vmem:[%s20451_s2 + $0x2f8] sm:$0xff]  }
 0x5e0   : > { %12891 = vmatpush3.bf16.msra.mxu0 %v14221_v50  ;;  %v5499_v50 = vrot.slane %v17130_v56, 1 }
 0x5e1   : > { %v4978_v40 = vmax.f32 %v4944_v55, 0.0  ;;  %v5099_v35 = vor.u32 %v5097_v45, %v5096_v41  ;;  %v17387_v8 = vsel %vm14512_vm2, %v5096_v41, 0  ;;  %v5406_v28 = vor.u32 %v5405_v51, %v5401_v21 }
 0x5e2   : > { %v5420_v59 = vshll.u32 %v17387_v8, 16  ;;  %v5487_v45 = vrot.slane %v17038_v22, 1  ;;  %v5484_v21 = vrot.slane %v17045_v58, 1  ;;  %v5488_v51 = vrot.slane %v17030_v20, 1 }
 0x5e3   : > { %v4994_v9 = vpack.c.bf16 %v4978_v40, %v4977_v36  ;;  %v17397_v31 = vsel %vm14512_vm2, 0, %v5099_v35  ;;  %v17400_v3 = vsel %vm507_vm3, %v5406_v28, %v5410_v7  ;;  %v5485_v36 = vrot.slane %v17034_v46, 1 }
 0x5e4   : > { %5558 = vrot.lane.b32.xlu0 %v17397_v31, %s14434_s22  ;;  %v5415_v29 = vshll.u32 %v17397_v31, 16  ;;  %5450 = vrot.lane.b32.xlu1 %v17400_v3, %s14434_s22  ;;  %v5413_v60 = vshrl.u32 %v17397_v31, 16  ;;  %v5422_v12 = vrot.slane %v5420_v59, 1  ;;  %v17425_v40 = vsel %vm764_vm4, %v5487_v45, %v5488_v51 }
 0x5e5   : > { %v5101_v26 = vshrl.u32 %v4994_v9, 16  ;;  %v5104_v52 = vshll.u32 %v4994_v9, 16  ;;  %v5493_v35 = vrot.slane %v17085_v11, 1  ;;  %v17431_v4 = vsel %vm764_vm4, %v5484_v21, %v5485_v36 }
 0x5e6   : > { %v5417_v2 = vrot.slane %v5415_v29, 1  ;;  %v5490_v28 = vrot.slane %v17072_v1, 1  ;;  %v5494_v20 = vrot.slane %v17101_v17, 1  ;;  %v5491_v46 = vrot.slane %v17091_v6, 1 }
 0x5e7   : > { %v5103_v27 = vrot.slane %v5101_v26, 7  ;;  %v5496_v29 = vrot.slane %v17108_v18, 1  ;;  %v5500_v17 = vrot.slane %v17152_v33, 1  ;;  %v5497_v6 = vrot.slane %v17126_v10, 1 }
 0x5e8   : > { %v5418_v15 = vor.u32 %v5417_v2, %v5413_v60  ;;  %v17439_v7 = vsel %vm764_vm4, %v5493_v35, %v5494_v20  ;;  %v17445_v9 = vsel %vm764_vm4, %v5490_v28, %v5491_v46  ;;  %v5505_v26 = vrot.slane %v17173_v54, 1 }
 0x5e9   : > { %v5106_v25 = vor.u32 %v5104_v52, %v5103_v27  ;;  %v17453_v59 = vsel %vm764_vm4, %v5499_v50, %v5500_v17  ;;  %v17459_v60 = vsel %vm764_vm4, %v5496_v29, %v5497_v6  ;;  %v5502_v2 = vrot.slane %v17147_v43, 1 }
 0x5ea   : > { %v17410_v41 = vsel %vm507_vm3, %v5418_v15, %v5422_v12  ;;  %v5506_v33 = vrot.slane %v17184_v61, 1  ;;  %v5503_v10 = vrot.slane %v17167_v38, 1  ;;  %v5511_v15 = vrot.slane %v17243_v49, 1 }
 0x5eb   : > { %5452 = vrot.lane.b32.xlu1 %v17410_v41, %s14434_s22  ;;  %v17417_v55 = vsel %vm14512_vm2, 0, %v5106_v25  ;;  %v5508_v25 = vrot.slane %v17194_v16, 1  ;;  %v5512_v61 = vrot.slane %v17228_v44, 1  ;;  %v5509_v38 = vrot.slane %v17207_v32, 1 }
 0x5ec   : > { %5560 = vrot.lane.b32.xlu0 %v17417_v55, %s14434_s22  ;;  %v17467_v52 = vsel %vm764_vm4, %v5505_v26, %v5506_v33  ;;  %v17473_v12 = vsel %vm764_vm4, %v5502_v2, %v5503_v10  ;;  %v5517_v21 = vrot.slane %v17302_v0, 1  ;;  %v5514_v36 = vrot.slane %v17268_v34, 1 }
 0x5ed   : > { %v17481_v45 = vsel %vm764_vm4, %v5511_v15, %v5512_v61  ;;  %v17487_v51 = vsel %vm764_vm4, %v5508_v25, %v5509_v38  ;;  %v5565_v35 = vshll.u32 %v17417_v55, 16  ;;  %v5518_v32 = vrot.slane %v17288_v30, 1  ;;  %v14204_v25 = vld [vmem:[%s20451_s2 + $0x348] sm:$0xff]  }
 0x5ee   : > { %v5515_v44 = vrot.slane %v17257_v57, 1  ;;  %v5523_v20 = vrot.slane %v17372_v37, 1  ;;  %v5170_v46 = vsel %vm14512_vm2, %v5103_v27, 0  ;;  %v5520_v29 = vrot.slane %v17338_v13, 1 }
 0x5ef   : > { %5580 = vrot.lane.b32.xlu1 %v17425_v40, %s14434_s22  ;;  %v17496_v28 = vsel %vm764_vm4, %v5517_v21, %v5518_v32  ;;  %v5567_v17 = vrot.slane %v5565_v35, 1  ;;  %v5524_v57 = vrot.slane %v17356_v63, 1  ;;  %v5521_v30 = vrot.slane %v17322_v47, 1 }
 0x5f0   : > { %5578 = vrot.lane.b32.xlu0 %v17431_v4, %s14434_s22  ;;  %v17504_v50 = vsel %vm764_vm4, %v5514_v36, %v5515_v44  ;;  %v5563_v6 = vshrl.u32 %v17417_v55, 16  ;;  %v5570_v26 = vshll.u32 %v5170_v46, 16  ;;  %v5526_v10 = vrot.slane %v17397_v31, 1  ;;  %v14333_v36 = vld [vmem:[%s20451_s2 + $0x340] sm:$0xff]  }
 0x5f1   : > { %v17513_v33 = vsel %vm764_vm4, %v5523_v20, %v5524_v57  ;;  %v17521_v63 = vsel %vm764_vm4, %v5520_v29, %v5521_v30  ;;  %v5527_v61 = vrot.slane %v17387_v8, 1  ;;  %v5575_v32 = vrot.slane %v17417_v55, 1  ;;  %v14222_v57 = vld [vmem:[%s20451_s2 + $0x358] sm:$0xff]  }
 0x5f2   : > { %v5568_v47 = vor.u32 %v5567_v17, %v5563_v6  ;;  %v5572_v21 = vrot.slane %v5570_v26, 1  ;;  %v5576_v44 = vrot.slane %v5170_v46, 1 }
 0x5f3   : > { %5584 = vrot.lane.b32.xlu1 %v17439_v7, %s14434_s22  ;;  %v17536_v35 = vsel %vm764_vm4, %v5526_v10, %v5527_v61 }
 0x5f4   : > { %5582 = vrot.lane.b32.xlu0 %v17445_v9, %s14434_s22  ;;  %v17541_v8 = vsel %vm507_vm3, %v5568_v47, %v5572_v21  ;;  %v17550_v17 = vsel %vm764_vm4, %v5575_v32, %v5576_v44 }
 0x5f7   : > { %5588 = vrot.lane.b32.xlu1 %v17453_v59, %s14434_s22 }
 0x5f8   : > { %5586 = vrot.lane.b32.xlu0 %v17459_v60, %s14434_s22 }
 0x5fb   : > { %5592 = vrot.lane.b32.xlu1 %v17467_v52, %s14434_s22 }
 0x5fc   : > { %5590 = vrot.lane.b32.xlu0 %v17473_v12, %s14434_s22 }
 0x5ff   : > { %5596 = vrot.lane.b32.xlu1 %v17481_v45, %s14434_s22 }
 0x600   : > { %5594 = vrot.lane.b32.xlu0 %v17487_v51, %s14434_s22 }
 0x603   : > { %5600 = vrot.lane.b32.xlu1 %v17496_v28, %s14434_s22 }
 0x604   : > { %5598 = vrot.lane.b32.xlu0 %v17504_v50, %s14434_s22 }
 0x605   : > { %v5533_v27 = vpop.permute.xlu0 %5532 }
 0x606   : > { %v5531_v2 = vpop.permute.xlu1 %5530  ;;  %v5662_v38 = vsel %vm896_vm5, %v17431_v4, %v5533_v27  ;;  %v14207_v4 = vld [vmem:[%s20451_s2 + $0x350] sm:$0xff]  }
 0x607   : > { %v5658_v15 = vsel %vm896_vm5, %v15032_v42, %v5531_v2  ;;  %5604 = vrot.lane.b32.xlu1 %v17513_v33, %s14434_s22 }
 0x608   : > { %6066 = vmatprep.mubr.bf16.mxu1 %v5658_v15  ;;  %5602 = vrot.lane.b32.xlu0 %v17521_v63, %s14434_s22 }
 0x609   : > { %6067 = vmatmul.mubr.bf16.vlgmr.msra.gmra.mrb[240].mxu1 %v15042_v5 }
 0x60a   : > { %13861 = vmatpush3.bf16.msra.mxu1 %v14333_v36  ;;  %6074 = vmatprep.mubr.bf16.mxu1 %v5662_v38 }
 0x60b   : > { %5606 = vrot.lane.b32.xlu1 %v17536_v35, %s14434_s22  ;;  %13862 = vmatprep.subr.bf16.mxu1 %v14204_v25 }
 0x60c   : > { %5610 = vrot.lane.b32.xlu0 %v17541_v8, %s14434_s22 }
 0x60e   : > { %v5425_v20 = vpop.permute.xlu1 %5424  ;;  %13863 = vmatpush3.bf16.msra.mxu1 %v14204_v25 }
 0x60f   : > { %v5535_v29 = vpop.permute.xlu0 %5534  ;;  %13864 = vmatprep.subr.bf16.mxu1 %v14207_v4  ;;  %v5613_v30 = vsel %vm896_vm5, %v17045_v58, %v5425_v20 }
 0x610   : > { %5608 = vrot.lane.b32.xlu0 %v17550_v17, %s14434_s22  ;;  %v5666_v46 = vsel %vm896_vm5, %v17425_v40, %v5535_v29 }
 0x611   : > { %6075 = vmatmul.mubr.bf16.gmra.mrb[244].mxu1 %v5613_v30 }
 0x612   : > { %v5427_v6 = vpop.permute.xlu1 %5426  ;;  %6082 = vmatprep.mubr.bf16.mxu1 %v5666_v46  ;;  %13865 = vmatpush3.bf16.msra.mxu1 %v14207_v4 }
 0x613   : > { %v5616_v26 = vsel %vm896_vm5, %v17038_v22, %v5427_v6  ;;  %13866 = vmatprep.subr.bf16.mxu1 %v14222_v57  ;;  %v5537_v27 = vpop.permute.xlu0 %5536 }
 0x614   : > { %6227 = vmatprep.mubr.bf16.mxu0 %v5616_v26  ;;  %v5670_v2 = vsel %vm896_vm5, %v17445_v9, %v5537_v27 }
 0x616   : > { %13867 = vmatpush3.bf16.msra.mxu1 %v14222_v57 }
 0x617   : > { %v5539_v10 = vpop.permute.xlu0 %5538 }
 0x618   : > { %v5674_v47 = vsel %vm896_vm5, %v17439_v7, %v5539_v10 }
 0x619   : > { %6083 = vmatmul.mubr.bf16.gmra.mrb[248].mxu1 %v5616_v26  ;;  %v5429_v58 = vpop.permute.xlu1 %5428 }
 0x61a   : > { %6090 = vmatprep.mubr.bf16.mxu1 %v5670_v2  ;;  %v5619_v15 = vsel %vm896_vm5, %v17072_v1, %v5429_v58 }
 0x61d   : > { %v5541_v25 = vpop.permute.xlu0 %5540 }
 0x61e   : > { %v5431_v22 = vpop.permute.xlu1 %5430  ;;  %v5678_v38 = vsel %vm896_vm5, %v17459_v60, %v5541_v25 }
 0x61f   : > { %v17571_v61 = vsel %vm896_vm5, %v17085_v11, %v5431_v22 }
 0x621   : > { %6091 = vmatmul.mubr.bf16.gmra.mrb[252].mxu1 %v5619_v15  ;;  %v5543_v36 = vpop.permute.xlu0 %5542 }
 0x622   : > { %6098 = vmatprep.mubr.bf16.mxu1 %v5674_v47  ;;  %v5682_v32 = vsel %vm896_vm5, %v17453_v59, %v5543_v36 }
 0x623   : > { %v5433_v21 = vpop.permute.xlu1 %5432 }
 0x624   : > { %v17578_v1 = vsel %vm896_vm5, %v17108_v18, %v5433_v21 }
 0x625   : > { %v5545_v4 = vpop.permute.xlu0 %5544 }
 0x626   : > { %v5686_v20 = vsel %vm896_vm5, %v17473_v12, %v5545_v4 }
 0x627   : > { %v5435_v11 = vpop.permute.xlu1 %5434 }
 0x628   : > { %v17585_v44 = vsel %vm896_vm5, %v17130_v56, %v5435_v11 }
 0x629   : > { %6099 = vmatmul.mubr.bf16.gmra.mrb[0].mxu1 %v17571_v61  ;;  %v5547_v29 = vpop.permute.xlu0 %5546 }
 0x62a   : > { %6106 = vmatprep.mubr.bf16.mxu1 %v5678_v38  ;;  %v5690_v30 = vsel %vm896_vm5, %v17467_v52, %v5547_v29 }
 0x62b   : > { %v5437_v18 = vpop.permute.xlu1 %5436 }
 0x62c   : > { %v17592_v57 = vsel %vm896_vm5, %v17147_v43, %v5437_v18 }
 0x62f   : > { %v5439_v56 = vpop.permute.xlu1 %5438 }
 0x630   : > { %v17599_v6 = vsel %vm896_vm5, %v17173_v54, %v5439_v56 }
 0x631   : > { %6107 = vmatmul.mubr.bf16.gmra.mrb[4].mxu1 %v17578_v1  ;;  %v5549_v46 = vpop.permute.xlu0 %5548 }
 0x632   : > { %6114 = vmatprep.mubr.bf16.mxu1 %v5682_v32  ;;  %v5694_v26 = vsel %vm896_vm5, %v17487_v51, %v5549_v46 }
 0x633   : > { %v5441_v27 = vpop.permute.xlu1 %5440 }
 0x634   : > { %v17606_v10 = vsel %vm896_vm5, %v17194_v16, %v5441_v27  ;;  %v20571_v27 = vld [vmem:[#allocation12_spill] sm:$0xff] }
 0x637   : > { %v5551_v43 = vpop.permute.xlu0 %5550 }
 0x638   : > { %v5443_v2 = vpop.permute.xlu1 %5442  ;;  %v5698_v54 = vsel %vm896_vm5, %v17481_v45, %v5551_v43 }
 0x639   : > { %6115 = vmatmul.mubr.bf16.gmra.mrb[8].mxu1 %v17585_v44  ;;  %v17613_v21 = vsel %vm896_vm5, %v17243_v49, %v5443_v2 }
 0x63a   : > { %6122 = vmatprep.mubr.bf16.mxu1 %v5686_v20 }
 0x63e   : > { %v5445_v47 = vpop.permute.xlu1 %5444 }
 0x63f   : > { %v5553_v58 = vpop.permute.xlu0 %5552  ;;  %v17620_v20 = vsel %vm896_vm5, %v17268_v34, %v5445_v47 }
 0x640   : > { %v5702_v16 = vsel %vm896_vm5, %v17504_v50, %v5553_v58 }
 0x641   : > { %6123 = vmatmul.mubr.bf16.gmra.mrb[12].mxu1 %v17592_v57 }
 0x642   : > { %6130 = vmatprep.mubr.bf16.mxu1 %v5690_v30  ;;  %v20570_v30 = vld [vmem:[#allocation5_spill] sm:$0xff] }
 0x646   : > { %v5447_v25 = vpop.permute.xlu1 %5446 }
 0x647   : > { %v5555_v22 = vpop.permute.xlu0 %5554  ;;  %v5646_v46 = vsel %vm896_vm5, %v17302_v0, %v5447_v25 }
 0x648   : > { %v5706_v49 = vsel %vm896_vm5, %v17496_v28, %v5555_v22 }
 0x649   : > { %6131 = vmatmul.mubr.bf16.gmra.mrb[16].mxu1 %v17599_v6 }
 0x64a   : > { %6138 = vmatprep.mubr.bf16.mxu1 %v5694_v26 }
 0x64e   : > { %v5449_v36 = vpop.permute.xlu1 %5448 }
 0x64f   : > { %v5557_v38 = vpop.permute.xlu0 %5556  ;;  %v5649_v2 = vsel %vm896_vm5, %v17338_v13, %v5449_v36 }
 0x650   : > { %v5710_v34 = vsel %vm896_vm5, %v17521_v63, %v5557_v38 }
 0x651   : > { %6139 = vmatmul.mubr.bf16.gmra.mrb[20].mxu1 %v17606_v10 }
 0x652   : > { %6146 = vmatprep.mubr.bf16.mxu1 %v5698_v54 }
 0x656   : > { %v5559_v32 = vpop.permute.xlu0 %5558  ;;  %v5451_v11 = vpop.permute.xlu1 %5450 }
 0x657   : > { %v5714_v0 = vsel %vm896_vm5, %v17513_v33, %v5559_v32  ;;  %v5652_v47 = vsel %vm896_vm5, %v17372_v37, %v5451_v11  ;;  %v20574_v37 = vld [vmem:[#allocation7_spill] sm:$0xff] }
 0x659   : > { %6147 = vmatmul.mubr.bf16.gmra.mrb[24].mxu1 %v17613_v21 }
 0x65a   : > { %6154 = vmatprep.mubr.bf16.mxu1 %v5702_v16 }
 0x65d   : > { %v5453_v18 = vpop.permute.xlu1 %5452 }
 0x65e   : > { %v5561_v4 = vpop.permute.xlu0 %5560  ;;  %v5655_v38 = vsel %vm896_vm5, %v17397_v31, %v5453_v18  ;;  %v14224_v18 = vld [vmem:[%s20451_s2 + $0x360] sm:$0xff]  }
 0x65f   : > { %v5718_v13 = vsel %vm896_vm5, %v17536_v35, %v5561_v4 }
 0x661   : > { %6155 = vmatmul.mubr.bf16.gmra.mrb[28].mxu1 %v17620_v20  ;;  %v5581_v26 = vpop.permute.xlu1 %5580 }
 0x662   : > { %6162 = vmatprep.mubr.bf16.mxu1 %v5706_v49  ;;  %v5579_v29 = vpop.permute.xlu0 %5578  ;;  %v5726_v43 = vsel %vm896_vm5, %v20571_v27, %v5581_v26 }
 0x663   : > { %v5722_v56 = vsel %vm896_vm5, %v20570_v30, %v5579_v29 }
 0x664   : > { %6228 = vmatmul.mubr.bf16.vlgmr.msra.gmra.mrb[240].mxu0 %v5722_v56 }
 0x665   : > { %6235 = vmatprep.mubr.bf16.mxu0 %v5619_v15  ;;  %v20572_v15 = vld [vmem:[#allocation6_spill] sm:$0xff]  ;;  %v5585_v22 = vpop.permute.xlu1 %5584 }
 0x666   : > { %v5583_v58 = vpop.permute.xlu0 %5582 }
 0x667   : > { %v5730_v54 = vsel %vm896_vm5, %v20572_v15, %v5583_v58 }
 0x669   : > { %6163 = vmatmul.mubr.bf16.gmra.mrb[32].mxu1 %v5646_v46  ;;  %v5589_v36 = vpop.permute.xlu1 %5588 }
 0x66a   : > { %6170 = vmatprep.mubr.bf16.mxu1 %v5710_v34  ;;  %v5587_v16 = vpop.permute.xlu0 %5586 }
 0x66c   : > { %6236 = vmatmul.mubr.bf16.gmra.mrb[244].mxu0 %v5726_v43 }
 0x66d   : > { %6243 = vmatprep.mubr.bf16.mxu0 %v17571_v61  ;;  %v20573_v61 = vld [vmem:[#allocation15_spill] sm:$0xff] }
 0x66e   : > { %v5734_v25 = vsel %vm896_vm5, %v20573_v61, %v5585_v22 }
 0x671   : > { %6171 = vmatmul.mubr.bf16.gmra.mrb[36].mxu1 %v5649_v2 }
 0x672   : > { %6178 = vmatprep.mubr.bf16.mxu1 %v5714_v0 }
 0x674   : > { %6244 = vmatmul.mubr.bf16.gmra.mrb[248].mxu0 %v5730_v54  ;;  %v14225_v54 = vld [vmem:[%s20451_s2 + $0x3a8] sm:$0xff]  }
 0x675   : > { %6251 = vmatprep.mubr.bf16.mxu0 %v17578_v1  ;;  %v5738_v1 = vsel %vm896_vm5, %v20574_v37, %v5587_v16 }
 0x679   : > { %6179 = vmatmul.mubr.bf16.gmra.mrb[40].mxu1 %v5652_v47 }
 0x67a   : > { %6186 = vmatprep.mubr.bf16.mxu1 %v5718_v13 }
 0x67c   : > { %6252 = vmatmul.mubr.bf16.gmra.mrb[252].mxu0 %v5734_v25 }
 0x67d   : > { %6259 = vmatprep.mubr.bf16.mxu0 %v17585_v44  ;;  %v20575_v44 = vld [vmem:[#allocation8_spill] sm:$0xff] }
 0x67e   : > { %v5742_v31 = vsel %vm896_vm5, %v20575_v44, %v5589_v36 }
 0x681   : > { %6187 = vmatmul.mubr.bf16.gmra.mrb[44].mxu1 %v5655_v38 }
 0x682   : > { %13868 = vmatprep.mubr.msk.bf16.mxu1 %vm896_vm5, %v17425_v40  ;;  %v5591_v40 = vpop.permute.xlu0 %5590 }
 0x684   : > { %6260 = vmatmul.mubr.bf16.gmra.mrb[0].mxu0 %v5738_v1 }
 0x685   : > { %6267 = vmatprep.mubr.bf16.mxu0 %v17592_v57  ;;  %v5746_v57 = vsel %vm896_vm5, %v17214_v53, %v5591_v40 }
 0x689   : > { %13869 = vmatmul.mubr.msk.bf16.vlgmr.msra.gmra.mrb[48].mxu1 %vm896_vm5, %v17445_v9 }
 0x68a   : > { %13872 = vmatprep.mubr.msk.bf16.mxu1 %vm896_vm5, %v17439_v7  ;;  %v5593_v7 = vpop.permute.xlu1 %5592 }
 0x68b   : > { %v5750_v9 = vsel %vm896_vm5, %v17224_v62, %v5593_v7  ;;  %v14228_v7 = vld [vmem:[%s20451_s2 + $0x370] sm:$0xff]  }
 0x68c   : > { %6268 = vmatmul.mubr.bf16.gmra.mrb[4].mxu0 %v5742_v31 }
 0x68d   : > { %6275 = vmatprep.mubr.bf16.mxu0 %v17599_v6 }
 0x691   : > { %13873 = vmatmul.mubr.msk.bf16.gmra.mrb[52].mxu1 %vm896_vm5, %v17459_v60  ;;  %v5597_v60 = vpop.permute.xlu1 %5596 }
 0x692   : > { %13876 = vmatprep.mubr.msk.bf16.mxu1 %vm896_vm5, %v17453_v59  ;;  %v5595_v59 = vpop.permute.xlu0 %5594  ;;  %v5758_v62 = vsel %vm896_vm5, %v17273_v48, %v5597_v60 }
 0x693   : > { %v5754_v53 = vsel %vm896_vm5, %v17239_v19, %v5595_v59 }
 0x694   : > { %6276 = vmatmul.mubr.bf16.gmra.mrb[8].mxu0 %v5746_v57  ;;  %v14227_v57 = vld [vmem:[%s20451_s2 + $0x3b0] sm:$0xff]  }
 0x695   : > { %6283 = vmatprep.mubr.bf16.mxu0 %v17606_v10 }
 0x699   : > { %13877 = vmatmul.mubr.msk.bf16.gmra.mrb[56].mxu1 %vm896_vm5, %v17473_v12  ;;  %v5601_v12 = vpop.permute.xlu1 %5600 }
 0x69a   : > { %13880 = vmatprep.mubr.msk.bf16.mxu1 %vm896_vm5, %v17467_v52  ;;  %v5599_v52 = vpop.permute.xlu0 %5598  ;;  %v5766_v48 = vsel %vm896_vm5, %v17331_v14, %v5601_v12 }
 0x69b   : > { %v5762_v19 = vsel %vm896_vm5, %v17298_v24, %v5599_v52 }
 0x69c   : > { %6284 = vmatmul.mubr.bf16.gmra.mrb[12].mxu0 %v5750_v9 }
 0x69d   : > { %6291 = vmatprep.mubr.bf16.mxu0 %v17613_v21 }
 0x6a1   : > { %13881 = vmatmul.mubr.msk.bf16.gmra.mrb[60].mxu1 %vm896_vm5, %v17487_v51  ;;  %v5605_v51 = vpop.permute.xlu1 %5604 }
 0x6a2   : > { %13884 = vmatprep.mubr.msk.bf16.mxu1 %vm896_vm5, %v17481_v45  ;;  %v5603_v45 = vpop.permute.xlu0 %5602 }
 0x6a3   : > { %v5770_v24 = vsel %vm896_vm5, %v17366_v39, %v5603_v45 }
 0x6a4   : > { %6292 = vmatmul.mubr.bf16.gmra.mrb[16].mxu0 %v5754_v53 }
 0x6a5   : > { %6299 = vmatprep.mubr.bf16.mxu0 %v17620_v20 }
 0x6a9   : > { %13885 = vmatmul.mubr.msk.bf16.gmra.mrb[64].mxu1 %vm896_vm5, %v17504_v50  ;;  %v5774_v50 = vsel %vm896_vm5, %v17400_v3, %v5605_v51  ;;  %v14229_v51 = vld [vmem:[%s20451_s2 + $0x3b8] sm:$0xff]  }
 0x6aa   : > { %13888 = vmatprep.mubr.msk.bf16.mxu1 %vm896_vm5, %v17496_v28  ;;  %v5611_v28 = vpop.permute.xlu0 %5610 }
 0x6ab   : > { %v5785_v14 = vsel %vm896_vm5, %v17417_v55, %v5611_v28  ;;  %v14230_v28 = vld [vmem:[%s20451_s2 + $0x378] sm:$0xff]  }
 0x6ac   : > { %6300 = vmatmul.mubr.bf16.gmra.mrb[20].mxu0 %v5758_v62 }
 0x6ad   : > { %6307 = vmatprep.mubr.bf16.mxu0 %v5646_v46 }
 0x6ae   : > { %v5609_v39 = vpop.permute.xlu0 %5608 }
 0x6b1   : > { %13889 = vmatmul.mubr.msk.bf16.gmra.mrb[68].mxu1 %vm896_vm5, %v17521_v63 }
 0x6b2   : > { %13892 = vmatprep.mubr.msk.bf16.mxu1 %vm896_vm5, %v17513_v33  ;;  %v5607_v33 = vpop.permute.xlu1 %5606 }
 0x6b3   : > { %v5778_v63 = vsel %vm896_vm5, %v17410_v41, %v5607_v33 }
 0x6b4   : > { %6308 = vmatmul.mubr.bf16.gmra.mrb[24].mxu0 %v5762_v19 }
 0x6b5   : > { %6315 = vmatprep.mubr.bf16.mxu0 %v5649_v2 }
 0x6b9   : > { %13893 = vmatmul.mubr.msk.bf16.gmra.mrb[72].mxu1 %vm896_vm5, %v17536_v35  ;;  %v5782_v35 = vsel %vm896_vm5, %v17541_v8, %v5609_v39  ;;  %v14223_v8 = vld [vmem:[%s20451_s2 + $0x3a0] sm:$0xff]  }
 0x6ba   : > { %13896 = vmatprep.mubr.msk.bf16.mxu1 %vm896_vm5, %v17550_v17  ;;  %13008 = vmatprep.subr.bf16.mxu0 %v14223_v8 }
 0x6bb   : > { %13009 = vmatpush3.bf16.msra.mxu0 %v14224_v18 }
 0x6bc   : > { %6316 = vmatmul.mubr.bf16.gmra.mrb[28].mxu0 %v5766_v48  ;;  %13010 = vmatprep.subr.bf16.mxu0 %v14225_v54 }
 0x6bd   : > { %6323 = vmatprep.mubr.bf16.mxu0 %v5652_v47  ;;  %v14226_v47 = vld [vmem:[%s20451_s2 + $0x368] sm:$0xff]  }
 0x6bf   : > { %13011 = vmatpush3.bf16.msra.mxu0 %v14226_v47 }
 0x6c0   : > { %13012 = vmatprep.subr.bf16.mxu0 %v14227_v57 }
 0x6c1   : > { %13897 = vmatmul.mubr.msk.bf16.gmra.mrb[76].mxu1 %vm896_vm5, %v15032_v42 }
 0x6c3   : > { %13013 = vmatpush3.bf16.msra.mxu0 %v14228_v7 }
 0x6c4   : > { %6324 = vmatmul.mubr.bf16.gmra.mrb[32].mxu0 %v5770_v24  ;;  %13014 = vmatprep.subr.bf16.mxu0 %v14229_v51 }
 0x6c5   : > { %6331 = vmatprep.mubr.bf16.mxu0 %v5655_v38 }
 0x6c7   : > { %13015 = vmatpush3.bf16.msra.mxu0 %v14230_v28 }
 0x6cc   : > { %6332 = vmatmul.mubr.bf16.gmra.mrb[36].mxu0 %v5774_v50 }
 0x6cd   : > { %6339 = vmatprep.mubr.bf16.mxu0 %v5785_v14 }
 0x6d4   : > { %6340 = vmatmul.mubr.bf16.gmra.mrb[40].mxu0 %v5778_v63 }
 0x6d5   : > { %6347 = vmatprep.mubr.bf16.mxu0 %v15042_v5 }
 0x6dc   : > { %v12780_v17 = vpop.f32.mrb[240].mxu1  ;;  %6348 = vmatmul.mubr.bf16.gmra.mrb[44].mxu0 %v5782_v35 }
 0x6dd   : > { %v12781_v6 = vpop.f32.mrb[241].mxu1 }
 0x6de   : > { %v17714_v3 = vadd.f32 %v12781_v6, %v12780_v17  ;;  %v12783_v10 = vpop.f32.mrb[242].mxu1 }
 0x6df   : > { %v12784_v21 = vpop.f32.mrb[243].mxu1 }
 0x6e0   : > { %v17716_v55 = vadd.f32 %v12784_v21, %v12783_v10 }
 0x6e4   : > { %v12786_v32 = vpop.f32.mrb[244].mxu1 }
 0x6e5   : > { %v12787_v11 = vpop.f32.mrb[245].mxu1 }
 0x6e6   : > { %v17718_v4 = vadd.f32 %v12787_v11, %v12786_v32  ;;  %v12789_v41 = vpop.f32.mrb[246].mxu1 }
 0x6e7   : > { %v12790_v20 = vpop.f32.mrb[247].mxu1 }
 0x6e8   : > { %v17720_v49 = vadd.f32 %v12790_v20, %v12789_v41  ;;  %v14231_v41 = vld [vmem:[%s20451_s2 + $0x3c0] sm:$0xff]  }
 0x6e9   : > { %v14232_v20 = vld [vmem:[%s20451_s2 + $0x380] sm:$0xff]   ;;  %13016 = vmatprep.subr.bf16.mxu0 %v14231_v41 }
 0x6ea   : > { %13017 = vmatpush3.bf16.msra.mxu0 %v14232_v20 }
 0x6ec   : > { %v12792_v29 = vpop.f32.mrb[248].mxu1 }
 0x6ed   : > { %v12793_v30 = vpop.f32.mrb[249].mxu1 }
 0x6ee   : > { %v17728_v56 = vadd.f32 %v12793_v30, %v12792_v29  ;;  %v12795_v46 = vpop.f32.mrb[250].mxu1 }
 0x6ef   : > { %v12796_v26 = vpop.f32.mrb[251].mxu1 }
 0x6f0   : > { %v17730_v34 = vadd.f32 %v12796_v26, %v12795_v46 }
 0x6f4   : > { %v12798_v27 = vpop.f32.mrb[252].mxu1 }
 0x6f5   : > { %v12799_v43 = vpop.f32.mrb[253].mxu1 }
 0x6f6   : > { %v17732_v2 = vadd.f32 %v12799_v43, %v12798_v27  ;;  %v12801_v58 = vpop.f32.mrb[254].mxu1 }
 0x6f7   : > { %v12802_v0 = vpop.f32.mrb[255].mxu1 }
 0x6f8   : > { %v17734_v15 = vadd.f32 %v12802_v0, %v12801_v58 }
 0x6fc   : > { %v12804_v22 = vpop.f32.mrb[0].mxu1 }
 0x6fd   : > { %v12805_v13 = vpop.f32.mrb[1].mxu1 }
 0x6fe   : > { %v17742_v61 = vadd.f32 %v12805_v13, %v12804_v22  ;;  %v12807_v25 = vpop.f32.mrb[2].mxu1 }
 0x6ff   : > { %v12808_v38 = vpop.f32.mrb[3].mxu1 }
 0x700   : > { %v17744_v16 = vadd.f32 %v12808_v38, %v12807_v25 }
 0x704   : > { %v12810_v37 = vpop.f32.mrb[4].mxu1 }
 0x705   : > { %v12811_v1 = vpop.f32.mrb[5].mxu1 }
 0x706   : > { %v17746_v36 = vadd.f32 %v12811_v1, %v12810_v37  ;;  %v12813_v44 = vpop.f32.mrb[6].mxu1  ;;  %v14233_v1 = vld [vmem:[%s20451_s2 + $0x3c8] sm:$0xff]  }
 0x707   : > { %v12814_v31 = vpop.f32.mrb[7].mxu1  ;;  %13018 = vmatprep.subr.bf16.mxu0 %v14233_v1 }
 0x708   : > { %v17748_v40 = vadd.f32 %v12814_v31, %v12813_v44  ;;  %v14234_v44 = vld [vmem:[%s20451_s2 + $0x388] sm:$0xff]  }
 0x709   : > { %13019 = vmatpush3.bf16.msra.mxu0 %v14234_v44  ;;  %v14237_v44 = vld [vmem:[%s20451_s2 + $0x3d8] sm:$0xff]  }
 0x70c   : > { %v12816_v9 = vpop.f32.mrb[8].mxu1 }
 0x70d   : > { %v12817_v59 = vpop.f32.mrb[9].mxu1 }
 0x70e   : > { %v17756_v53 = vadd.f32 %v12817_v59, %v12816_v9  ;;  %v12819_v60 = vpop.f32.mrb[10].mxu1 }
 0x70f   : > { %v12820_v62 = vpop.f32.mrb[11].mxu1 }
 0x710   : > { %v17758_v52 = vadd.f32 %v12820_v62, %v12819_v60  ;;  %v14235_v62 = vld [vmem:[%s20451_s2 + $0x3d0] sm:$0xff]  }
 0x711   : > { %13020 = vmatprep.subr.bf16.mxu0 %v14235_v62 }
 0x714   : > { %v12822_v19 = vpop.f32.mrb[12].mxu1 }
 0x715   : > { %v12823_v12 = vpop.f32.mrb[13].mxu1 }
 0x716   : > { %v17760_v48 = vadd.f32 %v12823_v12, %v12822_v19  ;;  %v12825_v45 = vpop.f32.mrb[14].mxu1  ;;  %v14236_v19 = vld [vmem:[%s20451_s2 + $0x390] sm:$0xff]  }
 0x717   : > { %v12826_v24 = vpop.f32.mrb[15].mxu1  ;;  %13021 = vmatpush3.bf16.msra.mxu0 %v14236_v19 }
 0x718   : > { %v17768_v50 = vadd.f32 %v12826_v24, %v12825_v45  ;;  %13022 = vmatprep.subr.bf16.mxu0 %v14237_v44 }
 0x71c   : > { %v12828_v14 = vpop.f32.mrb[16].mxu1 }
 0x71d   : > { %v12829_v33 = vpop.f32.mrb[17].mxu1 }
 0x71e   : > { %v17770_v63 = vadd.f32 %v12829_v33, %v12828_v14  ;;  %v12831_v39 = vpop.f32.mrb[18].mxu1 }
 0x71f   : > { %v12832_v35 = vpop.f32.mrb[19].mxu1 }
 0x720   : > { %v17772_v17 = vadd.f32 %v12832_v35, %v12831_v39 }
 0x724   : > { %v12834_v6 = vpop.f32.mrb[20].mxu1 }
 0x725   : > { %v12835_v10 = vpop.f32.mrb[21].mxu1 }
 0x726   : > { %v17774_v21 = vadd.f32 %v12835_v10, %v12834_v6  ;;  %v12837_v32 = vpop.f32.mrb[22].mxu1 }
 0x727   : > { %v12838_v11 = vpop.f32.mrb[23].mxu1 }
 0x728   : > { %v17782_v8 = vadd.f32 %v12838_v11, %v12837_v32 }
 0x72c   : > { %v12840_v18 = vpop.f32.mrb[24].mxu1 }
 0x72d   : > { %v12841_v29 = vpop.f32.mrb[25].mxu1 }
 0x72e   : > { %v17784_v30 = vadd.f32 %v12841_v29, %v12840_v18  ;;  %v12843_v46 = vpop.f32.mrb[26].mxu1 }
 0x72f   : > { %v12844_v26 = vpop.f32.mrb[27].mxu1 }
 0x730   : > { %v17786_v27 = vadd.f32 %v12844_v26, %v12843_v46 }
 0x734   : > { %v12846_v43 = vpop.f32.mrb[28].mxu1 }
 0x735   : > { %v12847_v58 = vpop.f32.mrb[29].mxu1 }
 0x736   : > { %v17788_v0 = vadd.f32 %v12847_v58, %v12846_v43  ;;  %v12849_v54 = vpop.f32.mrb[30].mxu1 }
 0x737   : > { %v12850_v47 = vpop.f32.mrb[31].mxu1  ;;  %v12892_v22 = vpop.f32.mrb[240].mxu0 }
 0x738   : > { %v17790_v13 = vadd.f32 %v12850_v47, %v12849_v54  ;;  %v12893_v25 = vpop.f32.mrb[241].mxu0 }
 0x739   : > { %v12894_v38 = vadd.f32 %v12893_v25, %v12892_v22  ;;  %v12895_v37 = vpop.f32.mrb[242].mxu0 }
 0x73a   : > { %v12896_v31 = vpop.f32.mrb[243].mxu0 }
 0x73b   : > { %v12897_v57 = vadd.f32 %v12896_v31, %v12895_v37  ;;  %v17799_v7 = vadd.f32 %v12894_v38, %v17714_v3 }
 0x73c   : > { %v12852_v9 = vpop.f32.mrb[32].mxu1 }
 0x73d   : > { %v12853_v59 = vpop.f32.mrb[33].mxu1  ;;  %v17802_v60 = vadd.f32 %v12897_v57, %v17716_v55 }
 0x73e   : > { %v17810_v12 = vadd.f32 %v12853_v59, %v12852_v9  ;;  %v12855_v45 = vpop.f32.mrb[34].mxu1 }
 0x73f   : > { %v12856_v3 = vpop.f32.mrb[35].mxu1  ;;  %v12898_v24 = vpop.f32.mrb[244].mxu0 }
 0x740   : > { %v17812_v51 = vadd.f32 %v12856_v3, %v12855_v45  ;;  %v12899_v28 = vpop.f32.mrb[245].mxu0 }
 0x741   : > { %v12900_v55 = vadd.f32 %v12899_v28, %v12898_v24  ;;  %v12901_v14 = vpop.f32.mrb[246].mxu0 }
 0x742   : > { %v12902_v33 = vpop.f32.mrb[247].mxu0 }
 0x743   : > { %v12903_v39 = vadd.f32 %v12902_v33, %v12901_v14  ;;  %v6238_v35 = vadd.f32 %v12900_v55, %v17718_v4 }
 0x744   : > { %v12858_v6 = vpop.f32.mrb[36].mxu1 }
 0x745   : > { %v12859_v10 = vpop.f32.mrb[37].mxu1  ;;  %v6241_v32 = vadd.f32 %v12903_v39, %v17720_v49 }
 0x746   : > { %v17816_v11 = vadd.f32 %v12859_v10, %v12858_v6  ;;  %v12861_v41 = vpop.f32.mrb[38].mxu1 }
 0x747   : > { %v12862_v20 = vpop.f32.mrb[39].mxu1  ;;  %v12904_v18 = vpop.f32.mrb[248].mxu0 }
 0x748   : > { %v17818_v29 = vadd.f32 %v12862_v20, %v12861_v41  ;;  %v12905_v46 = vpop.f32.mrb[249].mxu0 }
 0x749   : > { %v12906_v26 = vadd.f32 %v12905_v46, %v12904_v18  ;;  %v12907_v43 = vpop.f32.mrb[250].mxu0 }
 0x74a   : > { %v12908_v58 = vpop.f32.mrb[251].mxu0 }
 0x74b   : > { %v12909_v54 = vadd.f32 %v12908_v58, %v12907_v43  ;;  %v17821_v47 = vadd.f32 %v12906_v26, %v17728_v56  ;;  %v14238_v56 = vld [vmem:[%s20451_s2 + $0x398] sm:$0xff]  }
 0x74c   : > { %v12864_v4 = vpop.f32.mrb[40].mxu1  ;;  %13023 = vmatpush3.bf16.msra.mxu0 %v14238_v56 }
 0x74d   : > { %v12865_v22 = vpop.f32.mrb[41].mxu1  ;;  %v17824_v25 = vadd.f32 %v12909_v54, %v17730_v34 }
 0x74e   : > { %v17826_v49 = vadd.f32 %v12865_v22, %v12864_v4  ;;  %v12867_v38 = vpop.f32.mrb[42].mxu1 }
 0x74f   : > { %v12868_v37 = vpop.f32.mrb[43].mxu1  ;;  %v12910_v1 = vpop.f32.mrb[252].mxu0 }
 0x750   : > { %v17831_v31 = vadd.f32 %v12868_v37, %v12867_v38  ;;  %v12911_v57 = vpop.f32.mrb[253].mxu0 }
 0x751   : > { %v12912_v9 = vadd.f32 %v12911_v57, %v12910_v1  ;;  %v12913_v59 = vpop.f32.mrb[254].mxu0 }
 0x752   : > { %v12914_v34 = vpop.f32.mrb[255].mxu0 }
 0x753   : > { %v12915_v62 = vadd.f32 %v12914_v34, %v12913_v59  ;;  %v6254_v19 = vadd.f32 %v12912_v9, %v17732_v2 }
 0x754   : > { %v12870_v45 = vpop.f32.mrb[44].mxu1 }
 0x755   : > { %v12871_v3 = vpop.f32.mrb[45].mxu1  ;;  %v6257_v24 = vadd.f32 %v12915_v62, %v17734_v15 }
 0x756   : > { %v17838_v28 = vadd.f32 %v12871_v3, %v12870_v45  ;;  %v12873_v55 = vpop.f32.mrb[46].mxu1 }
 0x757   : > { %v12874_v14 = vpop.f32.mrb[47].mxu1  ;;  %v12916_v33 = vpop.f32.mrb[0].mxu0 }
 0x758   : > { %v17840_v39 = vadd.f32 %v12874_v14, %v12873_v55  ;;  %v12917_v6 = vpop.f32.mrb[1].mxu0 }
 0x759   : > { %v12918_v10 = vadd.f32 %v12917_v6, %v12916_v33  ;;  %v12919_v41 = vpop.f32.mrb[2].mxu0 }
 0x75a   : > { %v12920_v20 = vpop.f32.mrb[3].mxu0 }
 0x75b   : > { %v12921_v18 = vadd.f32 %v12920_v20, %v12919_v41  ;;  %v17843_v46 = vadd.f32 %v12918_v10, %v17742_v61 }
 0x75c   : > { %v13870_v2 = vpop.f32.mrb[48].mxu1 }
 0x75d   : > { %v6399_v26 = vadd.f32 %v13870_v2, %v6238_v35  ;;  %v6390_v43 = vpop.f32.mrb[49].mxu1  ;;  %v17846_v15 = vadd.f32 %v12921_v18, %v17744_v16  ;;  %v14239_v35 = vld [vmem:[%s20451_s2 + $0x460] sm:$0xff]  }
 0x75e   : > { %v6391_v58 = vadd.f32 %v6390_v43, %v17799_v7  ;;  %v13871_v54 = vpop.f32.mrb[50].mxu1  ;;  %13900 = vmatprep.subr.bf16.mxu0 %v14239_v35 }
 0x75f   : > { %v6402_v4 = vadd.f32 %v13871_v54, %v6241_v32  ;;  %v6393_v22 = vpop.f32.mrb[51].mxu1  ;;  %v12922_v38 = vpop.f32.mrb[4].mxu0  ;;  %v6519_v44 = vmax.f32 %v6399_v26, 0.0 }
 0x760   : > { %v6394_v37 = vadd.f32 %v6393_v22, %v17802_v60  ;;  %v12923_v1 = vpop.f32.mrb[5].mxu0  ;;  %v6517_v9 = vmax.f32 %v6391_v58, 0.0 }
 0x761   : > { %v6520_v57 = vmax.f32 %v6402_v4, 0.0  ;;  %v12924_v56 = vadd.f32 %v12923_v1, %v12922_v38  ;;  %v12925_v61 = vpop.f32.mrb[6].mxu0 }
 0x762   : > { %v6518_v16 = vmax.f32 %v6394_v37, 0.0  ;;  %v12926_v59 = vpop.f32.mrb[7].mxu0 }
 0x763   : > { %v6550_v34 = vpack.c.bf16 %v6520_v57, %v6519_v44  ;;  %v12927_v7 = vadd.f32 %v12926_v59, %v12925_v61  ;;  %v6270_v32 = vadd.f32 %v12924_v56, %v17746_v36 }
 0x764   : > { %v6549_v62 = vpack.c.bf16 %v6518_v16, %v6517_v9  ;;  %v13874_v45 = vpop.f32.mrb[52].mxu1 }
 0x765   : > { %v6573_v60 = vshrl.u32 %v6550_v34, 16  ;;  %v6415_v3 = vadd.f32 %v13874_v45, %v6254_v19  ;;  %v6406_v55 = vpop.f32.mrb[53].mxu1  ;;  %v6273_v14 = vadd.f32 %v12927_v7, %v17748_v40  ;;  %v6576_v20 = vshll.u32 %v6550_v34, 16 }
 0x766   : > { %v6566_v33 = vshrl.u32 %v6549_v62, 16  ;;  %v6407_v6 = vadd.f32 %v6406_v55, %v17821_v47  ;;  %v13875_v10 = vpop.f32.mrb[54].mxu1  ;;  %v6569_v58 = vshll.u32 %v6549_v62, 16 }
 0x767   : > { %v6575_v41 = vrot.slane %v6573_v60, 7  ;;  %v6418_v18 = vadd.f32 %v13875_v10, %v6257_v24  ;;  %v6409_v2 = vpop.f32.mrb[55].mxu1  ;;  %v12928_v26 = vpop.f32.mrb[8].mxu0  ;;  %v6523_v36 = vmax.f32 %v6415_v3, 0.0 }
 0x768   : > { %v6568_v43 = vrot.slane %v6566_v33, 7  ;;  %v6410_v54 = vadd.f32 %v6409_v2, %v17824_v25  ;;  %v12929_v4 = vpop.f32.mrb[9].mxu0  ;;  %v6521_v1 = vmax.f32 %v6407_v6, 0.0 }
 0x769   : > { %v6578_v22 = vor.u32 %v6576_v20, %v6575_v41  ;;  %v17859_v19 = vsel %vm14512_vm2, %v6575_v41, 0  ;;  %v6524_v40 = vmax.f32 %v6418_v18, 0.0  ;;  %v12930_v38 = vadd.f32 %v12929_v4, %v12928_v26  ;;  %v12931_v47 = vpop.f32.mrb[10].mxu0 }
 0x76a   : > { %v6571_v37 = vor.u32 %v6569_v58, %v6568_v43  ;;  %v17863_v24 = vsel %vm14512_vm2, %v6568_v43, 0  ;;  %v6522_v44 = vmax.f32 %v6410_v54, 0.0  ;;  %v12932_v57 = vpop.f32.mrb[11].mxu0  ;;  %v6834_v34 = vshll.u32 %v17859_v19, 16 }
 0x76b   : > { %v6552_v56 = vpack.c.bf16 %v6524_v40, %v6523_v36  ;;  %v12933_v61 = vadd.f32 %v12932_v57, %v12931_v47  ;;  %v17867_v25 = vsel %vm14512_vm2, 0, %v6578_v22  ;;  %v6278_v59 = vadd.f32 %v12930_v38, %v17756_v53 }
 0x76c   : > { %v6551_v35 = vpack.c.bf16 %v6522_v44, %v6521_v1  ;;  %v13878_v9 = vpop.f32.mrb[56].mxu1  ;;  %7102 = vrot.lane.b32.xlu0 %v17867_v25, %s14434_s22  ;;  %v17873_v16 = vsel %vm14512_vm2, 0, %v6571_v37  ;;  %v6822_v60 = vshll.u32 %v17863_v24, 16  ;;  %v6827_v3 = vshrl.u32 %v17867_v25, 16 }
 0x76d   : > { %v6587_v7 = vshrl.u32 %v6552_v56, 16  ;;  %v6431_v62 = vadd.f32 %v13878_v9, %v6270_v32  ;;  %v6422_v45 = vpop.f32.mrb[57].mxu1  ;;  %7100 = vrot.lane.b32.xlu1 %v17873_v16, %s14434_s22  ;;  %v6590_v55 = vshll.u32 %v6552_v56, 16  ;;  %v6817_v41 = vshll.u32 %v17873_v16, 16 }
 0x76e   : > { %v6580_v33 = vshrl.u32 %v6551_v35, 16  ;;  %v6423_v6 = vadd.f32 %v6422_v45, %v17843_v46  ;;  %v13879_v10 = vpop.f32.mrb[58].mxu1  ;;  %v6583_v20 = vshll.u32 %v6551_v35, 16  ;;  %v6815_v26 = vshrl.u32 %v17873_v16, 16 }
 0x76f   : > { %v6589_v53 = vrot.slane %v6587_v7, 7  ;;  %v6434_v18 = vadd.f32 %v13879_v10, %v6273_v14  ;;  %v6425_v2 = vpop.f32.mrb[59].mxu1  ;;  %v12934_v32 = vpop.f32.mrb[12].mxu0  ;;  %v6527_v58 = vmax.f32 %v6431_v62, 0.0  ;;  %v6819_v4 = vrot.slane %v6817_v41, 1 }
 0x770   : > { %v6582_v43 = vrot.slane %v6580_v33, 7  ;;  %v6426_v36 = vadd.f32 %v6425_v2, %v17846_v15  ;;  %v12935_v54 = vpop.f32.mrb[13].mxu0  ;;  %v6525_v22 = vmax.f32 %v6423_v6, 0.0  ;;  %v6824_v47 = vrot.slane %v6822_v60, 1 }
 0x771   : > { %v6528_v40 = vmax.f32 %v6434_v18, 0.0  ;;  %v12936_v38 = vadd.f32 %v12935_v54, %v12934_v32  ;;  %v12937_v46 = vpop.f32.mrb[14].mxu0  ;;  %v6592_v37 = vor.u32 %v6590_v55, %v6589_v53  ;;  %v6820_v14 = vor.u32 %v6819_v4, %v6815_v26 }
 0x772   : > { %v6585_v1 = vor.u32 %v6583_v20, %v6582_v43  ;;  %v6526_v44 = vmax.f32 %v6426_v36, 0.0  ;;  %v12938_v57 = vpop.f32.mrb[15].mxu0  ;;  %v6281_v7 = vadd.f32 %v12933_v61, %v17758_v52  ;;  %v6829_v60 = vshll.u32 %v17867_v25, 16 }
 0x773   : > { %v6554_v56 = vpack.c.bf16 %v6528_v40, %v6527_v58  ;;  %v12939_v35 = vadd.f32 %v12938_v57, %v12937_v46  ;;  %v6286_v9 = vadd.f32 %v12936_v38, %v17760_v48  ;;  %v17888_v45 = vsel %vm507_vm3, %v6820_v14, %v6824_v47 }
 0x774   : > { %v6553_v62 = vpack.c.bf16 %v6526_v44, %v6525_v22  ;;  %v13882_v15 = vpop.f32.mrb[60].mxu1  ;;  %v17892_v33 = vsel %vm14512_vm2, 0, %v6585_v1  ;;  %v17897_v55 = vsel %vm14512_vm2, %v6589_v53, 0  ;;  %6994 = vrot.lane.b32.xlu1 %v17888_v45, %s14434_s22  ;;  %v17906_v61 = vsel %vm14512_vm2, %v6582_v43, 0 }
 0x775   : > { %v6601_v6 = vshrl.u32 %v6554_v56, 16  ;;  %v6447_v10 = vadd.f32 %v13882_v15, %v6286_v9  ;;  %v6438_v52 = vpop.f32.mrb[61].mxu1  ;;  %7104 = vrot.lane.b32.xlu0 %v17892_v33, %s14434_s22  ;;  %v6289_v48 = vadd.f32 %v12939_v35, %v17768_v50  ;;  %v6831_v53 = vrot.slane %v6829_v60, 1 }
 0x776   : > { %v6594_v41 = vshrl.u32 %v6553_v62, 16  ;;  %v6439_v20 = vadd.f32 %v6438_v52, %v6278_v59  ;;  %v13883_v18 = vpop.f32.mrb[62].mxu1  ;;  %v6604_v32 = vshll.u32 %v6554_v56, 16  ;;  %v6597_v26 = vshll.u32 %v6553_v62, 16 }
 0x777   : > { %v6603_v2 = vrot.slane %v6601_v6, 7  ;;  %v6450_v58 = vadd.f32 %v13883_v18, %v6289_v48  ;;  %v6441_v36 = vpop.f32.mrb[63].mxu1  ;;  %v12940_v54 = vpop.f32.mrb[16].mxu0  ;;  %v6832_v40 = vor.u32 %v6831_v53, %v6827_v3  ;;  %v6836_v50 = vrot.slane %v6834_v34, 1 }
 0x778   : > { %v6596_v4 = vrot.slane %v6594_v41, 7  ;;  %v6442_v22 = vadd.f32 %v6441_v36, %v6281_v7  ;;  %v12941_v38 = vpop.f32.mrb[17].mxu0  ;;  %v6531_v46 = vmax.f32 %v6447_v10, 0.0  ;;  %v6529_v43 = vmax.f32 %v6439_v20, 0.0 }
 0x779   : > { %v6532_v47 = vmax.f32 %v6450_v58, 0.0  ;;  %v12942_v1 = vadd.f32 %v12941_v38, %v12940_v54  ;;  %v12943_v59 = vpop.f32.mrb[18].mxu0  ;;  %v6606_v44 = vor.u32 %v6604_v32, %v6603_v2  ;;  %v17911_v56 = vsel %vm507_vm3, %v6832_v40, %v6836_v50 }
 0x77a   : > { %v6599_v57 = vor.u32 %v6597_v26, %v6596_v4  ;;  %v6530_v14 = vmax.f32 %v6442_v22, 0.0  ;;  %20576 = vst [vmem:[#allocation9_spill] sm:$0xff] %v17911_v56  ;;  %v12944_v35 = vpop.f32.mrb[19].mxu0  ;;  %v17915_v9 = vsel %vm14512_vm2, %v6603_v2, 0  ;;  %6996 = vrot.lane.b32.xlu1 %v17911_v56, %s14434_s22  ;;  %v17921_v34 = vsel %vm14512_vm2, 0, %v6592_v37 }
 0x77b   : > { %v6556_v3 = vpack.c.bf16 %v6532_v47, %v6531_v46  ;;  %v12945_v7 = vadd.f32 %v12944_v35, %v12943_v59  ;;  %7106 = vrot.lane.b32.xlu0 %v17921_v34, %s14434_s22  ;;  %v6841_v60 = vshll.u32 %v17892_v33, 16  ;;  %v6846_v6 = vshll.u32 %v17906_v61, 16 }
 0x77c   : > { %v6555_v62 = vpack.c.bf16 %v6530_v14, %v6529_v43  ;;  %v13886_v15 = vpop.f32.mrb[64].mxu1  ;;  %v6294_v10 = vadd.f32 %v12942_v1, %v17770_v63  ;;  %v6839_v48 = vshrl.u32 %v17892_v33, 16  ;;  %v17931_v37 = vsel %vm14512_vm2, 0, %v6599_v57 }
 0x77d   : > { %v6615_v52 = vshrl.u32 %v6556_v3, 16  ;;  %v6454_v41 = vpop.f32.mrb[65].mxu1  ;;  %v6297_v20 = vadd.f32 %v12945_v7, %v17772_v17  ;;  %v6618_v18 = vshll.u32 %v6556_v3, 16  ;;  %v6843_v32 = vrot.slane %v6841_v60, 1 }
 0x77e   : > { %v6608_v53 = vshrl.u32 %v6555_v62, 16  ;;  %v6611_v2 = vshll.u32 %v6555_v62, 16  ;;  %v13887_v26 = vpop.f32.mrb[66].mxu1  ;;  %v6848_v36 = vrot.slane %v6846_v6, 1  ;;  %v6455_v54 = vadd.f32 %v6454_v41, %v6294_v10 }
 0x77f   : > { %v6617_v58 = vrot.slane %v6615_v52, 7  ;;  %v6457_v22 = vpop.f32.mrb[67].mxu1  ;;  %v12946_v63 = vpop.f32.mrb[20].mxu0  ;;  %v6853_v40 = vshll.u32 %v17921_v34, 16  ;;  %v6844_v38 = vor.u32 %v6843_v32, %v6839_v48  ;;  %7108 = vrot.lane.b32.xlu0 %v17931_v37, %s14434_s22  ;;  %v6858_v17 = vshll.u32 %v17897_v55, 16 }
 0x780   : > { %v6610_v50 = vrot.slane %v6608_v53, 7  ;;  %v6458_v46 = vadd.f32 %v6457_v22, %v6297_v20  ;;  %v12947_v43 = vpop.f32.mrb[21].mxu0  ;;  %v17940_v47 = vsel %vm14512_vm2, %v6596_v4, 0  ;;  %v6851_v59 = vshrl.u32 %v17921_v34, 16 }
 0x781   : > { %v6620_v1 = vor.u32 %v6618_v18, %v6617_v58  ;;  %v6855_v57 = vrot.slane %v6853_v40, 1  ;;  %v12949_v14 = vpop.f32.mrb[22].mxu0  ;;  %v17944_v3 = vsel %vm507_vm3, %v6844_v38, %v6848_v36  ;;  %v6533_v7 = vmax.f32 %v6455_v54, 0.0 }
 0x782   : > { %v6613_v35 = vor.u32 %v6611_v2, %v6610_v50  ;;  %20577 = vst [vmem:[#allocation11_spill] sm:$0xff] %v17944_v3  ;;  %v6534_v62 = vmax.f32 %v6458_v46, 0.0  ;;  %v12950_v60 = vpop.f32.mrb[23].mxu0  ;;  %v17948_v6 = vsel %vm14512_vm2, %v6617_v58, 0  ;;  %6998 = vrot.lane.b32.xlu1 %v17944_v3, %s14434_s22  ;;  %v12948_v10 = vadd.f32 %v12947_v43, %v12946_v63 }
 0x783   : > { %v6856_v4 = vor.u32 %v6855_v57, %v6851_v59  ;;  %v17954_v52 = vsel %vm14512_vm2, 0, %v6606_v44  ;;  %v6860_v41 = vrot.slane %v6858_v17, 1  ;;  %v12951_v20 = vadd.f32 %v12950_v60, %v12949_v14 }
 0x784   : > { %v6557_v48 = vpack.c.bf16 %v6534_v62, %v6533_v7  ;;  %7110 = vrot.lane.b32.xlu0 %v17954_v52, %s14434_s22  ;;  %v17958_v18 = vpop.f32.mrb[68].mxu1  ;;  %v6865_v53 = vshll.u32 %v17931_v37, 16  ;;  %v6302_v2 = vadd.f32 %v12948_v10, %v17774_v21  ;;  %v6863_v32 = vshrl.u32 %v17931_v37, 16 }
 0x785   : > { %v6870_v58 = vshll.u32 %v17940_v47, 16  ;;  %v6470_v36 = vpop.f32.mrb[69].mxu1  ;;  %v17966_v44 = vsel %vm14512_vm2, 0, %v6613_v35  ;;  %v17969_v22 = vsel %vm507_vm3, %v6856_v4, %v6860_v41  ;;  %v6305_v63 = vadd.f32 %v12951_v20, %v17782_v8 }
 0x786   : > { %v6622_v54 = vshrl.u32 %v6557_v48, 16  ;;  %20578 = vst [vmem:[#allocation14_spill] sm:$0xff] %v17969_v22  ;;  %v6867_v40 = vrot.slane %v6865_v53, 1  ;;  %v17972_v38 = vpop.f32.mrb[70].mxu1  ;;  %v6625_v46 = vshll.u32 %v6557_v48, 16  ;;  %7000 = vrot.lane.b32.xlu1 %v17969_v22, %s14434_s22  ;;  %v6463_v21 = vadd.f32 %v13886_v15, %v6302_v2 }
 0x787   : > { %v6872_v17 = vrot.slane %v6870_v58, 1  ;;  %v6473_v43 = vpop.f32.mrb[71].mxu1  ;;  %v12952_v59 = vpop.f32.mrb[24].mxu0  ;;  %v6877_v57 = vshll.u32 %v17954_v52, 16  ;;  %v6466_v35 = vadd.f32 %v13887_v26, %v6305_v63  ;;  %v6882_v8 = vshll.u32 %v17915_v9, 16 }
 0x788   : > { %v6624_v14 = vrot.slane %v6622_v54, 7  ;;  %v6868_v7 = vor.u32 %v6867_v40, %v6863_v32  ;;  %7112 = vrot.lane.b32.xlu0 %v17966_v44, %s14434_s22  ;;  %v12953_v62 = vpop.f32.mrb[25].mxu0  ;;  %v17982_v60 = vsel %vm14512_vm2, %v6610_v50, 0  ;;  %v6875_v15 = vshrl.u32 %v17954_v52, 16 }
 0x789   : > { %v6879_v4 = vrot.slane %v6877_v57, 1  ;;  %v12954_v10 = vadd.f32 %v12953_v62, %v12952_v59  ;;  %v12955_v48 = vpop.f32.mrb[26].mxu0  ;;  %v6535_v20 = vmax.f32 %v6463_v21, 0.0  ;;  %v6536_v53 = vmax.f32 %v6466_v35, 0.0 }
 0x78a   : > { %v6627_v41 = vor.u32 %v6625_v46, %v6624_v14  ;;  %v17986_v26 = vsel %vm507_vm3, %v6868_v7, %v6872_v17  ;;  %v12956_v2 = vpop.f32.mrb[27].mxu0  ;;  %v17993_v50 = vsel %vm14512_vm2, 0, %v6620_v1  ;;  %v6884_v40 = vrot.slane %v6882_v8, 1 }
 0x78b   : > { %20579 = vst [vmem:[#allocation17_spill] sm:$0xff] %v17986_v26  ;;  %7002 = vrot.lane.b32.xlu1 %v17986_v26, %s14434_s22  ;;  %v6880_v32 = vor.u32 %v6879_v4, %v6875_v15  ;;  %v6310_v58 = vadd.f32 %v12954_v10, %v17784_v30  ;;  %v12957_v54 = vadd.f32 %v12956_v2, %v12955_v48  ;;  %v6889_v21 = vshll.u32 %v17966_v44, 16 }
 0x78c   : > { %v6558_v63 = vpack.c.bf16 %v6536_v53, %v6535_v20  ;;  %7114 = vrot.lane.b32.xlu0 %v17993_v50, %s14434_s22  ;;  %v17997_v46 = vpop.f32.mrb[72].mxu1  ;;  %v6894_v17 = vshll.u32 %v17982_v60, 16  ;;  %v18003_v59 = vsel %vm14512_vm2, %v6624_v14, 0  ;;  %v18010_v35 = vsel %vm14512_vm2, 0, %v6627_v41 }
 0x78d   : > { %v6471_v30 = vadd.f32 %v6470_v36, %v6310_v58  ;;  %v6313_v1 = vadd.f32 %v12957_v54, %v17786_v27  ;;  %v18006_v57 = vpop.f32.mrb[73].mxu1  ;;  %v18013_v7 = vsel %vm507_vm3, %v6880_v32, %v6884_v40  ;;  %v6887_v8 = vshrl.u32 %v17966_v44, 16 }
 0x78e   : > { %20580 = vst [vmem:[#allocation10_spill] sm:$0xff] %v18013_v7  ;;  %v6891_v62 = vrot.slane %v6889_v21, 1  ;;  %v18016_v15 = vpop.f32.mrb[74].mxu1  ;;  %v6901_v14 = vshll.u32 %v17993_v50, 16  ;;  %v6896_v4 = vrot.slane %v6894_v17, 1  ;;  %v6899_v41 = vshrl.u32 %v17993_v50, 16 }
 0x78f   : > { %7004 = vrot.lane.b32.xlu1 %v18013_v7, %s14434_s22  ;;  %v6537_v27 = vmax.f32 %v6471_v30, 0.0  ;;  %v6474_v36 = vadd.f32 %v6473_v43, %v6313_v1  ;;  %v18021_v10 = vpop.f32.mrb[75].mxu1  ;;  %v12958_v48 = vpop.f32.mrb[28].mxu0  ;;  %v6906_v2 = vshll.u32 %v17948_v6, 16  ;;  %v6913_v58 = vshll.u32 %v18010_v35, 16 }
 0x790   : > { %v6892_v20 = vor.u32 %v6891_v62, %v6887_v8  ;;  %7116 = vrot.lane.b32.xlu0 %v18010_v35, %s14434_s22  ;;  %v6903_v53 = vrot.slane %v6901_v14, 1  ;;  %v12959_v32 = vpop.f32.mrb[29].mxu0  ;;  %v6911_v43 = vshrl.u32 %v18010_v35, 16  ;;  %v6629_v17 = vshrl.u32 %v6558_v63, 16 }
 0x791   : > { %v6538_v54 = vmax.f32 %v6474_v36, 0.0  ;;  %v12960_v40 = vadd.f32 %v12959_v32, %v12958_v48  ;;  %v12961_v21 = vpop.f32.mrb[30].mxu0  ;;  %v6915_v62 = vrot.slane %v6913_v58, 1  ;;  %v6918_v7 = vshll.u32 %v18003_v59, 16 }
 0x792   : > { %v18030_v30 = vsel %vm507_vm3, %v6892_v20, %v6896_v4  ;;  %v6904_v1 = vor.u32 %v6903_v53, %v6899_v41  ;;  %v12962_v8 = vpop.f32.mrb[31].mxu0  ;;  %v6631_v48 = vrot.slane %v6629_v17, 7  ;;  %v6908_v32 = vrot.slane %v6906_v2, 1 }
 0x793   : > { %v6559_v14 = vpack.c.bf16 %v6538_v54, %v6537_v27  ;;  %7006 = vrot.lane.b32.xlu1 %v18030_v30, %s14434_s22  ;;  %v6318_v26 = vadd.f32 %v12960_v40, %v17788_v0  ;;  %v12963_v36 = vadd.f32 %v12962_v8, %v12961_v21  ;;  %v6916_v22 = vor.u32 %v6915_v62, %v6911_v43 }
 0x794   : > { %v6632_v3 = vshll.u32 %v6558_v63, 16  ;;  %v18036_v56 = vpop.f32.mrb[76].mxu1  ;;  %v18042_v20 = vsel %vm14512_vm2, %v6631_v48, 0  ;;  %v18047_v0 = vsel %vm507_vm3, %v6904_v1, %v6908_v32  ;;  %v6920_v58 = vrot.slane %v6918_v7, 1 }
 0x795   : > { %v6479_v4 = vadd.f32 %v17958_v18, %v6318_v26  ;;  %v6321_v41 = vadd.f32 %v12963_v36, %v17790_v13  ;;  %v6636_v27 = vshrl.u32 %v6559_v14, 16  ;;  %v18044_v53 = vpop.f32.mrb[77].mxu1  ;;  %v6639_v43 = vshll.u32 %v6559_v14, 16 }
 0x796   : > { %v6634_v2 = vor.u32 %v6632_v3, %v6631_v48  ;;  %v18049_v54 = vpop.f32.mrb[78].mxu1  ;;  %v18057_v40 = vsel %vm507_vm3, %v6916_v22, %v6920_v58  ;;  %v6930_v3 = vshll.u32 %v18042_v20, 16  ;;  %v14241_v58 = vld [vmem:[%s20451_s2 + $0x420] sm:$0xff]  }
 0x797   : > { %7008 = vrot.lane.b32.xlu1 %v18047_v0, %s14434_s22  ;;  %v6482_v18 = vadd.f32 %v17972_v38, %v6321_v41  ;;  %v12964_v13 = vpop.f32.mrb[32].mxu0  ;;  %v6638_v26 = vrot.slane %v6636_v27, 7  ;;  %v18054_v63 = vpop.f32.mrb[79].mxu1  ;;  %v6539_v17 = vmax.f32 %v6479_v4, 0.0  ;;  %13120 = vmatprep.subr.bf16.mxu1 %v14241_v58 }
 0x798   : > { %v18061_v21 = vsel %vm14512_vm2, 0, %v6634_v2  ;;  %v12965_v7 = vpop.f32.mrb[33].mxu0  ;;  %v14242_v2 = vld [vmem:[%s20451_s2 + $0x3e0] sm:$0xff]  }
 0x799   : > { %v6540_v1 = vmax.f32 %v6482_v18, 0.0  ;;  %7118 = vrot.lane.b32.xlu0 %v18061_v21, %s14434_s22  ;;  %v12966_v38 = vadd.f32 %v12965_v7, %v12964_v13  ;;  %v12967_v8 = vpop.f32.mrb[34].mxu0  ;;  %v6925_v62 = vshll.u32 %v18061_v21, 16  ;;  %v6923_v22 = vshrl.u32 %v18061_v21, 16  ;;  %13121 = vmatpush3.bf16.msra.mxu1 %v14242_v2 }
 0x79a   : > { %v12968_v36 = vpop.f32.mrb[35].mxu0  ;;  %v6641_v48 = vor.u32 %v6639_v43, %v6638_v26  ;;  %v18070_v32 = vsel %vm14512_vm2, %v6638_v26, 0 }
 0x79b   : > { %v6560_v41 = vpack.c.bf16 %v6540_v1, %v6539_v17  ;;  %7010 = vrot.lane.b32.xlu1 %v18057_v40, %s14434_s22  ;;  %v6326_v14 = vadd.f32 %v12966_v38, %v17810_v12  ;;  %v12969_v4 = vadd.f32 %v12968_v36, %v12967_v8  ;;  %v6927_v27 = vrot.slane %v6925_v62, 1 }
 0x79c   : > { %v18083_v18 = vsel %vm14512_vm2, 0, %v6641_v48  ;;  %v6932_v12 = vrot.slane %v6930_v3, 1  ;;  %v6942_v17 = vshll.u32 %v18070_v32, 16 }
 0x79d   : > { %v6487_v13 = vadd.f32 %v18006_v57, %v6326_v14  ;;  %v6329_v26 = vadd.f32 %v12969_v4, %v17812_v51  ;;  %v6928_v7 = vor.u32 %v6927_v27, %v6923_v22  ;;  %7120 = vrot.lane.b32.xlu0 %v18083_v18, %s14434_s22  ;;  %v6937_v43 = vshll.u32 %v18083_v18, 16  ;;  %v14243_v51 = vld [vmem:[%s20451_s2 + $0x428] sm:$0xff]  }
 0x79e   : > { %v6643_v1 = vshrl.u32 %v6560_v41, 16  ;;  %v6935_v62 = vshrl.u32 %v18083_v18, 16  ;;  %v6646_v48 = vshll.u32 %v6560_v41, 16  ;;  %13122 = vmatprep.subr.bf16.mxu1 %v14243_v51  ;;  %v14247_v51 = vld [vmem:[%s20451_s2 + $0x3f0] sm:$0xff]  }
 0x79f   : > { %v6490_v38 = vadd.f32 %v18021_v10, %v6329_v26  ;;  %v18093_v8 = vsel %vm507_vm3, %v6928_v7, %v6932_v12  ;;  %v12970_v57 = vpop.f32.mrb[36].mxu0  ;;  %v6939_v36 = vrot.slane %v6937_v43, 1  ;;  %v6541_v14 = vmax.f32 %v6487_v13, 0.0 }
 0x7a0   : > { %20581 = vst [vmem:[#allocation13_spill] sm:$0xff] %v18093_v8  ;;  %7012 = vrot.lane.b32.xlu1 %v18093_v8, %s14434_s22  ;;  %v12971_v3 = vpop.f32.mrb[37].mxu0  ;;  %v6645_v22 = vrot.slane %v6643_v1, 7  ;;  %v6944_v26 = vrot.slane %v6942_v17, 1  ;;  %v14245_v8 = vld [vmem:[%s20451_s2 + $0x3e8] sm:$0xff]   ;;  %v14246_v1 = vld [vmem:[%s20451_s2 + $0x430] sm:$0xff]  }
 0x7a1   : > { %v6542_v4 = vmax.f32 %v6490_v38, 0.0  ;;  %v12972_v10 = vadd.f32 %v12971_v3, %v12970_v57  ;;  %v12973_v27 = vpop.f32.mrb[38].mxu0  ;;  %v6940_v2 = vor.u32 %v6939_v36, %v6935_v62  ;;  %13123 = vmatpush3.bf16.msra.mxu1 %v14245_v8 }
 0x7a2   : > { %v12974_v58 = vpop.f32.mrb[39].mxu0  ;;  %v6648_v7 = vor.u32 %v6646_v48, %v6645_v22  ;;  %v18103_v12 = vsel %vm14512_vm2, %v6645_v22, 0  ;;  %13124 = vmatprep.subr.bf16.mxu1 %v14246_v1 }
 0x7a3   : > { %v6561_v43 = vpack.c.bf16 %v6542_v4, %v6541_v14  ;;  %v6334_v41 = vadd.f32 %v12972_v10, %v17816_v11  ;;  %v12975_v13 = vadd.f32 %v12974_v58, %v12973_v27  ;;  %v18113_v38 = vsel %vm507_vm3, %v6940_v2, %v6944_v26 }
 0x7a4   : > { %v18117_v17 = vsel %vm14512_vm2, 0, %v6648_v7  ;;  %v6954_v57 = vshll.u32 %v18103_v12, 16  ;;  %7014 = vrot.lane.b32.xlu1 %v18113_v38, %s14434_s22 }
 0x7a5   : > { %v6495_v11 = vadd.f32 %v17997_v46, %v6334_v41  ;;  %v6337_v3 = vadd.f32 %v12975_v13, %v17818_v29  ;;  %7122 = vrot.lane.b32.xlu0 %v18117_v17, %s14434_s22  ;;  %v6949_v62 = vshll.u32 %v18117_v17, 16  ;;  %v6650_v36 = vshrl.u32 %v6561_v43, 16  ;;  %v14248_v29 = vld [vmem:[%s20451_s2 + $0x438] sm:$0xff]   ;;  %13125 = vmatpush3.bf16.msra.mxu1 %v14247_v51 }
 0x7a6   : > { %v6947_v48 = vshrl.u32 %v18117_v17, 16  ;;  %v6956_v4 = vrot.slane %v6954_v57, 1  ;;  %v6653_v27 = vshll.u32 %v6561_v43, 16  ;;  %13126 = vmatprep.subr.bf16.mxu1 %v14248_v29 }
 0x7a7   : > { %v6498_v8 = vadd.f32 %v18016_v15, %v6337_v3  ;;  %v12976_v22 = vpop.f32.mrb[40].mxu0  ;;  %v6951_v14 = vrot.slane %v6949_v62, 1  ;;  %v6652_v10 = vrot.slane %v6650_v36, 7  ;;  %v6543_v58 = vmax.f32 %v6495_v11, 0.0  ;;  %v14249_v3 = vld [vmem:[%s20451_s2 + $0x3f8] sm:$0xff]   ;;  %v14250_v11 = vld [vmem:[%s20451_s2 + $0x440] sm:$0xff]  }
 0x7a8   : > { %v12977_v46 = vpop.f32.mrb[41].mxu0 }
 0x7a9   : > { %v6544_v2 = vmax.f32 %v6498_v8, 0.0  ;;  %v12978_v26 = vadd.f32 %v12977_v46, %v12976_v22  ;;  %v12979_v7 = vpop.f32.mrb[42].mxu0  ;;  %v6952_v41 = vor.u32 %v6951_v14, %v6947_v48  ;;  %v6655_v13 = vor.u32 %v6653_v27, %v6652_v10  ;;  %13127 = vmatpush3.bf16.msra.mxu1 %v14249_v3  ;;  %v14251_v22 = vld [vmem:[%s20451_s2 + $0x400] sm:$0xff]  }
 0x7aa   : > { %v12980_v15 = vpop.f32.mrb[43].mxu0  ;;  %v18137_v1 = vsel %vm14512_vm2, %v6652_v10, 0  ;;  %13128 = vmatprep.subr.bf16.mxu1 %v14250_v11 }
 0x7ab   : > { %v6562_v57 = vpack.c.bf16 %v6544_v2, %v6543_v58  ;;  %v12981_v62 = vadd.f32 %v12980_v15, %v12979_v7  ;;  %v18143_v43 = vsel %vm507_vm3, %v6952_v41, %v6956_v4  ;;  %v6342_v51 = vadd.f32 %v12978_v26, %v17826_v49 }
 0x7ac   : > { %7016 = vrot.lane.b32.xlu1 %v18143_v43, %s14434_s22  ;;  %v18153_v36 = vsel %vm14512_vm2, 0, %v6655_v13  ;;  %v6966_v8 = vshll.u32 %v18137_v1, 16 }
 0x7ad   : > { %v6503_v49 = vadd.f32 %v18044_v53, %v6342_v51  ;;  %7124 = vrot.lane.b32.xlu0 %v18153_v36, %s14434_s22  ;;  %v6345_v48 = vadd.f32 %v12981_v62, %v17831_v31  ;;  %v6961_v14 = vshll.u32 %v18153_v36, 16  ;;  %v6657_v29 = vshrl.u32 %v6562_v57, 16  ;;  %13129 = vmatpush3.bf16.msra.mxu1 %v14251_v22  ;;  %v14252_v53 = vld [vmem:[%s20451_s2 + $0x448] sm:$0xff]  }
 0x7ae   : > { %v6959_v10 = vshrl.u32 %v18153_v36, 16  ;;  %v6968_v2 = vrot.slane %v6966_v8, 1  ;;  %v6660_v7 = vshll.u32 %v6562_v57, 16  ;;  %13130 = vmatprep.subr.bf16.mxu1 %v14252_v53  ;;  %v14253_v57 = vld [vmem:[%s20451_s2 + $0x408] sm:$0xff]  }
 0x7af   : > { %v6506_v46 = vadd.f32 %v18054_v63, %v6345_v48  ;;  %v12982_v4 = vpop.f32.mrb[44].mxu0  ;;  %v6963_v27 = vrot.slane %v6961_v14, 1  ;;  %v6659_v26 = vrot.slane %v6657_v29, 7  ;;  %v6545_v31 = vmax.f32 %v6503_v49, 0.0  ;;  %v14254_v48 = vld [vmem:[%s20451_s2 + $0x450] sm:$0xff]  }
 0x7b0   : > { %v12983_v58 = vpop.f32.mrb[45].mxu0 }
 0x7b1   : > { %v6546_v41 = vmax.f32 %v6506_v46, 0.0  ;;  %v12984_v15 = vadd.f32 %v12983_v58, %v12982_v4  ;;  %v12985_v13 = vpop.f32.mrb[46].mxu0  ;;  %v6964_v3 = vor.u32 %v6963_v27, %v6959_v10  ;;  %v6662_v63 = vor.u32 %v6660_v7, %v6659_v26  ;;  %13131 = vmatpush3.bf16.msra.mxu1 %v14253_v57  ;;  %v14256_v58 = vld [vmem:[%s20451_s2 + $0x458] sm:$0xff]  }
 0x7b2   : > { %v12986_v62 = vpop.f32.mrb[47].mxu0  ;;  %v18171_v51 = vsel %vm14512_vm2, %v6659_v26, 0  ;;  %13132 = vmatprep.subr.bf16.mxu1 %v14254_v48 }
 0x7b3   : > { %v6563_v11 = vpack.c.bf16 %v6546_v41, %v6545_v31  ;;  %v6350_v8 = vadd.f32 %v12984_v15, %v17838_v28  ;;  %v12987_v22 = vadd.f32 %v12986_v62, %v12985_v13  ;;  %v18178_v49 = vsel %vm507_vm3, %v6964_v3, %v6968_v2  ;;  %v14255_v28 = vld [vmem:[%s20451_s2 + $0x410] sm:$0xff]   ;;  %v14257_v62 = vld [vmem:[%s20451_s2 + $0x418] sm:$0xff]  }
 0x7b4   : > { %7018 = vrot.lane.b32.xlu1 %v18178_v49, %s14434_s22  ;;  %v18187_v14 = vsel %vm14512_vm2, 0, %v6662_v63  ;;  %v6978_v27 = vshll.u32 %v18171_v51, 16 }
 0x7b5   : > { %v6664_v29 = vshrl.u32 %v6563_v11, 16  ;;  %v6511_v46 = vadd.f32 %v18036_v56, %v6350_v8  ;;  %v6353_v4 = vadd.f32 %v12987_v22, %v17840_v39  ;;  %7126 = vrot.lane.b32.xlu0 %v18187_v14, %s14434_s22  ;;  %v6973_v10 = vshll.u32 %v18187_v14, 16  ;;  %13133 = vmatpush3.bf16.msra.mxu1 %v14255_v28 }
 0x7b6   : > { %v6667_v26 = vshll.u32 %v6563_v11, 16  ;;  %v6971_v56 = vshrl.u32 %v18187_v14, 16  ;;  %13134 = vmatprep.subr.bf16.mxu1 %v14256_v58  ;;  %v6980_v3 = vrot.slane %v6978_v27, 1 }
 0x7b7   : > { %v6666_v2 = vrot.slane %v6664_v29, 7  ;;  %v6514_v7 = vadd.f32 %v18049_v54, %v6353_v4  ;;  %v6975_v53 = vrot.slane %v6973_v10, 1  ;;  %v6547_v41 = vmax.f32 %v6511_v46, 0.0 }
 0x7b9   : > { %v6669_v39 = vor.u32 %v6667_v26, %v6666_v2  ;;  %v18205_v31 = vsel %vm14512_vm2, %v6666_v2, 0  ;;  %v6548_v15 = vmax.f32 %v6514_v7, 0.0  ;;  %v6976_v13 = vor.u32 %v6975_v53, %v6971_v56  ;;  %13135 = vmatpush3.bf16.msra.mxu1 %v14257_v62 }
 0x7ba   : > { %v6990_v8 = vshll.u32 %v18205_v31, 16  ;;  %v7057_v2 = vrot.slane %v17867_v25, 1  ;;  %v7054_v7 = vrot.slane %v17873_v16, 1  ;;  %v7058_v56 = vrot.slane %v17859_v19, 1 }
 0x7bb   : > { %v6564_v63 = vpack.c.bf16 %v6548_v15, %v6547_v41  ;;  %v18212_v54 = vsel %vm14512_vm2, 0, %v6669_v39  ;;  %v18215_v57 = vsel %vm507_vm3, %v6976_v13, %v6980_v3  ;;  %v7055_v53 = vrot.slane %v17863_v24, 1 }
 0x7bc   : > { %7128 = vrot.lane.b32.xlu0 %v18212_v54, %s14434_s22  ;;  %v6985_v11 = vshll.u32 %v18212_v54, 16  ;;  %7020 = vrot.lane.b32.xlu1 %v18215_v57, %s14434_s22  ;;  %v6983_v48 = vshrl.u32 %v18212_v54, 16  ;;  %v6992_v10 = vrot.slane %v6990_v8, 1  ;;  %v18240_v39 = vsel %vm764_vm4, %v7057_v2, %v7058_v56 }
 0x7bd   : > { %v6671_v22 = vshrl.u32 %v6564_v63, 16  ;;  %v6674_v46 = vshll.u32 %v6564_v63, 16  ;;  %v7063_v41 = vrot.slane %v17921_v34, 1  ;;  %v18246_v15 = vsel %vm764_vm4, %v7054_v7, %v7055_v53 }
 0x7be   : > { %v6987_v28 = vrot.slane %v6985_v11, 1  ;;  %v7060_v13 = vrot.slane %v17892_v33, 1  ;;  %v7064_v19 = vrot.slane %v17897_v55, 1  ;;  %v7061_v24 = vrot.slane %v17906_v61, 1 }
 0x7bf   : > { %v6673_v29 = vrot.slane %v6671_v22, 7  ;;  %v7069_v62 = vrot.slane %v17954_v52, 1  ;;  %v7066_v11 = vrot.slane %v17931_v37, 1  ;;  %v7070_v55 = vrot.slane %v17915_v9, 1 }
 0x7c0   : > { %v6988_v4 = vor.u32 %v6987_v28, %v6983_v48  ;;  %v18254_v3 = vsel %vm764_vm4, %v7063_v41, %v7064_v19  ;;  %v18260_v63 = vsel %vm764_vm4, %v7060_v13, %v7061_v24  ;;  %v7067_v61 = vrot.slane %v17940_v47, 1 }
 0x7c1   : > { %v6676_v27 = vor.u32 %v6674_v46, %v6673_v29  ;;  %v18268_v8 = vsel %vm764_vm4, %v7069_v62, %v7070_v55  ;;  %v7075_v22 = vrot.slane %v17993_v50, 1  ;;  %v7072_v28 = vrot.slane %v17966_v44, 1 }
 0x7c2   : > { %v18225_v58 = vsel %vm507_vm3, %v6988_v4, %v6992_v10  ;;  %v18274_v48 = vsel %vm764_vm4, %v7066_v11, %v7067_v61  ;;  %v7076_v9 = vrot.slane %v17948_v6, 1  ;;  %v7073_v47 = vrot.slane %v17982_v60, 1 }
 0x7c3   : > { %7022 = vrot.lane.b32.xlu1 %v18225_v58, %s14434_s22  ;;  %v18232_v26 = vsel %vm14512_vm2, 0, %v6676_v27  ;;  %v7081_v4 = vrot.slane %v18061_v21, 1  ;;  %v7078_v27 = vrot.slane %v18010_v35, 1  ;;  %v7082_v6 = vrot.slane %v18042_v20, 1 }
 0x7c4   : > { %7130 = vrot.lane.b32.xlu0 %v18232_v26, %s14434_s22  ;;  %v18282_v46 = vsel %vm764_vm4, %v7075_v22, %v7076_v9  ;;  %v18288_v10 = vsel %vm764_vm4, %v7072_v28, %v7073_v47  ;;  %v7079_v60 = vrot.slane %v18003_v59, 1  ;;  %v7087_v7 = vrot.slane %v18117_v17, 1 }
 0x7c5   : > { %v18296_v2 = vsel %vm764_vm4, %v7081_v4, %v7082_v6  ;;  %v7084_v53 = vrot.slane %v18083_v18, 1  ;;  %v7135_v41 = vshll.u32 %v18232_v26, 16  ;;  %v7088_v59 = vrot.slane %v18103_v12, 1 }
 0x7c6   : > { %v18302_v56 = vsel %vm764_vm4, %v7078_v27, %v7079_v60  ;;  %v7085_v20 = vrot.slane %v18070_v32, 1  ;;  %v7093_v19 = vrot.slane %v18187_v14, 1  ;;  %v6740_v24 = vsel %vm14512_vm2, %v6673_v29, 0  ;;  %v14240_v60 = vld [vmem:[%s20451_s2 + $0x468] sm:$0xff]  }
 0x7c7   : > { %7150 = vrot.lane.b32.xlu1 %v18240_v39, %s14434_s22  ;;  %v18311_v13 = vsel %vm764_vm4, %v7087_v7, %v7088_v59  ;;  %v7090_v11 = vrot.slane %v18153_v36, 1  ;;  %v7137_v55 = vrot.slane %v7135_v41, 1  ;;  %v7094_v32 = vrot.slane %v18171_v51, 1 }
 0x7c8   : > { %7148 = vrot.lane.b32.xlu0 %v18246_v15, %s14434_s22  ;;  %v18319_v62 = vsel %vm764_vm4, %v7084_v53, %v7085_v20  ;;  %v7091_v12 = vrot.slane %v18137_v1, 1  ;;  %v7133_v61 = vshrl.u32 %v18232_v26, 16  ;;  %v7140_v22 = vshll.u32 %v6740_v24, 16  ;;  %v14334_v53 = vld [vmem:[%s20451_s2 + $0x460] sm:$0xff]  }
 0x7c9   : > { %v18328_v29 = vsel %vm764_vm4, %v7093_v19, %v7094_v32  ;;  %v7096_v4 = vrot.slane %v18212_v54, 1  ;;  %v7097_v51 = vrot.slane %v18205_v31, 1  ;;  %v7145_v59 = vrot.slane %v18232_v26, 1  ;;  %v14258_v32 = vld [vmem:[%s20451_s2 + $0x478] sm:$0xff]  }
 0x7ca   : > { %v18333_v47 = vsel %vm764_vm4, %v7090_v11, %v7091_v12  ;;  %v7138_v27 = vor.u32 %v7137_v55, %v7133_v61  ;;  %v7142_v6 = vrot.slane %v7140_v22, 1  ;;  %v7146_v20 = vrot.slane %v6740_v24, 1 }
 0x7cb   : > { %7154 = vrot.lane.b32.xlu1 %v18254_v3, %s14434_s22  ;;  %v18351_v41 = vsel %vm764_vm4, %v7096_v4, %v7097_v51 }
 0x7cc   : > { %7152 = vrot.lane.b32.xlu0 %v18260_v63, %s14434_s22  ;;  %v18354_v31 = vsel %vm507_vm3, %v7138_v27, %v7142_v6  ;;  %v18365_v55 = vsel %vm764_vm4, %v7145_v59, %v7146_v20 }
 0x7cf   : > { %7158 = vrot.lane.b32.xlu1 %v18268_v8, %s14434_s22 }
 0x7d0   : > { %7156 = vrot.lane.b32.xlu0 %v18274_v48, %s14434_s22 }
 0x7d3   : > { %7162 = vrot.lane.b32.xlu1 %v18282_v46, %s14434_s22 }
 0x7d4   : > { %7160 = vrot.lane.b32.xlu0 %v18288_v10, %s14434_s22 }
 0x7d7   : > { %7166 = vrot.lane.b32.xlu1 %v18296_v2, %s14434_s22 }
 0x7d8   : > { %7164 = vrot.lane.b32.xlu0 %v18302_v56, %s14434_s22 }
 0x7db   : > { %7170 = vrot.lane.b32.xlu1 %v18311_v13, %s14434_s22 }
 0x7dc   : > { %7168 = vrot.lane.b32.xlu0 %v18319_v62, %s14434_s22 }
 0x7de   : > { %v7103_v28 = vpop.permute.xlu0 %7102 }
 0x7df   : > { %v7101_v9 = vpop.permute.xlu1 %7100  ;;  %7174 = vrot.lane.b32.xlu1 %v18328_v29, %s14434_s22  ;;  %v7232_v7 = vsel %vm896_vm5, %v18246_v15, %v7103_v28  ;;  %v14244_v15 = vld [vmem:[%s20451_s2 + $0x470] sm:$0xff]  }
 0x7e0   : > { %v7228_v1 = vsel %vm896_vm5, %v15032_v42, %v7101_v9  ;;  %7172 = vrot.lane.b32.xlu0 %v18333_v47, %s14434_s22 }
 0x7e1   : > { %7636 = vmatprep.mubr.bf16.mxu0 %v7228_v1 }
 0x7e2   : > { %7637 = vmatmul.mubr.bf16.vlgmr.msra.gmra.mrb[48].mxu0 %v15042_v5 }
 0x7e3   : > { %13901 = vmatpush3.bf16.msra.mxu0 %v14334_v53  ;;  %7644 = vmatprep.mubr.bf16.mxu0 %v7232_v7 }
 0x7e4   : > { %7176 = vrot.lane.b32.xlu1 %v18351_v41, %s14434_s22  ;;  %7180 = vrot.lane.b32.xlu0 %v18354_v31, %s14434_s22 }
 0x7e5   : > { %13902 = vmatprep.subr.bf16.mxu0 %v14240_v60 }
 0x7e6   : > { %v6995_v19 = vpop.permute.xlu1 %6994 }
 0x7e7   : > { %v7105_v11 = vpop.permute.xlu0 %7104  ;;  %13903 = vmatpush3.bf16.msra.mxu0 %v14240_v60  ;;  %v7183_v12 = vsel %vm896_vm5, %v17873_v16, %v6995_v19 }
 0x7e8   : > { %7178 = vrot.lane.b32.xlu0 %v18365_v55, %s14434_s22  ;;  %13904 = vmatprep.subr.bf16.mxu0 %v14244_v15  ;;  %v7236_v24 = vsel %vm896_vm5, %v18240_v39, %v7105_v11 }
 0x7ea   : > { %7645 = vmatmul.mubr.bf16.gmra.mrb[52].mxu0 %v7183_v12 }
 0x7eb   : > { %7652 = vmatprep.mubr.bf16.mxu0 %v7236_v24  ;;  %13905 = vmatpush3.bf16.msra.mxu0 %v14244_v15 }
 0x7ec   : > { %13906 = vmatprep.subr.bf16.mxu0 %v14258_v32  ;;  %v6997_v61 = vpop.permute.xlu1 %6996 }
 0x7ed   : > { %v7186_v22 = vsel %vm896_vm5, %v17867_v25, %v6997_v61  ;;  %v7107_v28 = vpop.permute.xlu0 %7106 }
 0x7ee   : > { %7797 = vmatprep.mubr.bf16.mxu1 %v7186_v22  ;;  %v7240_v9 = vsel %vm896_vm5, %v18260_v63, %v7107_v28 }
 0x7ef   : > { %13907 = vmatpush3.bf16.msra.mxu0 %v14258_v32 }
 0x7f1   : > { %v7109_v4 = vpop.permute.xlu0 %7108 }
 0x7f2   : > { %7653 = vmatmul.mubr.bf16.gmra.mrb[56].mxu0 %v7186_v22  ;;  %v7244_v1 = vsel %vm896_vm5, %v18254_v3, %v7109_v4 }
 0x7f3   : > { %7660 = vmatprep.mubr.bf16.mxu0 %v7240_v9 }
 0x7f4   : > { %v6999_v16 = vpop.permute.xlu1 %6998 }
 0x7f5   : > { %v7189_v27 = vsel %vm896_vm5, %v17892_v33, %v6999_v16 }
 0x7f6   : > { %v7111_v25 = vpop.permute.xlu0 %7110 }
 0x7f7   : > { %v7248_v60 = vsel %vm896_vm5, %v18274_v48, %v7111_v25 }
 0x7f8   : > { %v7001_v51 = vpop.permute.xlu1 %7000 }
 0x7f9   : > { %v18386_v6 = vsel %vm896_vm5, %v17921_v34, %v7001_v51 }
 0x7fa   : > { %7661 = vmatmul.mubr.bf16.gmra.mrb[60].mxu0 %v7189_v27  ;;  %v7113_v53 = vpop.permute.xlu0 %7112 }
 0x7fb   : > { %7668 = vmatprep.mubr.bf16.mxu0 %v7244_v1  ;;  %v7252_v59 = vsel %vm896_vm5, %v18268_v8, %v7113_v53 }
 0x7fd   : > { %v7003_v7 = vpop.permute.xlu1 %7002 }
 0x7fe   : > { %v18393_v33 = vsel %vm896_vm5, %v17931_v37, %v7003_v7  ;;  %v7115_v15 = vpop.permute.xlu0 %7114 }
 0x7ff   : > { %v7256_v19 = vsel %vm896_vm5, %v18288_v10, %v7115_v15 }
 0x801   : > { %v7005_v34 = vpop.permute.xlu1 %7004 }
 0x802   : > { %7669 = vmatmul.mubr.bf16.gmra.mrb[64].mxu0 %v18386_v6  ;;  %v18400_v20 = vsel %vm896_vm5, %v17954_v52, %v7005_v34  ;;  %v7117_v11 = vpop.permute.xlu0 %7116 }
 0x803   : > { %7676 = vmatprep.mubr.bf16.mxu0 %v7248_v60  ;;  %v7260_v12 = vsel %vm896_vm5, %v18282_v46, %v7117_v11 }
 0x805   : > { %v7007_v37 = vpop.permute.xlu1 %7006 }
 0x806   : > { %v18407_v32 = vsel %vm896_vm5, %v17966_v44, %v7007_v37 }
 0x809   : > { %v7009_v52 = vpop.permute.xlu1 %7008 }
 0x80a   : > { %7677 = vmatmul.mubr.bf16.gmra.mrb[68].mxu0 %v18393_v33  ;;  %v18414_v61 = vsel %vm896_vm5, %v17993_v50, %v7009_v52 }
 0x80b   : > { %7684 = vmatprep.mubr.bf16.mxu0 %v7252_v59  ;;  %v7119_v24 = vpop.permute.xlu0 %7118 }
 0x80c   : > { %v7264_v44 = vsel %vm896_vm5, %v18302_v56, %v7119_v24 }
 0x80d   : > { %v7011_v22 = vpop.permute.xlu1 %7010 }
 0x80e   : > { %v18421_v4 = vsel %vm896_vm5, %v18010_v35, %v7011_v22  ;;  %v20582_v22 = vld [vmem:[#allocation9_spill] sm:$0xff] }
 0x80f   : > { %v7121_v28 = vpop.permute.xlu0 %7120 }
 0x810   : > { %v7268_v50 = vsel %vm896_vm5, %v18296_v2, %v7121_v28 }
 0x812   : > { %7685 = vmatmul.mubr.bf16.gmra.mrb[72].mxu0 %v18400_v20  ;;  %v7013_v9 = vpop.permute.xlu1 %7012 }
 0x813   : > { %7692 = vmatprep.mubr.bf16.mxu0 %v7256_v19  ;;  %v18428_v7 = vsel %vm896_vm5, %v18061_v21, %v7013_v9 }
 0x816   : > { %v7015_v1 = vpop.permute.xlu1 %7014 }
 0x817   : > { %v7123_v16 = vpop.permute.xlu0 %7122  ;;  %v7213_v19 = vsel %vm896_vm5, %v18083_v18, %v7015_v1 }
 0x818   : > { %v7272_v35 = vsel %vm896_vm5, %v18319_v62, %v7123_v16 }
 0x81a   : > { %7693 = vmatmul.mubr.bf16.gmra.mrb[76].mxu0 %v18407_v32 }
 0x81b   : > { %7700 = vmatprep.mubr.bf16.mxu0 %v7260_v12 }
 0x81e   : > { %v7017_v25 = vpop.permute.xlu1 %7016 }
 0x81f   : > { %v7125_v51 = vpop.permute.xlu0 %7124  ;;  %v7216_v24 = vsel %vm896_vm5, %v18117_v17, %v7017_v25  ;;  %v20583_v17 = vld [vmem:[#allocation11_spill] sm:$0xff] }
 0x820   : > { %v7276_v21 = vsel %vm896_vm5, %v18311_v13, %v7125_v51 }
 0x822   : > { %7701 = vmatmul.mubr.bf16.gmra.mrb[80].mxu0 %v18414_v61 }
 0x823   : > { %7708 = vmatprep.mubr.bf16.mxu0 %v7264_v44 }
 0x826   : > { %v7019_v53 = vpop.permute.xlu1 %7018 }
 0x827   : > { %v7127_v60 = vpop.permute.xlu0 %7126 }
 0x828   : > { %v7280_v18 = vsel %vm896_vm5, %v18333_v47, %v7127_v60 }
 0x82a   : > { %7709 = vmatmul.mubr.bf16.gmra.mrb[84].mxu0 %v18421_v4 }
 0x82b   : > { %7716 = vmatprep.mubr.bf16.mxu0 %v7268_v50 }
 0x82e   : > { %v7129_v59 = vpop.permute.xlu0 %7128  ;;  %v7021_v34 = vpop.permute.xlu1 %7020 }
 0x82f   : > { %v7222_v1 = vsel %vm896_vm5, %v18187_v14, %v7021_v34 }
 0x832   : > { %7717 = vmatmul.mubr.bf16.gmra.mrb[88].mxu0 %v18428_v7 }
 0x833   : > { %7724 = vmatprep.mubr.bf16.mxu0 %v7272_v35 }
 0x835   : > { %v7023_v37 = vpop.permute.xlu1 %7022 }
 0x836   : > { %v7131_v15 = vpop.permute.xlu0 %7130  ;;  %v7225_v25 = vsel %vm896_vm5, %v18212_v54, %v7023_v37 }
 0x839   : > { %v7151_v52 = vpop.permute.xlu1 %7150 }
 0x83a   : > { %7725 = vmatmul.mubr.bf16.gmra.mrb[92].mxu0 %v7213_v19  ;;  %v7149_v11 = vpop.permute.xlu0 %7148  ;;  %v7296_v28 = vsel %vm896_vm5, %v20582_v22, %v7151_v52 }
 0x83b   : > { %v7292_v12 = vsel %vm896_vm5, %v17888_v45, %v7149_v11  ;;  %7732 = vmatprep.mubr.bf16.mxu0 %v7276_v21  ;;  %v7219_v45 = vsel %vm896_vm5, %v18153_v36, %v7019_v53  ;;  %v20584_v36 = vld [vmem:[#allocation14_spill] sm:$0xff]  ;;  %v14260_v11 = vld [vmem:[%s20451_s2 + $0x480] sm:$0xff]  }
 0x83c   : > { %7798 = vmatmul.mubr.bf16.vlgmr.msra.gmra.mrb[80].mxu1 %v7292_v12  ;;  %v20586_v53 = vld [vmem:[#allocation10_spill] sm:$0xff] }
 0x83d   : > { %7805 = vmatprep.mubr.bf16.mxu1 %v7189_v27  ;;  %v7284_v27 = vsel %vm896_vm5, %v18328_v29, %v7129_v59  ;;  %v7155_v16 = vpop.permute.xlu1 %7154 }
 0x83e   : > { %v7153_v44 = vpop.permute.xlu0 %7152  ;;  %v7304_v51 = vsel %vm896_vm5, %v20584_v36, %v7155_v16  ;;  %v14261_v16 = vld [vmem:[%s20451_s2 + $0x4c8] sm:$0xff]  }
 0x83f   : > { %v7300_v9 = vsel %vm896_vm5, %v20583_v17, %v7153_v44 }
 0x841   : > { %v7159_v14 = vpop.permute.xlu1 %7158 }
 0x842   : > { %7733 = vmatmul.mubr.bf16.gmra.mrb[96].mxu0 %v7216_v24  ;;  %v7157_v50 = vpop.permute.xlu0 %7156 }
 0x843   : > { %7740 = vmatprep.mubr.bf16.mxu0 %v7280_v18 }
 0x844   : > { %7806 = vmatmul.mubr.bf16.gmra.mrb[84].mxu1 %v7296_v28 }
 0x845   : > { %7813 = vmatprep.mubr.bf16.mxu1 %v18386_v6  ;;  %v7288_v6 = vsel %vm896_vm5, %v18351_v41, %v7131_v15 }
 0x846   : > { %v7161_v54 = vpop.permute.xlu0 %7160 }
 0x84a   : > { %7741 = vmatmul.mubr.bf16.gmra.mrb[100].mxu0 %v7219_v45 }
 0x84b   : > { %7748 = vmatprep.mubr.bf16.mxu0 %v7284_v27 }
 0x84c   : > { %7814 = vmatmul.mubr.bf16.gmra.mrb[88].mxu1 %v7300_v9 }
 0x84d   : > { %7821 = vmatprep.mubr.bf16.mxu1 %v18393_v33  ;;  %v20585_v33 = vld [vmem:[#allocation17_spill] sm:$0xff] }
 0x84e   : > { %v7308_v60 = vsel %vm896_vm5, %v20585_v33, %v7157_v50 }
 0x852   : > { %7749 = vmatmul.mubr.bf16.gmra.mrb[104].mxu0 %v7222_v1 }
 0x853   : > { %7756 = vmatprep.mubr.bf16.mxu0 %v7288_v6 }
 0x854   : > { %7822 = vmatmul.mubr.bf16.gmra.mrb[92].mxu1 %v7304_v51 }
 0x855   : > { %7829 = vmatprep.mubr.bf16.mxu1 %v18400_v20  ;;  %v7312_v20 = vsel %vm896_vm5, %v20586_v53, %v7159_v14 }
 0x85a   : > { %7757 = vmatmul.mubr.bf16.gmra.mrb[108].mxu0 %v7225_v25 }
 0x85b   : > { %13908 = vmatprep.mubr.msk.bf16.mxu0 %vm896_vm5, %v18240_v39  ;;  %v7316_v39 = vsel %vm896_vm5, %v18030_v30, %v7161_v54  ;;  %v7165_v30 = vpop.permute.xlu0 %7164 }
 0x85c   : > { %7830 = vmatmul.mubr.bf16.gmra.mrb[96].mxu1 %v7308_v60 }
 0x85d   : > { %7837 = vmatprep.mubr.bf16.mxu1 %v18407_v32 }
 0x862   : > { %13909 = vmatmul.mubr.msk.bf16.vlgmr.msra.gmra.mrb[112].mxu0 %vm896_vm5, %v18260_v63  ;;  %v7163_v63 = vpop.permute.xlu1 %7162 }
 0x863   : > { %13912 = vmatprep.mubr.msk.bf16.mxu0 %vm896_vm5, %v18254_v3  ;;  %v7320_v3 = vsel %vm896_vm5, %v18047_v0, %v7163_v63  ;;  %v20587_v0 = vld [vmem:[#allocation13_spill] sm:$0xff]  ;;  %v14263_v63 = vld [vmem:[%s20451_s2 + $0x4d0] sm:$0xff]  }
 0x864   : > { %7838 = vmatmul.mubr.bf16.gmra.mrb[100].mxu1 %v7312_v20 }
 0x865   : > { %7845 = vmatprep.mubr.bf16.mxu1 %v18414_v61 }
 0x86a   : > { %13913 = vmatmul.mubr.msk.bf16.gmra.mrb[116].mxu0 %vm896_vm5, %v18274_v48  ;;  %v7167_v48 = vpop.permute.xlu1 %7166 }
 0x86b   : > { %13916 = vmatprep.mubr.msk.bf16.mxu0 %vm896_vm5, %v18268_v8  ;;  %v7324_v8 = vsel %vm896_vm5, %v18057_v40, %v7165_v30 }
 0x86c   : > { %7846 = vmatmul.mubr.bf16.gmra.mrb[104].mxu1 %v7316_v39 }
 0x86d   : > { %7853 = vmatprep.mubr.bf16.mxu1 %v18421_v4 }
 0x872   : > { %13917 = vmatmul.mubr.msk.bf16.gmra.mrb[120].mxu0 %vm896_vm5, %v18288_v10  ;;  %v7169_v10 = vpop.permute.xlu0 %7168 }
 0x873   : > { %13920 = vmatprep.mubr.msk.bf16.mxu0 %vm896_vm5, %v18282_v46  ;;  %v7328_v46 = vsel %vm896_vm5, %v20587_v0, %v7167_v48  ;;  %v7332_v40 = vsel %vm896_vm5, %v18113_v38, %v7169_v10  ;;  %v14264_v10 = vld [vmem:[%s20451_s2 + $0x490] sm:$0xff]  }
 0x874   : > { %7854 = vmatmul.mubr.bf16.gmra.mrb[108].mxu1 %v7320_v3 }
 0x875   : > { %7861 = vmatprep.mubr.bf16.mxu1 %v18428_v7 }
 0x87a   : > { %13921 = vmatmul.mubr.msk.bf16.gmra.mrb[124].mxu0 %vm896_vm5, %v18302_v56 }
 0x87b   : > { %13924 = vmatprep.mubr.msk.bf16.mxu0 %vm896_vm5, %v18296_v2  ;;  %v7171_v2 = vpop.permute.xlu1 %7170 }
 0x87c   : > { %7862 = vmatmul.mubr.bf16.gmra.mrb[112].mxu1 %v7324_v8  ;;  %v7336_v56 = vsel %vm896_vm5, %v18143_v43, %v7171_v2 }
 0x87d   : > { %7869 = vmatprep.mubr.bf16.mxu1 %v7213_v19 }
 0x882   : > { %13925 = vmatmul.mubr.msk.bf16.gmra.mrb[128].mxu0 %vm896_vm5, %v18319_v62  ;;  %v7175_v62 = vpop.permute.xlu1 %7174 }
 0x883   : > { %13928 = vmatprep.mubr.msk.bf16.mxu0 %vm896_vm5, %v18311_v13  ;;  %v7173_v13 = vpop.permute.xlu0 %7172 }
 0x884   : > { %7870 = vmatmul.mubr.bf16.gmra.mrb[116].mxu1 %v7328_v46  ;;  %v7340_v38 = vsel %vm896_vm5, %v18178_v49, %v7173_v13 }
 0x885   : > { %7877 = vmatprep.mubr.bf16.mxu1 %v7216_v24 }
 0x88a   : > { %13929 = vmatmul.mubr.msk.bf16.gmra.mrb[132].mxu0 %vm896_vm5, %v18333_v47  ;;  %v7344_v47 = vsel %vm896_vm5, %v18215_v57, %v7175_v62 }
 0x88b   : > { %13932 = vmatprep.mubr.msk.bf16.mxu0 %vm896_vm5, %v18328_v29  ;;  %v7181_v29 = vpop.permute.xlu0 %7180 }
 0x88c   : > { %7878 = vmatmul.mubr.bf16.gmra.mrb[120].mxu1 %v7332_v40  ;;  %v7355_v43 = vsel %vm896_vm5, %v18232_v26, %v7181_v29  ;;  %v14265_v29 = vld [vmem:[%s20451_s2 + $0x4d8] sm:$0xff]  }
 0x88d   : > { %7885 = vmatprep.mubr.bf16.mxu1 %v7219_v45 }
 0x88f   : > { %v7179_v49 = vpop.permute.xlu0 %7178 }
 0x890   : > { %v7352_v32 = vsel %vm896_vm5, %v18354_v31, %v7179_v49  ;;  %v14259_v31 = vld [vmem:[%s20451_s2 + $0x4c0] sm:$0xff]   ;;  %v14266_v49 = vld [vmem:[%s20451_s2 + $0x498] sm:$0xff]  }
 0x891   : > { %13252 = vmatprep.subr.bf16.mxu1 %v14259_v31 }
 0x892   : > { %13933 = vmatmul.mubr.msk.bf16.gmra.mrb[136].mxu0 %vm896_vm5, %v18351_v41  ;;  %v7177_v41 = vpop.permute.xlu1 %7176  ;;  %13253 = vmatpush3.bf16.msra.mxu1 %v14260_v11 }
 0x893   : > { %13936 = vmatprep.mubr.msk.bf16.mxu0 %vm896_vm5, %v18365_v55  ;;  %v7348_v55 = vsel %vm896_vm5, %v18225_v58, %v7177_v41  ;;  %13254 = vmatprep.subr.bf16.mxu1 %v14261_v16 }
 0x894   : > { %7886 = vmatmul.mubr.bf16.gmra.mrb[124].mxu1 %v7336_v56 }
 0x895   : > { %7893 = vmatprep.mubr.bf16.mxu1 %v7222_v1  ;;  %v14262_v1 = vld [vmem:[%s20451_s2 + $0x488] sm:$0xff]  }
 0x896   : > { %13255 = vmatpush3.bf16.msra.mxu1 %v14262_v1 }
 0x897   : > { %13256 = vmatprep.subr.bf16.mxu1 %v14263_v63 }
 0x89a   : > { %13937 = vmatmul.mubr.msk.bf16.gmra.mrb[140].mxu0 %vm896_vm5, %v15032_v42  ;;  %13257 = vmatpush3.bf16.msra.mxu1 %v14264_v10 }
 0x89b   : > { %13258 = vmatprep.subr.bf16.mxu1 %v14265_v29 }
 0x89c   : > { %7894 = vmatmul.mubr.bf16.gmra.mrb[128].mxu1 %v7340_v38 }
 0x89d   : > { %7901 = vmatprep.mubr.bf16.mxu1 %v7225_v25 }
 0x89e   : > { %13259 = vmatpush3.bf16.msra.mxu1 %v14266_v49 }
 0x8a4   : > { %7902 = vmatmul.mubr.bf16.gmra.mrb[132].mxu1 %v7344_v47 }
 0x8a5   : > { %7909 = vmatprep.mubr.bf16.mxu1 %v7355_v43 }
 0x8ac   : > { %7910 = vmatmul.mubr.bf16.gmra.mrb[136].mxu1 %v7348_v55 }
 0x8ad   : > { %7917 = vmatprep.mubr.bf16.mxu1 %v15042_v5 }
 0x8b4   : > { %7918 = vmatmul.mubr.bf16.gmra.mrb[140].mxu1 %v7352_v32 }
 0x8b5   : > { %v13024_v61 = vpop.f32.mrb[48].mxu0 }
 0x8b6   : > { %v13025_v4 = vpop.f32.mrb[49].mxu0 }
 0x8b7   : > { %v18525_v57 = vadd.f32 %v13025_v4, %v13024_v61  ;;  %v13027_v7 = vpop.f32.mrb[50].mxu0 }
 0x8b8   : > { %v13028_v59 = vpop.f32.mrb[51].mxu0 }
 0x8b9   : > { %v18527_v26 = vadd.f32 %v13028_v59, %v13027_v7 }
 0x8bd   : > { %v13030_v35 = vpop.f32.mrb[52].mxu0 }
 0x8be   : > { %v13031_v34 = vpop.f32.mrb[53].mxu0 }
 0x8bf   : > { %v18529_v15 = vadd.f32 %v13031_v34, %v13030_v35  ;;  %v13033_v58 = vpop.f32.mrb[54].mxu0  ;;  %v14267_v34 = vld [vmem:[%s20451_s2 + $0x4e0] sm:$0xff]  }
 0x8c0   : > { %v13034_v19 = vpop.f32.mrb[55].mxu0  ;;  %13260 = vmatprep.subr.bf16.mxu1 %v14267_v34 }
 0x8c1   : > { %v18531_v37 = vadd.f32 %v13034_v19, %v13033_v58 }
 0x8c5   : > { %v13036_v21 = vpop.f32.mrb[56].mxu0 }
 0x8c6   : > { %v13037_v12 = vpop.f32.mrb[57].mxu0 }
 0x8c7   : > { %v18539_v52 = vadd.f32 %v13037_v12, %v13036_v21  ;;  %v13039_v24 = vpop.f32.mrb[58].mxu0 }
 0x8c8   : > { %v13040_v18 = vpop.f32.mrb[59].mxu0 }
 0x8c9   : > { %v18541_v22 = vadd.f32 %v13040_v18, %v13039_v24  ;;  %v14268_v24 = vld [vmem:[%s20451_s2 + $0x4a0] sm:$0xff]  }
 0x8ca   : > { %13261 = vmatpush3.bf16.msra.mxu1 %v14268_v24 }
 0x8cd   : > { %v13042_v28 = vpop.f32.mrb[60].mxu0 }
 0x8ce   : > { %v13043_v44 = vpop.f32.mrb[61].mxu0 }
 0x8cf   : > { %v18543_v45 = vadd.f32 %v13043_v44, %v13042_v28  ;;  %v13045_v27 = vpop.f32.mrb[62].mxu0 }
 0x8d0   : > { %v13046_v17 = vpop.f32.mrb[63].mxu0 }
 0x8d1   : > { %v18545_v9 = vadd.f32 %v13046_v17, %v13045_v27 }
 0x8d5   : > { %v13048_v6 = vpop.f32.mrb[64].mxu0 }
 0x8d6   : > { %v13049_v36 = vpop.f32.mrb[65].mxu0 }
 0x8d7   : > { %v18553_v51 = vadd.f32 %v13049_v36, %v13048_v6  ;;  %v13051_v50 = vpop.f32.mrb[66].mxu0 }
 0x8d8   : > { %v13052_v25 = vpop.f32.mrb[67].mxu0 }
 0x8d9   : > { %v18555_v33 = vadd.f32 %v13052_v25, %v13051_v50 }
 0x8dd   : > { %v13054_v60 = vpop.f32.mrb[68].mxu0 }
 0x8de   : > { %v13055_v14 = vpop.f32.mrb[69].mxu0 }
 0x8df   : > { %v18557_v53 = vadd.f32 %v13055_v14, %v13054_v60  ;;  %v13057_v20 = vpop.f32.mrb[70].mxu0  ;;  %v14269_v14 = vld [vmem:[%s20451_s2 + $0x4e8] sm:$0xff]  }
 0x8e0   : > { %v13058_v54 = vpop.f32.mrb[71].mxu0  ;;  %13262 = vmatprep.subr.bf16.mxu1 %v14269_v14 }
 0x8e1   : > { %v18559_v39 = vadd.f32 %v13058_v54, %v13057_v20 }
 0x8e5   : > { %v13060_v3 = vpop.f32.mrb[72].mxu0 }
 0x8e6   : > { %v13061_v30 = vpop.f32.mrb[73].mxu0 }
 0x8e7   : > { %v18564_v8 = vadd.f32 %v13061_v30, %v13060_v3  ;;  %v13063_v48 = vpop.f32.mrb[74].mxu0 }
 0x8e8   : > { %v13064_v0 = vpop.f32.mrb[75].mxu0 }
 0x8e9   : > { %v18566_v46 = vadd.f32 %v13064_v0, %v13063_v48 }
 0x8ed   : > { %v13066_v40 = vpop.f32.mrb[76].mxu0 }
 0x8ee   : > { %v13067_v2 = vpop.f32.mrb[77].mxu0 }
 0x8ef   : > { %v18571_v56 = vadd.f32 %v13067_v2, %v13066_v40  ;;  %v13069_v13 = vpop.f32.mrb[78].mxu0  ;;  %v14270_v2 = vld [vmem:[%s20451_s2 + $0x4a8] sm:$0xff]  }
 0x8f0   : > { %v13070_v38 = vpop.f32.mrb[79].mxu0  ;;  %13263 = vmatpush3.bf16.msra.mxu1 %v14270_v2 }
 0x8f1   : > { %v18573_v62 = vadd.f32 %v13070_v38, %v13069_v13  ;;  %v14271_v13 = vld [vmem:[%s20451_s2 + $0x4f0] sm:$0xff]  }
 0x8f2   : > { %13264 = vmatprep.subr.bf16.mxu1 %v14271_v13 }
 0x8f5   : > { %v13072_v47 = vpop.f32.mrb[80].mxu0 }
 0x8f6   : > { %v13073_v43 = vpop.f32.mrb[81].mxu0 }
 0x8f7   : > { %v18578_v41 = vadd.f32 %v13073_v43, %v13072_v47  ;;  %v13075_v55 = vpop.f32.mrb[82].mxu0  ;;  %v14272_v43 = vld [vmem:[%s20451_s2 + $0x4b0] sm:$0xff]  }
 0x8f8   : > { %v13076_v32 = vpop.f32.mrb[83].mxu0  ;;  %13265 = vmatpush3.bf16.msra.mxu1 %v14272_v43 }
 0x8f9   : > { %v18583_v61 = vadd.f32 %v13076_v32, %v13075_v55 }
 0x8fd   : > { %v13078_v4 = vpop.f32.mrb[84].mxu0 }
 0x8fe   : > { %v13079_v7 = vpop.f32.mrb[85].mxu0 }
 0x8ff   : > { %v18585_v59 = vadd.f32 %v13079_v7, %v13078_v4  ;;  %v13081_v35 = vpop.f32.mrb[86].mxu0 }
 0x900   : > { %v13082_v58 = vpop.f32.mrb[87].mxu0 }
 0x901   : > { %v18590_v19 = vadd.f32 %v13082_v58, %v13081_v35 }
 0x905   : > { %v13084_v31 = vpop.f32.mrb[88].mxu0 }
 0x906   : > { %v13085_v11 = vpop.f32.mrb[89].mxu0 }
 0x907   : > { %v18592_v21 = vadd.f32 %v13085_v11, %v13084_v31  ;;  %v13087_v12 = vpop.f32.mrb[90].mxu0 }
 0x908   : > { %v13088_v18 = vpop.f32.mrb[91].mxu0 }
 0x909   : > { %v18597_v28 = vadd.f32 %v13088_v18, %v13087_v12 }
 0x90d   : > { %v13090_v44 = vpop.f32.mrb[92].mxu0 }
 0x90e   : > { %v13091_v27 = vpop.f32.mrb[93].mxu0 }
 0x90f   : > { %v18599_v17 = vadd.f32 %v13091_v27, %v13090_v44  ;;  %v13093_v16 = vpop.f32.mrb[94].mxu0  ;;  %v13136_v1 = vpop.f32.mrb[80].mxu1 }
 0x910   : > { %v13094_v6 = vpop.f32.mrb[95].mxu0  ;;  %v13137_v36 = vpop.f32.mrb[81].mxu1 }
 0x911   : > { %v18601_v50 = vadd.f32 %v13094_v6, %v13093_v16  ;;  %v13138_v25 = vadd.f32 %v13137_v36, %v13136_v1  ;;  %v13139_v60 = vpop.f32.mrb[82].mxu1 }
 0x912   : > { %v13140_v20 = vpop.f32.mrb[83].mxu1 }
 0x913   : > { %v13141_v54 = vadd.f32 %v13140_v20, %v13139_v60  ;;  %v18607_v63 = vadd.f32 %v13138_v25, %v18525_v57 }
 0x915   : > { %v13096_v3 = vpop.f32.mrb[96].mxu0  ;;  %v18610_v30 = vadd.f32 %v13141_v54, %v18527_v26  ;;  %v14273_v54 = vld [vmem:[%s20451_s2 + $0x4f8] sm:$0xff]  }
 0x916   : > { %v13097_v48 = vpop.f32.mrb[97].mxu0  ;;  %13266 = vmatprep.subr.bf16.mxu1 %v14273_v54 }
 0x917   : > { %v18612_v0 = vadd.f32 %v13097_v48, %v13096_v3  ;;  %v13099_v10 = vpop.f32.mrb[98].mxu0  ;;  %v13142_v40 = vpop.f32.mrb[84].mxu1 }
 0x918   : > { %v13100_v57 = vpop.f32.mrb[99].mxu0  ;;  %v13143_v38 = vpop.f32.mrb[85].mxu1 }
 0x919   : > { %v18620_v29 = vadd.f32 %v13100_v57, %v13099_v10  ;;  %v13144_v47 = vadd.f32 %v13143_v38, %v13142_v40  ;;  %v13145_v26 = vpop.f32.mrb[86].mxu1 }
 0x91a   : > { %v13146_v55 = vpop.f32.mrb[87].mxu1 }
 0x91b   : > { %v13147_v49 = vadd.f32 %v13146_v55, %v13145_v26  ;;  %v7808_v32 = vadd.f32 %v13144_v47, %v18529_v15 }
 0x91d   : > { %v13102_v4 = vpop.f32.mrb[100].mxu0  ;;  %v7811_v7 = vadd.f32 %v13147_v49, %v18531_v37 }
 0x91e   : > { %v13103_v35 = vpop.f32.mrb[101].mxu0 }
 0x91f   : > { %v18627_v34 = vadd.f32 %v13103_v35, %v13102_v4  ;;  %v13105_v58 = vpop.f32.mrb[102].mxu0  ;;  %v13148_v31 = vpop.f32.mrb[88].mxu1 }
 0x920   : > { %v13106_v11 = vpop.f32.mrb[103].mxu0  ;;  %v13149_v12 = vpop.f32.mrb[89].mxu1 }
 0x921   : > { %v18629_v24 = vadd.f32 %v13106_v11, %v13105_v58  ;;  %v13150_v18 = vadd.f32 %v13149_v12, %v13148_v31  ;;  %v13151_v44 = vpop.f32.mrb[90].mxu1 }
 0x922   : > { %v13152_v27 = vpop.f32.mrb[91].mxu1 }
 0x923   : > { %v13153_v16 = vadd.f32 %v13152_v27, %v13151_v44  ;;  %v18632_v1 = vadd.f32 %v13150_v18, %v18539_v52  ;;  %v14274_v52 = vld [vmem:[%s20451_s2 + $0x4b8] sm:$0xff]  }
 0x924   : > { %13267 = vmatpush3.bf16.msra.mxu1 %v14274_v52 }
 0x925   : > { %v13108_v15 = vpop.f32.mrb[104].mxu0  ;;  %v18635_v37 = vadd.f32 %v13153_v16, %v18541_v22 }
 0x926   : > { %v13109_v6 = vpop.f32.mrb[105].mxu0 }
 0x927   : > { %v18637_v36 = vadd.f32 %v13109_v6, %v13108_v15  ;;  %v13111_v25 = vpop.f32.mrb[106].mxu0  ;;  %v13154_v60 = vpop.f32.mrb[92].mxu1 }
 0x928   : > { %v13112_v14 = vpop.f32.mrb[107].mxu0  ;;  %v13155_v20 = vpop.f32.mrb[93].mxu1 }
 0x929   : > { %v18645_v3 = vadd.f32 %v13112_v14, %v13111_v25  ;;  %v13156_v48 = vadd.f32 %v13155_v20, %v13154_v60  ;;  %v13157_v22 = vpop.f32.mrb[94].mxu1 }
 0x92a   : > { %v13158_v10 = vpop.f32.mrb[95].mxu1 }
 0x92b   : > { %v13159_v40 = vadd.f32 %v13158_v10, %v13157_v22  ;;  %v7824_v2 = vadd.f32 %v13156_v48, %v18543_v45 }
 0x92d   : > { %v13114_v13 = vpop.f32.mrb[108].mxu0  ;;  %v7827_v57 = vadd.f32 %v13159_v40, %v18545_v9 }
 0x92e   : > { %v13115_v38 = vpop.f32.mrb[109].mxu0 }
 0x92f   : > { %v18649_v47 = vadd.f32 %v13115_v38, %v13114_v13  ;;  %v13117_v26 = vpop.f32.mrb[110].mxu0  ;;  %v13160_v43 = vpop.f32.mrb[96].mxu1 }
 0x930   : > { %v13118_v55 = vpop.f32.mrb[111].mxu0  ;;  %v13161_v49 = vpop.f32.mrb[97].mxu1 }
 0x931   : > { %v18651_v4 = vadd.f32 %v13118_v55, %v13117_v26  ;;  %v13162_v35 = vadd.f32 %v13161_v49, %v13160_v43  ;;  %v13163_v58 = vpop.f32.mrb[98].mxu1 }
 0x932   : > { %v13164_v31 = vpop.f32.mrb[99].mxu1 }
 0x933   : > { %v13165_v11 = vadd.f32 %v13164_v31, %v13163_v58  ;;  %v18654_v12 = vadd.f32 %v13162_v35, %v18553_v51 }
 0x935   : > { %v13910_v45 = vpop.f32.mrb[112].mxu0  ;;  %v18657_v18 = vadd.f32 %v13165_v11, %v18555_v33  ;;  %v14275_v33 = vld [vmem:[%s20451_s2 + $0x580] sm:$0xff]  }
 0x936   : > { %v7969_v9 = vadd.f32 %v13910_v45, %v7808_v32  ;;  %v7960_v44 = vpop.f32.mrb[113].mxu0  ;;  %13940 = vmatprep.subr.bf16.mxu1 %v14275_v33 }
 0x937   : > { %v7961_v27 = vadd.f32 %v7960_v44, %v18607_v63  ;;  %v13911_v16 = vpop.f32.mrb[114].mxu0  ;;  %v13166_v15 = vpop.f32.mrb[100].mxu1 }
 0x938   : > { %v7972_v6 = vadd.f32 %v13911_v16, %v7811_v7  ;;  %v7963_v25 = vpop.f32.mrb[115].mxu0  ;;  %v13167_v60 = vpop.f32.mrb[101].mxu1  ;;  %v8089_v52 = vmax.f32 %v7969_v9, 0.0 }
 0x939   : > { %v7964_v14 = vadd.f32 %v7963_v25, %v18610_v30  ;;  %v13168_v20 = vadd.f32 %v13167_v60, %v13166_v15  ;;  %v13169_v54 = vpop.f32.mrb[102].mxu1  ;;  %v8087_v32 = vmax.f32 %v7961_v27, 0.0 }
 0x93a   : > { %v8090_v51 = vmax.f32 %v7972_v6, 0.0  ;;  %v13170_v48 = vpop.f32.mrb[103].mxu1 }
 0x93b   : > { %v8088_v22 = vmax.f32 %v7964_v14, 0.0  ;;  %v13171_v10 = vadd.f32 %v13170_v48, %v13169_v54  ;;  %v7840_v63 = vadd.f32 %v13168_v20, %v18557_v53 }
 0x93c   : > { %v8120_v40 = vpack.c.bf16 %v8090_v51, %v8089_v52 }
 0x93d   : > { %v8119_v7 = vpack.c.bf16 %v8088_v22, %v8087_v32  ;;  %v13914_v13 = vpop.f32.mrb[116].mxu0  ;;  %v7843_v30 = vadd.f32 %v13171_v10, %v18559_v39 }
 0x93e   : > { %v8143_v38 = vshrl.u32 %v8120_v40, 16  ;;  %v7985_v26 = vadd.f32 %v13914_v13, %v7824_v2  ;;  %v7976_v43 = vpop.f32.mrb[117].mxu0  ;;  %v8146_v11 = vshll.u32 %v8120_v40, 16 }
 0x93f   : > { %v8136_v55 = vshrl.u32 %v8119_v7, 16  ;;  %v7977_v49 = vadd.f32 %v7976_v43, %v18632_v1  ;;  %v13915_v35 = vpop.f32.mrb[118].mxu0  ;;  %v13172_v58 = vpop.f32.mrb[104].mxu1  ;;  %v8139_v45 = vshll.u32 %v8119_v7, 16 }
 0x940   : > { %v8145_v31 = vrot.slane %v8143_v38, 7  ;;  %v7988_v9 = vadd.f32 %v13915_v35, %v7827_v57  ;;  %v7979_v44 = vpop.f32.mrb[119].mxu0  ;;  %v13173_v53 = vpop.f32.mrb[105].mxu1  ;;  %v8093_v16 = vmax.f32 %v7985_v26, 0.0 }
 0x941   : > { %v8138_v27 = vrot.slane %v8136_v55, 7  ;;  %v7980_v15 = vadd.f32 %v7979_v44, %v18635_v37  ;;  %v13174_v6 = vadd.f32 %v13173_v53, %v13172_v58  ;;  %v13175_v39 = vpop.f32.mrb[106].mxu1  ;;  %v8091_v1 = vmax.f32 %v7977_v49, 0.0 }
 0x942   : > { %v8148_v25 = vor.u32 %v8146_v11, %v8145_v31  ;;  %v18670_v2 = vsel %vm14512_vm2, %v8145_v31, 0  ;;  %v8094_v60 = vmax.f32 %v7988_v9, 0.0  ;;  %v13176_v14 = vpop.f32.mrb[107].mxu1 }
 0x943   : > { %v8141_v20 = vor.u32 %v8139_v45, %v8138_v27  ;;  %v18674_v57 = vsel %vm14512_vm2, %v8138_v27, 0  ;;  %v8092_v54 = vmax.f32 %v7980_v15, 0.0  ;;  %v13177_v52 = vadd.f32 %v13176_v14, %v13175_v39 }
 0x944   : > { %v8122_v51 = vpack.c.bf16 %v8094_v60, %v8093_v16  ;;  %v18678_v37 = vsel %vm14512_vm2, 0, %v8148_v25  ;;  %v8392_v48 = vshll.u32 %v18674_v57, 16  ;;  %v7848_v33 = vadd.f32 %v13174_v6, %v18564_v8 }
 0x945   : > { %v8121_v32 = vpack.c.bf16 %v8092_v54, %v8091_v1  ;;  %v13918_v22 = vpop.f32.mrb[120].mxu0  ;;  %8672 = vrot.lane.b32.xlu0 %v18678_v37, %s14434_s22  ;;  %v18686_v10 = vsel %vm14512_vm2, 0, %v8141_v20  ;;  %v18689_v40 = vadd.f32 %v13177_v52, %v18566_v46  ;;  %v8397_v7 = vshrl.u32 %v18678_v37, 16 }
 0x946   : > { %v8157_v13 = vshrl.u32 %v8122_v51, 16  ;;  %v8160_v38 = vshll.u32 %v8122_v51, 16  ;;  %v8001_v26 = vadd.f32 %v13918_v22, %v7840_v63  ;;  %v7992_v43 = vpop.f32.mrb[121].mxu0  ;;  %8670 = vrot.lane.b32.xlu1 %v18686_v10, %s14434_s22  ;;  %v8385_v8 = vshrl.u32 %v18686_v10, 16 }
 0x947   : > { %v8150_v55 = vshrl.u32 %v8121_v32, 16  ;;  %v8153_v49 = vshll.u32 %v8121_v32, 16  ;;  %v7993_v35 = vadd.f32 %v7992_v43, %v18654_v12  ;;  %v13919_v58 = vpop.f32.mrb[122].mxu0  ;;  %v13178_v31 = vpop.f32.mrb[108].mxu1  ;;  %v8387_v46 = vshll.u32 %v18686_v10, 16 }
 0x948   : > { %v8159_v11 = vrot.slane %v8157_v13, 7  ;;  %v8097_v45 = vmax.f32 %v8001_v26, 0.0  ;;  %v8004_v9 = vadd.f32 %v13919_v58, %v7843_v30  ;;  %v7995_v44 = vpop.f32.mrb[123].mxu0  ;;  %v13179_v53 = vpop.f32.mrb[109].mxu1  ;;  %v8394_v63 = vrot.slane %v8392_v48, 1 }
 0x949   : > { %v8152_v27 = vrot.slane %v8150_v55, 7  ;;  %v8095_v16 = vmax.f32 %v7993_v35, 0.0  ;;  %v7996_v15 = vadd.f32 %v7995_v44, %v18657_v18  ;;  %v13180_v6 = vadd.f32 %v13179_v53, %v13178_v31  ;;  %v13181_v39 = vpop.f32.mrb[110].mxu1 }
 0x94a   : > { %v8162_v25 = vor.u32 %v8160_v38, %v8159_v11  ;;  %v18700_v12 = vsel %vm14512_vm2, %v8159_v11, 0  ;;  %v8098_v1 = vmax.f32 %v8004_v9, 0.0  ;;  %v13182_v60 = vpop.f32.mrb[111].mxu1  ;;  %v8389_v14 = vrot.slane %v8387_v46, 1 }
 0x94b   : > { %v8155_v20 = vor.u32 %v8153_v49, %v8152_v27  ;;  %v18704_v30 = vsel %vm14512_vm2, %v8152_v27, 0  ;;  %v8096_v54 = vmax.f32 %v7996_v15, 0.0  ;;  %v13183_v52 = vadd.f32 %v13182_v60, %v13181_v39 }
 0x94c   : > { %v8124_v51 = vpack.c.bf16 %v8098_v1, %v8097_v45  ;;  %v7856_v18 = vadd.f32 %v13180_v6, %v18571_v56  ;;  %v8390_v48 = vor.u32 %v8389_v14, %v8385_v8  ;;  %v8399_v32 = vshll.u32 %v18678_v37, 16 }
 0x94d   : > { %v8123_v22 = vpack.c.bf16 %v8096_v54, %v8095_v16  ;;  %v13922_v13 = vpop.f32.mrb[124].mxu0  ;;  %v18710_v38 = vsel %vm14512_vm2, 0, %v8155_v20  ;;  %v7859_v26 = vadd.f32 %v13183_v52, %v18573_v62  ;;  %v8404_v43 = vshll.u32 %v18670_v2, 16 }
 0x94e   : > { %v8171_v55 = vshrl.u32 %v8124_v51, 16  ;;  %v8174_v49 = vshll.u32 %v8124_v51, 16  ;;  %v8017_v35 = vadd.f32 %v13922_v13, %v7856_v18  ;;  %v18715_v58 = vsel %vm507_vm3, %v8390_v48, %v8394_v63  ;;  %v8008_v56 = vpop.f32.mrb[125].mxu0  ;;  %8674 = vrot.lane.b32.xlu0 %v18710_v38, %s14434_s22 }
 0x94f   : > { %v8164_v8 = vshrl.u32 %v8123_v22, 16  ;;  %v8167_v31 = vshll.u32 %v8123_v22, 16  ;;  %8564 = vrot.lane.b32.xlu1 %v18715_v58, %s14434_s22  ;;  %v8009_v46 = vadd.f32 %v8008_v56, %v7848_v33  ;;  %v13923_v11 = vpop.f32.mrb[126].mxu0  ;;  %v13184_v62 = vpop.f32.mrb[112].mxu1  ;;  %v8401_v45 = vrot.slane %v8399_v32, 1 }
 0x950   : > { %v8173_v9 = vrot.slane %v8171_v55, 7  ;;  %v8101_v44 = vmax.f32 %v8017_v35, 0.0  ;;  %v8020_v53 = vadd.f32 %v13923_v11, %v7859_v26  ;;  %v8011_v27 = vpop.f32.mrb[127].mxu0  ;;  %v13185_v16 = vpop.f32.mrb[113].mxu1  ;;  %v8406_v63 = vrot.slane %v8404_v43, 1 }
 0x951   : > { %v8166_v15 = vrot.slane %v8164_v8, 7  ;;  %v8099_v6 = vmax.f32 %v8009_v46, 0.0  ;;  %v8012_v39 = vadd.f32 %v8011_v27, %v18689_v40  ;;  %v13186_v1 = vadd.f32 %v13185_v16, %v13184_v62  ;;  %v13187_v60 = vpop.f32.mrb[114].mxu1 }
 0x952   : > { %v8176_v14 = vor.u32 %v8174_v49, %v8173_v9  ;;  %v18724_v20 = vsel %vm14512_vm2, %v8173_v9, 0  ;;  %v8102_v33 = vmax.f32 %v8020_v53, 0.0  ;;  %v8402_v54 = vor.u32 %v8401_v45, %v8397_v7  ;;  %v13188_v52 = vpop.f32.mrb[115].mxu1 }
 0x953   : > { %v8169_v51 = vor.u32 %v8167_v31, %v8166_v15  ;;  %v18730_v18 = vsel %vm14512_vm2, %v8166_v15, 0  ;;  %v8100_v48 = vmax.f32 %v8012_v39, 0.0  ;;  %v18734_v40 = vsel %vm14512_vm2, 0, %v8162_v25 }
 0x954   : > { %v8126_v32 = vpack.c.bf16 %v8102_v33, %v8101_v44  ;;  %v18737_v22 = vsel %vm507_vm3, %v8402_v54, %v8406_v63  ;;  %8676 = vrot.lane.b32.xlu0 %v18734_v40, %s14434_s22  ;;  %v13189_v13 = vadd.f32 %v13188_v52, %v13187_v60  ;;  %v8409_v7 = vshrl.u32 %v18710_v38, 16 }
 0x955   : > { %v8125_v26 = vpack.c.bf16 %v8100_v48, %v8099_v6  ;;  %8566 = vrot.lane.b32.xlu1 %v18737_v22, %s14434_s22  ;;  %v13926_v43 = vpop.f32.mrb[128].mxu0  ;;  %v8411_v55 = vshll.u32 %v18710_v38, 16  ;;  %v8416_v25 = vshll.u32 %v18704_v30, 16  ;;  %v7864_v49 = vadd.f32 %v13186_v1, %v18578_v41 }
 0x956   : > { %v8185_v35 = vshrl.u32 %v8126_v32, 16  ;;  %v8188_v56 = vshll.u32 %v8126_v32, 16  ;;  %v8024_v8 = vpop.f32.mrb[129].mxu0  ;;  %v18749_v31 = vsel %vm14512_vm2, 0, %v8169_v51  ;;  %v7867_v46 = vadd.f32 %v13189_v13, %v18583_v61 }
 0x957   : > { %v8178_v11 = vshrl.u32 %v8125_v26, 16  ;;  %v8181_v62 = vshll.u32 %v8125_v26, 16  ;;  %v8413_v45 = vrot.slane %v8411_v55, 1  ;;  %v8418_v9 = vrot.slane %v8416_v25, 1  ;;  %v13927_v44 = vpop.f32.mrb[130].mxu0  ;;  %v13190_v53 = vpop.f32.mrb[116].mxu1 }
 0x958   : > { %v8187_v27 = vrot.slane %v8185_v35, 7  ;;  %v8025_v16 = vadd.f32 %v8024_v8, %v7864_v49  ;;  %8678 = vrot.lane.b32.xlu0 %v18749_v31, %s14434_s22  ;;  %v8027_v41 = vpop.f32.mrb[131].mxu0  ;;  %v13191_v63 = vpop.f32.mrb[117].mxu1  ;;  %v8421_v15 = vshrl.u32 %v18734_v40, 16  ;;  %v8423_v6 = vshll.u32 %v18734_v40, 16 }
 0x959   : > { %v8180_v39 = vrot.slane %v8178_v11, 7  ;;  %v8414_v1 = vor.u32 %v8413_v45, %v8409_v7  ;;  %v8028_v61 = vadd.f32 %v8027_v41, %v7867_v46  ;;  %v13192_v60 = vadd.f32 %v13191_v63, %v13190_v53  ;;  %v13193_v33 = vpop.f32.mrb[118].mxu1 }
 0x95a   : > { %v8190_v54 = vor.u32 %v8188_v56, %v8187_v27  ;;  %v18758_v52 = vsel %vm14512_vm2, %v8187_v27, 0  ;;  %v8103_v51 = vmax.f32 %v8025_v16, 0.0  ;;  %v8425_v48 = vrot.slane %v8423_v6, 1  ;;  %v13194_v32 = vpop.f32.mrb[119].mxu1 }
 0x95b   : > { %v8183_v13 = vor.u32 %v8181_v62, %v8180_v39  ;;  %v18762_v26 = vsel %vm14512_vm2, %v8180_v39, 0  ;;  %v18765_v55 = vsel %vm507_vm3, %v8414_v1, %v8418_v9  ;;  %v8104_v7 = vmax.f32 %v8028_v61, 0.0 }
 0x95c   : > { %20588 = vst [vmem:[#allocation16_spill] sm:$0xff] %v18765_v55  ;;  %8568 = vrot.lane.b32.xlu1 %v18765_v55, %s14434_s22  ;;  %v7872_v25 = vadd.f32 %v13192_v60, %v18585_v59  ;;  %v8426_v49 = vor.u32 %v8425_v48, %v8421_v15  ;;  %v8428_v35 = vshll.u32 %v18700_v12, 16  ;;  %v18773_v56 = vsel %vm14512_vm2, 0, %v8176_v14 }
 0x95d   : > { %v8127_v8 = vpack.c.bf16 %v8104_v7, %v8103_v51  ;;  %8680 = vrot.lane.b32.xlu0 %v18773_v56, %s14434_s22  ;;  %v13195_v46 = vadd.f32 %v13194_v32, %v13193_v33  ;;  %v18777_v11 = vpop.f32.mrb[132].mxu0  ;;  %v8433_v62 = vshrl.u32 %v18749_v31, 16  ;;  %v8435_v45 = vshll.u32 %v18749_v31, 16 }
 0x95e   : > { %v8033_v9 = vadd.f32 %v13926_v43, %v7872_v25  ;;  %v8430_v59 = vrot.slane %v8428_v35, 1  ;;  %v8440_v53 = vshll.u32 %v18730_v18, 16  ;;  %v8040_v27 = vpop.f32.mrb[133].mxu0  ;;  %v18784_v14 = vsel %vm14512_vm2, 0, %v8183_v13 }
 0x95f   : > { %v8192_v16 = vshrl.u32 %v8127_v8, 16  ;;  %v8195_v41 = vshll.u32 %v8127_v8, 16  ;;  %v7875_v63 = vadd.f32 %v13195_v46, %v18590_v19  ;;  %v8437_v15 = vrot.slane %v8435_v45, 1  ;;  %v18787_v6 = vpop.f32.mrb[134].mxu0  ;;  %v13196_v39 = vpop.f32.mrb[120].mxu1 }
 0x960   : > { %v8105_v1 = vmax.f32 %v8033_v9, 0.0  ;;  %v18790_v61 = vsel %vm507_vm3, %v8426_v49, %v8430_v59  ;;  %v8442_v43 = vrot.slane %v8440_v53, 1  ;;  %v8043_v60 = vpop.f32.mrb[135].mxu0  ;;  %v13197_v33 = vpop.f32.mrb[121].mxu1  ;;  %v8445_v51 = vshrl.u32 %v18773_v56, 16 }
 0x961   : > { %20589 = vst [vmem:[#allocation18_spill] sm:$0xff] %v18790_v61  ;;  %v8194_v48 = vrot.slane %v8192_v16, 7  ;;  %8570 = vrot.lane.b32.xlu1 %v18790_v61, %s14434_s22  ;;  %v8036_v32 = vadd.f32 %v13927_v44, %v7875_v63  ;;  %v8438_v13 = vor.u32 %v8437_v15, %v8433_v62  ;;  %8682 = vrot.lane.b32.xlu0 %v18784_v14, %s14434_s22  ;;  %v13199_v7 = vpop.f32.mrb[122].mxu1  ;;  %v8447_v25 = vshll.u32 %v18773_v56, 16 }
 0x962   : > { %v13198_v19 = vadd.f32 %v13197_v33, %v13196_v39  ;;  %v8452_v49 = vshll.u32 %v18724_v20, 16  ;;  %v18801_v35 = vsel %vm14512_vm2, 0, %v8190_v54  ;;  %v13200_v8 = vpop.f32.mrb[123].mxu1  ;;  %v8457_v46 = vshrl.u32 %v18784_v14, 16 }
 0x963   : > { %v8197_v45 = vor.u32 %v8195_v41, %v8194_v48  ;;  %v18806_v44 = vsel %vm14512_vm2, %v8194_v48, 0  ;;  %v8106_v62 = vmax.f32 %v8036_v32, 0.0  ;;  %v18809_v9 = vsel %vm507_vm3, %v8438_v13, %v8442_v43 }
 0x964   : > { %20590 = vst [vmem:[#allocation5_spill] sm:$0xff] %v18809_v9  ;;  %v7880_v59 = vadd.f32 %v13198_v19, %v18592_v21  ;;  %v8449_v53 = vrot.slane %v8447_v25, 1  ;;  %v8454_v16 = vrot.slane %v8452_v49, 1  ;;  %v13201_v63 = vadd.f32 %v13200_v8, %v13199_v7 }
 0x965   : > { %v8128_v15 = vpack.c.bf16 %v8106_v62, %v8105_v1  ;;  %8572 = vrot.lane.b32.xlu1 %v18809_v9, %s14434_s22  ;;  %8684 = vrot.lane.b32.xlu0 %v18801_v35, %s14434_s22  ;;  %v18816_v54 = vpop.f32.mrb[136].mxu0  ;;  %v8459_v41 = vshll.u32 %v18784_v14, 16  ;;  %v8464_v39 = vshll.u32 %v18762_v26, 16  ;;  %v18822_v43 = vsel %vm14512_vm2, 0, %v8197_v45 }
 0x966   : > { %v8041_v21 = vadd.f32 %v8040_v27, %v7880_v59  ;;  %v8450_v33 = vor.u32 %v8449_v53, %v8445_v51  ;;  %v7883_v1 = vadd.f32 %v13201_v63, %v18597_v28  ;;  %v18825_v48 = vpop.f32.mrb[137].mxu0  ;;  %v8469_v32 = vshrl.u32 %v18801_v35, 16 }
 0x967   : > { %v8199_v13 = vshrl.u32 %v8128_v15, 16  ;;  %v8202_v19 = vshll.u32 %v8128_v15, 16  ;;  %v8461_v7 = vrot.slane %v8459_v41, 1  ;;  %v8466_v25 = vrot.slane %v8464_v39, 1  ;;  %v18828_v49 = vpop.f32.mrb[138].mxu0  ;;  %v13202_v8 = vpop.f32.mrb[124].mxu1 }
 0x968   : > { %v8107_v62 = vmax.f32 %v8041_v21, 0.0  ;;  %v18831_v9 = vsel %vm507_vm3, %v8450_v33, %v8454_v16  ;;  %v8044_v45 = vadd.f32 %v8043_v60, %v7883_v1  ;;  %v18833_v27 = vpop.f32.mrb[139].mxu0  ;;  %v13203_v51 = vpop.f32.mrb[125].mxu1  ;;  %v8471_v28 = vshll.u32 %v18801_v35, 16 }
 0x969   : > { %20591 = vst [vmem:[#allocation12_spill] sm:$0xff] %v18831_v9  ;;  %v8201_v59 = vrot.slane %v8199_v13, 7  ;;  %8574 = vrot.lane.b32.xlu1 %v18831_v9, %s14434_s22  ;;  %v8462_v53 = vor.u32 %v8461_v7, %v8457_v46  ;;  %8686 = vrot.lane.b32.xlu0 %v18822_v43, %s14434_s22  ;;  %v13204_v63 = vadd.f32 %v13203_v51, %v13202_v8  ;;  %v8476_v15 = vshll.u32 %v18758_v52, 16  ;;  %v13205_v41 = vpop.f32.mrb[126].mxu1 }
 0x96a   : > { %v8108_v16 = vmax.f32 %v8044_v45, 0.0  ;;  %v8473_v39 = vrot.slane %v8471_v28, 1  ;;  %v13206_v60 = vpop.f32.mrb[127].mxu1  ;;  %v8481_v21 = vshrl.u32 %v18822_v43, 16  ;;  %v8483_v33 = vshll.u32 %v18822_v43, 16 }
 0x96b   : > { %v18844_v1 = vsel %vm507_vm3, %v8462_v53, %v8466_v25  ;;  %v7888_v13 = vadd.f32 %v13204_v63, %v18599_v17  ;;  %v8478_v46 = vrot.slane %v8476_v15, 1  ;;  %v13207_v7 = vadd.f32 %v13206_v60, %v13205_v41 }
 0x96c   : > { %20592 = vst [vmem:[#allocation6_spill] sm:$0xff] %v18844_v1  ;;  %v8129_v9 = vpack.c.bf16 %v8108_v16, %v8107_v62  ;;  %v8474_v61 = vor.u32 %v8473_v39, %v8469_v32  ;;  %v8204_v8 = vor.u32 %v8202_v19, %v8201_v59  ;;  %v8485_v51 = vrot.slane %v8483_v33, 1 }
 0x96d   : > { %8576 = vrot.lane.b32.xlu1 %v18844_v1, %s14434_s22  ;;  %v8049_v45 = vadd.f32 %v18777_v11, %v7888_v13  ;;  %v7891_v28 = vadd.f32 %v13207_v7, %v18601_v50  ;;  %v8488_v55 = vshll.u32 %v18806_v44, 16  ;;  %v18854_v25 = vsel %vm14512_vm2, %v8201_v59, 0  ;;  %v18856_v17 = vpop.f32.mrb[140].mxu0 }
 0x96e   : > { %v8206_v53 = vshrl.u32 %v8129_v9, 16  ;;  %v18860_v32 = vsel %vm14512_vm2, 0, %v8204_v8  ;;  %v18862_v19 = vpop.f32.mrb[141].mxu0  ;;  %v8209_v62 = vshll.u32 %v8129_v9, 16  ;;  %v18865_v11 = vsel %vm507_vm3, %v8474_v61, %v8478_v46 }
 0x96f   : > { %20593 = vst [vmem:[#allocation15_spill] sm:$0xff] %v18865_v11  ;;  %v8052_v50 = vadd.f32 %v18787_v6, %v7891_v28  ;;  %8688 = vrot.lane.b32.xlu0 %v18860_v32, %s14434_s22  ;;  %v8486_v59 = vor.u32 %v8485_v51, %v8481_v21  ;;  %v13208_v63 = vpop.f32.mrb[128].mxu1  ;;  %v18870_v15 = vpop.f32.mrb[142].mxu0  ;;  %v8490_v16 = vrot.slane %v8488_v55, 1  ;;  %v8495_v60 = vshll.u32 %v18860_v32, 16 }
 0x970   : > { %v8208_v41 = vrot.slane %v8206_v53, 7  ;;  %v13209_v39 = vpop.f32.mrb[129].mxu1  ;;  %v8500_v33 = vshll.u32 %v18854_v25, 16  ;;  %v18874_v9 = vpop.f32.mrb[143].mxu0  ;;  %v8109_v61 = vmax.f32 %v8049_v45, 0.0  ;;  %v8493_v55 = vshrl.u32 %v18860_v32, 16 }
 0x971   : > { %8578 = vrot.lane.b32.xlu1 %v18865_v11, %s14434_s22  ;;  %v8110_v6 = vmax.f32 %v8052_v50, 0.0  ;;  %v13210_v13 = vadd.f32 %v13209_v39, %v13208_v63  ;;  %v13211_v46 = vpop.f32.mrb[130].mxu1  ;;  %v18879_v21 = vsel %vm507_vm3, %v8486_v59, %v8490_v16  ;;  %v8497_v8 = vrot.slane %v8495_v60, 1  ;;  %v14277_v59 = vld [vmem:[%s20451_s2 + $0x540] sm:$0xff]  }
 0x972   : > { %v13212_v7 = vpop.f32.mrb[131].mxu1  ;;  %v8211_v51 = vor.u32 %v8209_v62, %v8208_v41  ;;  %v18885_v45 = vsel %vm14512_vm2, %v8208_v41, 0  ;;  %v8502_v50 = vrot.slane %v8500_v33, 1  ;;  %v14278_v62 = vld [vmem:[%s20451_s2 + $0x500] sm:$0xff]   ;;  %13364 = vmatprep.subr.bf16.mxu0 %v14277_v59 }
 0x973   : > { %v8130_v28 = vpack.c.bf16 %v8110_v6, %v8109_v61  ;;  %v7896_v53 = vadd.f32 %v13210_v13, %v18612_v0  ;;  %v13213_v1 = vadd.f32 %v13212_v7, %v13211_v46  ;;  %v8498_v11 = vor.u32 %v8497_v8, %v8493_v55  ;;  %v14279_v61 = vld [vmem:[%s20451_s2 + $0x548] sm:$0xff]   ;;  %13365 = vmatpush3.bf16.msra.mxu0 %v14278_v62 }
 0x974   : > { %v18889_v63 = vsel %vm14512_vm2, 0, %v8211_v51  ;;  %v8512_v33 = vshll.u32 %v18885_v45, 16  ;;  %13366 = vmatprep.subr.bf16.mxu0 %v14279_v61 }
 0x975   : > { %v8213_v0 = vshrl.u32 %v8130_v28, 16  ;;  %8580 = vrot.lane.b32.xlu1 %v18879_v21, %s14434_s22  ;;  %v8057_v41 = vadd.f32 %v18825_v48, %v7896_v53  ;;  %v7899_v16 = vadd.f32 %v13213_v1, %v18620_v29  ;;  %8690 = vrot.lane.b32.xlu0 %v18889_v63, %s14434_s22  ;;  %v18904_v39 = vsel %vm507_vm3, %v8498_v11, %v8502_v50  ;;  %v14280_v1 = vld [vmem:[%s20451_s2 + $0x508] sm:$0xff]  }
 0x976   : > { %v8507_v60 = vshll.u32 %v18889_v63, 16  ;;  %v8216_v13 = vshll.u32 %v8130_v28, 16  ;;  %v8505_v7 = vshrl.u32 %v18889_v63, 16  ;;  %v8514_v62 = vrot.slane %v8512_v33, 1  ;;  %v14283_v33 = vld [vmem:[%s20451_s2 + $0x510] sm:$0xff]  }
 0x977   : > { %v8215_v6 = vrot.slane %v8213_v0, 7  ;;  %v8060_v48 = vadd.f32 %v18833_v27, %v7899_v16  ;;  %v13214_v29 = vpop.f32.mrb[132].mxu1  ;;  %v8111_v11 = vmax.f32 %v8057_v41, 0.0  ;;  %13367 = vmatpush3.bf16.msra.mxu0 %v14280_v1 }
 0x978   : > { %v13215_v46 = vpop.f32.mrb[133].mxu1  ;;  %v8509_v55 = vrot.slane %v8507_v60, 1 }
 0x979   : > { %v8112_v8 = vmax.f32 %v8060_v48, 0.0  ;;  %8582 = vrot.lane.b32.xlu1 %v18904_v39, %s14434_s22  ;;  %v13216_v51 = vadd.f32 %v13215_v46, %v13214_v29  ;;  %v13217_v28 = vpop.f32.mrb[134].mxu1  ;;  %v8218_v53 = vor.u32 %v8216_v13, %v8215_v6  ;;  %v18920_v27 = vsel %vm14512_vm2, %v8215_v6, 0 }
 0x97a   : > { %v13218_v50 = vpop.f32.mrb[135].mxu1  ;;  %v8510_v59 = vor.u32 %v8509_v55, %v8505_v7  ;;  %v8524_v13 = vshll.u32 %v18920_v27, 16  ;;  %v14284_v7 = vld [vmem:[%s20451_s2 + $0x558] sm:$0xff]  }
 0x97b   : > { %v8131_v0 = vpack.c.bf16 %v8112_v8, %v8111_v11  ;;  %v7904_v41 = vadd.f32 %v13216_v51, %v18627_v34  ;;  %v13219_v16 = vadd.f32 %v13218_v50, %v13217_v28  ;;  %v18925_v60 = vsel %vm14512_vm2, 0, %v8218_v53  ;;  %v14282_v34 = vld [vmem:[%s20451_s2 + $0x550] sm:$0xff]  }
 0x97c   : > { %v18928_v61 = vsel %vm507_vm3, %v8510_v59, %v8514_v62  ;;  %8692 = vrot.lane.b32.xlu0 %v18925_v60, %s14434_s22  ;;  %v8519_v6 = vshll.u32 %v18925_v60, 16  ;;  %v8517_v11 = vshrl.u32 %v18925_v60, 16  ;;  %13368 = vmatprep.subr.bf16.mxu0 %v14282_v34  ;;  %v8526_v59 = vrot.slane %v8524_v13, 1 }
 0x97d   : > { %v8220_v48 = vshrl.u32 %v8131_v0, 16  ;;  %v8065_v29 = vadd.f32 %v18816_v54, %v7904_v41  ;;  %v7907_v1 = vadd.f32 %v13219_v16, %v18629_v24  ;;  %8584 = vrot.lane.b32.xlu1 %v18928_v61, %s14434_s22  ;;  %v8223_v8 = vshll.u32 %v8131_v0, 16  ;;  %13369 = vmatpush3.bf16.msra.mxu0 %v14283_v33  ;;  %v14285_v24 = vld [vmem:[%s20451_s2 + $0x518] sm:$0xff]  }
 0x97e   : > { %v8521_v46 = vrot.slane %v8519_v6, 1  ;;  %13370 = vmatprep.subr.bf16.mxu0 %v14284_v7 }
 0x97f   : > { %v8222_v55 = vrot.slane %v8220_v48, 7  ;;  %v8068_v51 = vadd.f32 %v18828_v49, %v7907_v1  ;;  %v13220_v28 = vpop.f32.mrb[136].mxu1  ;;  %v8113_v54 = vmax.f32 %v8065_v29, 0.0 }
 0x980   : > { %v13221_v53 = vpop.f32.mrb[137].mxu1  ;;  %v8522_v50 = vor.u32 %v8521_v46, %v8517_v11  ;;  %v14286_v46 = vld [vmem:[%s20451_s2 + $0x560] sm:$0xff]  }
 0x981   : > { %v8114_v62 = vmax.f32 %v8068_v51, 0.0  ;;  %v13222_v41 = vadd.f32 %v13221_v53, %v13220_v28  ;;  %v13223_v16 = vpop.f32.mrb[138].mxu1  ;;  %v8225_v6 = vor.u32 %v8223_v8, %v8222_v55  ;;  %v18954_v0 = vsel %vm14512_vm2, %v8222_v55, 0  ;;  %13371 = vmatpush3.bf16.msra.mxu0 %v14285_v24  ;;  %v14288_v24 = vld [vmem:[%s20451_s2 + $0x568] sm:$0xff]  }
 0x982   : > { %v13224_v49 = vpop.f32.mrb[139].mxu1  ;;  %v18957_v34 = vsel %vm507_vm3, %v8522_v50, %v8526_v59  ;;  %v8536_v11 = vshll.u32 %v18954_v0, 16  ;;  %13372 = vmatprep.subr.bf16.mxu0 %v14286_v46 }
 0x983   : > { %v8132_v33 = vpack.c.bf16 %v8114_v62, %v8113_v54  ;;  %v13225_v48 = vadd.f32 %v13224_v49, %v13223_v16  ;;  %8586 = vrot.lane.b32.xlu1 %v18957_v34, %s14434_s22  ;;  %v7912_v13 = vadd.f32 %v13222_v41, %v18637_v36  ;;  %v18964_v29 = vsel %vm14512_vm2, 0, %v8225_v6  ;;  %v14287_v36 = vld [vmem:[%s20451_s2 + $0x520] sm:$0xff]  }
 0x984   : > { %8694 = vrot.lane.b32.xlu0 %v18964_v29, %s14434_s22  ;;  %v8531_v1 = vshll.u32 %v18964_v29, 16  ;;  %v8529_v51 = vshrl.u32 %v18964_v29, 16  ;;  %v8538_v16 = vrot.slane %v8536_v11, 1 }
 0x985   : > { %v8227_v7 = vshrl.u32 %v8132_v33, 16  ;;  %v8073_v55 = vadd.f32 %v18862_v19, %v7912_v13  ;;  %v7915_v8 = vadd.f32 %v13225_v48, %v18645_v3  ;;  %v8230_v53 = vshll.u32 %v8132_v33, 16  ;;  %13373 = vmatpush3.bf16.msra.mxu0 %v14287_v36  ;;  %v14289_v19 = vld [vmem:[%s20451_s2 + $0x528] sm:$0xff]  }
 0x986   : > { %v8533_v28 = vrot.slane %v8531_v1, 1  ;;  %13374 = vmatprep.subr.bf16.mxu0 %v14288_v24 }
 0x987   : > { %v8229_v54 = vrot.slane %v8227_v7, 7  ;;  %v8076_v50 = vadd.f32 %v18874_v9, %v7915_v8  ;;  %v13226_v59 = vpop.f32.mrb[140].mxu1  ;;  %v8115_v62 = vmax.f32 %v8073_v55, 0.0 }
 0x988   : > { %v13227_v3 = vpop.f32.mrb[141].mxu1  ;;  %v8534_v41 = vor.u32 %v8533_v28, %v8529_v51  ;;  %v14291_v51 = vld [vmem:[%s20451_s2 + $0x530] sm:$0xff]  }
 0x989   : > { %v8116_v6 = vmax.f32 %v8076_v50, 0.0  ;;  %v13228_v49 = vadd.f32 %v13227_v3, %v13226_v59  ;;  %v13229_v48 = vpop.f32.mrb[142].mxu1  ;;  %v8232_v13 = vor.u32 %v8230_v53, %v8229_v54  ;;  %v18988_v33 = vsel %vm14512_vm2, %v8229_v54, 0  ;;  %13375 = vmatpush3.bf16.msra.mxu0 %v14289_v19  ;;  %v14292_v59 = vld [vmem:[%s20451_s2 + $0x578] sm:$0xff]  }
 0x98a   : > { %v13230_v9 = vpop.f32.mrb[143].mxu1  ;;  %v18991_v1 = vsel %vm507_vm3, %v8534_v41, %v8538_v16  ;;  %v8548_v8 = vshll.u32 %v18988_v33, 16  ;;  %v14293_v41 = vld [vmem:[%s20451_s2 + $0x538] sm:$0xff]  }
 0x98b   : > { %v8133_v46 = vpack.c.bf16 %v8116_v6, %v8115_v62  ;;  %v7920_v36 = vadd.f32 %v13228_v49, %v18649_v47  ;;  %v13231_v7 = vadd.f32 %v13230_v9, %v13229_v48  ;;  %8588 = vrot.lane.b32.xlu1 %v18991_v1, %s14434_s22  ;;  %v18998_v11 = vsel %vm14512_vm2, 0, %v8232_v13  ;;  %v14290_v47 = vld [vmem:[%s20451_s2 + $0x570] sm:$0xff]  }
 0x98c   : > { %8696 = vrot.lane.b32.xlu0 %v18998_v11, %s14434_s22  ;;  %v8543_v55 = vshll.u32 %v18998_v11, 16  ;;  %v8541_v53 = vshrl.u32 %v18998_v11, 16  ;;  %13376 = vmatprep.subr.bf16.mxu0 %v14290_v47  ;;  %v8550_v16 = vrot.slane %v8548_v8, 1 }
 0x98d   : > { %v8234_v28 = vshrl.u32 %v8133_v46, 16  ;;  %v8081_v24 = vadd.f32 %v18856_v17, %v7920_v36  ;;  %v7923_v54 = vadd.f32 %v13231_v7, %v18651_v4  ;;  %v8237_v62 = vshll.u32 %v8133_v46, 16  ;;  %13377 = vmatpush3.bf16.msra.mxu0 %v14291_v51 }
 0x98e   : > { %v8545_v50 = vrot.slane %v8543_v55, 1  ;;  %13378 = vmatprep.subr.bf16.mxu0 %v14292_v59 }
 0x98f   : > { %v8236_v19 = vrot.slane %v8234_v28, 7  ;;  %v8084_v3 = vadd.f32 %v18870_v15, %v7923_v54  ;;  %v8117_v49 = vmax.f32 %v8081_v24, 0.0 }
 0x990   : > { %v8546_v17 = vor.u32 %v8545_v50, %v8541_v53  ;;  %v8627_v50 = vrot.slane %v18678_v37, 1 }
 0x991   : > { %v8239_v4 = vor.u32 %v8237_v62, %v8236_v19  ;;  %v19022_v6 = vsel %vm14512_vm2, %v8236_v19, 0  ;;  %v8118_v48 = vmax.f32 %v8084_v3, 0.0  ;;  %13379 = vmatpush3.bf16.msra.mxu0 %v14293_v41  ;;  %v8624_v19 = vrot.slane %v18686_v10, 1 }
 0x992   : > { %v19025_v13 = vsel %vm507_vm3, %v8546_v17, %v8550_v16  ;;  %v8560_v36 = vshll.u32 %v19022_v6, 16  ;;  %v8628_v62 = vrot.slane %v18670_v2, 1  ;;  %v8625_v3 = vrot.slane %v18674_v57, 1 }
 0x993   : > { %v8134_v9 = vpack.c.bf16 %v8118_v48, %v8117_v49  ;;  %8590 = vrot.lane.b32.xlu1 %v19025_v13, %s14434_s22  ;;  %v19031_v15 = vsel %vm14512_vm2, 0, %v8239_v4  ;;  %v8633_v17 = vrot.slane %v18734_v40, 1  ;;  %v8630_v4 = vrot.slane %v18710_v38, 1 }
 0x994   : > { %8698 = vrot.lane.b32.xlu0 %v19031_v15, %s14434_s22  ;;  %v8555_v46 = vshll.u32 %v19031_v15, 16  ;;  %v8553_v55 = vshrl.u32 %v19031_v15, 16  ;;  %v8562_v24 = vrot.slane %v8560_v36, 1  ;;  %v19054_v41 = vsel %vm764_vm4, %v8627_v50, %v8628_v62 }
 0x995   : > { %v8241_v7 = vshrl.u32 %v8134_v9, 16  ;;  %v8244_v51 = vshll.u32 %v8134_v9, 16  ;;  %v19060_v16 = vsel %vm764_vm4, %v8624_v19, %v8625_v3  ;;  %v8634_v2 = vrot.slane %v18700_v12, 1 }
 0x996   : > { %v8557_v8 = vrot.slane %v8555_v46, 1  ;;  %v8631_v57 = vrot.slane %v18704_v30, 1  ;;  %v8639_v48 = vrot.slane %v18773_v56, 1  ;;  %v8636_v46 = vrot.slane %v18749_v31, 1 }
 0x997   : > { %v8243_v47 = vrot.slane %v8241_v7, 7  ;;  %v19068_v49 = vsel %vm764_vm4, %v8633_v17, %v8634_v2  ;;  %v8640_v12 = vrot.slane %v18724_v20, 1  ;;  %v8637_v30 = vrot.slane %v18730_v18, 1 }
 0x998   : > { %v8558_v28 = vor.u32 %v8557_v8, %v8553_v55  ;;  %v19074_v9 = vsel %vm764_vm4, %v8630_v4, %v8631_v57  ;;  %v8645_v7 = vrot.slane %v18801_v35, 1  ;;  %v8642_v8 = vrot.slane %v18784_v14, 1 }
 0x999   : > { %v8246_v54 = vor.u32 %v8244_v51, %v8243_v47  ;;  %v19082_v36 = vsel %vm764_vm4, %v8639_v48, %v8640_v12  ;;  %v19088_v55 = vsel %vm764_vm4, %v8636_v46, %v8637_v30  ;;  %v8646_v20 = vrot.slane %v18758_v52, 1 }
 0x99a   : > { %v19039_v53 = vsel %vm507_vm3, %v8558_v28, %v8562_v24  ;;  %v8643_v18 = vrot.slane %v18762_v26, 1  ;;  %v8651_v28 = vrot.slane %v18860_v32, 1  ;;  %v8652_v52 = vrot.slane %v18854_v25, 1 }
 0x99b   : > { %8592 = vrot.lane.b32.xlu1 %v19039_v53, %s14434_s22  ;;  %v19046_v59 = vsel %vm14512_vm2, 0, %v8246_v54  ;;  %v19096_v51 = vsel %vm764_vm4, %v8645_v7, %v8646_v20  ;;  %v8648_v54 = vrot.slane %v18822_v43, 1  ;;  %v8649_v26 = vrot.slane %v18806_v44, 1 }
 0x99c   : > { %8700 = vrot.lane.b32.xlu0 %v19046_v59, %s14434_s22  ;;  %v19102_v24 = vsel %vm764_vm4, %v8642_v8, %v8643_v18  ;;  %v19110_v50 = vsel %vm764_vm4, %v8651_v28, %v8652_v52  ;;  %v8657_v19 = vrot.slane %v18925_v60, 1  ;;  %v8654_v3 = vrot.slane %v18889_v63, 1  ;;  %v14276_v52 = vld [vmem:[%s20451_s2 + $0x588] sm:$0xff]  }
 0x99d   : > { %v19116_v62 = vsel %vm764_vm4, %v8648_v54, %v8649_v26  ;;  %v8658_v25 = vrot.slane %v18920_v27, 1  ;;  %v8705_v44 = vshll.u32 %v19046_v59, 16  ;;  %v8655_v17 = vrot.slane %v18885_v45, 1 }
 0x99e   : > { %v8663_v2 = vrot.slane %v18998_v11, 1  ;;  %v8660_v48 = vrot.slane %v18964_v29, 1  ;;  %v8310_v27 = vsel %vm14512_vm2, %v8243_v47, 0  ;;  %v8664_v45 = vrot.slane %v18988_v33, 1 }
 0x99f   : > { %8720 = vrot.lane.b32.xlu1 %v19054_v41, %s14434_s22  ;;  %v19125_v4 = vsel %vm764_vm4, %v8657_v19, %v8658_v25  ;;  %v19131_v57 = vsel %vm764_vm4, %v8654_v3, %v8655_v17  ;;  %v8707_v46 = vrot.slane %v8705_v44, 1  ;;  %v8661_v12 = vrot.slane %v18954_v0, 1 }
 0x9a0   : > { %8718 = vrot.lane.b32.xlu0 %v19060_v16, %s14434_s22  ;;  %v19141_v30 = vsel %vm764_vm4, %v8663_v2, %v8664_v45  ;;  %v8666_v7 = vrot.slane %v19031_v15, 1  ;;  %v8703_v8 = vshrl.u32 %v19046_v59, 16  ;;  %v8710_v20 = vshll.u32 %v8310_v27, 16 }
 0x9a1   : > { %v19148_v47 = vsel %vm764_vm4, %v8660_v48, %v8661_v12  ;;  %v8667_v0 = vrot.slane %v19022_v6, 1  ;;  %v14335_v6 = vld [vmem:[%s20451_s2 + $0x580] sm:$0xff]   ;;  %v8715_v44 = vrot.slane %v19046_v59, 1  ;;  %v8716_v17 = vrot.slane %v8310_v27, 1 }
 0x9a2   : > { %v8708_v33 = vor.u32 %v8707_v46, %v8703_v8  ;;  %v8712_v19 = vrot.slane %v8710_v20, 1  ;;  %v14294_v46 = vld [vmem:[%s20451_s2 + $0x598] sm:$0xff]  }
 0x9a3   : > { %8724 = vrot.lane.b32.xlu1 %v19068_v49, %s14434_s22  ;;  %v19159_v26 = vsel %vm764_vm4, %v8666_v7, %v8667_v0  ;;  %v19179_v48 = vsel %vm764_vm4, %v8715_v44, %v8716_v17 }
 0x9a4   : > { %8722 = vrot.lane.b32.xlu0 %v19074_v9, %s14434_s22  ;;  %v19170_v25 = vsel %vm507_vm3, %v8708_v33, %v8712_v19 }
 0x9a7   : > { %8728 = vrot.lane.b32.xlu1 %v19082_v36, %s14434_s22 }
 0x9a8   : > { %8726 = vrot.lane.b32.xlu0 %v19088_v55, %s14434_s22 }
 0x9ab   : > { %8732 = vrot.lane.b32.xlu1 %v19096_v51, %s14434_s22 }
 0x9ac   : > { %8730 = vrot.lane.b32.xlu0 %v19102_v24, %s14434_s22 }
 0x9af   : > { %8736 = vrot.lane.b32.xlu1 %v19110_v50, %s14434_s22 }
 0x9b0   : > { %8734 = vrot.lane.b32.xlu0 %v19116_v62, %s14434_s22 }
 0x9b3   : > { %8740 = vrot.lane.b32.xlu1 %v19125_v4, %s14434_s22 }
 0x9b4   : > { %8738 = vrot.lane.b32.xlu0 %v19131_v57, %s14434_s22 }
 0x9b7   : > { %8744 = vrot.lane.b32.xlu1 %v19141_v30, %s14434_s22  ;;  %v8673_v18 = vpop.permute.xlu0 %8672 }
 0x9b8   : > { %v8671_v28 = vpop.permute.xlu1 %8670  ;;  %8742 = vrot.lane.b32.xlu0 %v19148_v47, %s14434_s22  ;;  %v8802_v3 = vsel %vm896_vm5, %v19060_v16, %v8673_v18  ;;  %v14281_v16 = vld [vmem:[%s20451_s2 + $0x590] sm:$0xff]  }
 0x9b9   : > { %v8798_v54 = vsel %vm896_vm5, %v15032_v42, %v8671_v28 }
 0x9ba   : > { %9206 = vmatprep.mubr.bf16.mxu1 %v8798_v54 }
 0x9bb   : > { %9207 = vmatmul.mubr.bf16.vlgmr.msra.gmra.mrb[144].mxu1 %v15042_v5  ;;  %8746 = vrot.lane.b32.xlu1 %v19159_v26, %s14434_s22 }
 0x9bc   : > { %13941 = vmatpush3.bf16.msra.mxu1 %v14335_v6  ;;  %9214 = vmatprep.mubr.bf16.mxu1 %v8802_v3 }
 0x9bd   : > { %8750 = vrot.lane.b32.xlu0 %v19170_v25, %s14434_s22  ;;  %13942 = vmatprep.subr.bf16.mxu1 %v14276_v52 }
 0x9c0   : > { %v8675_v2 = vpop.permute.xlu0 %8674  ;;  %13943 = vmatpush3.bf16.msra.mxu1 %v14276_v52 }
 0x9c1   : > { %v8565_v45 = vpop.permute.xlu1 %8564  ;;  %8748 = vrot.lane.b32.xlu0 %v19179_v48, %s14434_s22  ;;  %13944 = vmatprep.subr.bf16.mxu1 %v14281_v16  ;;  %v8806_v27 = vsel %vm896_vm5, %v19054_v41, %v8675_v2 }
 0x9c2   : > { %v8753_v12 = vsel %vm896_vm5, %v18686_v10, %v8565_v45 }
 0x9c3   : > { %9215 = vmatmul.mubr.bf16.gmra.mrb[148].mxu1 %v8753_v12 }
 0x9c4   : > { %9222 = vmatprep.mubr.bf16.mxu1 %v8806_v27  ;;  %13945 = vmatpush3.bf16.msra.mxu1 %v14281_v16 }
 0x9c5   : > { %13946 = vmatprep.subr.bf16.mxu1 %v14294_v46 }
 0x9c6   : > { %v8677_v8 = vpop.permute.xlu0 %8676 }
 0x9c7   : > { %v8567_v7 = vpop.permute.xlu1 %8566  ;;  %v8810_v18 = vsel %vm896_vm5, %v19074_v9, %v8677_v8 }
 0x9c8   : > { %v8756_v20 = vsel %vm896_vm5, %v18678_v37, %v8567_v7  ;;  %13947 = vmatpush3.bf16.msra.mxu1 %v14294_v46 }
 0x9c9   : > { %9367 = vmatprep.mubr.bf16.mxu0 %v8756_v20 }
 0x9ca   : > { %v8679_v28 = vpop.permute.xlu0 %8678 }
 0x9cb   : > { %9223 = vmatmul.mubr.bf16.gmra.mrb[152].mxu1 %v8756_v20  ;;  %v8814_v33 = vsel %vm896_vm5, %v19068_v49, %v8679_v28 }
 0x9cc   : > { %9230 = vmatprep.mubr.bf16.mxu1 %v8810_v18 }
 0x9ce   : > { %v8569_v10 = vpop.permute.xlu1 %8568 }
 0x9cf   : > { %v8759_v0 = vsel %vm896_vm5, %v18710_v38, %v8569_v10  ;;  %v8681_v52 = vpop.permute.xlu0 %8680 }
 0x9d0   : > { %v8818_v19 = vsel %vm896_vm5, %v19088_v55, %v8681_v52 }
 0x9d3   : > { %9231 = vmatmul.mubr.bf16.gmra.mrb[156].mxu1 %v8759_v0  ;;  %v8571_v54 = vpop.permute.xlu1 %8570  ;;  %v8683_v6 = vpop.permute.xlu0 %8682 }
 0x9d4   : > { %9238 = vmatprep.mubr.bf16.mxu1 %v8814_v33  ;;  %v19200_v37 = vsel %vm896_vm5, %v18734_v40, %v8571_v54  ;;  %v8822_v44 = vsel %vm896_vm5, %v19082_v36, %v8683_v6 }
 0x9d7   : > { %v8573_v3 = vpop.permute.xlu1 %8572  ;;  %v8685_v16 = vpop.permute.xlu0 %8684 }
 0x9d8   : > { %v19207_v38 = vsel %vm896_vm5, %v18749_v31, %v8573_v3  ;;  %v8826_v2 = vsel %vm896_vm5, %v19102_v24, %v8685_v16 }
 0x9db   : > { %9239 = vmatmul.mubr.bf16.gmra.mrb[160].mxu1 %v19200_v37  ;;  %v8575_v40 = vpop.permute.xlu1 %8574  ;;  %v8687_v45 = vpop.permute.xlu0 %8686 }
 0x9dc   : > { %9246 = vmatprep.mubr.bf16.mxu1 %v8818_v19  ;;  %v19214_v17 = vsel %vm896_vm5, %v18773_v56, %v8575_v40  ;;  %v8830_v12 = vsel %vm896_vm5, %v19096_v51, %v8687_v45 }
 0x9df   : > { %v8577_v31 = vpop.permute.xlu1 %8576 }
 0x9e0   : > { %v19221_v46 = vsel %vm896_vm5, %v18784_v14, %v8577_v31 }
 0x9e1   : > { %v8689_v56 = vpop.permute.xlu0 %8688 }
 0x9e2   : > { %v8834_v14 = vsel %vm896_vm5, %v19116_v62, %v8689_v56 }
 0x9e3   : > { %9247 = vmatmul.mubr.bf16.gmra.mrb[164].mxu1 %v19207_v38  ;;  %v8579_v27 = vpop.permute.xlu1 %8578 }
 0x9e4   : > { %9254 = vmatprep.mubr.bf16.mxu1 %v8822_v44  ;;  %v19228_v7 = vsel %vm896_vm5, %v18801_v35, %v8579_v27 }
 0x9e7   : > { %v8581_v8 = vpop.permute.xlu1 %8580  ;;  %v8691_v20 = vpop.permute.xlu0 %8690 }
 0x9e8   : > { %v19235_v28 = vsel %vm896_vm5, %v18822_v43, %v8581_v8  ;;  %v8838_v35 = vsel %vm896_vm5, %v19110_v50, %v8691_v20 }
 0x9eb   : > { %9255 = vmatmul.mubr.bf16.gmra.mrb[168].mxu1 %v19214_v17  ;;  %v8583_v18 = vpop.permute.xlu1 %8582 }
 0x9ec   : > { %9262 = vmatprep.mubr.bf16.mxu1 %v8826_v2  ;;  %v19242_v3 = vsel %vm896_vm5, %v18860_v32, %v8583_v18 }
 0x9ee   : > { %v8693_v10 = vpop.permute.xlu0 %8692 }
 0x9ef   : > { %v8585_v33 = vpop.permute.xlu1 %8584  ;;  %v8842_v43 = vsel %vm896_vm5, %v19131_v57, %v8693_v10 }
 0x9f0   : > { %v8783_v2 = vsel %vm896_vm5, %v18889_v63, %v8585_v33 }
 0x9f3   : > { %9263 = vmatmul.mubr.bf16.gmra.mrb[172].mxu1 %v19221_v46 }
 0x9f4   : > { %9270 = vmatprep.mubr.bf16.mxu1 %v8830_v12 }
 0x9f5   : > { %v8587_v52 = vpop.permute.xlu1 %8586 }
 0x9f6   : > { %v8695_v54 = vpop.permute.xlu0 %8694  ;;  %v8786_v56 = vsel %vm896_vm5, %v18925_v60, %v8587_v52  ;;  %v20597_v52 = vld [vmem:[#allocation12_spill] sm:$0xff] }
 0x9f7   : > { %v8846_v32 = vsel %vm896_vm5, %v19125_v4, %v8695_v54 }
 0x9fb   : > { %9271 = vmatmul.mubr.bf16.gmra.mrb[176].mxu1 %v19228_v7 }
 0x9fc   : > { %9278 = vmatprep.mubr.bf16.mxu1 %v8834_v14 }
 0x9fd   : > { %v8589_v6 = vpop.permute.xlu1 %8588 }
 0x9fe   : > { %v8697_v19 = vpop.permute.xlu0 %8696  ;;  %v8789_v20 = vsel %vm896_vm5, %v18964_v29, %v8589_v6 }
 0x9ff   : > { %v8850_v63 = vsel %vm896_vm5, %v19148_v47, %v8697_v19 }
 0xa03   : > { %9279 = vmatmul.mubr.bf16.gmra.mrb[180].mxu1 %v19235_v28 }
 0xa04   : > { %9286 = vmatprep.mubr.bf16.mxu1 %v8838_v35 }
 0xa05   : > { %v8591_v40 = vpop.permute.xlu1 %8590 }
 0xa06   : > { %v8699_v44 = vpop.permute.xlu0 %8698  ;;  %v8792_v18 = vsel %vm896_vm5, %v18998_v11, %v8591_v40 }
 0xa07   : > { %v8854_v60 = vsel %vm896_vm5, %v19141_v30, %v8699_v44 }
 0xa0b   : > { %9287 = vmatmul.mubr.bf16.gmra.mrb[184].mxu1 %v19242_v3 }
 0xa0c   : > { %9294 = vmatprep.mubr.bf16.mxu1 %v8842_v43 }
 0xa0d   : > { %v8593_v31 = vpop.permute.xlu1 %8592 }
 0xa0e   : > { %v8701_v16 = vpop.permute.xlu0 %8700  ;;  %v8795_v54 = vsel %vm896_vm5, %v19031_v15, %v8593_v31 }
 0xa0f   : > { %v8858_v29 = vsel %vm896_vm5, %v19159_v26, %v8701_v16 }
 0xa11   : > { %v8721_v27 = vpop.permute.xlu1 %8720 }
 0xa12   : > { %v8719_v45 = vpop.permute.xlu0 %8718  ;;  %v8866_v8 = vsel %vm896_vm5, %v18737_v22, %v8721_v27 }
 0xa13   : > { %v8862_v12 = vsel %vm896_vm5, %v18715_v58, %v8719_v45  ;;  %9295 = vmatmul.mubr.bf16.gmra.mrb[188].mxu1 %v8783_v2  ;;  %v14296_v45 = vld [vmem:[%s20452_s3] sm:$0xff]  }
 0xa14   : > { %9302 = vmatprep.mubr.bf16.mxu1 %v8846_v32  ;;  %9368 = vmatmul.mubr.bf16.vlgmr.msra.gmra.mrb[144].mxu0 %v8862_v12 }
 0xa15   : > { %9375 = vmatprep.mubr.bf16.mxu0 %v8759_v0  ;;  %v20594_v0 = vld [vmem:[#allocation16_spill] sm:$0xff]  ;;  %v8725_v22 = vpop.permute.xlu1 %8724 }
 0xa16   : > { %v8723_v58 = vpop.permute.xlu0 %8722 }
 0xa17   : > { %v8870_v14 = vsel %vm896_vm5, %v20594_v0, %v8723_v58 }
 0xa19   : > { %v8729_v11 = vpop.permute.xlu1 %8728 }
 0xa1a   : > { %v8727_v33 = vpop.permute.xlu0 %8726  ;;  %v8882_v19 = vsel %vm896_vm5, %v20597_v52, %v8729_v11 }
 0xa1b   : > { %9303 = vmatmul.mubr.bf16.gmra.mrb[192].mxu1 %v8786_v56 }
 0xa1c   : > { %9310 = vmatprep.mubr.bf16.mxu1 %v8850_v63  ;;  %9376 = vmatmul.mubr.bf16.gmra.mrb[148].mxu0 %v8866_v8 }
 0xa1d   : > { %9383 = vmatprep.mubr.bf16.mxu0 %v19200_v37  ;;  %v20595_v37 = vld [vmem:[#allocation18_spill] sm:$0xff] }
 0xa1e   : > { %v8874_v10 = vsel %vm896_vm5, %v20595_v37, %v8725_v22  ;;  %v8731_v15 = vpop.permute.xlu0 %8730  ;;  %v14298_v37 = vld [vmem:[%s20452_s3 + $0x8] sm:$0xff]  }
 0xa23   : > { %9311 = vmatmul.mubr.bf16.gmra.mrb[196].mxu1 %v8789_v20 }
 0xa24   : > { %9318 = vmatprep.mubr.bf16.mxu1 %v8854_v60  ;;  %9384 = vmatmul.mubr.bf16.gmra.mrb[152].mxu0 %v8870_v14 }
 0xa25   : > { %9391 = vmatprep.mubr.bf16.mxu0 %v19207_v38  ;;  %v20596_v38 = vld [vmem:[#allocation5_spill] sm:$0xff] }
 0xa26   : > { %v8878_v35 = vsel %vm896_vm5, %v20596_v38, %v8727_v33 }
 0xa2b   : > { %9319 = vmatmul.mubr.bf16.gmra.mrb[200].mxu1 %v8792_v18 }
 0xa2c   : > { %9326 = vmatprep.mubr.bf16.mxu1 %v8858_v29  ;;  %9392 = vmatmul.mubr.bf16.gmra.mrb[156].mxu0 %v8874_v10 }
 0xa2d   : > { %9399 = vmatprep.mubr.bf16.mxu0 %v19214_v17  ;;  %v20598_v17 = vld [vmem:[#allocation6_spill] sm:$0xff] }
 0xa33   : > { %9327 = vmatmul.mubr.bf16.gmra.mrb[204].mxu1 %v8795_v54 }
 0xa34   : > { %13948 = vmatprep.mubr.msk.bf16.mxu1 %vm896_vm5, %v19054_v41  ;;  %9400 = vmatmul.mubr.bf16.gmra.mrb[160].mxu0 %v8878_v35  ;;  %v8886_v41 = vsel %vm896_vm5, %v20598_v17, %v8731_v15 }
 0xa35   : > { %9407 = vmatprep.mubr.bf16.mxu0 %v19221_v46  ;;  %v20599_v46 = vld [vmem:[#allocation15_spill] sm:$0xff] }
 0xa3b   : > { %13949 = vmatmul.mubr.msk.bf16.vlgmr.msra.gmra.mrb[208].mxu1 %vm896_vm5, %v19074_v9  ;;  %v8733_v9 = vpop.permute.xlu1 %8732 }
 0xa3c   : > { %13952 = vmatprep.mubr.msk.bf16.mxu1 %vm896_vm5, %v19068_v49  ;;  %9408 = vmatmul.mubr.bf16.gmra.mrb[164].mxu0 %v8882_v19  ;;  %v8890_v49 = vsel %vm896_vm5, %v20599_v46, %v8733_v9 }
 0xa3d   : > { %9415 = vmatprep.mubr.bf16.mxu0 %v19228_v7 }
 0xa3f   : > { %v8737_v7 = vpop.permute.xlu1 %8736 }
 0xa43   : > { %13953 = vmatmul.mubr.msk.bf16.gmra.mrb[212].mxu1 %vm896_vm5, %v19088_v55  ;;  %v8735_v55 = vpop.permute.xlu0 %8734 }
 0xa44   : > { %13956 = vmatprep.mubr.msk.bf16.mxu1 %vm896_vm5, %v19082_v36  ;;  %9416 = vmatmul.mubr.bf16.gmra.mrb[168].mxu0 %v8886_v41  ;;  %v8894_v36 = vsel %vm896_vm5, %v18879_v21, %v8735_v55 }
 0xa45   : > { %9423 = vmatprep.mubr.bf16.mxu0 %v19235_v28 }
 0xa47   : > { %v8739_v21 = vpop.permute.xlu0 %8738 }
 0xa4b   : > { %13957 = vmatmul.mubr.msk.bf16.gmra.mrb[216].mxu1 %vm896_vm5, %v19102_v24  ;;  %v8898_v24 = vsel %vm896_vm5, %v18904_v39, %v8737_v7  ;;  %v8741_v39 = vpop.permute.xlu1 %8740  ;;  %v14299_v7 = vld [vmem:[%s20452_s3 + $0x50] sm:$0xff]  }
 0xa4c   : > { %13960 = vmatprep.mubr.msk.bf16.mxu1 %vm896_vm5, %v19096_v51  ;;  %9424 = vmatmul.mubr.bf16.gmra.mrb[172].mxu0 %v8890_v49  ;;  %v8902_v51 = vsel %vm896_vm5, %v18928_v61, %v8739_v21  ;;  %v8743_v61 = vpop.permute.xlu0 %8742 }
 0xa4d   : > { %9431 = vmatprep.mubr.bf16.mxu0 %v19242_v3 }
 0xa53   : > { %13961 = vmatmul.mubr.msk.bf16.gmra.mrb[220].mxu1 %vm896_vm5, %v19116_v62  ;;  %v8910_v62 = vsel %vm896_vm5, %v18991_v1, %v8743_v61 }
 0xa54   : > { %13964 = vmatprep.mubr.msk.bf16.mxu1 %vm896_vm5, %v19110_v50  ;;  %9432 = vmatmul.mubr.bf16.gmra.mrb[176].mxu0 %v8894_v36  ;;  %v8906_v50 = vsel %vm896_vm5, %v18957_v34, %v8741_v39 }
 0xa55   : > { %9439 = vmatprep.mubr.bf16.mxu0 %v8783_v2 }
 0xa5b   : > { %13965 = vmatmul.mubr.msk.bf16.gmra.mrb[224].mxu1 %vm896_vm5, %v19131_v57  ;;  %v8751_v57 = vpop.permute.xlu0 %8750 }
 0xa5c   : > { %13968 = vmatprep.mubr.msk.bf16.mxu1 %vm896_vm5, %v19125_v4  ;;  %9440 = vmatmul.mubr.bf16.gmra.mrb[180].mxu0 %v8898_v24  ;;  %v8745_v4 = vpop.permute.xlu1 %8744  ;;  %v14300_v24 = vld [vmem:[%s20452_s3 + $0x10] sm:$0xff]  }
 0xa5d   : > { %9447 = vmatprep.mubr.bf16.mxu0 %v8786_v56  ;;  %v8914_v34 = vsel %vm896_vm5, %v19025_v13, %v8745_v4 }
 0xa5f   : > { %v8749_v1 = vpop.permute.xlu0 %8748 }
 0xa63   : > { %13969 = vmatmul.mubr.msk.bf16.gmra.mrb[228].mxu1 %vm896_vm5, %v19148_v47  ;;  %v8747_v47 = vpop.permute.xlu1 %8746 }
 0xa64   : > { %13972 = vmatprep.mubr.msk.bf16.mxu1 %vm896_vm5, %v19141_v30  ;;  %9448 = vmatmul.mubr.bf16.gmra.mrb[184].mxu0 %v8902_v51  ;;  %v8925_v30 = vsel %vm896_vm5, %v19046_v59, %v8751_v57 }
 0xa65   : > { %9455 = vmatprep.mubr.bf16.mxu0 %v8789_v20 }
 0xa6b   : > { %13973 = vmatmul.mubr.msk.bf16.gmra.mrb[232].mxu1 %vm896_vm5, %v19159_v26  ;;  %v8918_v26 = vsel %vm896_vm5, %v19039_v53, %v8747_v47  ;;  %v14302_v47 = vld [vmem:[%s20452_s3 + $0x18] sm:$0xff]  }
 0xa6c   : > { %13976 = vmatprep.mubr.msk.bf16.mxu1 %vm896_vm5, %v19179_v48  ;;  %9456 = vmatmul.mubr.bf16.gmra.mrb[188].mxu0 %v8906_v50  ;;  %v8922_v48 = vsel %vm896_vm5, %v19170_v25, %v8749_v1  ;;  %v14295_v25 = vld [vmem:[%s20452_s3 + $0x40] sm:$0xff]  }
 0xa6d   : > { %9463 = vmatprep.mubr.bf16.mxu0 %v8792_v18  ;;  %13496 = vmatprep.subr.bf16.mxu0 %v14295_v25  ;;  %v14297_v18 = vld [vmem:[%s20452_s3 + $0x48] sm:$0xff]  }
 0xa6e   : > { %13497 = vmatpush3.bf16.msra.mxu0 %v14296_v45  ;;  %v14303_v45 = vld [vmem:[%s20452_s3 + $0x60] sm:$0xff]  }
 0xa6f   : > { %13498 = vmatprep.subr.bf16.mxu0 %v14297_v18 }
 0xa72   : > { %13499 = vmatpush3.bf16.msra.mxu0 %v14298_v37 }
 0xa73   : > { %13977 = vmatmul.mubr.msk.bf16.gmra.mrb[236].mxu1 %vm896_vm5, %v15032_v42  ;;  %13500 = vmatprep.subr.bf16.mxu0 %v14299_v7  ;;  %v14305_v7 = vld [vmem:[%s20452_s3 + $0x68] sm:$0xff]  }
 0xa74   : > { %9464 = vmatmul.mubr.bf16.gmra.mrb[192].mxu0 %v8910_v62 }
 0xa75   : > { %9471 = vmatprep.mubr.bf16.mxu0 %v8795_v54 }
 0xa76   : > { %13501 = vmatpush3.bf16.msra.mxu0 %v14300_v24  ;;  %v14306_v24 = vld [vmem:[%s20452_s3 + $0x28] sm:$0xff]  }
 0xa7c   : > { %9472 = vmatmul.mubr.bf16.gmra.mrb[196].mxu0 %v8914_v34 }
 0xa7d   : > { %9479 = vmatprep.mubr.bf16.mxu0 %v8925_v30  ;;  %v14301_v30 = vld [vmem:[%s20452_s3 + $0x58] sm:$0xff]  }
 0xa7e   : > { %13502 = vmatprep.subr.bf16.mxu0 %v14301_v30  ;;  %v14307_v30 = vld [vmem:[%s20452_s3 + $0x70] sm:$0xff]  }
 0xa7f   : > { %13503 = vmatpush3.bf16.msra.mxu0 %v14302_v47  ;;  %v14308_v47 = vld [vmem:[%s20452_s3 + $0x30] sm:$0xff]  }
 0xa80   : > { %13504 = vmatprep.subr.bf16.mxu0 %v14303_v45 }
 0xa84   : > { %9480 = vmatmul.mubr.bf16.gmra.mrb[200].mxu0 %v8918_v26 }
 0xa85   : > { %9487 = vmatprep.mubr.bf16.mxu0 %v15042_v5 }
 0xa8c   : > { %9488 = vmatmul.mubr.bf16.gmra.mrb[204].mxu0 %v8922_v48 }
 0xa8e   : > { %v13268_v28 = vpop.f32.mrb[144].mxu1 }
 0xa8f   : > { %v13269_v3 = vpop.f32.mrb[145].mxu1 }
 0xa90   : > { %v19339_v13 = vadd.f32 %v13269_v3, %v13268_v28  ;;  %v13271_v6 = vpop.f32.mrb[146].mxu1 }
 0xa91   : > { %v13272_v44 = vpop.f32.mrb[147].mxu1 }
 0xa92   : > { %v19341_v59 = vadd.f32 %v13272_v44, %v13271_v6 }
 0xa96   : > { %v13274_v43 = vpop.f32.mrb[148].mxu1 }
 0xa97   : > { %v13275_v40 = vpop.f32.mrb[149].mxu1 }
 0xa98   : > { %v19343_v16 = vadd.f32 %v13275_v40, %v13274_v43  ;;  %v13277_v53 = vpop.f32.mrb[150].mxu1 }
 0xa99   : > { %v13278_v2 = vpop.f32.mrb[151].mxu1 }
 0xa9a   : > { %v19345_v31 = vadd.f32 %v13278_v2, %v13277_v53 }
 0xa9e   : > { %v13280_v12 = vpop.f32.mrb[152].mxu1 }
 0xa9f   : > { %v13281_v32 = vpop.f32.mrb[153].mxu1 }
 0xaa0   : > { %v19353_v27 = vadd.f32 %v13281_v32, %v13280_v12  ;;  %v13283_v56 = vpop.f32.mrb[154].mxu1  ;;  %v14304_v12 = vld [vmem:[%s20452_s3 + $0x20] sm:$0xff]  }
 0xaa1   : > { %v13284_v8 = vpop.f32.mrb[155].mxu1  ;;  %13505 = vmatpush3.bf16.msra.mxu0 %v14304_v12 }
 0xaa2   : > { %v19355_v63 = vadd.f32 %v13284_v8, %v13283_v56  ;;  %13506 = vmatprep.subr.bf16.mxu0 %v14305_v7 }
 0xaa5   : > { %13507 = vmatpush3.bf16.msra.mxu0 %v14306_v24 }
 0xaa6   : > { %v13286_v58 = vpop.f32.mrb[156].mxu1  ;;  %13508 = vmatprep.subr.bf16.mxu0 %v14307_v30 }
 0xaa7   : > { %v13287_v20 = vpop.f32.mrb[157].mxu1 }
 0xaa8   : > { %v19357_v0 = vadd.f32 %v13287_v20, %v13286_v58  ;;  %v13289_v14 = vpop.f32.mrb[158].mxu1 }
 0xaa9   : > { %v13290_v60 = vpop.f32.mrb[159].mxu1  ;;  %13509 = vmatpush3.bf16.msra.mxu0 %v14308_v47 }
 0xaaa   : > { %v19359_v22 = vadd.f32 %v13290_v60, %v13289_v14 }
 0xaae   : > { %v13292_v10 = vpop.f32.mrb[160].mxu1 }
 0xaaf   : > { %v13293_v29 = vpop.f32.mrb[161].mxu1 }
 0xab0   : > { %v19367_v33 = vadd.f32 %v13293_v29, %v13292_v10  ;;  %v13295_v54 = vpop.f32.mrb[162].mxu1 }
 0xab1   : > { %v13296_v38 = vpop.f32.mrb[163].mxu1 }
 0xab2   : > { %v19369_v35 = vadd.f32 %v13296_v38, %v13295_v54 }
 0xab6   : > { %v13298_v11 = vpop.f32.mrb[164].mxu1 }
 0xab7   : > { %v13299_v52 = vpop.f32.mrb[165].mxu1 }
 0xab8   : > { %v19371_v19 = vadd.f32 %v13299_v52, %v13298_v11  ;;  %v13301_v15 = vpop.f32.mrb[166].mxu1 }
 0xab9   : > { %v13302_v17 = vpop.f32.mrb[167].mxu1 }
 0xaba   : > { %v19373_v41 = vadd.f32 %v13302_v17, %v13301_v15 }
 0xabe   : > { %v13304_v9 = vpop.f32.mrb[168].mxu1 }
 0xabf   : > { %v13305_v46 = vpop.f32.mrb[169].mxu1 }
 0xac0   : > { %v19375_v49 = vadd.f32 %v13305_v46, %v13304_v9  ;;  %v13307_v55 = vpop.f32.mrb[170].mxu1 }
 0xac1   : > { %v13308_v36 = vpop.f32.mrb[171].mxu1 }
 0xac2   : > { %v19383_v21 = vadd.f32 %v13308_v36, %v13307_v55 }
 0xac6   : > { %v13310_v51 = vpop.f32.mrb[172].mxu1 }
 0xac7   : > { %v13311_v39 = vpop.f32.mrb[173].mxu1 }
 0xac8   : > { %v19385_v50 = vadd.f32 %v13311_v39, %v13310_v51  ;;  %v13313_v61 = vpop.f32.mrb[174].mxu1 }
 0xac9   : > { %v13314_v62 = vpop.f32.mrb[175].mxu1 }
 0xaca   : > { %v19387_v4 = vadd.f32 %v13314_v62, %v13313_v61 }
 0xace   : > { %v13316_v57 = vpop.f32.mrb[176].mxu1 }
 0xacf   : > { %v13317_v34 = vpop.f32.mrb[177].mxu1 }
 0xad0   : > { %v19395_v26 = vadd.f32 %v13317_v34, %v13316_v57  ;;  %v13319_v1 = vpop.f32.mrb[178].mxu1 }
 0xad1   : > { %v13320_v48 = vpop.f32.mrb[179].mxu1 }
 0xad2   : > { %v19397_v28 = vadd.f32 %v13320_v48, %v13319_v1 }
 0xad6   : > { %v13322_v3 = vpop.f32.mrb[180].mxu1 }
 0xad7   : > { %v13323_v6 = vpop.f32.mrb[181].mxu1 }
 0xad8   : > { %v19399_v44 = vadd.f32 %v13323_v6, %v13322_v3  ;;  %v13325_v43 = vpop.f32.mrb[182].mxu1 }
 0xad9   : > { %v13326_v40 = vpop.f32.mrb[183].mxu1 }
 0xada   : > { %v19401_v53 = vadd.f32 %v13326_v40, %v13325_v43 }
 0xade   : > { %v13328_v2 = vpop.f32.mrb[184].mxu1 }
 0xadf   : > { %v13329_v25 = vpop.f32.mrb[185].mxu1 }
 0xae0   : > { %v19409_v32 = vadd.f32 %v13329_v25, %v13328_v2  ;;  %v13331_v56 = vpop.f32.mrb[186].mxu1 }
 0xae1   : > { %v13332_v8 = vpop.f32.mrb[187].mxu1 }
 0xae2   : > { %v19411_v58 = vadd.f32 %v13332_v8, %v13331_v56 }
 0xae6   : > { %v13334_v20 = vpop.f32.mrb[188].mxu1 }
 0xae7   : > { %v13335_v14 = vpop.f32.mrb[189].mxu1  ;;  %v13380_v60 = vpop.f32.mrb[144].mxu0 }
 0xae8   : > { %v19413_v18 = vadd.f32 %v13335_v14, %v13334_v20  ;;  %v13337_v37 = vpop.f32.mrb[190].mxu1  ;;  %v13381_v10 = vpop.f32.mrb[145].mxu0 }
 0xae9   : > { %v13338_v29 = vpop.f32.mrb[191].mxu1  ;;  %v13382_v54 = vadd.f32 %v13381_v10, %v13380_v60  ;;  %v13383_v38 = vpop.f32.mrb[146].mxu0 }
 0xaea   : > { %v19415_v11 = vadd.f32 %v13338_v29, %v13337_v37  ;;  %v13384_v52 = vpop.f32.mrb[147].mxu0 }
 0xaeb   : > { %v13385_v15 = vadd.f32 %v13384_v52, %v13383_v38  ;;  %v19418_v17 = vadd.f32 %v13382_v54, %v19339_v13 }
 0xaed   : > { %v19421_v9 = vadd.f32 %v13385_v15, %v19341_v59 }
 0xaee   : > { %v13340_v46 = vpop.f32.mrb[192].mxu1 }
 0xaef   : > { %v13341_v55 = vpop.f32.mrb[193].mxu1  ;;  %v13386_v36 = vpop.f32.mrb[148].mxu0 }
 0xaf0   : > { %v19429_v51 = vadd.f32 %v13341_v55, %v13340_v46  ;;  %v13343_v39 = vpop.f32.mrb[194].mxu1  ;;  %v13387_v61 = vpop.f32.mrb[149].mxu0 }
 0xaf1   : > { %v13344_v13 = vpop.f32.mrb[195].mxu1  ;;  %v13388_v62 = vadd.f32 %v13387_v61, %v13386_v36  ;;  %v13389_v57 = vpop.f32.mrb[150].mxu0 }
 0xaf2   : > { %v19431_v59 = vadd.f32 %v13344_v13, %v13343_v39  ;;  %v13390_v34 = vpop.f32.mrb[151].mxu0 }
 0xaf3   : > { %v13391_v1 = vadd.f32 %v13390_v34, %v13389_v57  ;;  %v9378_v48 = vadd.f32 %v13388_v62, %v19343_v16 }
 0xaf5   : > { %v9381_v3 = vadd.f32 %v13391_v1, %v19345_v31  ;;  %v14311_v1 = vld [vmem:[%s20452_s3 + $0xc0] sm:$0xff]  }
 0xaf6   : > { %v13346_v6 = vpop.f32.mrb[196].mxu1  ;;  %13608 = vmatprep.subr.bf16.mxu1 %v14311_v1 }
 0xaf7   : > { %v13347_v43 = vpop.f32.mrb[197].mxu1  ;;  %v13392_v40 = vpop.f32.mrb[152].mxu0 }
 0xaf8   : > { %v19441_v2 = vadd.f32 %v13347_v43, %v13346_v6  ;;  %v13349_v25 = vpop.f32.mrb[198].mxu1  ;;  %v13393_v45 = vpop.f32.mrb[153].mxu0  ;;  %v14312_v6 = vld [vmem:[%s20452_s3 + $0x80] sm:$0xff]  }
 0xaf9   : > { %v13350_v12 = vpop.f32.mrb[199].mxu1  ;;  %v13394_v56 = vadd.f32 %v13393_v45, %v13392_v40  ;;  %v13395_v8 = vpop.f32.mrb[154].mxu0  ;;  %13609 = vmatpush3.bf16.msra.mxu1 %v14312_v6 }
 0xafa   : > { %v19443_v20 = vadd.f32 %v13350_v12, %v13349_v25  ;;  %v13396_v14 = vpop.f32.mrb[155].mxu0 }
 0xafb   : > { %v13397_v60 = vadd.f32 %v13396_v14, %v13395_v8  ;;  %v19446_v16 = vadd.f32 %v13394_v56, %v19353_v27  ;;  %v14309_v27 = vld [vmem:[%s20452_s3 + $0x78] sm:$0xff]  }
 0xafc   : > { %13510 = vmatprep.subr.bf16.mxu0 %v14309_v27 }
 0xafd   : > { %v19449_v31 = vadd.f32 %v13397_v60, %v19355_v63  ;;  %v14310_v63 = vld [vmem:[%s20452_s3 + $0x38] sm:$0xff]  }
 0xafe   : > { %v13352_v37 = vpop.f32.mrb[200].mxu1  ;;  %13511 = vmatpush3.bf16.msra.mxu0 %v14310_v63 }
 0xaff   : > { %v13353_v10 = vpop.f32.mrb[201].mxu1  ;;  %v13398_v29 = vpop.f32.mrb[156].mxu0 }
 0xb00   : > { %v19451_v54 = vadd.f32 %v13353_v10, %v13352_v37  ;;  %v13355_v38 = vpop.f32.mrb[202].mxu1  ;;  %v13399_v52 = vpop.f32.mrb[157].mxu0 }
 0xb01   : > { %v13356_v15 = vpop.f32.mrb[203].mxu1  ;;  %v13400_v46 = vadd.f32 %v13399_v52, %v13398_v29  ;;  %v13401_v55 = vpop.f32.mrb[158].mxu0 }
 0xb02   : > { %v19453_v36 = vadd.f32 %v13356_v15, %v13355_v38  ;;  %v13402_v7 = vpop.f32.mrb[159].mxu0 }
 0xb03   : > { %v13403_v24 = vadd.f32 %v13402_v7, %v13401_v55  ;;  %v9394_v39 = vadd.f32 %v13400_v46, %v19357_v0 }
 0xb05   : > { %v9397_v61 = vadd.f32 %v13403_v24, %v19359_v22 }
 0xb06   : > { %v13358_v13 = vpop.f32.mrb[204].mxu1 }
 0xb07   : > { %v13359_v62 = vpop.f32.mrb[205].mxu1  ;;  %v13404_v57 = vpop.f32.mrb[160].mxu0 }
 0xb08   : > { %v19463_v34 = vadd.f32 %v13359_v62, %v13358_v13  ;;  %v13361_v30 = vpop.f32.mrb[206].mxu1  ;;  %v13405_v47 = vpop.f32.mrb[161].mxu0 }
 0xb09   : > { %v13362_v0 = vpop.f32.mrb[207].mxu1  ;;  %v13406_v43 = vadd.f32 %v13405_v47, %v13404_v57  ;;  %v13407_v40 = vpop.f32.mrb[162].mxu0  ;;  %v14315_v57 = vld [vmem:[%s20452_s3 + $0x88] sm:$0xff]  }
 0xb0a   : > { %v19471_v22 = vadd.f32 %v13362_v0, %v13361_v30  ;;  %v13408_v25 = vpop.f32.mrb[163].mxu0 }
 0xb0b   : > { %v13409_v45 = vadd.f32 %v13408_v25, %v13407_v40  ;;  %v19474_v12 = vadd.f32 %v13406_v43, %v19367_v33 }
 0xb0d   : > { %v19477_v56 = vadd.f32 %v13409_v45, %v19369_v35 }
 0xb0e   : > { %v13950_v8 = vpop.f32.mrb[208].mxu1 }
 0xb0f   : > { %v9539_v14 = vadd.f32 %v13950_v8, %v9378_v48  ;;  %v9530_v60 = vpop.f32.mrb[209].mxu1  ;;  %v13410_v37 = vpop.f32.mrb[164].mxu0  ;;  %v14313_v48 = vld [vmem:[%s20452_s3 + $0x100] sm:$0xff]  }
 0xb10   : > { %v9531_v10 = vadd.f32 %v9530_v60, %v19418_v17  ;;  %v13951_v29 = vpop.f32.mrb[210].mxu1  ;;  %v13411_v38 = vpop.f32.mrb[165].mxu0  ;;  %13980 = vmatprep.subr.bf16.mxu0 %v14313_v48 }
 0xb11   : > { %v9542_v52 = vadd.f32 %v13951_v29, %v9381_v3  ;;  %v13412_v15 = vadd.f32 %v13411_v38, %v13410_v37  ;;  %v9533_v46 = vpop.f32.mrb[211].mxu1  ;;  %v13413_v55 = vpop.f32.mrb[166].mxu0  ;;  %v9659_v27 = vmax.f32 %v9539_v14, 0.0 }
 0xb12   : > { %v9534_v7 = vadd.f32 %v9533_v46, %v19421_v9  ;;  %v13414_v33 = vpop.f32.mrb[167].mxu0  ;;  %v9657_v13 = vmax.f32 %v9531_v10, 0.0  ;;  %v14314_v9 = vld [vmem:[%s20452_s3 + $0xc8] sm:$0xff]  }
 0xb13   : > { %v9660_v63 = vmax.f32 %v9542_v52, 0.0  ;;  %v13415_v24 = vadd.f32 %v13414_v33, %v13413_v55  ;;  %v9410_v35 = vadd.f32 %v13412_v15, %v19371_v19  ;;  %13610 = vmatprep.subr.bf16.mxu1 %v14314_v9 }
 0xb14   : > { %v9658_v17 = vmax.f32 %v9534_v7, 0.0  ;;  %13611 = vmatpush3.bf16.msra.mxu1 %v14315_v57 }
 0xb15   : > { %v9690_v62 = vpack.c.bf16 %v9660_v63, %v9659_v27  ;;  %v9413_v3 = vadd.f32 %v13415_v24, %v19373_v41 }
 0xb16   : > { %v9689_v30 = vpack.c.bf16 %v9658_v17, %v9657_v13  ;;  %v13954_v19 = vpop.f32.mrb[212].mxu1 }
 0xb17   : > { %v9713_v47 = vshrl.u32 %v9690_v62, 16  ;;  %v9555_v1 = vadd.f32 %v13954_v19, %v9394_v39  ;;  %v9546_v6 = vpop.f32.mrb[213].mxu1  ;;  %v13416_v0 = vpop.f32.mrb[168].mxu0  ;;  %v9716_v8 = vshll.u32 %v9690_v62, 16 }
 0xb18   : > { %v9706_v43 = vshrl.u32 %v9689_v30, 16  ;;  %v9547_v40 = vadd.f32 %v9546_v6, %v19446_v16  ;;  %v13955_v41 = vpop.f32.mrb[214].mxu1  ;;  %v13417_v25 = vpop.f32.mrb[169].mxu0  ;;  %v9709_v38 = vshll.u32 %v9689_v30, 16  ;;  %v14316_v16 = vld [vmem:[%s20452_s3 + $0xd0] sm:$0xff]  }
 0xb19   : > { %v9715_v45 = vrot.slane %v9713_v47, 7  ;;  %v9558_v14 = vadd.f32 %v13955_v41, %v9397_v61  ;;  %v13418_v60 = vadd.f32 %v13417_v25, %v13416_v0  ;;  %v9549_v37 = vpop.f32.mrb[215].mxu1  ;;  %v13419_v10 = vpop.f32.mrb[170].mxu0  ;;  %v9663_v52 = vmax.f32 %v9555_v1, 0.0  ;;  %13612 = vmatprep.subr.bf16.mxu1 %v14316_v16 }
 0xb1a   : > { %v9708_v29 = vrot.slane %v9706_v43, 7  ;;  %v9550_v39 = vadd.f32 %v9549_v37, %v19449_v31  ;;  %v13420_v15 = vpop.f32.mrb[171].mxu0  ;;  %v9661_v55 = vmax.f32 %v9547_v40, 0.0  ;;  %v14317_v31 = vld [vmem:[%s20452_s3 + $0x90] sm:$0xff]  }
 0xb1b   : > { %v9718_v46 = vor.u32 %v9716_v8, %v9715_v45  ;;  %v9664_v7 = vmax.f32 %v9558_v14, 0.0  ;;  %v13421_v33 = vadd.f32 %v13420_v15, %v13419_v10  ;;  %v19502_v24 = vadd.f32 %v13418_v60, %v19375_v49  ;;  %13613 = vmatpush3.bf16.msra.mxu1 %v14317_v31 }
 0xb1c   : > { %v9711_v27 = vor.u32 %v9709_v38, %v9708_v29  ;;  %v19499_v61 = vsel %vm14512_vm2, %v9708_v29, 0  ;;  %v9662_v63 = vmax.f32 %v9550_v39, 0.0  ;;  %v19516_v62 = vsel %vm14512_vm2, %v9715_v45, 0  ;;  %v14318_v29 = vld [vmem:[%s20452_s3 + $0xd8] sm:$0xff]  }
 0xb1d   : > { %v9692_v48 = vpack.c.bf16 %v9664_v7, %v9663_v52  ;;  %v19509_v13 = vsel %vm14512_vm2, 0, %v9718_v46  ;;  %v19512_v17 = vadd.f32 %v13421_v33, %v19383_v21  ;;  %v9961_v1 = vshll.u32 %v19499_v61, 16  ;;  %13614 = vmatprep.subr.bf16.mxu1 %v14318_v29 }
 0xb1e   : > { %v9691_v9 = vpack.c.bf16 %v9662_v63, %v9661_v55  ;;  %v13958_v49 = vpop.f32.mrb[216].mxu1  ;;  %10241 = vrot.lane.b32.xlu0 %v19509_v13, %s14434_s22  ;;  %v19522_v57 = vsel %vm14512_vm2, 0, %v9711_v27  ;;  %v9966_v6 = vshrl.u32 %v19509_v13, 16  ;;  %v9968_v45 = vshll.u32 %v19509_v13, 16 }
 0xb1f   : > { %v9727_v30 = vshrl.u32 %v9692_v48, 16  ;;  %v9571_v19 = vadd.f32 %v13958_v49, %v9410_v35  ;;  %v9562_v47 = vpop.f32.mrb[217].mxu1  ;;  %10239 = vrot.lane.b32.xlu1 %v19522_v57, %s14434_s22  ;;  %v13422_v21 = vpop.f32.mrb[172].mxu0  ;;  %v9956_v25 = vshll.u32 %v19522_v57, 16  ;;  %v9730_v8 = vshll.u32 %v9692_v48, 16 }
 0xb20   : > { %v9720_v0 = vshrl.u32 %v9691_v9, 16  ;;  %v9563_v43 = vadd.f32 %v9562_v47, %v19474_v12  ;;  %v13959_v40 = vpop.f32.mrb[218].mxu1  ;;  %v13423_v41 = vpop.f32.mrb[173].mxu0  ;;  %v9954_v10 = vshrl.u32 %v19522_v57, 16  ;;  %v14319_v12 = vld [vmem:[%s20452_s3 + $0x98] sm:$0xff]   ;;  %v9723_v52 = vshll.u32 %v9691_v9, 16 }
 0xb21   : > { %v9574_v35 = vadd.f32 %v13959_v40, %v9413_v3  ;;  %v13424_v14 = vadd.f32 %v13423_v41, %v13422_v21  ;;  %v9565_v60 = vpop.f32.mrb[219].mxu1  ;;  %v13425_v37 = vpop.f32.mrb[174].mxu0  ;;  %v9958_v46 = vrot.slane %v9956_v25, 1  ;;  %v9729_v3 = vrot.slane %v9727_v30, 7  ;;  %13615 = vmatpush3.bf16.msra.mxu1 %v14319_v12 }
 0xb22   : > { %v9722_v38 = vrot.slane %v9720_v0, 7  ;;  %v9566_v39 = vadd.f32 %v9565_v60, %v19477_v56  ;;  %v13426_v15 = vpop.f32.mrb[175].mxu0  ;;  %v9667_v55 = vmax.f32 %v9571_v19, 0.0  ;;  %v9665_v27 = vmax.f32 %v9563_v43, 0.0 }
 0xb23   : > { %v9668_v7 = vmax.f32 %v9574_v35, 0.0  ;;  %v13427_v33 = vadd.f32 %v13426_v15, %v13425_v37  ;;  %v9426_v31 = vadd.f32 %v13424_v14, %v19385_v50  ;;  %v9959_v49 = vor.u32 %v9958_v46, %v9954_v10 }
 0xb24   : > { %v9725_v16 = vor.u32 %v9723_v52, %v9722_v38  ;;  %v9666_v63 = vmax.f32 %v9566_v39, 0.0  ;;  %v9963_v47 = vrot.slane %v9961_v1, 1  ;;  %v9970_v19 = vrot.slane %v9968_v45, 1  ;;  %v14320_v1 = vld [vmem:[%s20452_s3 + $0xe0] sm:$0xff]  }
 0xb25   : > { %v9694_v48 = vpack.c.bf16 %v9668_v7, %v9667_v55  ;;  %v9429_v9 = vadd.f32 %v13427_v33, %v19387_v4  ;;  %v9973_v0 = vshll.u32 %v19516_v62, 16  ;;  %v9732_v40 = vor.u32 %v9730_v8, %v9729_v3  ;;  %v14321_v45 = vld [vmem:[%s20452_s3 + $0xa0] sm:$0xff]   ;;  %13616 = vmatprep.subr.bf16.mxu1 %v14320_v1 }
 0xb26   : > { %v9693_v21 = vpack.c.bf16 %v9666_v63, %v9665_v27  ;;  %v13962_v56 = vpop.f32.mrb[220].mxu1  ;;  %v19543_v30 = vsel %vm14512_vm2, 0, %v9725_v16  ;;  %v19547_v50 = vsel %vm507_vm3, %v9959_v49, %v9963_v47  ;;  %v19559_v8 = vsel %vm14512_vm2, %v9729_v3, 0  ;;  %13617 = vmatpush3.bf16.msra.mxu1 %v14321_v45 }
 0xb27   : > { %v9741_v43 = vshrl.u32 %v9694_v48, 16  ;;  %v9587_v41 = vadd.f32 %v13962_v56, %v9426_v31  ;;  %v9578_v25 = vpop.f32.mrb[221].mxu1  ;;  %10243 = vrot.lane.b32.xlu0 %v19543_v30, %s14434_s22  ;;  %v13428_v4 = vpop.f32.mrb[176].mxu0  ;;  %10133 = vrot.lane.b32.xlu1 %v19547_v50, %s14434_s22  ;;  %v9971_v10 = vor.u32 %v9970_v19, %v9966_v6  ;;  %v19566_v29 = vsel %vm14512_vm2, %v9722_v38, 0  ;;  %v14323_v19 = vld [vmem:[%s20452_s3 + $0xa8] sm:$0xff]  }
 0xb28   : > { %v9734_v35 = vshrl.u32 %v9693_v21, 16  ;;  %v9579_v14 = vadd.f32 %v9578_v25, %v19502_v24  ;;  %v13963_v60 = vpop.f32.mrb[222].mxu1  ;;  %v13429_v37 = vpop.f32.mrb[177].mxu0  ;;  %v9737_v55 = vshll.u32 %v9693_v21, 16  ;;  %v9975_v33 = vrot.slane %v9973_v0, 1  ;;  %v14322_v21 = vld [vmem:[%s20452_s3 + $0xe8] sm:$0xff]  }
 0xb29   : > { %v9743_v12 = vrot.slane %v9741_v43, 7  ;;  %v9590_v52 = vadd.f32 %v13963_v60, %v9429_v9  ;;  %v13430_v39 = vadd.f32 %v13429_v37, %v13428_v4  ;;  %v9581_v15 = vpop.f32.mrb[223].mxu1  ;;  %v13431_v46 = vpop.f32.mrb[178].mxu0  ;;  %v9744_v24 = vshll.u32 %v9694_v48, 16  ;;  %13618 = vmatprep.subr.bf16.mxu1 %v14322_v21 }
 0xb2a   : > { %v9736_v3 = vrot.slane %v9734_v35, 7  ;;  %v9582_v7 = vadd.f32 %v9581_v15, %v19512_v17  ;;  %v13432_v16 = vpop.f32.mrb[179].mxu0  ;;  %v9671_v27 = vmax.f32 %v9587_v41, 0.0  ;;  %v9669_v38 = vmax.f32 %v9579_v14, 0.0  ;;  %13619 = vmatpush3.bf16.msra.mxu1 %v14323_v19 }
 0xb2b   : > { %v9672_v6 = vmax.f32 %v9590_v52, 0.0  ;;  %v13433_v63 = vadd.f32 %v13432_v16, %v13431_v46  ;;  %v19570_v47 = vsel %vm507_vm3, %v9971_v10, %v9975_v33  ;;  %v9746_v9 = vor.u32 %v9744_v24, %v9743_v12 }
 0xb2c   : > { %v9739_v31 = vor.u32 %v9737_v55, %v9736_v3  ;;  %v9670_v49 = vmax.f32 %v9582_v7, 0.0  ;;  %10135 = vrot.lane.b32.xlu1 %v19570_v47, %s14434_s22  ;;  %v19576_v17 = vsel %vm14512_vm2, 0, %v9732_v40  ;;  %v9980_v48 = vshll.u32 %v19543_v30, 16 }
 0xb2d   : > { %v9696_v56 = vpack.c.bf16 %v9672_v6, %v9671_v27  ;;  %10245 = vrot.lane.b32.xlu0 %v19576_v17, %s14434_s22  ;;  %v9978_v41 = vshrl.u32 %v19543_v30, 16  ;;  %v9985_v40 = vshll.u32 %v19566_v29, 16  ;;  %v9434_v25 = vadd.f32 %v13430_v39, %v19395_v26 }
 0xb2e   : > { %v9695_v0 = vpack.c.bf16 %v9670_v49, %v9669_v38  ;;  %v13966_v43 = vpop.f32.mrb[224].mxu1  ;;  %v9982_v1 = vrot.slane %v9980_v48, 1  ;;  %v19592_v35 = vsel %vm14512_vm2, 0, %v9739_v31  ;;  %v9437_v60 = vadd.f32 %v13433_v63, %v19397_v28 }
 0xb2f   : > { %v9755_v4 = vshrl.u32 %v9696_v56, 16  ;;  %v9594_v45 = vpop.f32.mrb[225].mxu1  ;;  %v13434_v14 = vpop.f32.mrb[180].mxu0  ;;  %v19597_v37 = vsel %vm14512_vm2, %v9743_v12, 0  ;;  %v19601_v10 = vsel %vm14512_vm2, %v9736_v3, 0  ;;  %v9987_v7 = vrot.slane %v9985_v40, 1 }
 0xb30   : > { %v9748_v26 = vshrl.u32 %v9695_v0, 16  ;;  %v9595_v52 = vadd.f32 %v9594_v45, %v9434_v25  ;;  %v13967_v39 = vpop.f32.mrb[226].mxu1  ;;  %v13435_v15 = vpop.f32.mrb[181].mxu0  ;;  %v9751_v46 = vshll.u32 %v9695_v0, 16  ;;  %v9983_v55 = vor.u32 %v9982_v1, %v9978_v41  ;;  %v14324_v12 = vld [vmem:[%s20452_s3 + $0xf0] sm:$0xff]   ;;  %v14327_v45 = vld [vmem:[%s20452_s3 + $0xb8] sm:$0xff]  }
 0xb31   : > { %v13436_v33 = vadd.f32 %v13435_v15, %v13434_v14  ;;  %v9597_v16 = vpop.f32.mrb[227].mxu1  ;;  %v13437_v28 = vpop.f32.mrb[182].mxu0  ;;  %v14325_v3 = vld [vmem:[%s20452_s3 + $0xb0] sm:$0xff]   ;;  %v9757_v24 = vrot.slane %v9755_v4, 7  ;;  %10247 = vrot.lane.b32.xlu0 %v19592_v35, %s14434_s22  ;;  %v9992_v63 = vshll.u32 %v19576_v17, 16  ;;  %v9758_v38 = vshll.u32 %v9696_v56, 16  ;;  %13620 = vmatprep.subr.bf16.mxu1 %v14324_v12 }
 0xb32   : > { %v19609_v27 = vrot.slane %v9748_v26, 7  ;;  %v9598_v6 = vadd.f32 %v9597_v16, %v9437_v60  ;;  %v13438_v31 = vpop.f32.mrb[183].mxu0  ;;  %v19615_v49 = vsel %vm507_vm3, %v9983_v55, %v9987_v7  ;;  %v9990_v21 = vshrl.u32 %v19576_v17, 16  ;;  %13621 = vmatpush3.bf16.msra.mxu1 %v14325_v3 }
 0xb33   : > { %v9442_v48 = vadd.f32 %v13436_v33, %v19399_v44  ;;  %10137 = vrot.lane.b32.xlu1 %v19615_v49, %s14434_s22  ;;  %v9673_v0 = vmax.f32 %v9595_v52, 0.0  ;;  %v9994_v40 = vrot.slane %v9992_v63, 1  ;;  %v9997_v56 = vshll.u32 %v19559_v8, 16  ;;  %v14326_v44 = vld [vmem:[%s20452_s3 + $0xf8] sm:$0xff]  }
 0xb34   : > { %v9753_v19 = vor.u32 %v9751_v46, %v19609_v27  ;;  %v9674_v41 = vmax.f32 %v9598_v6, 0.0  ;;  %v13439_v4 = vadd.f32 %v13438_v31, %v13437_v28  ;;  %v19625_v1 = vsel %vm14512_vm2, 0, %v9746_v9  ;;  %13622 = vmatprep.subr.bf16.mxu1 %v14326_v44 }
 0xb35   : > { %v9603_v25 = vadd.f32 %v13966_v43, %v9442_v48  ;;  %v9760_v14 = vor.u32 %v9758_v38, %v9757_v24  ;;  %v9995_v26 = vor.u32 %v9994_v40, %v9990_v21  ;;  %10249 = vrot.lane.b32.xlu0 %v19625_v1, %s14434_s22  ;;  %v10004_v52 = vshll.u32 %v19592_v35, 16 }
 0xb36   : > { %v9697_v60 = vpack.c.bf16 %v9674_v41, %v9673_v0  ;;  %v19635_v43 = vpop.f32.mrb[228].mxu1  ;;  %v19640_v9 = vsel %vm14512_vm2, %v9757_v24, 0  ;;  %v9999_v15 = vrot.slane %v9997_v56, 1  ;;  %v9445_v46 = vadd.f32 %v13439_v4, %v19401_v53  ;;  %13623 = vmatpush3.bf16.msra.mxu1 %v14327_v45 }
 0xb37   : > { %v10009_v55 = vshll.u32 %v19601_v10, 16  ;;  %v9610_v7 = vpop.f32.mrb[229].mxu1  ;;  %v13440_v33 = vpop.f32.mrb[184].mxu0  ;;  %v10002_v28 = vshrl.u32 %v19592_v35, 16  ;;  %v10006_v12 = vrot.slane %v10004_v52, 1  ;;  %v19647_v3 = vsel %vm14512_vm2, 0, %v9753_v19 }
 0xb38   : > { %v9762_v16 = vshrl.u32 %v9697_v60, 16  ;;  %v19649_v6 = vpop.f32.mrb[230].mxu1  ;;  %v13441_v24 = vpop.f32.mrb[185].mxu0  ;;  %v9675_v63 = vmax.f32 %v9603_v25, 0.0  ;;  %v19652_v53 = vsel %vm507_vm3, %v9995_v26, %v9999_v15  ;;  %v9606_v31 = vadd.f32 %v13967_v39, %v9445_v46 }
 0xb39   : > { %v13442_v38 = vadd.f32 %v13441_v24, %v13440_v33  ;;  %v9613_v48 = vpop.f32.mrb[231].mxu1  ;;  %v13443_v21 = vpop.f32.mrb[186].mxu0  ;;  %10139 = vrot.lane.b32.xlu1 %v19652_v53, %s14434_s22  ;;  %v10007_v41 = vor.u32 %v10006_v12, %v10002_v28  ;;  %v10011_v40 = vrot.slane %v10009_v55, 1  ;;  %10251 = vrot.lane.b32.xlu0 %v19647_v3, %s14434_s22  ;;  %v10016_v19 = vshll.u32 %v19625_v1, 16 }
 0xb3a   : > { %v9764_v0 = vrot.slane %v9762_v16, 7  ;;  %v13444_v56 = vpop.f32.mrb[187].mxu0  ;;  %v9676_v25 = vmax.f32 %v9606_v31, 0.0  ;;  %v10021_v39 = vshll.u32 %v19597_v37, 16  ;;  %v9765_v45 = vshll.u32 %v9697_v60, 16 }
 0xb3b   : > { %v9450_v4 = vadd.f32 %v13442_v38, %v19409_v32  ;;  %v13445_v44 = vadd.f32 %v13444_v56, %v13443_v21  ;;  %v19662_v26 = vsel %vm507_vm3, %v10007_v41, %v10011_v40  ;;  %v10014_v52 = vshrl.u32 %v19625_v1, 16 }
 0xb3c   : > { %20600 = vst [vmem:[#allocation7_spill] sm:$0xff] %v19662_v26  ;;  %v10018_v15 = vrot.slane %v10016_v19, 1  ;;  %v19668_v46 = vsel %vm14512_vm2, %v19609_v27, 0  ;;  %v9698_v55 = vpack.c.bf16 %v9676_v25, %v9675_v63  ;;  %v9767_v32 = vor.u32 %v9765_v45, %v9764_v0 }
 0xb3d   : > { %v9611_v33 = vadd.f32 %v9610_v7, %v9450_v4  ;;  %v9453_v16 = vadd.f32 %v13445_v44, %v19411_v58  ;;  %10141 = vrot.lane.b32.xlu1 %v19662_v26, %s14434_s22  ;;  %v19675_v28 = vsel %vm14512_vm2, 0, %v9760_v14  ;;  %v10028_v24 = vshll.u32 %v19647_v3, 16 }
 0xb3e   : > { %v10019_v60 = vor.u32 %v10018_v15, %v10014_v52  ;;  %v19677_v12 = vpop.f32.mrb[232].mxu1  ;;  %v9769_v31 = vshrl.u32 %v9698_v55, 16  ;;  %v10023_v27 = vrot.slane %v10021_v39, 1  ;;  %10253 = vrot.lane.b32.xlu0 %v19675_v28, %s14434_s22  ;;  %v10026_v58 = vshrl.u32 %v19647_v3, 16 }
 0xb3f   : > { %v9614_v38 = vadd.f32 %v9613_v48, %v9453_v16  ;;  %v19683_v7 = vpop.f32.mrb[233].mxu1  ;;  %v13446_v63 = vpop.f32.mrb[188].mxu0  ;;  %v9677_v21 = vmax.f32 %v9611_v33, 0.0  ;;  %v10030_v41 = vrot.slane %v10028_v24, 1  ;;  %v10033_v14 = vshll.u32 %v19668_v46, 16 }
 0xb40   : > { %v10193_v40 = vrot.slane %v19522_v57, 1  ;;  %v19687_v19 = vpop.f32.mrb[234].mxu1  ;;  %v13447_v56 = vpop.f32.mrb[189].mxu0  ;;  %v19690_v25 = vsel %vm507_vm3, %v10019_v60, %v10023_v27  ;;  %v10194_v4 = vrot.slane %v19499_v61, 1  ;;  %v9771_v52 = vrot.slane %v9769_v31, 7 }
 0xb41   : > { %20601 = vst [vmem:[#allocation8_spill] sm:$0xff] %v19690_v25  ;;  %v9678_v48 = vmax.f32 %v9614_v38, 0.0  ;;  %v13448_v39 = vadd.f32 %v13447_v56, %v13446_v63  ;;  %v19693_v44 = vpop.f32.mrb[235].mxu1  ;;  %v13449_v45 = vpop.f32.mrb[190].mxu0  ;;  %10143 = vrot.lane.b32.xlu1 %v19690_v25, %s14434_s22  ;;  %v10031_v15 = vor.u32 %v10030_v41, %v10026_v58  ;;  %v10035_v33 = vrot.slane %v10033_v14, 1 }
 0xb42   : > { %v13450_v16 = vpop.f32.mrb[191].mxu0  ;;  %v19698_v26 = vsel %vm764_vm4, %v10193_v40, %v10194_v4  ;;  %v9772_v38 = vshll.u32 %v9698_v55, 16  ;;  %v10040_v31 = vshll.u32 %v19675_v28, 16  ;;  %v10045_v58 = vshll.u32 %v19640_v9, 16 }
 0xb43   : > { %v9699_v24 = vpack.c.bf16 %v9678_v48, %v9677_v21  ;;  %v9458_v60 = vadd.f32 %v13448_v39, %v19413_v18  ;;  %v13451_v27 = vadd.f32 %v13450_v16, %v13449_v45  ;;  %v19702_v61 = vsel %vm507_vm3, %v10031_v15, %v10035_v33  ;;  %10287 = vrot.lane.b32.xlu0 %v19698_v26, %s14434_s22 }
 0xb44   : > { %20602 = vst [vmem:[#allocation9_spill] sm:$0xff] %v19702_v61  ;;  %v19711_v41 = vsel %vm14512_vm2, 0, %v9767_v32  ;;  %v19716_v55 = vsel %vm14512_vm2, %v9764_v0, 0  ;;  %v10038_v14 = vshrl.u32 %v19675_v28, 16  ;;  %v10042_v40 = vrot.slane %v10040_v31, 1 }
 0xb45   : > { %v9776_v63 = vshrl.u32 %v9699_v24, 16  ;;  %v9619_v21 = vadd.f32 %v19635_v43, %v9458_v60  ;;  %v9461_v18 = vadd.f32 %v13451_v27, %v19415_v11  ;;  %10145 = vrot.lane.b32.xlu1 %v19702_v61, %s14434_s22  ;;  %v9774_v56 = vor.u32 %v9772_v38, %v9771_v52 }
 0xb46   : > { %v19721_v48 = vpop.f32.mrb[236].mxu1  ;;  %v9779_v4 = vshll.u32 %v9699_v24, 16  ;;  %v10196_v11 = vrot.slane %v19509_v13, 1  ;;  %v10043_v0 = vor.u32 %v10042_v40, %v10038_v14  ;;  %v10047_v15 = vrot.slane %v10045_v58, 1 }
 0xb47   : > { %v19723_v43 = vrot.slane %v9776_v63, 7  ;;  %v9622_v32 = vadd.f32 %v19649_v6, %v9461_v18  ;;  %v13452_v39 = vpop.f32.mrb[192].mxu0  ;;  %v19727_v45 = vpop.f32.mrb[237].mxu1  ;;  %v10197_v33 = vrot.slane %v19516_v62, 1  ;;  %v10052_v60 = vshll.u32 %v19711_v41, 16 }
 0xb48   : > { %v13453_v16 = vpop.f32.mrb[193].mxu0  ;;  %v19731_v27 = vpop.f32.mrb[238].mxu1  ;;  %v9679_v38 = vmax.f32 %v9619_v21, 0.0  ;;  %v10050_v6 = vshrl.u32 %v19711_v41, 16  ;;  %v19739_v58 = vsel %vm507_vm3, %v10043_v0, %v10047_v15  ;;  %v19743_v62 = vsel %vm14512_vm2, 0, %v9774_v56 }
 0xb49   : > { %v9680_v31 = vmax.f32 %v9622_v32, 0.0  ;;  %v13454_v63 = vadd.f32 %v13453_v16, %v13452_v39  ;;  %v13455_v24 = vpop.f32.mrb[194].mxu0  ;;  %v19734_v18 = vpop.f32.mrb[239].mxu1  ;;  %10255 = vrot.lane.b32.xlu1 %v19711_v41, %s14434_s22  ;;  %v10054_v14 = vrot.slane %v10052_v60, 1  ;;  %v10057_v21 = vshll.u32 %v19716_v55, 16  ;;  %10147 = vrot.lane.b32.xlu0 %v19739_v58, %s14434_s22 }
 0xb4a   : > { %v13456_v40 = vpop.f32.mrb[195].mxu0  ;;  %v9781_v61 = vor.u32 %v9779_v4, %v19723_v43  ;;  %v19751_v0 = vsel %vm764_vm4, %v10196_v11, %v10197_v33  ;;  %v10200_v4 = vrot.slane %v19566_v29, 1  ;;  %v10064_v11 = vshll.u32 %v19743_v62, 16 }
 0xb4b   : > { %v9700_v32 = vpack.c.bf16 %v9680_v31, %v9679_v38  ;;  %v9466_v39 = vadd.f32 %v13454_v63, %v19429_v51  ;;  %v13457_v16 = vadd.f32 %v13456_v40, %v13455_v24  ;;  %v10055_v15 = vor.u32 %v10054_v14, %v10050_v6 }
 0xb4c   : > { %v19757_v38 = vsel %vm14512_vm2, %v9771_v52, 0  ;;  %v10059_v51 = vrot.slane %v10057_v21, 1  ;;  %v10199_v31 = vrot.slane %v19543_v30, 1  ;;  %v10062_v6 = vshrl.u32 %v19743_v62, 16 }
 0xb4d   : > { %v9783_v25 = vshrl.u32 %v9700_v32, 16  ;;  %v9627_v56 = vadd.f32 %v19683_v7, %v9466_v39  ;;  %v9469_v60 = vadd.f32 %v13457_v16, %v19431_v59  ;;  %10289 = vrot.lane.b32.xlu1 %v19751_v0, %s14434_s22  ;;  %v9786_v63 = vshll.u32 %v9700_v32, 16  ;;  %10257 = vrot.lane.b32.xlu0 %v19743_v62, %s14434_s22 }
 0xb4e   : > { %v19769_v7 = vsel %vm14512_vm2, 0, %v9781_v61  ;;  %v19772_v24 = vsel %vm507_vm3, %v10055_v15, %v10059_v51  ;;  %v10066_v29 = vrot.slane %v10064_v11, 1  ;;  %v10069_v14 = vshll.u32 %v19757_v38, 16 }
 0xb4f   : > { %v9785_v33 = vrot.slane %v9783_v25, 7  ;;  %v9630_v59 = vadd.f32 %v19693_v44, %v9469_v60  ;;  %v13458_v52 = vpop.f32.mrb[196].mxu0  ;;  %v9681_v21 = vmax.f32 %v9627_v56, 0.0  ;;  %v19779_v44 = vsel %vm764_vm4, %v10199_v31, %v10200_v4 }
 0xb50   : > { %v13459_v25 = vpop.f32.mrb[197].mxu0  ;;  %v10067_v61 = vor.u32 %v10066_v29, %v10062_v6  ;;  %v10076_v60 = vshll.u32 %v19769_v7, 16  ;;  %v10202_v31 = vrot.slane %v19576_v17, 1 }
 0xb51   : > { %v9682_v40 = vmax.f32 %v9630_v59, 0.0  ;;  %v13460_v32 = vadd.f32 %v13459_v25, %v13458_v52  ;;  %v13461_v39 = vpop.f32.mrb[198].mxu0  ;;  %v9788_v16 = vor.u32 %v9786_v63, %v9785_v33  ;;  %10149 = vrot.lane.b32.xlu1 %v19772_v24, %s14434_s22  ;;  %10291 = vrot.lane.b32.xlu0 %v19779_v44, %s14434_s22  ;;  %v19788_v63 = vsel %vm14512_vm2, %v19723_v43, 0 }
 0xb52   : > { %v13462_v15 = vpop.f32.mrb[199].mxu0  ;;  %v10071_v59 = vrot.slane %v10069_v14, 1  ;;  %v10078_v52 = vrot.slane %v10076_v60, 1  ;;  %v10203_v25 = vrot.slane %v19559_v8, 1  ;;  %v10074_v14 = vshrl.u32 %v19769_v7, 16 }
 0xb53   : > { %v9701_v51 = vpack.c.bf16 %v9682_v40, %v9681_v21  ;;  %v9474_v56 = vadd.f32 %v13460_v32, %v19441_v2  ;;  %v13463_v11 = vadd.f32 %v13462_v15, %v13461_v39  ;;  %v19793_v4 = vsel %vm14512_vm2, 0, %v9788_v16 }
 0xb54   : > { %v19801_v43 = vsel %vm507_vm3, %v10067_v61, %v10071_v59  ;;  %v10081_v40 = vshll.u32 %v19788_v63, 16  ;;  %v10088_v39 = vshll.u32 %v19793_v4, 16  ;;  %v19814_v61 = vsel %vm764_vm4, %v10202_v31, %v10203_v25 }
 0xb55   : > { %v9790_v6 = vshrl.u32 %v9701_v51, 16  ;;  %v9635_v29 = vadd.f32 %v19677_v12, %v9474_v56  ;;  %v9477_v2 = vadd.f32 %v13463_v11, %v19443_v20  ;;  %v9793_v21 = vshll.u32 %v9701_v51, 16  ;;  %10259 = vrot.lane.b32.xlu1 %v19769_v7, %s14434_s22  ;;  %20603 = vst [vmem:[#allocation11_spill] sm:$0xff] %v19801_v43  ;;  %10151 = vrot.lane.b32.xlu0 %v19801_v43, %s14434_s22 }
 0xb56   : > { %v19810_v20 = vsel %vm14512_vm2, %v9785_v33, 0  ;;  %v10079_v15 = vor.u32 %v10078_v52, %v10074_v14  ;;  %v10205_v51 = vrot.slane %v19592_v35, 1  ;;  %v10083_v33 = vrot.slane %v10081_v40, 1 }
 0xb57   : > { %v9792_v32 = vrot.slane %v9790_v6, 7  ;;  %v9638_v12 = vadd.f32 %v19687_v19, %v9477_v2  ;;  %v13464_v8 = vpop.f32.mrb[200].mxu0  ;;  %v9683_v16 = vmax.f32 %v9635_v29, 0.0  ;;  %v10090_v6 = vrot.slane %v10088_v39, 1 }
 0xb58   : > { %v13465_v60 = vpop.f32.mrb[201].mxu0  ;;  %v10086_v43 = vshrl.u32 %v19793_v4, 16  ;;  %v10093_v29 = vshll.u32 %v19810_v20, 16  ;;  %v10206_v52 = vrot.slane %v19601_v10, 1 }
 0xb59   : > { %v9684_v56 = vmax.f32 %v9638_v12, 0.0  ;;  %v13466_v11 = vadd.f32 %v13465_v60, %v13464_v8  ;;  %v13467_v59 = vpop.f32.mrb[202].mxu0  ;;  %v9795_v19 = vor.u32 %v9793_v21, %v9792_v32  ;;  %10293 = vrot.lane.b32.xlu1 %v19814_v61, %s14434_s22  ;;  %10261 = vrot.lane.b32.xlu0 %v19793_v4, %s14434_s22  ;;  %v19830_v8 = vsel %vm507_vm3, %v10079_v15, %v10083_v33 }
 0xb5a   : > { %v13468_v2 = vpop.f32.mrb[203].mxu0  ;;  %v10091_v12 = vor.u32 %v10090_v6, %v10086_v43  ;;  %v19833_v39 = vsel %vm764_vm4, %v10205_v51, %v10206_v52  ;;  %v10095_v10 = vrot.slane %v10093_v29, 1  ;;  %v19841_v43 = vsel %vm14512_vm2, %v9792_v32, 0 }
 0xb5b   : > { %v9702_v31 = vpack.c.bf16 %v9684_v56, %v9683_v16  ;;  %v13469_v25 = vadd.f32 %v13468_v2, %v13467_v59  ;;  %v9482_v14 = vadd.f32 %v13466_v11, %v19451_v54  ;;  %v19827_v21 = vsel %vm14512_vm2, 0, %v9795_v19 }
 0xb5c   : > { %v10100_v60 = vshll.u32 %v19827_v21, 16  ;;  %v10098_v2 = vshrl.u32 %v19827_v21, 16  ;;  %v10105_v29 = vshll.u32 %v19841_v43, 16 }
 0xb5d   : > { %v9797_v40 = vshrl.u32 %v9702_v31, 16  ;;  %v9643_v16 = vadd.f32 %v19727_v45, %v9482_v14  ;;  %10153 = vrot.lane.b32.xlu1 %v19830_v8, %s14434_s22  ;;  %v9485_v54 = vadd.f32 %v13469_v25, %v19453_v36  ;;  %v9800_v15 = vshll.u32 %v9702_v31, 16  ;;  %10295 = vrot.lane.b32.xlu0 %v19833_v39, %s14434_s22 }
 0xb5e   : > { %v19847_v45 = vsel %vm507_vm3, %v10091_v12, %v10095_v10  ;;  %v10208_v36 = vrot.slane %v19625_v1, 1  ;;  %v10102_v6 = vrot.slane %v10100_v60, 1  ;;  %v10209_v25 = vrot.slane %v19597_v37, 1 }
 0xb5f   : > { %v9799_v56 = vrot.slane %v9797_v40, 7  ;;  %v13470_v51 = vpop.f32.mrb[204].mxu0  ;;  %v9646_v11 = vadd.f32 %v19734_v18, %v9485_v54  ;;  %v9685_v31 = vmax.f32 %v9643_v16, 0.0  ;;  %v10211_v60 = vrot.slane %v19647_v3, 1 }
 0xb60   : > { %v13471_v59 = vpop.f32.mrb[205].mxu0  ;;  %v10103_v10 = vor.u32 %v10102_v6, %v10098_v2 }
 0xb61   : > { %v13472_v19 = vadd.f32 %v13471_v59, %v13470_v51  ;;  %v13473_v32 = vpop.f32.mrb[206].mxu0  ;;  %v9802_v33 = vor.u32 %v9800_v15, %v9799_v56  ;;  %10263 = vrot.lane.b32.xlu1 %v19827_v21, %s14434_s22  ;;  %v9686_v52 = vmax.f32 %v9646_v11, 0.0  ;;  %v19858_v18 = vsel %vm14512_vm2, %v9799_v56, 0  ;;  %10155 = vrot.lane.b32.xlu0 %v19847_v45, %s14434_s22 }
 0xb62   : > { %v13474_v14 = vpop.f32.mrb[207].mxu0  ;;  %v19871_v56 = vsel %vm764_vm4, %v10208_v36, %v10209_v25  ;;  %v10107_v11 = vrot.slane %v10105_v29, 1 }
 0xb63   : > { %v9490_v12 = vadd.f32 %v13472_v19, %v19463_v34  ;;  %v13475_v40 = vadd.f32 %v13474_v14, %v13473_v32  ;;  %v19865_v16 = vsel %vm14512_vm2, 0, %v9802_v33  ;;  %v9703_v54 = vpack.c.bf16 %v9686_v52, %v9685_v31 }
 0xb64   : > { %v10112_v37 = vshll.u32 %v19865_v16, 16  ;;  %v10110_v59 = vshrl.u32 %v19865_v16, 16  ;;  %v10117_v19 = vshll.u32 %v19858_v18, 16  ;;  %v10212_v33 = vrot.slane %v19668_v46, 1 }
 0xb65   : > { %v9651_v15 = vadd.f32 %v19721_v48, %v9490_v12  ;;  %v9493_v51 = vadd.f32 %v13475_v40, %v19471_v22  ;;  %v9804_v34 = vshrl.u32 %v9703_v54, 16  ;;  %10297 = vrot.lane.b32.xlu1 %v19871_v56, %s14434_s22  ;;  %10265 = vrot.lane.b32.xlu0 %v19865_v16, %s14434_s22  ;;  %v19882_v48 = vsel %vm507_vm3, %v10103_v10, %v10107_v11 }
 0xb66   : > { %v10114_v6 = vrot.slane %v10112_v37, 1  ;;  %v9807_v22 = vshll.u32 %v9703_v54, 16  ;;  %v10119_v14 = vrot.slane %v10117_v19, 1  ;;  %v10214_v54 = vrot.slane %v19675_v28, 1 }
 0xb67   : > { %v9654_v32 = vadd.f32 %v19731_v27, %v9493_v51  ;;  %v9806_v36 = vrot.slane %v9804_v34, 7  ;;  %v9687_v29 = vmax.f32 %v9651_v15, 0.0  ;;  %v19892_v27 = vsel %vm764_vm4, %v10211_v60, %v10212_v33 }
 0xb68   : > { %v10115_v2 = vor.u32 %v10114_v6, %v10110_v59  ;;  %v10215_v15 = vrot.slane %v19640_v9, 1  ;;  %v10217_v33 = vrot.slane %v19711_v41, 1 }
 0xb69   : > { %v9688_v31 = vmax.f32 %v9654_v32, 0.0  ;;  %v9809_v52 = vor.u32 %v9807_v22, %v9806_v36  ;;  %v19887_v25 = vsel %vm14512_vm2, %v9806_v36, 0  ;;  %10157 = vrot.lane.b32.xlu1 %v19882_v48, %s14434_s22  ;;  %10299 = vrot.lane.b32.xlu0 %v19892_v27, %s14434_s22 }
 0xb6a   : > { %v19897_v46 = vsel %vm507_vm3, %v10115_v2, %v10119_v14  ;;  %v10129_v60 = vshll.u32 %v19887_v25, 16  ;;  %v19913_v6 = vsel %vm764_vm4, %v10214_v54, %v10215_v15  ;;  %v10218_v2 = vrot.slane %v19716_v55, 1 }
 0xb6b   : > { %v9704_v12 = vpack.c.bf16 %v9688_v31, %v9687_v29  ;;  %v19901_v40 = vsel %vm14512_vm2, 0, %v9809_v52  ;;  %v10220_v29 = vrot.slane %v19743_v62, 1  ;;  %v10221_v52 = vrot.slane %v19757_v38, 1 }
 0xb6c   : > { %v10124_v37 = vshll.u32 %v19901_v40, 16  ;;  %v10122_v34 = vshrl.u32 %v19901_v40, 16  ;;  %v10131_v36 = vrot.slane %v10129_v60, 1  ;;  %v19932_v31 = vsel %vm764_vm4, %v10217_v33, %v10218_v2 }
 0xb6d   : > { %v9811_v10 = vshrl.u32 %v9704_v12, 16  ;;  %10267 = vrot.lane.b32.xlu1 %v19901_v40, %s14434_s22  ;;  %v9814_v11 = vshll.u32 %v9704_v12, 16  ;;  %10159 = vrot.lane.b32.xlu0 %v19897_v46, %s14434_s22  ;;  %v10223_v14 = vrot.slane %v19769_v7, 1  ;;  %v10224_v55 = vrot.slane %v19788_v63, 1 }
 0xb6e   : > { %v10126_v59 = vrot.slane %v10124_v37, 1  ;;  %v10226_v54 = vrot.slane %v19793_v4, 1  ;;  %v10227_v60 = vrot.slane %v19810_v20, 1  ;;  %v10229_v15 = vrot.slane %v19827_v21, 1 }
 0xb6f   : > { %v9813_v51 = vrot.slane %v9811_v10, 7  ;;  %v19940_v10 = vsel %vm764_vm4, %v10220_v29, %v10221_v52  ;;  %v19949_v37 = vsel %vm764_vm4, %v10223_v14, %v10224_v55  ;;  %v10230_v63 = vrot.slane %v19841_v43, 1 }
 0xb70   : > { %v10127_v32 = vor.u32 %v10126_v59, %v10122_v34  ;;  %v19957_v34 = vsel %vm764_vm4, %v10226_v54, %v10227_v60  ;;  %v10232_v59 = vrot.slane %v19865_v16, 1  ;;  %v10235_v33 = vrot.slane %v19901_v40, 1  ;;  %v14328_v60 = vld [vmem:[%s20452_s3 + $0x108] sm:$0xff]  }
 0xb71   : > { %v9816_v19 = vor.u32 %v9814_v11, %v9813_v51  ;;  %10301 = vrot.lane.b32.xlu1 %v19913_v6, %s14434_s22  ;;  %v9880_v38 = vsel %vm14512_vm2, %v9813_v51, 0  ;;  %v19964_v20 = vsel %vm764_vm4, %v10229_v15, %v10230_v63  ;;  %v10236_v29 = vrot.slane %v19887_v25, 1  ;;  %v14336_v15 = vld [vmem:[%s20452_s3 + $0x100] sm:$0xff]  }
 0xb72   : > { %v19922_v22 = vsel %vm507_vm3, %v10127_v32, %v10131_v36  ;;  %v10279_v51 = vshll.u32 %v9880_v38, 16  ;;  %v10285_v14 = vrot.slane %v9880_v38, 1 }
 0xb73   : > { %v19919_v9 = vsel %vm14512_vm2, 0, %v9816_v19  ;;  %v10233_v19 = vrot.slane %v19858_v18, 1  ;;  %v19983_v52 = vsel %vm764_vm4, %v10235_v33, %v10236_v29 }
 0xb74   : > { %10269 = vrot.lane.b32.xlu0 %v19919_v9, %s14434_s22  ;;  %v10274_v12 = vshll.u32 %v19919_v9, 16  ;;  %v10272_v23 = vshrl.u32 %v19919_v9, 16  ;;  %v10281_v36 = vrot.slane %v10279_v51, 1  ;;  %v10284_v18 = vrot.slane %v19919_v9, 1 }
 0xb75   : > { %10161 = vrot.lane.b32.xlu1 %v19922_v22, %s14434_s22  ;;  %v19970_v43 = vsel %vm764_vm4, %v10232_v59, %v10233_v19 }
 0xb76   : > { %v10276_v11 = vrot.slane %v10274_v12, 1  ;;  %v19988_v12 = vsel %vm764_vm4, %v10284_v18, %v10285_v14 }
 0xb78   : > { %10303 = vrot.lane.b32.xlu0 %v19932_v31, %s14434_s22  ;;  %v10277_v32 = vor.u32 %v10276_v11, %v10272_v23  ;;  %v14329_v11 = vld [vmem:[%s20452_s3 + $0x110] sm:$0xff]   ;;  %v14330_v23 = vld [vmem:[%s20452_s3 + $0x118] sm:$0xff]  }
 0xb79   : > { %10305 = vrot.lane.b32.xlu1 %v19940_v10, %s14434_s22 }
 0xb7a   : > { %v19976_v2 = vsel %vm507_vm3, %v10277_v32, %v10281_v36 }
 0xb7c   : > { %10307 = vrot.lane.b32.xlu0 %v19949_v37, %s14434_s22 }
 0xb7d   : > { %10309 = vrot.lane.b32.xlu1 %v19957_v34, %s14434_s22 }
 0xb80   : > { %10311 = vrot.lane.b32.xlu0 %v19964_v20, %s14434_s22 }
 0xb81   : > { %10313 = vrot.lane.b32.xlu1 %v19970_v43, %s14434_s22 }
 0xb84   : > { %10319 = vrot.lane.b32.xlu0 %v19976_v2, %s14434_s22 }
 0xb85   : > { %10315 = vrot.lane.b32.xlu1 %v19983_v52, %s14434_s22 }
 0xb88   : > { %10317 = vrot.lane.b32.xlu0 %v19988_v12, %s14434_s22 }
 0xb90   : > { %v10242_v55 = vpop.permute.xlu0 %10241 }
 0xb91   : > { %v10240_v25 = vpop.permute.xlu1 %10239  ;;  %v10371_v38 = vsel %vm896_vm5, %v19698_v26, %v10242_v55 }
 0xb92   : > { %v10367_v54 = vsel %vm896_vm5, %v15032_v42, %v10240_v25 }
 0xb93   : > { %10775 = vmatprep.mubr.bf16.mxu0 %v10367_v54 }
 0xb94   : > { %10776 = vmatmul.mubr.bf16.vlgmr.msra.gmra.mrb[208].mxu0 %v15042_v5 }
 0xb95   : > { %13981 = vmatpush3.bf16.msra.mxu0 %v14336_v15  ;;  %10783 = vmatprep.mubr.bf16.mxu0 %v10371_v38 }
 0xb96   : > { %13982 = vmatprep.subr.bf16.mxu0 %v14328_v60 }
 0xb99   : > { %v10244_v63 = vpop.permute.xlu0 %10243  ;;  %13983 = vmatpush3.bf16.msra.mxu0 %v14328_v60  ;;  %v10134_v59 = vpop.permute.xlu1 %10133 }
 0xb9a   : > { %13984 = vmatprep.subr.bf16.mxu0 %v14329_v11  ;;  %v10322_v26 = vsel %vm896_vm5, %v19522_v57, %v10134_v59  ;;  %v10375_v51 = vsel %vm896_vm5, %v19751_v0, %v10244_v63 }
 0xb9c   : > { %10784 = vmatmul.mubr.bf16.gmra.mrb[212].mxu0 %v10322_v26 }
 0xb9d   : > { %10791 = vmatprep.mubr.bf16.mxu0 %v10375_v51  ;;  %13985 = vmatpush3.bf16.msra.mxu0 %v14329_v11 }
 0xb9e   : > { %13986 = vmatprep.subr.bf16.mxu0 %v14330_v23  ;;  %v10136_v19 = vpop.permute.xlu1 %10135 }
 0xb9f   : > { %v10246_v32 = vpop.permute.xlu0 %10245  ;;  %v10325_v36 = vsel %vm896_vm5, %v19509_v13, %v10136_v19 }
 0xba0   : > { %10936 = vmatprep.mubr.bf16.mxu1 %v10325_v36  ;;  %v10379_v29 = vsel %vm896_vm5, %v19779_v44, %v10246_v32 }
 0xba1   : > { %13987 = vmatpush3.bf16.msra.mxu0 %v14330_v23 }
 0xba3   : > { %v10248_v33 = vpop.permute.xlu0 %10247 }
 0xba4   : > { %10792 = vmatmul.mubr.bf16.gmra.mrb[216].mxu0 %v10325_v36  ;;  %v10383_v54 = vsel %vm896_vm5, %v19814_v61, %v10248_v33 }
 0xba5   : > { %10799 = vmatprep.mubr.bf16.mxu0 %v10379_v29  ;;  %v10138_v57 = vpop.permute.xlu1 %10137 }
 0xba6   : > { %v10328_v14 = vsel %vm896_vm5, %v19543_v30, %v10138_v57 }
 0xba7   : > { %v10250_v18 = vpop.permute.xlu0 %10249 }
 0xba8   : > { %v10387_v11 = vsel %vm896_vm5, %v19833_v39, %v10250_v18 }
 0xbab   : > { %v10140_v55 = vpop.permute.xlu1 %10139  ;;  %v10252_v25 = vpop.permute.xlu0 %10251 }
 0xbac   : > { %10800 = vmatmul.mubr.bf16.gmra.mrb[220].mxu0 %v10328_v14  ;;  %v10331_v38 = vsel %vm896_vm5, %v19576_v17, %v10140_v55  ;;  %v10391_v17 = vsel %vm896_vm5, %v19871_v56, %v10252_v25 }
 0xbad   : > { %10807 = vmatprep.mubr.bf16.mxu0 %v10383_v54 }
 0xbaf   : > { %v10142_v13 = vpop.permute.xlu1 %10141 }
 0xbb0   : > { %v10254_v60 = vpop.permute.xlu0 %10253  ;;  %v10334_v23 = vsel %vm896_vm5, %v19592_v35, %v10142_v13 }
 0xbb1   : > { %v10395_v35 = vsel %vm896_vm5, %v19892_v27, %v10254_v60 }
 0xbb3   : > { %v10144_v15 = vpop.permute.xlu1 %10143 }
 0xbb4   : > { %10808 = vmatmul.mubr.bf16.gmra.mrb[224].mxu0 %v10331_v38 }
 0xbb5   : > { %10815 = vmatprep.mubr.bf16.mxu0 %v10387_v11  ;;  %v10288_v63 = vpop.permute.xlu0 %10287 }
 0xbb6   : > { %v10431_v30 = vsel %vm896_vm5, %v19547_v50, %v10288_v63  ;;  %v10337_v50 = vsel %vm896_vm5, %v19625_v1, %v10144_v15  ;;  %v20604_v15 = vld [vmem:[#allocation7_spill] sm:$0xff] }
 0xbb7   : > { %v10146_v59 = vpop.permute.xlu1 %10145  ;;  %10937 = vmatmul.mubr.bf16.vlgmr.msra.gmra.mrb[240].mxu1 %v10431_v30 }
 0xbb8   : > { %10944 = vmatprep.mubr.bf16.mxu1 %v10328_v14 }
 0xbbb   : > { %v10256_v26 = vpop.permute.xlu1 %10255  ;;  %v10148_v51 = vpop.permute.xlu0 %10147 }
 0xbbc   : > { %10816 = vmatmul.mubr.bf16.gmra.mrb[228].mxu0 %v10334_v23  ;;  %v10399_v1 = vsel %vm896_vm5, %v19913_v6, %v10256_v26 }
 0xbbd   : > { %10823 = vmatprep.mubr.bf16.mxu0 %v10391_v17 }
 0xbbf   : > { %v10290_v19 = vpop.permute.xlu1 %10289  ;;  %v10258_v36 = vpop.permute.xlu0 %10257 }
 0xbc0   : > { %v10435_v32 = vsel %vm896_vm5, %v19570_v47, %v10290_v19  ;;  %v10340_v47 = vsel %vm896_vm5, %v19647_v3, %v10146_v59  ;;  %v10403_v3 = vsel %vm896_vm5, %v19932_v31, %v10258_v36  ;;  %v20606_v36 = vld [vmem:[#allocation9_spill] sm:$0xff] }
 0xbc1   : > { %10945 = vmatmul.mubr.bf16.gmra.mrb[244].mxu1 %v10435_v32 }
 0xbc2   : > { %10952 = vmatprep.mubr.bf16.mxu1 %v10331_v38 }
 0xbc3   : > { %v10150_v33 = vpop.permute.xlu1 %10149  ;;  %v10292_v29 = vpop.permute.xlu0 %10291 }
 0xbc4   : > { %10824 = vmatmul.mubr.bf16.gmra.mrb[232].mxu0 %v10337_v50  ;;  %v10439_v18 = vsel %vm896_vm5, %v19615_v49, %v10292_v29  ;;  %v10343_v49 = vsel %vm896_vm5, %v19675_v28, %v10148_v51 }
 0xbc5   : > { %10831 = vmatprep.mubr.bf16.mxu0 %v10395_v35 }
 0xbc7   : > { %v10260_v57 = vpop.permute.xlu1 %10259  ;;  %v10152_v14 = vpop.permute.xlu0 %10151 }
 0xbc8   : > { %v10407_v28 = vsel %vm896_vm5, %v19940_v10, %v10260_v57  ;;  %v10349_v17 = vsel %vm896_vm5, %v19743_v62, %v10152_v14 }
 0xbc9   : > { %10953 = vmatmul.mubr.bf16.gmra.mrb[248].mxu1 %v10439_v18 }
 0xbca   : > { %10960 = vmatprep.mubr.bf16.mxu1 %v10334_v23  ;;  %v20605_v23 = vld [vmem:[#allocation8_spill] sm:$0xff] }
 0xbcb   : > { %v10294_v55 = vpop.permute.xlu1 %10293  ;;  %v10262_v25 = vpop.permute.xlu0 %10261 }
 0xbcc   : > { %10832 = vmatmul.mubr.bf16.gmra.mrb[236].mxu0 %v10340_v47  ;;  %v10443_v54 = vsel %vm896_vm5, %v19652_v53, %v10294_v55  ;;  %v10346_v53 = vsel %vm896_vm5, %v19711_v41, %v10150_v33  ;;  %v10411_v41 = vsel %vm896_vm5, %v19949_v37, %v10262_v25 }
 0xbcd   : > { %10839 = vmatprep.mubr.bf16.mxu0 %v10399_v1 }
 0xbcf   : > { %v10154_v13 = vpop.permute.xlu1 %10153  ;;  %v10296_v60 = vpop.permute.xlu0 %10295 }
 0xbd0   : > { %v10447_v11 = vsel %vm896_vm5, %v20604_v15, %v10296_v60  ;;  %v10352_v33 = vsel %vm896_vm5, %v19769_v7, %v10154_v13 }
 0xbd1   : > { %10961 = vmatmul.mubr.bf16.gmra.mrb[252].mxu1 %v10443_v54  ;;  %v20607_v54 = vld [vmem:[#allocation11_spill] sm:$0xff] }
 0xbd2   : > { %10968 = vmatprep.mubr.bf16.mxu1 %v10337_v50 }
 0xbd3   : > { %v10264_v38 = vpop.permute.xlu1 %10263  ;;  %v10156_v63 = vpop.permute.xlu0 %10155 }
 0xbd4   : > { %10840 = vmatmul.mubr.bf16.gmra.mrb[240].mxu0 %v10343_v49  ;;  %v10415_v62 = vsel %vm896_vm5, %v19957_v34, %v10264_v38 }
 0xbd5   : > { %10847 = vmatprep.mubr.bf16.mxu0 %v10403_v3 }
 0xbd7   : > { %v10298_v30 = vpop.permute.xlu1 %10297  ;;  %v10266_v59 = vpop.permute.xlu0 %10265 }
 0xbd8   : > { %v10451_v26 = vsel %vm896_vm5, %v20605_v23, %v10298_v30  ;;  %v10419_v7 = vsel %vm896_vm5, %v19964_v20, %v10266_v59 }
 0xbd9   : > { %10969 = vmatmul.mubr.bf16.gmra.mrb[0].mxu1 %v10447_v11 }
 0xbda   : > { %10976 = vmatprep.mubr.bf16.mxu1 %v10340_v47  ;;  %v10355_v47 = vsel %vm896_vm5, %v19793_v4, %v10156_v63 }
 0xbdb   : > { %v10158_v51 = vpop.permute.xlu1 %10157  ;;  %v10300_v19 = vpop.permute.xlu0 %10299 }
 0xbdc   : > { %10848 = vmatmul.mubr.bf16.gmra.mrb[244].mxu0 %v10346_v53  ;;  %v10455_v50 = vsel %vm896_vm5, %v20606_v36, %v10300_v19  ;;  %v10358_v25 = vsel %vm896_vm5, %v19827_v21, %v10158_v51 }
 0xbdd   : > { %10855 = vmatprep.mubr.bf16.mxu0 %v10407_v28 }
 0xbdf   : > { %v10268_v32 = vpop.permute.xlu1 %10267  ;;  %v10160_v35 = vpop.permute.xlu0 %10159 }
 0xbe0   : > { %v10361_v13 = vsel %vm896_vm5, %v19865_v16, %v10160_v35 }
 0xbe1   : > { %10977 = vmatmul.mubr.bf16.gmra.mrb[4].mxu1 %v10451_v26 }
 0xbe2   : > { %10984 = vmatprep.mubr.bf16.mxu1 %v10343_v49 }
 0xbe3   : > { %v10302_v29 = vpop.permute.xlu1 %10301 }
 0xbe4   : > { %10856 = vmatmul.mubr.bf16.gmra.mrb[248].mxu0 %v10349_v17  ;;  %v10459_v18 = vsel %vm896_vm5, %v19739_v58, %v10302_v29  ;;  %v10423_v58 = vsel %vm896_vm5, %v19970_v43, %v10268_v32 }
 0xbe5   : > { %10863 = vmatprep.mubr.bf16.mxu0 %v10411_v41 }
 0xbe6   : > { %v10270_v57 = vpop.permute.xlu0 %10269 }
 0xbe7   : > { %v10162_v1 = vpop.permute.xlu1 %10161 }
 0xbe8   : > { %v10364_v60 = vsel %vm896_vm5, %v19901_v40, %v10162_v1 }
 0xbe9   : > { %10985 = vmatmul.mubr.bf16.gmra.mrb[8].mxu1 %v10455_v50 }
 0xbea   : > { %10992 = vmatprep.mubr.bf16.mxu1 %v10346_v53  ;;  %v10304_v14 = vpop.permute.xlu0 %10303 }
 0xbeb   : > { %v10463_v55 = vsel %vm896_vm5, %v19772_v24, %v10304_v14  ;;  %v10306_v4 = vpop.permute.xlu1 %10305  ;;  %v10427_v24 = vsel %vm896_vm5, %v19983_v52, %v10270_v57 }
 0xbec   : > { %10864 = vmatmul.mubr.bf16.gmra.mrb[252].mxu0 %v10352_v33  ;;  %v10467_v49 = vsel %vm896_vm5, %v20607_v54, %v10306_v4 }
 0xbed   : > { %10871 = vmatprep.mubr.bf16.mxu0 %v10415_v62 }
 0xbee   : > { %v10308_v21 = vpop.permute.xlu0 %10307 }
 0xbef   : > { %v10471_v3 = vsel %vm896_vm5, %v19830_v8, %v10308_v21  ;;  %v10310_v16 = vpop.permute.xlu1 %10309 }
 0xbf0   : > { %v10475_v38 = vsel %vm896_vm5, %v19847_v45, %v10310_v16 }
 0xbf1   : > { %10993 = vmatmul.mubr.bf16.gmra.mrb[12].mxu1 %v10459_v18 }
 0xbf2   : > { %11000 = vmatprep.mubr.bf16.mxu1 %v10349_v17  ;;  %v10312_v8 = vpop.permute.xlu0 %10311 }
 0xbf3   : > { %v10479_v40 = vsel %vm896_vm5, %v19882_v48, %v10312_v8 }
 0xbf4   : > { %10872 = vmatmul.mubr.bf16.gmra.mrb[0].mxu0 %v10355_v47 }
 0xbf5   : > { %10879 = vmatprep.mubr.bf16.mxu0 %v10419_v7 }
 0xbf6   : > { %v10320_v45 = vpop.permute.xlu0 %10319 }
 0xbf9   : > { %11001 = vmatmul.mubr.bf16.gmra.mrb[16].mxu1 %v10463_v55 }
 0xbfa   : > { %11008 = vmatprep.mubr.bf16.mxu1 %v10352_v33  ;;  %v10318_v48 = vpop.permute.xlu0 %10317 }
 0xbfc   : > { %10880 = vmatmul.mubr.bf16.gmra.mrb[4].mxu0 %v10358_v25 }
 0xbfd   : > { %10887 = vmatprep.mubr.bf16.mxu0 %v10423_v58 }
 0xc01   : > { %11009 = vmatmul.mubr.bf16.gmra.mrb[20].mxu1 %v10467_v49 }
 0xc02   : > { %11016 = vmatprep.mubr.bf16.mxu1 %v10355_v47 }
 0xc04   : > { %10888 = vmatmul.mubr.bf16.gmra.mrb[8].mxu0 %v10361_v13 }
 0xc05   : > { %10895 = vmatprep.mubr.bf16.mxu0 %v10427_v24 }
 0xc09   : > { %11017 = vmatmul.mubr.bf16.gmra.mrb[24].mxu1 %v10471_v3 }
 0xc0a   : > { %11024 = vmatprep.mubr.bf16.mxu1 %v10358_v25 }
 0xc0c   : > { %10896 = vmatmul.mubr.bf16.gmra.mrb[12].mxu0 %v10364_v60 }
 0xc0d   : > { %13988 = vmatprep.mubr.msk.bf16.mxu0 %vm896_vm5, %v19751_v0  ;;  %v10314_v0 = vpop.permute.xlu1 %10313 }
 0xc11   : > { %11025 = vmatmul.mubr.bf16.gmra.mrb[28].mxu1 %v10475_v38 }
 0xc12   : > { %11032 = vmatprep.mubr.bf16.mxu1 %v10361_v13 }
 0xc14   : > { %13989 = vmatmul.mubr.msk.bf16.vlgmr.msra.gmra.mrb[16].mxu0 %vm896_vm5, %v19779_v44  ;;  %v10483_v44 = vsel %vm896_vm5, %v19897_v46, %v10314_v0 }
 0xc15   : > { %13992 = vmatprep.mubr.msk.bf16.mxu0 %vm896_vm5, %v19814_v61  ;;  %v10494_v61 = vsel %vm896_vm5, %v19919_v9, %v10320_v45 }
 0xc19   : > { %11033 = vmatmul.mubr.bf16.gmra.mrb[32].mxu1 %v10479_v40 }
 0xc1a   : > { %11040 = vmatprep.mubr.bf16.mxu1 %v10364_v60 }
 0xc1c   : > { %13993 = vmatmul.mubr.msk.bf16.gmra.mrb[20].mxu0 %vm896_vm5, %v19833_v39  ;;  %v10316_v39 = vpop.permute.xlu1 %10315 }
 0xc1d   : > { %13996 = vmatprep.mubr.msk.bf16.mxu0 %vm896_vm5, %v19871_v56  ;;  %v10487_v56 = vsel %vm896_vm5, %v19922_v22, %v10316_v39 }
 0xc21   : > { %11041 = vmatmul.mubr.bf16.gmra.mrb[36].mxu1 %v10483_v44 }
 0xc22   : > { %11048 = vmatprep.mubr.bf16.mxu1 %v10494_v61 }
 0xc24   : > { %13997 = vmatmul.mubr.msk.bf16.gmra.mrb[24].mxu0 %vm896_vm5, %v19892_v27  ;;  %v10491_v27 = vsel %vm896_vm5, %v19976_v2, %v10318_v48 }
 0xc25   : > { %14000 = vmatprep.mubr.msk.bf16.mxu0 %vm896_vm5, %v19913_v6 }
 0xc29   : > { %11049 = vmatmul.mubr.bf16.gmra.mrb[40].mxu1 %v10487_v56 }
 0xc2a   : > { %11056 = vmatprep.mubr.bf16.mxu1 %v15042_v5 }
 0xc2c   : > { %14001 = vmatmul.mubr.msk.bf16.gmra.mrb[28].mxu0 %vm896_vm5, %v19932_v31 }
 0xc2d   : > { %14004 = vmatprep.mubr.msk.bf16.mxu0 %vm896_vm5, %v19940_v10 }
 0xc31   : > { %11057 = vmatmul.mubr.bf16.gmra.mrb[44].mxu1 %v10491_v27 }
 0xc34   : > { %14005 = vmatmul.mubr.msk.bf16.gmra.mrb[32].mxu0 %vm896_vm5, %v19949_v37 }
 0xc35   : > { %14008 = vmatprep.mubr.msk.bf16.mxu0 %vm896_vm5, %v19957_v34 }
 0xc3c   : > { %14009 = vmatmul.mubr.msk.bf16.gmra.mrb[36].mxu0 %vm896_vm5, %v19964_v20 }
 0xc3d   : > { %14012 = vmatprep.mubr.msk.bf16.mxu0 %vm896_vm5, %v19970_v43 }
 0xc44   : > { %14013 = vmatmul.mubr.msk.bf16.gmra.mrb[40].mxu0 %vm896_vm5, %v19983_v52 }
 0xc45   : > { %14016 = vmatprep.mubr.msk.bf16.mxu0 %vm896_vm5, %v19988_v12 }
 0xc4c   : > { %14017 = vmatmul.mubr.msk.bf16.gmra.mrb[44].mxu0 %vm896_vm5, %v15032_v42 }
 0xc67   : > { %v13512_v5 = vpop.f32.mrb[208].mxu0 }
 0xc68   : > { %v13513_v46 = vpop.f32.mrb[209].mxu0 }
 0xc69   : > { %v13514_v6 = vadd.f32 %v13513_v46, %v13512_v5  ;;  %v13515_v9 = vpop.f32.mrb[210].mxu0 }
 0xc6a   : > { %v13516_v22 = vpop.f32.mrb[211].mxu0 }
 0xc6b   : > { %v13517_v31 = vadd.f32 %v13516_v22, %v13515_v9 }
 0xc6f   : > { %v13518_v10 = vpop.f32.mrb[212].mxu0 }
 0xc70   : > { %v13519_v37 = vpop.f32.mrb[213].mxu0 }
 0xc71   : > { %v13520_v34 = vadd.f32 %v13519_v37, %v13518_v10  ;;  %v13521_v20 = vpop.f32.mrb[214].mxu0 }
 0xc72   : > { %v13522_v43 = vpop.f32.mrb[215].mxu0 }
 0xc73   : > { %v13523_v2 = vadd.f32 %v13522_v43, %v13521_v20 }
 0xc77   : > { %v13524_v15 = vpop.f32.mrb[216].mxu0 }
 0xc78   : > { %v13525_v52 = vpop.f32.mrb[217].mxu0 }
 0xc79   : > { %v13526_v11 = vadd.f32 %v13525_v52, %v13524_v15  ;;  %v13527_v53 = vpop.f32.mrb[218].mxu0 }
 0xc7a   : > { %v13528_v12 = vpop.f32.mrb[219].mxu0 }
 0xc7b   : > { %v13529_v63 = vadd.f32 %v13528_v12, %v13527_v53 }
 0xc7f   : > { %v13530_v28 = vpop.f32.mrb[220].mxu0 }
 0xc80   : > { %v13531_v42 = vpop.f32.mrb[221].mxu0 }
 0xc81   : > { %v13532_v30 = vadd.f32 %v13531_v42, %v13530_v28  ;;  %v13533_v59 = vpop.f32.mrb[222].mxu0 }
 0xc82   : > { %v13534_v23 = vpop.f32.mrb[223].mxu0 }
 0xc83   : > { %v13535_v26 = vadd.f32 %v13534_v23, %v13533_v59 }
 0xc87   : > { %v13536_v17 = vpop.f32.mrb[224].mxu0 }
 0xc88   : > { %v13537_v51 = vpop.f32.mrb[225].mxu0 }
 0xc89   : > { %v20134_v41 = vadd.f32 %v13537_v51, %v13536_v17  ;;  %v13539_v19 = vpop.f32.mrb[226].mxu0 }
 0xc8a   : > { %v13540_v32 = vpop.f32.mrb[227].mxu0  ;;  %v13624_v36 = vpop.f32.mrb[240].mxu1 }
 0xc8b   : > { %v20136_v50 = vadd.f32 %v13540_v32, %v13539_v19  ;;  %v13625_v33 = vpop.f32.mrb[241].mxu1 }
 0xc8c   : > { %v13626_v35 = vadd.f32 %v13625_v33, %v13624_v36  ;;  %v13627_v62 = vpop.f32.mrb[242].mxu1 }
 0xc8d   : > { %v13628_v29 = vpop.f32.mrb[243].mxu1 }
 0xc8e   : > { %v13629_v57 = vadd.f32 %v13628_v29, %v13627_v62  ;;  %v20138_v47 = vadd.f32 %v13626_v35, %v13514_v6 }
 0xc8f   : > { %v13542_v18 = vpop.f32.mrb[228].mxu0 }
 0xc90   : > { %v13543_v7 = vpop.f32.mrb[229].mxu0  ;;  %v20142_v55 = vadd.f32 %v13629_v57, %v13517_v31 }
 0xc91   : > { %v20140_v14 = vadd.f32 %v13543_v7, %v13542_v18  ;;  %v13545_v1 = vpop.f32.mrb[230].mxu0 }
 0xc92   : > { %v13546_v25 = vpop.f32.mrb[231].mxu0 }
 0xc93   : > { %v20144_v58 = vadd.f32 %v13546_v25, %v13545_v1 }
 0xc94   : > { %v13630_v4 = vpop.f32.mrb[244].mxu1 }
 0xc95   : > { %v13631_v54 = vpop.f32.mrb[245].mxu1 }
 0xc96   : > { %v13632_v49 = vadd.f32 %v13631_v54, %v13630_v4  ;;  %v13633_v13 = vpop.f32.mrb[246].mxu1 }
 0xc97   : > { %v13548_v24 = vpop.f32.mrb[232].mxu0  ;;  %v13634_v21 = vpop.f32.mrb[247].mxu1 }
 0xc98   : > { %v13549_v3 = vpop.f32.mrb[233].mxu0  ;;  %v13635_v60 = vadd.f32 %v13634_v21, %v13633_v13  ;;  %v20148_v8 = vadd.f32 %v13632_v49, %v13520_v34 }
 0xc99   : > { %v20146_v16 = vadd.f32 %v13549_v3, %v13548_v24  ;;  %v13551_v38 = vpop.f32.mrb[234].mxu0 }
 0xc9a   : > { %v13552_v40 = vpop.f32.mrb[235].mxu0  ;;  %v20152_v45 = vadd.f32 %v13635_v60, %v13523_v2 }
 0xc9b   : > { %v20150_v0 = vadd.f32 %v13552_v40, %v13551_v38 }
 0xc9c   : > { %v13636_v44 = vpop.f32.mrb[248].mxu1 }
 0xc9d   : > { %v13637_v61 = vpop.f32.mrb[249].mxu1 }
 0xc9e   : > { %v13638_v39 = vadd.f32 %v13637_v61, %v13636_v44  ;;  %v13639_v56 = vpop.f32.mrb[250].mxu1 }
 0xc9f   : > { %v13554_v48 = vpop.f32.mrb[236].mxu0  ;;  %v13640_v27 = vpop.f32.mrb[251].mxu1 }
 0xca0   : > { %v13555_v5 = vpop.f32.mrb[237].mxu0  ;;  %v13641_v46 = vadd.f32 %v13640_v27, %v13639_v56  ;;  %v20156_v22 = vadd.f32 %v13638_v39, %v13526_v11 }
 0xca1   : > { %v20154_v6 = vadd.f32 %v13555_v5, %v13554_v48  ;;  %v13557_v9 = vpop.f32.mrb[238].mxu0 }
 0xca2   : > { %v13558_v31 = vpop.f32.mrb[239].mxu0  ;;  %v20160_v37 = vadd.f32 %v13641_v46, %v13529_v63 }
 0xca3   : > { %v20158_v10 = vadd.f32 %v13558_v31, %v13557_v9 }
 0xca4   : > { %v13642_v34 = vpop.f32.mrb[252].mxu1 }
 0xca5   : > { %v13643_v20 = vpop.f32.mrb[253].mxu1 }
 0xca6   : > { %v13644_v43 = vadd.f32 %v13643_v20, %v13642_v34  ;;  %v13645_v2 = vpop.f32.mrb[254].mxu1 }
 0xca7   : > { %v13560_v15 = vpop.f32.mrb[240].mxu0  ;;  %v13646_v52 = vpop.f32.mrb[255].mxu1 }
 0xca8   : > { %v13561_v53 = vpop.f32.mrb[241].mxu0  ;;  %v13647_v12 = vadd.f32 %v13646_v52, %v13645_v2  ;;  %v20164_v59 = vadd.f32 %v13644_v43, %v13532_v30 }
 0xca9   : > { %v20162_v28 = vadd.f32 %v13561_v53, %v13560_v15  ;;  %v13563_v42 = vpop.f32.mrb[242].mxu0 }
 0xcaa   : > { %v13564_v11 = vpop.f32.mrb[243].mxu0  ;;  %v20168_v17 = vadd.f32 %v13647_v12, %v13535_v26 }
 0xcab   : > { %v20166_v23 = vadd.f32 %v13564_v11, %v13563_v42 }
 0xcac   : > { %v13648_v63 = vpop.f32.mrb[0].mxu1 }
 0xcad   : > { %v13649_v51 = vpop.f32.mrb[1].mxu1 }
 0xcae   : > { %v13650_v19 = vadd.f32 %v13649_v51, %v13648_v63  ;;  %v13651_v32 = vpop.f32.mrb[2].mxu1 }
 0xcaf   : > { %v13566_v36 = vpop.f32.mrb[244].mxu0  ;;  %v13652_v33 = vpop.f32.mrb[3].mxu1 }
 0xcb0   : > { %v13567_v35 = vpop.f32.mrb[245].mxu0  ;;  %v13653_v62 = vadd.f32 %v13652_v33, %v13651_v32  ;;  %v20173_v18 = vadd.f32 %v13650_v19, %v20134_v41 }
 0xcb1   : > { %v20170_v29 = vadd.f32 %v13567_v35, %v13566_v36  ;;  %v13569_v57 = vpop.f32.mrb[246].mxu0 }
 0xcb2   : > { %v13570_v30 = vpop.f32.mrb[247].mxu0  ;;  %v20178_v26 = vadd.f32 %v13653_v62, %v20136_v50 }
 0xcb3   : > { %v20175_v7 = vadd.f32 %v13570_v30, %v13569_v57 }
 0xcb4   : > { %v13654_v1 = vpop.f32.mrb[4].mxu1 }
 0xcb5   : > { %v13655_v25 = vpop.f32.mrb[5].mxu1 }
 0xcb6   : > { %v13656_v4 = vadd.f32 %v13655_v25, %v13654_v1  ;;  %v13657_v54 = vpop.f32.mrb[6].mxu1 }
 0xcb7   : > { %v13572_v49 = vpop.f32.mrb[248].mxu0  ;;  %v13658_v13 = vpop.f32.mrb[7].mxu1 }
 0xcb8   : > { %v13573_v24 = vpop.f32.mrb[249].mxu0  ;;  %v13659_v21 = vadd.f32 %v13658_v13, %v13657_v54  ;;  %v20183_v41 = vadd.f32 %v13656_v4, %v20140_v14 }
 0xcb9   : > { %v20180_v3 = vadd.f32 %v13573_v24, %v13572_v49  ;;  %v13575_v60 = vpop.f32.mrb[250].mxu0 }
 0xcba   : > { %v13576_v38 = vpop.f32.mrb[251].mxu0  ;;  %v20188_v50 = vadd.f32 %v13659_v21, %v20144_v58 }
 0xcbb   : > { %v20185_v40 = vadd.f32 %v13576_v38, %v13575_v60 }
 0xcbc   : > { %v13660_v44 = vpop.f32.mrb[8].mxu1 }
 0xcbd   : > { %v13661_v61 = vpop.f32.mrb[9].mxu1 }
 0xcbe   : > { %v13662_v39 = vadd.f32 %v13661_v61, %v13660_v44  ;;  %v13663_v56 = vpop.f32.mrb[10].mxu1 }
 0xcbf   : > { %v13578_v48 = vpop.f32.mrb[252].mxu0  ;;  %v13664_v27 = vpop.f32.mrb[11].mxu1 }
 0xcc0   : > { %v13579_v5 = vpop.f32.mrb[253].mxu0  ;;  %v13665_v46 = vadd.f32 %v13664_v27, %v13663_v56  ;;  %v20193_v14 = vadd.f32 %v13662_v39, %v20146_v16 }
 0xcc1   : > { %v20190_v9 = vadd.f32 %v13579_v5, %v13578_v48  ;;  %v13581_v31 = vpop.f32.mrb[254].mxu0 }
 0xcc2   : > { %v13582_v34 = vpop.f32.mrb[255].mxu0  ;;  %v20198_v58 = vadd.f32 %v13665_v46, %v20150_v0 }
 0xcc3   : > { %v20195_v20 = vadd.f32 %v13582_v34, %v13581_v31 }
 0xcc4   : > { %v13666_v43 = vpop.f32.mrb[12].mxu1 }
 0xcc5   : > { %v13667_v2 = vpop.f32.mrb[13].mxu1 }
 0xcc6   : > { %v13668_v15 = vadd.f32 %v13667_v2, %v13666_v43  ;;  %v13669_v52 = vpop.f32.mrb[14].mxu1 }
 0xcc7   : > { %v13584_v53 = vpop.f32.mrb[0].mxu0  ;;  %v13670_v12 = vpop.f32.mrb[15].mxu1 }
 0xcc8   : > { %v13585_v42 = vpop.f32.mrb[1].mxu0  ;;  %v13671_v11 = vadd.f32 %v13670_v12, %v13669_v52  ;;  %v20203_v16 = vadd.f32 %v13668_v15, %v20154_v6 }
 0xcc9   : > { %v20200_v63 = vadd.f32 %v13585_v42, %v13584_v53  ;;  %v13587_v51 = vpop.f32.mrb[2].mxu0 }
 0xcca   : > { %v13588_v19 = vpop.f32.mrb[3].mxu0  ;;  %v20208_v0 = vadd.f32 %v13671_v11, %v20158_v10 }
 0xccb   : > { %v20205_v32 = vadd.f32 %v13588_v19, %v13587_v51 }
 0xccc   : > { %v13672_v36 = vpop.f32.mrb[16].mxu1 }
 0xccd   : > { %v13673_v33 = vpop.f32.mrb[17].mxu1 }
 0xcce   : > { %v13674_v35 = vadd.f32 %v13673_v33, %v13672_v36  ;;  %v13675_v62 = vpop.f32.mrb[18].mxu1 }
 0xccf   : > { %v13590_v57 = vpop.f32.mrb[4].mxu0  ;;  %v13676_v30 = vpop.f32.mrb[19].mxu1 }
 0xcd0   : > { %v13591_v1 = vpop.f32.mrb[5].mxu0  ;;  %v13677_v25 = vadd.f32 %v13676_v30, %v13675_v62  ;;  %v20213_v6 = vadd.f32 %v13674_v35, %v20162_v28 }
 0xcd1   : > { %v20210_v4 = vadd.f32 %v13591_v1, %v13590_v57  ;;  %v13593_v54 = vpop.f32.mrb[6].mxu0 }
 0xcd2   : > { %v13594_v49 = vpop.f32.mrb[7].mxu0  ;;  %v20218_v10 = vadd.f32 %v13677_v25, %v20166_v23 }
 0xcd3   : > { %v20215_v13 = vadd.f32 %v13594_v49, %v13593_v54 }
 0xcd4   : > { %v13678_v24 = vpop.f32.mrb[20].mxu1 }
 0xcd5   : > { %v13679_v21 = vpop.f32.mrb[21].mxu1 }
 0xcd6   : > { %v13680_v60 = vadd.f32 %v13679_v21, %v13678_v24  ;;  %v13681_v38 = vpop.f32.mrb[22].mxu1  ;;  %v14337_v24 = vld [vmem:[%s14543_s13 + $0x10] sm:$0xff] }
 0xcd7   : > { %v13596_v44 = vpop.f32.mrb[8].mxu0  ;;  %v13682_v61 = vpop.f32.mrb[23].mxu1 }
 0xcd8   : > { %v13597_v39 = vpop.f32.mrb[9].mxu0  ;;  %v13683_v56 = vadd.f32 %v13682_v61, %v13681_v38  ;;  %v20223_v28 = vadd.f32 %v13680_v60, %v20170_v29 }
 0xcd9   : > { %v20220_v48 = vadd.f32 %v13597_v39, %v13596_v44  ;;  %v13599_v27 = vpop.f32.mrb[10].mxu0  ;;  %v14338_v44 = vld [vmem:[%s14543_s13] sm:$0xff] }
 0xcda   : > { %v13600_v5 = vpop.f32.mrb[11].mxu0  ;;  %v20228_v23 = vadd.f32 %v13683_v56, %v20175_v7 }
 0xcdb   : > { %v20225_v46 = vadd.f32 %v13600_v5, %v13599_v27 }
 0xcdc   : > { %v13684_v31 = vpop.f32.mrb[24].mxu1 }
 0xcdd   : > { %v13685_v34 = vpop.f32.mrb[25].mxu1 }
 0xcde   : > { %v13686_v43 = vadd.f32 %v13685_v34, %v13684_v31  ;;  %v13687_v2 = vpop.f32.mrb[26].mxu1 }
 0xcdf   : > { %v13602_v15 = vpop.f32.mrb[12].mxu0  ;;  %v13688_v52 = vpop.f32.mrb[27].mxu1 }
 0xce0   : > { %v13603_v53 = vpop.f32.mrb[13].mxu0  ;;  %v13689_v12 = vadd.f32 %v13688_v52, %v13687_v2  ;;  %v20233_v11 = vadd.f32 %v13686_v43, %v20180_v3 }
 0xce1   : > { %v20230_v42 = vadd.f32 %v13603_v53, %v13602_v15  ;;  %v13605_v29 = vpop.f32.mrb[14].mxu0 }
 0xce2   : > { %v13606_v51 = vpop.f32.mrb[15].mxu0  ;;  %v20239_v7 = vadd.f32 %v13689_v12, %v20185_v40 }
 0xce3   : > { %v20235_v19 = vadd.f32 %v13606_v51, %v13605_v29  ;;  %v14341_v29 = vld [vmem:[%s14543_s13 + $0x30] sm:$0xff] }
 0xce4   : > { %v13690_v36 = vpop.f32.mrb[28].mxu1 }
 0xce5   : > { %v13691_v33 = vpop.f32.mrb[29].mxu1 }
 0xce6   : > { %v13692_v35 = vadd.f32 %v13691_v33, %v13690_v36  ;;  %v13693_v62 = vpop.f32.mrb[30].mxu1 }
 0xce7   : > { %v13990_v57 = vpop.f32.mrb[16].mxu0  ;;  %v13694_v30 = vpop.f32.mrb[31].mxu1 }
 0xce8   : > { %v11108_v3 = vadd.f32 %v13990_v57, %v20148_v8  ;;  %v11099_v1 = vpop.f32.mrb[17].mxu0  ;;  %v13695_v25 = vadd.f32 %v13694_v30, %v13693_v62  ;;  %v20246_v40 = vadd.f32 %v13692_v35, %v20190_v9  ;;  %v14342_v35 = vld [vmem:[%s14543_s13 + $0x20] sm:$0xff] }
 0xce9   : > { %v11100_v54 = vadd.f32 %v11099_v1, %v20138_v47  ;;  %v13991_v49 = vpop.f32.mrb[18].mxu0  ;;  %v14339_v47 = vld [vmem:[%s14543_s13 + $0x18] sm:$0xff] }
 0xcea   : > { %v11228_v21 = vadd.f32 %v14337_v24, %v11108_v3  ;;  %v11111_v60 = vadd.f32 %v13991_v49, %v20152_v45  ;;  %v11102_v38 = vpop.f32.mrb[19].mxu0  ;;  %v20253_v8 = vadd.f32 %v13695_v25, %v20195_v20  ;;  %v14340_v45 = vld [vmem:[%s14543_s13 + $0x8] sm:$0xff] }
 0xceb   : > { %v11226_v61 = vadd.f32 %v14338_v44, %v11100_v54  ;;  %v11103_v39 = vadd.f32 %v11102_v38, %v20142_v55  ;;  %v14344_v3 = vld [vmem:[%s14543_s13 + $0x28] sm:$0xff] }
 0xcec   : > { %11260 = vst.msk [vmem:[%s20255_s12 + $0x10] sm:$0xff] %vm896_vm5, %v11228_v21  ;;  %v11229_v9 = vadd.f32 %v14339_v47, %v11111_v60  ;;  %v13696_v56 = vpop.f32.mrb[32].mxu1 }
 0xced   : > { %11258 = vst.msk [vmem:[%s20255_s12] sm:$0xff] %vm896_vm5, %v11226_v61  ;;  %v11227_v27 = vadd.f32 %v14340_v45, %v11103_v39  ;;  %v13697_v55 = vpop.f32.mrb[33].mxu1  ;;  %v14345_v61 = vld [vmem:[%s14543_s13 + $0x50] sm:$0xff] }
 0xcee   : > { %11261 = vst.msk [vmem:[%s20255_s12 + $0x18] sm:$0xff] %vm896_vm5, %v11229_v9  ;;  %v13698_v20 = vadd.f32 %v13697_v55, %v13696_v56  ;;  %v13699_v5 = vpop.f32.mrb[34].mxu1  ;;  %v14346_v56 = vld [vmem:[%s14543_s13 + $0x40] sm:$0xff] }
 0xcef   : > { %11259 = vst.msk [vmem:[%s20255_s12 + $0x8] sm:$0xff] %vm896_vm5, %v11227_v27  ;;  %v13994_v31 = vpop.f32.mrb[20].mxu0  ;;  %v13700_v34 = vpop.f32.mrb[35].mxu1 }
 0xcf0   : > { %v11124_v43 = vadd.f32 %v13994_v31, %v20164_v59  ;;  %v11115_v2 = vpop.f32.mrb[21].mxu0  ;;  %v13701_v15 = vadd.f32 %v13700_v34, %v13699_v5  ;;  %v20270_v12 = vadd.f32 %v13698_v20, %v20200_v63  ;;  %v14348_v20 = vld [vmem:[%s14543_s13 + $0x48] sm:$0xff] }
 0xcf1   : > { %v11116_v52 = vadd.f32 %v11115_v2, %v20156_v22  ;;  %v13995_v53 = vpop.f32.mrb[22].mxu0  ;;  %v14343_v22 = vld [vmem:[%s14543_s13 + $0x38] sm:$0xff] }
 0xcf2   : > { %v11232_v51 = vadd.f32 %v14341_v29, %v11124_v43  ;;  %v11127_v36 = vadd.f32 %v13995_v53, %v20168_v17  ;;  %v11118_v33 = vpop.f32.mrb[23].mxu0  ;;  %v20277_v57 = vadd.f32 %v13701_v15, %v20205_v32 }
 0xcf3   : > { %v11230_v62 = vadd.f32 %v14342_v35, %v11116_v52  ;;  %v11119_v59 = vadd.f32 %v11118_v33, %v20160_v37 }
 0xcf4   : > { %11264 = vst.msk [vmem:[%s20255_s12 + $0x30] sm:$0xff] %vm896_vm5, %v11232_v51  ;;  %v11233_v30 = vadd.f32 %v14343_v22, %v11127_v36  ;;  %v13702_v63 = vpop.f32.mrb[36].mxu1  ;;  %v14349_v51 = vld [vmem:[%s14543_s13 + $0x70] sm:$0xff] }
 0xcf5   : > { %11262 = vst.msk [vmem:[%s20255_s12 + $0x20] sm:$0xff] %vm896_vm5, %v11230_v62  ;;  %v11231_v1 = vadd.f32 %v14344_v3, %v11119_v59  ;;  %v13703_v17 = vpop.f32.mrb[37].mxu1  ;;  %v14350_v62 = vld [vmem:[%s14543_s13 + $0x60] sm:$0xff] }
 0xcf6   : > { %11265 = vst.msk [vmem:[%s20255_s12 + $0x38] sm:$0xff] %vm896_vm5, %v11233_v30  ;;  %v13704_v25 = vadd.f32 %v13703_v17, %v13702_v63  ;;  %v13705_v54 = vpop.f32.mrb[38].mxu1  ;;  %v14352_v63 = vld [vmem:[%s14543_s13 + $0x68] sm:$0xff] }
 0xcf7   : > { %11263 = vst.msk [vmem:[%s20255_s12 + $0x28] sm:$0xff] %vm896_vm5, %v11231_v1  ;;  %v13998_v37 = vpop.f32.mrb[24].mxu0  ;;  %v13706_v32 = vpop.f32.mrb[39].mxu1 }
 0xcf8   : > { %v11140_v49 = vadd.f32 %v13998_v37, %v20183_v41  ;;  %v11131_v24 = vpop.f32.mrb[25].mxu0  ;;  %v13707_v21 = vadd.f32 %v13706_v32, %v13705_v54  ;;  %v20292_v44 = vadd.f32 %v13704_v25, %v20210_v4 }
 0xcf9   : > { %v11132_v60 = vadd.f32 %v11131_v24, %v20173_v18  ;;  %v13999_v38 = vpop.f32.mrb[26].mxu0  ;;  %v14347_v18 = vld [vmem:[%s14543_s13 + $0x58] sm:$0xff] }
 0xcfa   : > { %v11236_v39 = vadd.f32 %v14345_v61, %v11140_v49  ;;  %v11143_v47 = vadd.f32 %v13999_v38, %v20188_v50  ;;  %v11134_v9 = vpop.f32.mrb[27].mxu0  ;;  %v20299_v27 = vadd.f32 %v13707_v21, %v20215_v13  ;;  %v14353_v21 = vld [vmem:[%s14543_s13 + $0x90] sm:$0xff] }
 0xcfb   : > { %v11234_v45 = vadd.f32 %v14346_v56, %v11132_v60  ;;  %v11135_v41 = vadd.f32 %v11134_v9, %v20178_v26 }
 0xcfc   : > { %11268 = vst.msk [vmem:[%s20255_s12 + $0x50] sm:$0xff] %vm896_vm5, %v11236_v39  ;;  %v11237_v55 = vadd.f32 %v14347_v18, %v11143_v47  ;;  %v13708_v4 = vpop.f32.mrb[40].mxu1  ;;  %v14354_v39 = vld [vmem:[%s14543_s13 + $0x80] sm:$0xff] }
 0xcfd   : > { %11266 = vst.msk [vmem:[%s20255_s12 + $0x40] sm:$0xff] %vm896_vm5, %v11234_v45  ;;  %v11235_v5 = vadd.f32 %v14348_v20, %v11135_v41  ;;  %v13709_v50 = vpop.f32.mrb[41].mxu1 }
 0xcfe   : > { %11269 = vst.msk [vmem:[%s20255_s12 + $0x58] sm:$0xff] %vm896_vm5, %v11237_v55  ;;  %v13710_v31 = vadd.f32 %v13709_v50, %v13708_v4  ;;  %v13711_v34 = vpop.f32.mrb[42].mxu1  ;;  %v14357_v55 = vld [vmem:[%s14543_s13 + $0xb0] sm:$0xff]  ;;  %v14358_v50 = vld [vmem:[%s14543_s13 + $0xa0] sm:$0xff] }
 0xcff   : > { %11267 = vst.msk [vmem:[%s20255_s12 + $0x48] sm:$0xff] %vm896_vm5, %v11235_v5  ;;  %v14002_v26 = vpop.f32.mrb[28].mxu0  ;;  %v13712_v13 = vpop.f32.mrb[43].mxu1 }
 0xd00   : > { %v11156_v43 = vadd.f32 %v14002_v26, %v20203_v16  ;;  %v11147_v2 = vpop.f32.mrb[29].mxu0  ;;  %v13713_v15 = vadd.f32 %v13712_v13, %v13711_v34  ;;  %v20314_v29 = vadd.f32 %v13710_v31, %v20220_v48  ;;  %v14359_v26 = vld [vmem:[%s14543_s13 + $0xb8] sm:$0xff] }
 0xd01   : > { %v11148_v52 = vadd.f32 %v11147_v2, %v20193_v14  ;;  %v14003_v53 = vpop.f32.mrb[30].mxu0  ;;  %v14351_v14 = vld [vmem:[%s14543_s13 + $0x78] sm:$0xff] }
 0xd02   : > { %v11240_v36 = vadd.f32 %v14349_v51, %v11156_v43  ;;  %v11159_v33 = vadd.f32 %v14003_v53, %v20208_v0  ;;  %v11150_v35 = vpop.f32.mrb[31].mxu0  ;;  %v20321_v22 = vadd.f32 %v13713_v15, %v20225_v46 }
 0xd03   : > { %v11238_v59 = vadd.f32 %v14350_v62, %v11148_v52  ;;  %v11151_v16 = vadd.f32 %v11150_v35, %v20198_v58  ;;  %v14361_v52 = vld [vmem:[%s14543_s13 + $0xd0] sm:$0xff] }
 0xd04   : > { %11272 = vst.msk [vmem:[%s20255_s12 + $0x70] sm:$0xff] %vm896_vm5, %v11240_v36  ;;  %v11241_v30 = vadd.f32 %v14351_v14, %v11159_v33  ;;  %v13714_v48 = vpop.f32.mrb[44].mxu1  ;;  %v14362_v33 = vld [vmem:[%s14543_s13 + $0xc0] sm:$0xff] }
 0xd05   : > { %11270 = vst.msk [vmem:[%s20255_s12 + $0x60] sm:$0xff] %vm896_vm5, %v11238_v59  ;;  %v11239_v3 = vadd.f32 %v14352_v63, %v11151_v16  ;;  %v13715_v0 = vpop.f32.mrb[45].mxu1  ;;  %v14365_v63 = vld [vmem:[%s14543_s13 + $0xf0] sm:$0xff] }
 0xd06   : > { %11273 = vst.msk [vmem:[%s20255_s12 + $0x78] sm:$0xff] %vm896_vm5, %v11241_v30  ;;  %v13716_v1 = vadd.f32 %v13715_v0, %v13714_v48  ;;  %v13717_v17 = vpop.f32.mrb[46].mxu1 }
 0xd07   : > { %11271 = vst.msk [vmem:[%s20255_s12 + $0x68] sm:$0xff] %vm896_vm5, %v11239_v3  ;;  %v14006_v58 = vpop.f32.mrb[32].mxu0  ;;  %v13718_v46 = vpop.f32.mrb[47].mxu1 }
 0xd08   : > { %v11172_v25 = vadd.f32 %v14006_v58, %v20223_v28  ;;  %v11163_v54 = vpop.f32.mrb[33].mxu0  ;;  %v13719_v37 = vadd.f32 %v13718_v46, %v13717_v17  ;;  %v11059_v24 = vadd.f32 %v13716_v1, %v20230_v42  ;;  %v14356_v42 = vld [vmem:[%s14543_s13 + $0x88] sm:$0xff]  ;;  %v14366_v17 = vld [vmem:[%s14543_s13 + $0xe0] sm:$0xff] }
 0xd09   : > { %v11164_v32 = vadd.f32 %v11163_v54, %v20213_v6  ;;  %v14007_v49 = vpop.f32.mrb[34].mxu0  ;;  %v14355_v6 = vld [vmem:[%s14543_s13 + $0x98] sm:$0xff]  ;;  %v14368_v54 = vld [vmem:[%s14543_s13 + $0xe8] sm:$0xff] }
 0xd0a   : > { %v11244_v60 = vadd.f32 %v14353_v21, %v11172_v25  ;;  %v11175_v38 = vadd.f32 %v14007_v49, %v20228_v23  ;;  %v11166_v61 = vpop.f32.mrb[35].mxu0  ;;  %v11062_v9 = vadd.f32 %v13719_v37, %v20235_v19 }
 0xd0b   : > { %v11242_v47 = vadd.f32 %v14354_v39, %v11164_v32  ;;  %v11167_v28 = vadd.f32 %v11166_v61, %v20218_v10 }
 0xd0c   : > { %11276 = vst.msk [vmem:[%s20255_s12 + $0x90] sm:$0xff] %vm896_vm5, %v11244_v60  ;;  %v11245_v56 = vadd.f32 %v14355_v6, %v11175_v38 }
 0xd0d   : > { %11274 = vst.msk [vmem:[%s20255_s12 + $0x80] sm:$0xff] %vm896_vm5, %v11242_v47  ;;  %v11243_v45 = vadd.f32 %v14356_v42, %v11167_v28 }
 0xd0e   : > { %11277 = vst.msk [vmem:[%s20255_s12 + $0x98] sm:$0xff] %vm896_vm5, %v11245_v56 }
 0xd0f   : > { %11275 = vst.msk [vmem:[%s20255_s12 + $0x88] sm:$0xff] %vm896_vm5, %v11243_v45  ;;  %v14010_v23 = vpop.f32.mrb[36].mxu0 }
 0xd10   : > { %v11188_v10 = vadd.f32 %v14010_v23, %v20246_v40  ;;  %v11179_v19 = vpop.f32.mrb[37].mxu0 }
 0xd11   : > { %v11180_v41 = vadd.f32 %v11179_v19, %v20233_v11  ;;  %v14011_v18 = vpop.f32.mrb[38].mxu0  ;;  %v14360_v11 = vld [vmem:[%s14543_s13 + $0xa8] sm:$0xff] }
 0xd12   : > { %v11248_v4 = vadd.f32 %v14357_v55, %v11188_v10  ;;  %v11191_v20 = vadd.f32 %v14011_v18, %v20253_v8  ;;  %v11182_v5 = vpop.f32.mrb[39].mxu0 }
 0xd13   : > { %v11246_v31 = vadd.f32 %v14358_v50, %v11180_v41  ;;  %v11183_v34 = vadd.f32 %v11182_v5, %v20239_v7 }
 0xd14   : > { %11280 = vst.msk [vmem:[%s20255_s12 + $0xb0] sm:$0xff] %vm896_vm5, %v11248_v4  ;;  %v11249_v40 = vadd.f32 %v14359_v26, %v11191_v20 }
 0xd15   : > { %11278 = vst.msk [vmem:[%s20255_s12 + $0xa0] sm:$0xff] %vm896_vm5, %v11246_v31  ;;  %v11247_v13 = vadd.f32 %v14360_v11, %v11183_v34 }
 0xd16   : > { %11281 = vst.msk [vmem:[%s20255_s12 + $0xb8] sm:$0xff] %vm896_vm5, %v11249_v40 }
 0xd17   : > { %11279 = vst.msk [vmem:[%s20255_s12 + $0xa8] sm:$0xff] %vm896_vm5, %v11247_v13  ;;  %v14014_v8 = vpop.f32.mrb[40].mxu0 }
 0xd18   : > { %v11204_v7 = vadd.f32 %v14014_v8, %v20292_v44  ;;  %v11195_v43 = vpop.f32.mrb[41].mxu0  ;;  %v14363_v44 = vld [vmem:[%s14543_s13 + $0xd8] sm:$0xff] }
 0xd19   : > { %v11196_v2 = vadd.f32 %v11195_v43, %v20270_v12  ;;  %v14015_v15 = vpop.f32.mrb[42].mxu0  ;;  %v14364_v12 = vld [vmem:[%s14543_s13 + $0xc8] sm:$0xff] }
 0xd1a   : > { %v11252_v53 = vadd.f32 %v14361_v52, %v11204_v7  ;;  %v11207_v51 = vadd.f32 %v14015_v15, %v20299_v27  ;;  %v11198_v36 = vpop.f32.mrb[43].mxu0 }
 0xd1b   : > { %v11250_v35 = vadd.f32 %v14362_v33, %v11196_v2  ;;  %v11199_v62 = vadd.f32 %v11198_v36, %v20277_v57 }
 0xd1c   : > { %11284 = vst.msk [vmem:[%s20255_s12 + $0xd0] sm:$0xff] %vm896_vm5, %v11252_v53  ;;  %v11253_v59 = vadd.f32 %v14363_v44, %v11207_v51 }
 0xd1d   : > { %11282 = vst.msk [vmem:[%s20255_s12 + $0xc0] sm:$0xff] %vm896_vm5, %v11250_v35  ;;  %v11251_v16 = vadd.f32 %v14364_v12, %v11199_v62 }
 0xd1e   : > { %11285 = vst.msk [vmem:[%s20255_s12 + $0xd8] sm:$0xff] %vm896_vm5, %v11253_v59 }
 0xd1f   : > { %11283 = vst.msk [vmem:[%s20255_s12 + $0xc8] sm:$0xff] %vm896_vm5, %v11251_v16  ;;  %v14018_v27 = vpop.f32.mrb[44].mxu0 }
 0xd20   : > { %v11220_v14 = vadd.f32 %v14018_v27, %v11059_v24  ;;  %v11211_v30 = vpop.f32.mrb[45].mxu0 }
 0xd21   : > { %v11212_v57 = vadd.f32 %v11211_v30, %v20314_v29  ;;  %v14019_v48 = vpop.f32.mrb[46].mxu0  ;;  %v14367_v29 = vld [vmem:[%s14543_s13 + $0xf8] sm:$0xff] }
 0xd22   : > { %v11256_v3 = vadd.f32 %v14365_v63, %v11220_v14  ;;  %v11223_v0 = vadd.f32 %v14019_v48, %v11062_v9  ;;  %v11214_v1 = vpop.f32.mrb[47].mxu0 }
 0xd23   : > { %v11254_v58 = vadd.f32 %v14366_v17, %v11212_v57  ;;  %v11215_v46 = vadd.f32 %v11214_v1, %v20321_v22 }
 0xd24   : > { %11288 = vst.msk [vmem:[%s20255_s12 + $0xf0] sm:$0xff] %vm896_vm5, %v11256_v3  ;;  %v11257_v25 = vadd.f32 %v14367_v29, %v11223_v0 }
 0xd25   : > { %11286 = vst.msk [vmem:[%s20255_s12 + $0xe0] sm:$0xff] %vm896_vm5, %v11254_v58  ;;  %v11255_v37 = vadd.f32 %v14368_v54, %v11215_v46 }
 0xd26   : > { %11289 = vst.msk [vmem:[%s20255_s12 + $0xf8] sm:$0xff] %vm896_vm5, %v11257_v25 }
 0xd27   : > { %11287 = vst.msk [vmem:[%s20255_s12 + $0xe8] sm:$0xff] %vm896_vm5, %v11255_v37 }
 0xd28   : > { %14382 = shalt.err (!%p14379_p3)
}
 0xd29   : > { %s14383_s13 = scalar_lea.hbm %s20395_s19, 4096  ;;  %s14387_s8 = scalar_lea.hbm %s20453_s4, 8192 }
 0xd2a   : > { %p14384_p4 = scmp.ne.s32.totalorder %s20395_s19, %s14383_s13  ;;  %p14388_p9 = scmp.lt.u32.totalorder %s20395_s19, %s20453_s4 }
 0xd2b   : > { %p14389_p10 = scmp.lt.u32.totalorder %s14387_s8, %s14383_s13  ;;  %p14391_p12 = scmp.lt.u32.totalorder %s14383_s13, %s20395_s19 }
 0xd2c   : > { %p14385_p7 = pnand %p14384_p4, %p14501_p5 }
 0xd2d   : > { %p14390_p11 = por %p14389_p10, %p14388_p9 }
 0xd2e   : > { %p14386_p8 = pneg %p14385_p7 }
 0xd2f   : > { %p14392_p13 = por %p14391_p12, %p14390_p11 }
 0xd31   : > { %p14393_p0 = pnand %p14392_p13, %p14386_p8 }
 0xd33   : > { %14396 = shalt.err (!%p14393_p0)
}
 0xd34   : > { %s14436_s11 = smov 128   ;;  %s14437_s12 = smov 8  }
 0xd35   : > { %14036 = dma.vmem_to_hbm [thread:$0]  (%p14501_p5), %s20397_s20, 4096, %s20395_s19, %s20408_s28, %s14436_s11, %s14436_s11, %s14437_s12  }
 0xd36 PF: > { %p14042_p1 = scmp.ge.s32.totalorder %s14431_s18, 2  ;;  %s11319_s14 = sand.u32 1, %s14419_s15  }
 0xd37   : > { %s11320_s23 = scalar_lea.sflag [#allocation3], %s11319_s14 }
 0xd38   : > { %p14039_p2 = pnand %p14042_p1, %p14505_p6 }
 0xd3a   : > { %14414 = dma.done.wait (!%p14039_p2), %s11320_s23, 4096  }
 0xd3b   : > { %14416 = vsyncadd (!%p14039_p2), %s11320_s23, 4294963200  ;;  %p14_p3 = scmp.ge.s32.totalorder %s14488_s21, 4   ;;  %s20608_s15 = smov %s14423_s16 }
 0xd3c   : > { %s20609_s16 = smov %s14427_s17  ;;  %s20610_s17 = smov %s14499_s24 }
 0xd3d   : > { %s20611_s18 = smov %s14488_s21  ;;  %16 = sbr.rel (!%p14_p3) target bundleno = 3 (0x3), region = 75 }
 0xd44   :  { %11325 = vsyncpa [#allocation3], 1 }
 0xd45   :  { %11327 = vsyncpa [#allocation3 + $0x1], 1 }

</bundles_post_ra>
